<compile_context>
chip_gen: v7x
topology: tpu7x:2x2x1
jax: 0.10.0
libtpu: 0.0.40
codegen_flags: <defaults>
</compile_context>

<pallas_src>
import functools

import jax
import jax.numpy as jnp
from jax.experimental import pallas as pl
from jax.experimental.pallas import tpu as pltpu

# Numerai feature count (X_train.shape[1]); the 2018 dataset has 50 features.
IN_FEATURES = 50
H1, H2, H3, H4 = 1000, 500, 200, 1

F_PAD = 64         # 50  -> 64   (aligned K for fc1)
H1_PAD = 1024      # 1000 -> 1024
H2_PAD = 512       # 500 -> 512
H3_PAD = 256       # 200 -> 256  (lane-aligned fc3 output / fc4 reduction width)
TILE_B = 512       # batch rows per grid step (M dim presented to the MXU)


def mlp_kernel(x_ref,
               w1_ref, b1_ref,
               w2_ref, b2_ref,
               w3_ref, b3_ref,
               w4_ref, b4_ref,
               o_ref):
    x = x_ref[...]                       # (TB, F_PAD) bf16 (padded+cast in wrapper)
    ew = b1_ref.dtype                    # epilogue dtype: bf16 on v6e/v7x, f32 on v5e

    # fc1 + relu   (bias/relu in `ew`, re-expressed as bf16 for the next MXU dot)
    h = jnp.dot(x, w1_ref[...], preferred_element_type=jnp.float32)
    h = jnp.maximum(h.astype(ew) + b1_ref[...], 0.0).astype(jnp.bfloat16)   # (TB, 1024)

    # fc2 + relu
    h = jnp.dot(h, w2_ref[...], preferred_element_type=jnp.float32)
    h = jnp.maximum(h.astype(ew) + b2_ref[...], 0.0).astype(jnp.bfloat16)   # (TB, 512)

    # fc3 + sigmoid (f32; padded lanes get sigmoid(0)=0.5, killed by zero w4 entries)
    h = jnp.dot(h, w3_ref[...], preferred_element_type=jnp.float32) + b3_ref[...]
    h = jax.nn.sigmoid(h)                                                   # (TB, 256) f32

    # fc4 (out_features = 1) computed directly as a lane-dense (1, TB) row:
    # (1, K) contracted with (TB, K) on the last dim (q @ k.T pattern).
    logit = jax.lax.dot_general(
        w4_ref[...], h, (((1,), (1,)), ((), ())),
        preferred_element_type=jnp.float32) + b4_ref[...]                   # (1, TB)
    o_ref[...] = jax.nn.sigmoid(logit)                                      # fc5 = Sigmoid()


@functools.partial(jax.jit, static_argnames=("tile_b",))
def net_forward(x, kparams, tile_b=TILE_B):
    """x: (B, IN_FEATURES) f32.  kparams: padded params from prepare_kernel_params."""
    w1, b1, w2, b2, w3, b3, w4, b4 = kparams
    B, F = x.shape

    # Pad features 50 -> F_PAD, batch up to a multiple of the tile, and cast to
    # bf16 once (single fused pad+cast; halves streamed x bytes, removes the
    # per-tile in-kernel cast).
    nb = pl.cdiv(B, tile_b)
    b_pad = nb * tile_b
    x = jnp.pad(x, ((0, b_pad - B), (0, F_PAD - F))).astype(jnp.bfloat16)

    const = lambda i: (0, 0)   # weights / biases: same block every tile (stay resident)

    out = pl.pallas_call(
        mlp_kernel,
        out_shape=jax.ShapeDtypeStruct((1, b_pad), jnp.float32),   # lane-dense output
        grid=(nb,),
        in_specs=[
            pl.BlockSpec((tile_b, F_PAD), lambda i: (i, 0)),   # x: streamed over batch
            pl.BlockSpec((F_PAD, H1_PAD), const),              # w1 (bf16)
            pl.BlockSpec((1, H1_PAD), const),                  # b1 (epilogue dtype)
            pl.BlockSpec((H1_PAD, H2_PAD), const),             # w2 (bf16)
            pl.BlockSpec((1, H2_PAD), const),                  # b2 (epilogue dtype)
            pl.BlockSpec((H2_PAD, H3_PAD), const),             # w3 (bf16)
            pl.BlockSpec((1, H3_PAD), const),                  # b3 (f32)
            pl.BlockSpec((1, H3_PAD), const),                  # w4 row (f32)
            pl.BlockSpec((1, 1), const),                       # b4
        ],
        out_specs=pl.BlockSpec((1, tile_b), lambda i: (0, i)),
        compiler_params=pltpu.CompilerParams(
            dimension_semantics=("parallel",),
            vmem_limit_bytes=32 * 1024 * 1024),
    )(x, w1, b1, w2, b2, w3, b3, w4, b4)

    return out[0, :B][:, None]           # back to (B, 1)


def _epilogue_dtype():
    """bf16 bias/relu epilogue only on chips with a bf16 VALU (v6e / v7x)."""
    try:
        kind = jax.devices()[0].device_kind.lower()
    except Exception:
        return jnp.float32
    if any(g in kind for g in ("v2", "v3", "v4", "v5")):
        return jnp.float32
    return jnp.bfloat16


def init_params(key):
    """PyTorch-style Linear init; weights stored [in, out] (pre-transposed), f32."""
    def linear(key, fan_in, fan_out):
        kw, kb = jax.random.split(key)
        bound = 1.0 / jnp.sqrt(fan_in)
        w = jax.random.uniform(kw, (fan_in, fan_out), jnp.float32, -bound, bound)
        b = jax.random.uniform(kb, (1, fan_out), jnp.float32, -bound, bound)
        return w, b

    k1, k2, k3, k4 = jax.random.split(key, 4)
    return (
        linear(k1, IN_FEATURES, H1),
        linear(k2, H1, H2),
        linear(k3, H2, H3),
        linear(k4, H3, H4),
    )


def prepare_kernel_params(params, epilogue_dtype=None):
    """Zero-pad to 128/256-aligned shapes; bf16 weights, epilogue-dtype b1/b2."""
    if epilogue_dtype is None:
        epilogue_dtype = _epilogue_dtype()
    (w1, b1), (w2, b2), (w3, b3), (w4, b4) = params

    w1p = jnp.pad(w1, ((0, F_PAD - IN_FEATURES), (0, H1_PAD - H1))).astype(jnp.bfloat16)
    b1p = jnp.pad(b1, ((0, 0), (0, H1_PAD - H1))).astype(epilogue_dtype)
    w2p = jnp.pad(w2, ((0, H1_PAD - H1), (0, H2_PAD - H2))).astype(jnp.bfloat16)
    b2p = jnp.pad(b2, ((0, 0), (0, H2_PAD - H2))).astype(epilogue_dtype)
    w3p = jnp.pad(w3, ((0, H2_PAD - H2), (0, H3_PAD - H3))).astype(jnp.bfloat16)
    b3p = jnp.pad(b3, ((0, 0), (0, H3_PAD - H3)))                       # f32
    # fc4 weight as a single f32 row; padded entries are zero so the 0.5 values
    # in padded sigmoid(fc3) lanes contribute nothing.
    w4p = jnp.pad(w4.reshape(1, H3), ((0, 0), (0, H3_PAD - H3)))        # f32
    return (w1p, b1p, w2p, b2p, w3p, b3p, w4p, b4)


def net_forward_ref(x, params):
    """Pure-JAX f32 reference matching the PyTorch forward."""
    (w1, b1), (w2, b2), (w3, b3), (w4, b4) = params
    h = jnp.maximum(x @ w1 + b1, 0.0)
    h = jnp.maximum(h @ w2 + b2, 0.0)
    h = jax.nn.sigmoid(h @ w3 + b3)
    return jax.nn.sigmoid(h @ w4 + b4)


if __name__ == "__main__":
    key = jax.random.PRNGKey(0)
    kx, kp = jax.random.split(key)

    batch = 1024   # 2 grid tiles of 512 rows (keeps the parallel axis >= 2 blocks)
    x = jax.random.normal(kx, (batch, IN_FEATURES), dtype=jnp.float32)

    params = init_params(kp)
    kparams = prepare_kernel_params(params)

    out = net_forward(x, kparams)
    jax.block_until_ready(out)

    ref = net_forward_ref(x, params)

    assert out.shape == (batch, 1)
    assert bool(jnp.all(jnp.isfinite(out)))
    assert bool(jnp.all((out >= 0.0) & (out <= 1.0)))          # final sigmoid range
    assert bool(jnp.allclose(out, ref, atol=5e-2))             # bf16 weight/act tolerance
    print("KERNEL_OK")
</pallas_src>

<mosaic_0001>
module attributes {stable_mosaic.version = 11 : i64} {
  func.func @mlp_kernel(%arg0: i32, %arg1: memref<512x64xbf16, #tpu.memory_space<vmem>>, %arg2: memref<64x1024xbf16, #tpu.memory_space<vmem>>, %arg3: memref<1x1024xbf16, #tpu.memory_space<vmem>>, %arg4: memref<1024x512xbf16, #tpu.memory_space<vmem>>, %arg5: memref<1x512xbf16, #tpu.memory_space<vmem>>, %arg6: memref<512x256xbf16, #tpu.memory_space<vmem>>, %arg7: memref<1x256xf32, #tpu.memory_space<vmem>>, %arg8: memref<1x256xf32, #tpu.memory_space<vmem>>, %arg9: memref<1x1xf32, #tpu.memory_space<vmem>>, %arg10: memref<1x512xf32, #tpu.memory_space<vmem>>) attributes {dimension_semantics = [#tpu.dimension_semantics<parallel>], iteration_bounds = array<i64: 2>, scalar_prefetch = 0 : i64, scratch_operands = 0 : i64, tpu.core_type = #tpu.core_type<tc>, window_params = [{transform_indices = @transform_0, window_bounds = array<i64: 512, 64>}, {pipeline_mode = #tpu.pipeline_mode<synchronous>, transform_indices = @transform_1, window_bounds = array<i64: 64, 1024>}, {pipeline_mode = #tpu.pipeline_mode<synchronous>, transform_indices = @transform_2, window_bounds = array<i64: 1, 1024>}, {pipeline_mode = #tpu.pipeline_mode<synchronous>, transform_indices = @transform_3, window_bounds = array<i64: 1024, 512>}, {pipeline_mode = #tpu.pipeline_mode<synchronous>, transform_indices = @transform_4, window_bounds = array<i64: 1, 512>}, {pipeline_mode = #tpu.pipeline_mode<synchronous>, transform_indices = @transform_5, window_bounds = array<i64: 512, 256>}, {pipeline_mode = #tpu.pipeline_mode<synchronous>, transform_indices = @transform_6, window_bounds = array<i64: 1, 256>}, {pipeline_mode = #tpu.pipeline_mode<synchronous>, transform_indices = @transform_7, window_bounds = array<i64: 1, 256>}, {pipeline_mode = #tpu.pipeline_mode<synchronous>, transform_indices = @transform_8, window_bounds = array<i64: 1, 1>}, {transform_indices = @transform_9, window_bounds = array<i64: 1, 512>}]} {
    %c0 = arith.constant 0 : index
    %c0_0 = arith.constant 0 : index
    %0 = vector.load %arg1[%c0, %c0_0] : memref<512x64xbf16, #tpu.memory_space<vmem>>, vector<512x64xbf16>
    %c0_1 = arith.constant 0 : index
    %c0_2 = arith.constant 0 : index
    %1 = vector.load %arg2[%c0_1, %c0_2] : memref<64x1024xbf16, #tpu.memory_space<vmem>>, vector<64x1024xbf16>
    %cst = arith.constant dense<0.000000e+00> : vector<512x1024xf32>
    %2 = tpu.matmul %0, %1, %cst {dimension_numbers = #tpu.dot_dimension_numbers<[1], [0], [0], [1], [0, 0, 1, 1], [], []>} : vector<512x64xbf16>, vector<64x1024xbf16>, vector<512x1024xf32> -> vector<512x1024xf32>
    %3 = arith.truncf %2 : vector<512x1024xf32> to vector<512x1024xbf16>
    %c0_3 = arith.constant 0 : index
    %c0_4 = arith.constant 0 : index
    %4 = vector.load %arg3[%c0_3, %c0_4] : memref<1x1024xbf16, #tpu.memory_space<vmem>>, vector<1x1024xbf16>
    %5 = vector.broadcast %4 : vector<1x1024xbf16> to vector<512x1024xbf16>
    %6 = arith.addf %3, %5 : vector<512x1024xbf16>
    %cst_5 = arith.constant 0.000000e+00 : bf16
    %7 = vector.broadcast %cst_5 : bf16 to vector<512x1024xbf16>
    %8 = arith.maximumf %6, %7 : vector<512x1024xbf16>
    %c0_6 = arith.constant 0 : index
    %c0_7 = arith.constant 0 : index
    %9 = vector.load %arg4[%c0_6, %c0_7] : memref<1024x512xbf16, #tpu.memory_space<vmem>>, vector<1024x512xbf16>
    %cst_8 = arith.constant dense<0.000000e+00> : vector<512x512xf32>
    %10 = tpu.matmul %8, %9, %cst_8 {dimension_numbers = #tpu.dot_dimension_numbers<[1], [0], [0], [1], [0, 0, 1, 1], [], []>} : vector<512x1024xbf16>, vector<1024x512xbf16>, vector<512x512xf32> -> vector<512x512xf32>
    %11 = arith.truncf %10 : vector<512x512xf32> to vector<512x512xbf16>
    %c0_9 = arith.constant 0 : index
    %c0_10 = arith.constant 0 : index
    %12 = vector.load %arg5[%c0_9, %c0_10] : memref<1x512xbf16, #tpu.memory_space<vmem>>, vector<1x512xbf16>
    %13 = vector.broadcast %12 : vector<1x512xbf16> to vector<512x512xbf16>
    %14 = arith.addf %11, %13 : vector<512x512xbf16>
    %cst_11 = arith.constant 0.000000e+00 : bf16
    %15 = vector.broadcast %cst_11 : bf16 to vector<512x512xbf16>
    %16 = arith.maximumf %14, %15 : vector<512x512xbf16>
    %c0_12 = arith.constant 0 : index
    %c0_13 = arith.constant 0 : index
    %17 = vector.load %arg6[%c0_12, %c0_13] : memref<512x256xbf16, #tpu.memory_space<vmem>>, vector<512x256xbf16>
    %cst_14 = arith.constant dense<0.000000e+00> : vector<512x256xf32>
    %18 = tpu.matmul %16, %17, %cst_14 {dimension_numbers = #tpu.dot_dimension_numbers<[1], [0], [0], [1], [0, 0, 1, 1], [], []>} : vector<512x512xbf16>, vector<512x256xbf16>, vector<512x256xf32> -> vector<512x256xf32>
    %c0_15 = arith.constant 0 : index
    %c0_16 = arith.constant 0 : index
    %19 = vector.load %arg7[%c0_15, %c0_16] : memref<1x256xf32, #tpu.memory_space<vmem>>, vector<1x256xf32>
    %20 = vector.broadcast %19 : vector<1x256xf32> to vector<512x256xf32>
    %21 = arith.addf %18, %20 : vector<512x256xf32>
    %22 = arith.negf %21 : vector<512x256xf32>
    %23 = math.exp %22 : vector<512x256xf32>
    %cst_17 = arith.constant 1.000000e+00 : f32
    %24 = vector.broadcast %cst_17 : f32 to vector<512x256xf32>
    %25 = arith.addf %24, %23 : vector<512x256xf32>
    %26 = arith.divf %24, %25 : vector<512x256xf32>
    %c0_18 = arith.constant 0 : index
    %c0_19 = arith.constant 0 : index
    %27 = vector.load %arg8[%c0_18, %c0_19] : memref<1x256xf32, #tpu.memory_space<vmem>>, vector<1x256xf32>
    %cst_20 = arith.constant dense<0.000000e+00> : vector<1x512xf32>
    %28 = tpu.matmul %27, %26, %cst_20 {dimension_numbers = #tpu.dot_dimension_numbers<[1], [1], [0], [0], [0, 0, 1, 0], [], []>} : vector<1x256xf32>, vector<512x256xf32>, vector<1x512xf32> -> vector<1x512xf32>
    %c0_21 = arith.constant 0 : index
    %c0_22 = arith.constant 0 : index
    %29 = vector.load %arg9[%c0_21, %c0_22] : memref<1x1xf32, #tpu.memory_space<vmem>>, vector<1x1xf32>
    %30 = vector.broadcast %29 : vector<1x1xf32> to vector<1x512xf32>
    %31 = arith.addf %28, %30 : vector<1x512xf32>
    %32 = arith.negf %31 : vector<1x512xf32>
    %33 = math.exp %32 : vector<1x512xf32>
    %cst_23 = arith.constant 1.000000e+00 : f32
    %34 = vector.broadcast %cst_23 : f32 to vector<1x512xf32>
    %35 = arith.addf %34, %33 : vector<1x512xf32>
    %36 = arith.divf %34, %35 : vector<1x512xf32>
    %c0_24 = arith.constant 0 : index
    %c0_25 = arith.constant 0 : index
    %37 = vector.load %arg10[%c0_24, %c0_25] : memref<1x512xf32, #tpu.memory_space<vmem>>, vector<1x512xf32>
    tpu.vector_store %arg10[%c0_24, %c0_25], %36 {strides = array<i32>} : memref<1x512xf32, #tpu.memory_space<vmem>>, vector<1x512xf32>,
    return
  }
  func.func @transform_0(%arg0: i32) -> (i32, i32) {
    %c0_i32 = arith.constant 0 : i32
    %c0_i32_0 = arith.constant 0 : i32
    return %arg0, %c0_i32 : i32, i32
  }
  func.func @transform_1(%arg0: i32) -> (i32, i32) {
    %c0_i32 = arith.constant 0 : i32
    %c0_i32_0 = arith.constant 0 : i32
    %c0_i32_1 = arith.constant 0 : i32
    return %c0_i32, %c0_i32_0 : i32, i32
  }
  func.func @transform_2(%arg0: i32) -> (i32, i32) {
    %c0_i32 = arith.constant 0 : i32
    %c0_i32_0 = arith.constant 0 : i32
    %c0_i32_1 = arith.constant 0 : i32
    return %c0_i32, %c0_i32_0 : i32, i32
  }
  func.func @transform_3(%arg0: i32) -> (i32, i32) {
    %c0_i32 = arith.constant 0 : i32
    %c0_i32_0 = arith.constant 0 : i32
    %c0_i32_1 = arith.constant 0 : i32
    return %c0_i32, %c0_i32_0 : i32, i32
  }
  func.func @transform_4(%arg0: i32) -> (i32, i32) {
    %c0_i32 = arith.constant 0 : i32
    %c0_i32_0 = arith.constant 0 : i32
    %c0_i32_1 = arith.constant 0 : i32
    return %c0_i32, %c0_i32_0 : i32, i32
  }
  func.func @transform_5(%arg0: i32) -> (i32, i32) {
    %c0_i32 = arith.constant 0 : i32
    %c0_i32_0 = arith.constant 0 : i32
    %c0_i32_1 = arith.constant 0 : i32
    return %c0_i32, %c0_i32_0 : i32, i32
  }
  func.func @transform_6(%arg0: i32) -> (i32, i32) {
    %c0_i32 = arith.constant 0 : i32
    %c0_i32_0 = arith.constant 0 : i32
    %c0_i32_1 = arith.constant 0 : i32
    return %c0_i32, %c0_i32_0 : i32, i32
  }
  func.func @transform_7(%arg0: i32) -> (i32, i32) {
    %c0_i32 = arith.constant 0 : i32
    %c0_i32_0 = arith.constant 0 : i32
    %c0_i32_1 = arith.constant 0 : i32
    return %c0_i32, %c0_i32_0 : i32, i32
  }
  func.func @transform_8(%arg0: i32) -> (i32, i32) {
    %c0_i32 = arith.constant 0 : i32
    %c0_i32_0 = arith.constant 0 : i32
    %c0_i32_1 = arith.constant 0 : i32
    return %c0_i32, %c0_i32_0 : i32, i32
  }
  func.func @transform_9(%arg0: i32) -> (i32, i32) {
    %c0_i32 = arith.constant 0 : i32
    %c0_i32_0 = arith.constant 0 : i32
    return %c0_i32, %arg0 : i32, i32
  }
}

</mosaic_0001>

<bundles_post_ra>
// kernel: net_forward.1
= control target key start
LH: loop header
LB: loop body
LE: loop exit
PB: predicated region body
PF: predicated region fallthrough
CT: control target
= control target key end

     0   :  { %s19429_s0 = inlined_call_operand.vmem [shape: bf16[1024,64], index: 0, kind: input, shape index: {}]   ;;  %s19430_s1 = inlined_call_operand.vmem [shape: bf16[64,1024], index: 1, kind: input, shape index: {}]   ;;  %s19431_s2 = inlined_call_operand.vmem [shape: bf16[1,1024], index: 2, kind: input, shape index: {}]   ;;  %s19432_s3 = inlined_call_operand.vmem [shape: bf16[1024,512], index: 3, kind: input, shape index: {}]   ;;  %s19433_s4 = inlined_call_operand.vmem [shape: bf16[1,512], index: 4, kind: input, shape index: {}]   ;;  %s19434_s5 = inlined_call_operand.hbm [shape: bf16[512,256], index: 5, kind: input, shape index: {}]   ;;  %s19435_s6 = inlined_call_operand.vmem [shape: f32[1,256], index: 6, kind: input, shape index: {}]   ;;  %s19436_s7 = inlined_call_operand.vmem [shape: f32[1,256], index: 7, kind: input, shape index: {}]   ;;  %s19437_s8 = inlined_call_operand.<no memory space> [shape: f32[1,1], index: 8, kind: input, shape index: {}]   ;;  %s19438_s9 = inlined_call_operand.hbm [shape: f32[1,1024], index: 9, kind: output, shape index: {}]  }
   0x1   :  { %v14_v0 = vstv %s19437_s8 }
   0x2   :  { %15 = vst [vmem:[#allocation2] sm:$0x1] %v14_v0 }
   0x3   :  { %16 = vsyncpa [#allocation4], 0 }
   0x4   :  { %17 = vsyncpa [#allocation5], 0 }
   0x5   :  { %19 = vsyncpa [#allocation5 + $0x1], 0  ;;  %s13249_s11 = smov 0   ;;  %s13251_s12 = smov 0  }
   0x6   :  { %s13253_s13 = smov 0   ;;  %s13255_s14 = smov 0  }
   0x7 LB: > { %s13270_s8 = sadd.s32 4294967295, %s13188_s14   ;;  %s10128_s15 = sadd.s32 4294967294, %s13188_s14   ;;  %s13188_s14 = sphi %s13255_s14, %s21390_s14   ;;  %s13184_s13 = sphi %s13253_s13, %s21389_s13   ;;  %s13180_s12 = sphi %s13251_s12, %s21388_s12   ;;  %s13176_s11 = sphi %s13249_s11, %s21387_s11  }
   0x8   : > { %s13274_s16 = sadd.s32 1, %s13188_s14   ;;  %s226_s17 = sadd.s32 1, %s13184_s13 }
   0x9   : > { %s223_s18 = ssub.s32 %s13188_s14, %s13274_s16  ;;  %p236_p0 = scmp.ne.s32.totalorder %s13184_s13, %s13180_s12 }
   0xa   : > { %p224_p1 = scmp.eq.s32.totalorder %s223_s18, 0  ;;  %p237_p2 = scmp.eq.s32.totalorder %s13270_s8, 1 }
   0xb   : > { %p242_p3 = scmp.ne.s32.totalorder %s13180_s12, %s13176_s11  ;;  %p243_p4 = scmp.eq.s32.totalorder %s10128_s15, 1 }
   0xc   : > { %s13285_s19 = scalar_select %p224_p1, %s13184_s13, %s226_s17  }
   0xd   : > { %p13287_p5 = por %p237_p2, %p236_p0  ;;  %p13291_p6 = por %p243_p4, %p242_p3 }
   0xe   : > { %p10129_p7 = scmp.ge.s32.totalorder %s13188_s14, 1  ;;  %p250_p8 = scmp.lt.s32.totalorder %s13188_s14, 3 }
   0xf   : > { %s19995_s20 = scalar_select %p13287_p5, 1, 0 }
  0x10   : > { %s19996_s21 = scalar_select %p13291_p6, 1, 0 }
  0x11   : > { %p19439_p9 = scmp.eq.s32.totalorder %s13270_s8, 0  ;;  %p13298_p10 = pnand %p10129_p7, %p250_p8 }
  0x12   : > { %s13190_s23 = smov [#allocation3]   ;;  %s13094_s28 = scalar_lea.hbm %s19434_s5, 8192 }
  0x13   : > { %s19997_s22 = scalar_select %p13298_p10, 1, 0 }
  0x14   : > { %s274_s24 = sshll.u32 %s13190_s23, 4  ;;  %p11954_p11 = pneg %p13298_p10  ;;  %s275_s24 = int_to_ptr.vmem [resolvable:$true] %s274_s24 }
  0x15   : > { %p13095_p13 = scmp.ne.s32.totalorder %s19434_s5, %s13094_s28  ;;  %p13101_p3 = scmp.lt.u32.totalorder %s13094_s28, %s19434_s5 }
  0x16   : > { %p13306_p12 = pnand %p19439_p9, %p11954_p11 }
  0x18   : > { %p13096_p0 = pneg %p13306_p12 }
  0x1a   : > { %p13097_p1 = pnand %p13096_p0, %p13095_p13 }
  0x1c   : > { %p13098_p2 = pneg %p13097_p1 }
  0x1e   : > { %p13103_p4 = pnand %p13101_p3, %p13098_p2 }
  0x20   : > { %13106 = shalt.err (!%p13103_p4)
}
  0x21   : > { %s13107_s17 = scalar_lea.vmem %s275_s24, 8192  ;;  %p13115_p9 = scmp.lt.s32.totalorder %s275_s24, %s275_s24 }
  0x22   : > { %p13108_p7 = scmp.ne.s32.totalorder %s275_s24, %s13107_s17  ;;  %p13116_p6 = scmp.lt.s32.totalorder %s13107_s17, %s13107_s17 }
  0x24   : > { %p13110_p8 = pnand %p13108_p7, %p13096_p0  ;;  %p13117_p5 = por %p13116_p6, %p13115_p9 }
  0x26   : > { %p13111_p11 = pneg %p13110_p8 }
  0x28   : > { %p13118_p10 = pnand %p13117_p5, %p13111_p11 }
  0x2a   : > { %13121 = shalt.err (!%p13118_p10)
}
  0x2b   : > { %s13191_s18 = smov 128   ;;  %s13192_s23 = smov 8  }
  0x2c   : > { %11957 = dma.hbm_to_vmem [thread:$0]  (!%p13306_p12), %s19434_s5, 8192, %s275_s24, [#allocation4], %s13191_s18, %s13191_s18, %s13192_s23  }
  0x2d   : > { %p19999_p13 = scmp.ne.s32.totalorder %s19997_s22, 0 }
  0x2f   : > { %308 = sbr.rel (%p19999_p13) target bundleno = 2542 (0x9ee), region = 56 }
  0x36   : > { %p20000_p1 = scmp.eq.s32.totalorder %s13270_s8, 0 }
  0x38   : > { %13167 = dma.done.wait (%p20000_p1), [#allocation4], 8192   ;;  %p20001_p0 = pmov %p20000_p1 }
  0x39   : > { %s13333_s28 = sshll.u32 %s13270_s8, 6  ;;  %v19443_v1 = vmov 0   ;;  %v416_v2 = vld [vmem:[%s19430_s1] sm:$0xff]  ;;  %v417_v4 = vld [vmem:[%s19430_s1 + $0x8] sm:$0xff]  ;;  %vm768_vm0 = vcmask 523264   ;;  %v418_v35 = vld [vmem:[%s19430_s1 + $0x10] sm:$0xff] }
  0x3a   : > { %13169 = vsyncadd (%p20001_p0), [#allocation4], 4294959104  ;;  %897 = vmatprep.mubr.bf16.mxu0 %v19443_v1  ;;  %1250 = vmatprep.mubr.bf16.mxu1 %v19443_v1  ;;  %p345_p5 = scmp.lt.s32.totalorder %s13333_s28, 127  ;;  %v420_v3 = vld [vmem:[%s19430_s1 + $0x20] sm:$0xff]  ;;  %v421_v6 = vld [vmem:[%s19430_s1 + $0x28] sm:$0xff]  ;;  %s341_s17 = sand.u32 1, %s13180_s12  }
  0x3b   : > { %12002 = vset.pattern.permute.xlu0 %v19443_v1  ;;  %v10170_v5 = vcombine.high %v416_v2, %v420_v3  ;;  %v10169_v7 = vcombine.low %v416_v2, %v420_v3  ;;  %v424_v8 = vld [vmem:[%s19430_s1 + $0x40] sm:$0xff]  ;;  %v10172_v10 = vcombine.high %v417_v4, %v421_v6  ;;  %v10171_v11 = vcombine.low %v417_v4, %v421_v6  ;;  %v425_v13 = vld [vmem:[%s19430_s1 + $0x48] sm:$0xff]  ;;  %v422_v36 = vld [vmem:[%s19430_s1 + $0x30] sm:$0xff]  ;;  %s10134_s18 = sshll.u32 %s341_s17, 2  ;;  %s10043_s27 = scalar_lea.sflag [#allocation5], %s341_s17 }
  0x3c   : > { %s346_s22 = scalar_select %p345_p5, %s13333_s28, 127  ;;  %v428_v9 = vld [vmem:[%s19430_s1 + $0x60] sm:$0xff]  ;;  %v429_v14 = vld [vmem:[%s19430_s1 + $0x68] sm:$0xff]  ;;  %v10173_v37 = vcombine.low %v418_v35, %v422_v36  ;;  %v10174_v38 = vcombine.high %v418_v35, %v422_v36  ;;  %v426_v47 = vld [vmem:[%s19430_s1 + $0x50] sm:$0xff] }
  0x3d   : > { %v10178_v12 = vcombine.high %v424_v8, %v428_v9  ;;  %v432_v15 = vld [vmem:[%s19430_s1 + $0x80] sm:$0xff]  ;;  %865 = vmatprep.subr.bf16.mxu0 %v10170_v5  ;;  %v10180_v16 = vcombine.high %v425_v13, %v429_v14  ;;  %v433_v18 = vld [vmem:[%s19430_s1 + $0x88] sm:$0xff]  ;;  %1218 = vmatprep.subr.bf16.mxu1 %v10172_v10  ;;  %v10177_v20 = vcombine.low %v424_v8, %v428_v9  ;;  %v430_v48 = vld [vmem:[%s19430_s1 + $0x70] sm:$0xff]  ;;  %p21385_p9 = scmp.ne.s32.totalorder %s19995_s20, 0  ;;  %s13195_s29 = smov [#allocation6]  }
  0x3e   : > { %s10136_s24 = sshll.u32 %s346_s22, 2  ;;  %v436_v17 = vld [vmem:[%s19430_s1 + $0xa0] sm:$0xff]  ;;  %v437_v19 = vld [vmem:[%s19430_s1 + $0xa8] sm:$0xff]  ;;  %866 = vmatpush1.bf16.msra.mxu0 %v10169_v7  ;;  %1219 = vmatpush1.bf16.msra.mxu1 %v10171_v11  ;;  %v10179_v22 = vcombine.low %v425_v13, %v429_v14  ;;  %v10181_v49 = vcombine.low %v426_v47, %v430_v48  ;;  %v10182_v50 = vcombine.high %v426_v47, %v430_v48  ;;  %v434_v58 = vld [vmem:[%s19430_s1 + $0x90] sm:$0xff]  ;;  %s343_s22 = scalar_lea.vmem [#allocation6], %s10134_s18 }
  0x3f   : > { %v440_v21 = vld [vmem:[%s19430_s1 + $0xc0] sm:$0xff]  ;;  %s13382_s10 = scalar_lea.vmem %s19429_s0, %s10136_s24  ;;  %867 = vmatprep.subr.bf16.mxu0 %v10178_v12  ;;  %v10186_v23 = vcombine.high %v432_v15, %v436_v17  ;;  %1220 = vmatprep.subr.bf16.mxu1 %v10180_v16  ;;  %v10188_v25 = vcombine.high %v433_v18, %v437_v19  ;;  %v441_v26 = vld [vmem:[%s19430_s1 + $0xc8] sm:$0xff]  ;;  %v10185_v28 = vcombine.low %v432_v15, %v436_v17  ;;  %v438_v59 = vld [vmem:[%s19430_s1 + $0xb0] sm:$0xff]  ;;  %s10057_s23 = sshll.u32 %s343_s22, 4  ;;  %s19389_s23 = int_to_ptr.vmem [resolvable:$true] %s10057_s23 }
  0x40   : > { %v444_v24 = vld [vmem:[%s19430_s1 + $0xe0] sm:$0xff]  ;;  %v445_v27 = vld [vmem:[%s19430_s1 + $0xe8] sm:$0xff]  ;;  %v10187_v29 = vcombine.low %v433_v18, %v437_v19  ;;  %v12005_v40 = vld [vmem:[%s13382_s10 + $0x10] sm:$0xff]   ;;  %v10190_v60 = vcombine.high %v434_v58, %v438_v59  ;;  %v10189_v61 = vcombine.low %v434_v58, %v438_v59  ;;  %s19387_s24 = scalar_lea.hbm %s19438_s9, %s13333_s28  ;;  %s13122_s25 = scalar_lea.vmem %s19389_s23, 64 }
  0x41   : > { %v10194_v30 = vcombine.high %v440_v21, %v444_v24  ;;  %v10196_v31 = vcombine.high %v441_v26, %v445_v27  ;;  %v10193_v32 = vcombine.low %v440_v21, %v444_v24  ;;  %v10195_v33 = vcombine.low %v441_v26, %v445_v27  ;;  %v12003_v34 = vld [vmem:[%s13382_s10] sm:$0xff]   ;;  %v12004_v39 = vld [vmem:[%s13382_s10 + $0x8] sm:$0xff]   ;;  %v12006_v41 = vld [vmem:[%s13382_s10 + $0x18] sm:$0xff]   ;;  %p13123_p6 = scmp.ne.s32.totalorder %s19389_s23, %s13122_s25  ;;  %s13126_s30 = sshll.u32 %s13195_s29, 4  ;;  %s13127_s30 = int_to_ptr.vmem [resolvable:$false] %s13126_s30 }
  0x42   : > { %868 = vmatpush1.bf16.msra.mxu0 %v10177_v20  ;;  %1221 = vmatpush1.bf16.msra.mxu1 %v10179_v22  ;;  %v12007_v42 = vld [vmem:[%s13382_s10 + $0x20] sm:$0xff]   ;;  %v12008_v43 = vld [vmem:[%s13382_s10 + $0x28] sm:$0xff]   ;;  %v12009_v44 = vld [vmem:[%s13382_s10 + $0x30] sm:$0xff]   ;;  %s13128_s8 = scalar_lea.vmem %s13127_s30, 128  ;;  %p13129_p2 = scmp.lt.s32.totalorder %s19389_s23, %s13127_s30 }
  0x43   : > { %869 = vmatprep.subr.bf16.mxu0 %v10186_v23  ;;  %1222 = vmatprep.subr.bf16.mxu1 %v10188_v25  ;;  %v12010_v45 = vld [vmem:[%s13382_s10 + $0x38] sm:$0xff]   ;;  %v13440_v46 = vld [vmem:[%s13382_s10 + $0x40] sm:$0xff]   ;;  %v13455_v51 = vld [vmem:[%s13382_s10 + $0x48] sm:$0xff]   ;;  %p13124_p10 = pnand %p13123_p6, %p21385_p9  ;;  %p13130_p3 = scmp.lt.s32.totalorder %s13128_s8, %s13122_s25 }
  0x44   : > { %v13464_v52 = vld [vmem:[%s13382_s10 + $0x50] sm:$0xff]   ;;  %v13473_v53 = vld [vmem:[%s13382_s10 + $0x58] sm:$0xff]   ;;  %v13482_v54 = vld [vmem:[%s13382_s10 + $0x60] sm:$0xff]  }
  0x45   : > { %v13491_v55 = vld [vmem:[%s13382_s10 + $0x68] sm:$0xff]   ;;  %v13500_v56 = vld [vmem:[%s13382_s10 + $0x70] sm:$0xff]   ;;  %v13509_v57 = vld [vmem:[%s13382_s10 + $0x78] sm:$0xff]   ;;  %p13125_p12 = pneg %p13124_p10  ;;  %p13131_p4 = por %p13130_p3, %p13129_p2 }
  0x46   : > { %870 = vmatpush1.bf16.msra.mxu0 %v10185_v28  ;;  %1223 = vmatpush1.bf16.msra.mxu1 %v10187_v29  ;;  %v13524_v62 = vld [vmem:[%s13382_s10 + $0x80] sm:$0xff]   ;;  %v442_v63 = vld [vmem:[%s19430_s1 + $0xd0] sm:$0xff]  ;;  %v13542_v5 = vld [vmem:[%s13382_s10 + $0x88] sm:$0xff]  }
  0x47   : > { %871 = vmatprep.subr.bf16.mxu0 %v10194_v30  ;;  %1224 = vmatprep.subr.bf16.mxu1 %v10196_v31  ;;  %v446_v0 = vld [vmem:[%s19430_s1 + $0xf0] sm:$0xff]  ;;  %v13560_v7 = vld [vmem:[%s13382_s10 + $0x98] sm:$0xff]   ;;  %v13569_v8 = vld [vmem:[%s13382_s10 + $0xa0] sm:$0xff]   ;;  %p13132_p7 = pnand %p13131_p4, %p13125_p12 }
  0x48   : > { %v10198_v2 = vcombine.high %v442_v63, %v446_v0  ;;  %v10197_v3 = vcombine.low %v442_v63, %v446_v0  ;;  %v12037_v4 = vld [vmem:[%s19432_s3 + $0x4] ss:$16 sps:$4 sm:$0xff]   ;;  %v13578_v9 = vld [vmem:[%s13382_s10 + $0xa8] sm:$0xff]   ;;  %v13596_v11 = vld [vmem:[%s13382_s10 + $0xb8] sm:$0xff]  }
  0x49   : > { %v13551_v6 = vld [vmem:[%s13382_s10 + $0x90] sm:$0xff]   ;;  %20002 = vst [vmem:[#allocation9_spill] sm:$0xff] %v13596_v11  ;;  %v13605_v12 = vld [vmem:[%s13382_s10 + $0xc0] sm:$0xff]   ;;  %v12028_v13 = vld [vmem:[%s13382_s10 + $0xc8] sm:$0xff]  }
  0x4a   : > { %872 = vmatpush1.bf16.msra.mxu0 %v10193_v32  ;;  %1225 = vmatpush1.bf16.msra.mxu1 %v10195_v33  ;;  %v13587_v10 = vld [vmem:[%s13382_s10 + $0xb0] sm:$0xff]   ;;  %20003 = vst [vmem:[#allocation10_spill] sm:$0xff] %v13605_v12  ;;  %v12030_v17 = vld [vmem:[%s13382_s10 + $0xd8] sm:$0xff]   ;;  %v12031_v30 = vld [vmem:[%s13382_s10 + $0xe0] sm:$0xff]  }
  0x4b   : > { %10916 = vmatprep.subr.bf16.mxu1 %v10174_v38  ;;  %1571 = vmatprep.subr.bf16.mxu0 %v10174_v38  ;;  %v12029_v14 = vld [vmem:[%s13382_s10 + $0xd0] sm:$0xff]  }
  0x4d   : > { %10201 = vmatmul.mubr.msk.bf16.vlgmr.msra.gmra.mrb[0].mxu0 %vm768_vm0, %v12003_v34  ;;  %10233 = vmatmul.mubr.msk.bf16.vlgmr.msra.gmra.mrb[0].mxu1 %vm768_vm0, %v12003_v34 }
  0x4e   : > { %907 = vmatprep.mubr.bf16.mxu0 %v19443_v1  ;;  %1260 = vmatprep.mubr.bf16.mxu1 %v19443_v1 }
  0x4f   : > { %10920 = vmatpush1.bf16.msra.mxu1 %v10173_v37  ;;  %1572 = vmatpush1.bf16.msra.mxu0 %v10173_v37 }
  0x50   : > { %10917 = vmatprep.subr.bf16.mxu1 %v10182_v50  ;;  %1573 = vmatprep.subr.bf16.mxu0 %v10182_v50 }
  0x53   : > { %10921 = vmatpush1.bf16.msra.mxu1 %v10181_v49  ;;  %1574 = vmatpush1.bf16.msra.mxu0 %v10181_v49 }
  0x54   : > { %1575 = vmatprep.subr.bf16.mxu0 %v10190_v60  ;;  %10918 = vmatprep.subr.bf16.mxu1 %v10190_v60 }
  0x55   : > { %10202 = vmatmul.mubr.msk.bf16.gmra.mrb[4].mxu0 %vm768_vm0, %v12004_v39  ;;  %10234 = vmatmul.mubr.msk.bf16.gmra.mrb[4].mxu1 %vm768_vm0, %v12004_v39  ;;  %v12035_v39 = vld [vmem:[%s19432_s3] ss:$16 sps:$4 sm:$0xff]  }
  0x56   : > { %917 = vmatprep.mubr.bf16.mxu0 %v19443_v1  ;;  %1270 = vmatprep.mubr.bf16.mxu1 %v19443_v1 }
  0x57   : > { %1576 = vmatpush1.bf16.msra.mxu0 %v10189_v61  ;;  %10922 = vmatpush1.bf16.msra.mxu1 %v10189_v61 }
  0x58   : > { %1577 = vmatprep.subr.bf16.mxu0 %v10198_v2  ;;  %10919 = vmatprep.subr.bf16.mxu1 %v10198_v2  ;;  %v12033_v2 = vld [vmem:[%s13382_s10 + $0xf0] sm:$0xff]  }
  0x5b   : > { %1578 = vmatpush1.bf16.msra.mxu0 %v10197_v3  ;;  %10923 = vmatpush1.bf16.msra.mxu1 %v10197_v3 }
  0x5c   : > { %4688 = vmatprep.subr.bf16.mxu0 %v12037_v4 }
  0x5d   : > { %10203 = vmatmul.mubr.msk.bf16.gmra.mrb[8].mxu0 %vm768_vm0, %v12005_v40  ;;  %10235 = vmatmul.mubr.msk.bf16.gmra.mrb[8].mxu1 %vm768_vm0, %v12005_v40 }
  0x5e   : > { %927 = vmatprep.mubr.bf16.mxu0 %v19443_v1  ;;  %1280 = vmatprep.mubr.bf16.mxu1 %v19443_v1 }
  0x65   : > { %10204 = vmatmul.mubr.msk.bf16.gmra.mrb[12].mxu0 %vm768_vm0, %v12006_v41  ;;  %10236 = vmatmul.mubr.msk.bf16.gmra.mrb[12].mxu1 %vm768_vm0, %v12006_v41 }
  0x66   : > { %937 = vmatprep.mubr.bf16.mxu0 %v19443_v1  ;;  %1290 = vmatprep.mubr.bf16.mxu1 %v19443_v1 }
  0x6d   : > { %10205 = vmatmul.mubr.msk.bf16.gmra.mrb[16].mxu0 %vm768_vm0, %v12007_v42  ;;  %10237 = vmatmul.mubr.msk.bf16.gmra.mrb[16].mxu1 %vm768_vm0, %v12007_v42 }
  0x6e   : > { %947 = vmatprep.mubr.bf16.mxu0 %v19443_v1  ;;  %1300 = vmatprep.mubr.bf16.mxu1 %v19443_v1 }
  0x75   : > { %10206 = vmatmul.mubr.msk.bf16.gmra.mrb[20].mxu0 %vm768_vm0, %v12008_v43  ;;  %10238 = vmatmul.mubr.msk.bf16.gmra.mrb[20].mxu1 %vm768_vm0, %v12008_v43  ;;  %v12032_v43 = vld [vmem:[%s13382_s10 + $0xe8] sm:$0xff]  }
  0x76   : > { %957 = vmatprep.mubr.bf16.mxu0 %v19443_v1  ;;  %1310 = vmatprep.mubr.bf16.mxu1 %v19443_v1 }
  0x7d   : > { %10207 = vmatmul.mubr.msk.bf16.gmra.mrb[24].mxu0 %vm768_vm0, %v12009_v44  ;;  %10239 = vmatmul.mubr.msk.bf16.gmra.mrb[24].mxu1 %vm768_vm0, %v12009_v44 }
  0x7e   : > { %967 = vmatprep.mubr.bf16.mxu0 %v19443_v1  ;;  %1320 = vmatprep.mubr.bf16.mxu1 %v19443_v1 }
  0x85   : > { %10208 = vmatmul.mubr.msk.bf16.gmra.mrb[28].mxu0 %vm768_vm0, %v12010_v45  ;;  %10240 = vmatmul.mubr.msk.bf16.gmra.mrb[28].mxu1 %vm768_vm0, %v12010_v45 }
  0x86   : > { %977 = vmatprep.mubr.bf16.mxu0 %v19443_v1  ;;  %1330 = vmatprep.mubr.bf16.mxu1 %v19443_v1 }
  0x8d   : > { %10209 = vmatmul.mubr.msk.bf16.gmra.mrb[32].mxu0 %vm768_vm0, %v13440_v46  ;;  %10241 = vmatmul.mubr.msk.bf16.gmra.mrb[32].mxu1 %vm768_vm0, %v13440_v46 }
  0x8e   : > { %987 = vmatprep.mubr.bf16.mxu0 %v19443_v1  ;;  %1340 = vmatprep.mubr.bf16.mxu1 %v19443_v1 }
  0x95   : > { %10210 = vmatmul.mubr.msk.bf16.gmra.mrb[36].mxu0 %vm768_vm0, %v13455_v51  ;;  %10242 = vmatmul.mubr.msk.bf16.gmra.mrb[36].mxu1 %vm768_vm0, %v13455_v51 }
  0x96   : > { %997 = vmatprep.mubr.bf16.mxu0 %v19443_v1  ;;  %1350 = vmatprep.mubr.bf16.mxu1 %v19443_v1 }
  0x9d   : > { %10211 = vmatmul.mubr.msk.bf16.gmra.mrb[40].mxu0 %vm768_vm0, %v13464_v52  ;;  %10243 = vmatmul.mubr.msk.bf16.gmra.mrb[40].mxu1 %vm768_vm0, %v13464_v52 }
  0x9e   : > { %1007 = vmatprep.mubr.bf16.mxu0 %v19443_v1  ;;  %1360 = vmatprep.mubr.bf16.mxu1 %v19443_v1 }
  0xa5   : > { %10212 = vmatmul.mubr.msk.bf16.gmra.mrb[44].mxu0 %vm768_vm0, %v13473_v53  ;;  %10244 = vmatmul.mubr.msk.bf16.gmra.mrb[44].mxu1 %vm768_vm0, %v13473_v53 }
  0xa6   : > { %1017 = vmatprep.mubr.bf16.mxu0 %v19443_v1  ;;  %1370 = vmatprep.mubr.bf16.mxu1 %v19443_v1 }
  0xad   : > { %10213 = vmatmul.mubr.msk.bf16.gmra.mrb[48].mxu0 %vm768_vm0, %v13482_v54  ;;  %10245 = vmatmul.mubr.msk.bf16.gmra.mrb[48].mxu1 %vm768_vm0, %v13482_v54 }
  0xae   : > { %1027 = vmatprep.mubr.bf16.mxu0 %v19443_v1  ;;  %1380 = vmatprep.mubr.bf16.mxu1 %v19443_v1 }
  0xb5   : > { %10214 = vmatmul.mubr.msk.bf16.gmra.mrb[52].mxu0 %vm768_vm0, %v13491_v55  ;;  %10246 = vmatmul.mubr.msk.bf16.gmra.mrb[52].mxu1 %vm768_vm0, %v13491_v55 }
  0xb6   : > { %1037 = vmatprep.mubr.bf16.mxu0 %v19443_v1  ;;  %1390 = vmatprep.mubr.bf16.mxu1 %v19443_v1 }
  0xbd   : > { %10215 = vmatmul.mubr.msk.bf16.gmra.mrb[56].mxu0 %vm768_vm0, %v13500_v56  ;;  %10247 = vmatmul.mubr.msk.bf16.gmra.mrb[56].mxu1 %vm768_vm0, %v13500_v56 }
  0xbe   : > { %1047 = vmatprep.mubr.bf16.mxu0 %v19443_v1  ;;  %1400 = vmatprep.mubr.bf16.mxu1 %v19443_v1 }
  0xc5   : > { %10216 = vmatmul.mubr.msk.bf16.gmra.mrb[60].mxu0 %vm768_vm0, %v13509_v57  ;;  %10248 = vmatmul.mubr.msk.bf16.gmra.mrb[60].mxu1 %vm768_vm0, %v13509_v57 }
  0xc6   : > { %1057 = vmatprep.mubr.bf16.mxu0 %v19443_v1  ;;  %1410 = vmatprep.mubr.bf16.mxu1 %v19443_v1 }
  0xcd   : > { %10217 = vmatmul.mubr.msk.bf16.gmra.mrb[64].mxu0 %vm768_vm0, %v13524_v62  ;;  %10249 = vmatmul.mubr.msk.bf16.gmra.mrb[64].mxu1 %vm768_vm0, %v13524_v62 }
  0xce   : > { %1067 = vmatprep.mubr.bf16.mxu0 %v19443_v1  ;;  %1420 = vmatprep.mubr.bf16.mxu1 %v19443_v1 }
  0xd5   : > { %10218 = vmatmul.mubr.msk.bf16.gmra.mrb[68].mxu0 %vm768_vm0, %v13542_v5  ;;  %10250 = vmatmul.mubr.msk.bf16.gmra.mrb[68].mxu1 %vm768_vm0, %v13542_v5 }
  0xd6   : > { %1077 = vmatprep.mubr.bf16.mxu0 %v19443_v1  ;;  %1430 = vmatprep.mubr.bf16.mxu1 %v19443_v1 }
  0xdd   : > { %10219 = vmatmul.mubr.msk.bf16.gmra.mrb[72].mxu0 %vm768_vm0, %v13551_v6  ;;  %10251 = vmatmul.mubr.msk.bf16.gmra.mrb[72].mxu1 %vm768_vm0, %v13551_v6 }
  0xde   : > { %1087 = vmatprep.mubr.bf16.mxu0 %v19443_v1  ;;  %1440 = vmatprep.mubr.bf16.mxu1 %v19443_v1 }
  0xe5   : > { %10220 = vmatmul.mubr.msk.bf16.gmra.mrb[76].mxu0 %vm768_vm0, %v13560_v7  ;;  %10252 = vmatmul.mubr.msk.bf16.gmra.mrb[76].mxu1 %vm768_vm0, %v13560_v7 }
  0xe6   : > { %1097 = vmatprep.mubr.bf16.mxu0 %v19443_v1  ;;  %1450 = vmatprep.mubr.bf16.mxu1 %v19443_v1 }
  0xed   : > { %10221 = vmatmul.mubr.msk.bf16.gmra.mrb[80].mxu0 %vm768_vm0, %v13569_v8  ;;  %10253 = vmatmul.mubr.msk.bf16.gmra.mrb[80].mxu1 %vm768_vm0, %v13569_v8 }
  0xee   : > { %1107 = vmatprep.mubr.bf16.mxu0 %v19443_v1  ;;  %1460 = vmatprep.mubr.bf16.mxu1 %v19443_v1 }
  0xf5   : > { %10222 = vmatmul.mubr.msk.bf16.gmra.mrb[84].mxu0 %vm768_vm0, %v13578_v9  ;;  %10254 = vmatmul.mubr.msk.bf16.gmra.mrb[84].mxu1 %vm768_vm0, %v13578_v9 }
  0xf6   : > { %1117 = vmatprep.mubr.bf16.mxu0 %v19443_v1  ;;  %1470 = vmatprep.mubr.bf16.mxu1 %v19443_v1 }
  0xfd   : > { %10223 = vmatmul.mubr.msk.bf16.gmra.mrb[88].mxu0 %vm768_vm0, %v13587_v10  ;;  %10255 = vmatmul.mubr.msk.bf16.gmra.mrb[88].mxu1 %vm768_vm0, %v13587_v10 }
  0xfe   : > { %1127 = vmatprep.mubr.bf16.mxu0 %v19443_v1  ;;  %1480 = vmatprep.mubr.bf16.mxu1 %v19443_v1 }
 0x105   : > { %10224 = vmatmul.mubr.msk.bf16.gmra.mrb[92].mxu0 %vm768_vm0, %v13596_v11  ;;  %10256 = vmatmul.mubr.msk.bf16.gmra.mrb[92].mxu1 %vm768_vm0, %v13596_v11  ;;  %v13047_v11 = vld [vmem:[%s13382_s10 + $0x18] sm:$0xff]  }
 0x106   : > { %1137 = vmatprep.mubr.bf16.mxu0 %v19443_v1  ;;  %1490 = vmatprep.mubr.bf16.mxu1 %v19443_v1 }
 0x10d   : > { %10225 = vmatmul.mubr.msk.bf16.gmra.mrb[96].mxu0 %vm768_vm0, %v13605_v12  ;;  %10257 = vmatmul.mubr.msk.bf16.gmra.mrb[96].mxu1 %vm768_vm0, %v13605_v12 }
 0x10e   : > { %1147 = vmatprep.mubr.bf16.mxu0 %v19443_v1  ;;  %1500 = vmatprep.mubr.bf16.mxu1 %v19443_v1 }
 0x115   : > { %10226 = vmatmul.mubr.msk.bf16.gmra.mrb[100].mxu0 %vm768_vm0, %v12028_v13  ;;  %10258 = vmatmul.mubr.msk.bf16.gmra.mrb[100].mxu1 %vm768_vm0, %v12028_v13 }
 0x116   : > { %1157 = vmatprep.mubr.bf16.mxu0 %v19443_v1  ;;  %1510 = vmatprep.mubr.bf16.mxu1 %v19443_v1 }
 0x11d   : > { %10227 = vmatmul.mubr.msk.bf16.gmra.mrb[104].mxu0 %vm768_vm0, %v12029_v14  ;;  %10259 = vmatmul.mubr.msk.bf16.gmra.mrb[104].mxu1 %vm768_vm0, %v12029_v14 }
 0x11e   : > { %1167 = vmatprep.mubr.bf16.mxu0 %v19443_v1  ;;  %1520 = vmatprep.mubr.bf16.mxu1 %v19443_v1 }
 0x120   : > { %v13623_v15 = vpop.f32.mrb[0].mxu0  ;;  %v13625_v16 = vpop.f32.mrb[0].mxu1 }
 0x121   : > { %20004 = vst [vmem:[#allocation11_spill] sm:$0xff] %v13625_v16  ;;  %v13628_v18 = vpop.f32.mrb[1].mxu0  ;;  %v13630_v19 = vpop.f32.mrb[1].mxu1 }
 0x122   : > { %20005 = vst [vmem:[#allocation12_spill] sm:$0xff] %v13630_v19  ;;  %v13632_v20 = vpop.f32.mrb[2].mxu0  ;;  %v13634_v21 = vpop.f32.mrb[2].mxu1 }
 0x123   : > { %20006 = vst [vmem:[#allocation13_spill] sm:$0xff] %v13634_v21  ;;  %v13638_v23 = vpop.f32.mrb[3].mxu0  ;;  %v13642_v25 = vpop.f32.mrb[3].mxu1  ;;  %v12059_v21 = vld [vmem:[%s19432_s3 + $0x100] ss:$16 sps:$4 sm:$0xff]  }
 0x124   : > { %20007 = vst [vmem:[#allocation14_spill] sm:$0xff] %v13642_v25  ;;  %v20044_v25 = vlaneseq }
 0x125   : > { %10228 = vmatmul.mubr.msk.bf16.gmra.mrb[108].mxu0 %vm768_vm0, %v12030_v17  ;;  %10260 = vmatmul.mubr.msk.bf16.gmra.mrb[108].mxu1 %vm768_vm0, %v12030_v17 }
 0x126   : > { %1177 = vmatprep.mubr.bf16.mxu0 %v19443_v1  ;;  %1530 = vmatprep.mubr.bf16.mxu1 %v19443_v1 }
 0x128   : > { %v13652_v28 = vpop.f32.mrb[4].mxu0  ;;  %v13654_v29 = vpop.f32.mrb[4].mxu1 }
 0x129   : > { %20008 = vst [vmem:[#allocation15_spill] sm:$0xff] %v13654_v29  ;;  %v13657_v31 = vpop.f32.mrb[5].mxu0  ;;  %v13659_v32 = vpop.f32.mrb[5].mxu1  ;;  %v13045_v29 = vld [vmem:[%s13382_s10 + $0x8] sm:$0xff]  }
 0x12a   : > { %20009 = vst [vmem:[#allocation16_spill] sm:$0xff] %v13659_v32  ;;  %v13661_v33 = vpop.f32.mrb[6].mxu0  ;;  %v13663_v34 = vpop.f32.mrb[6].mxu1  ;;  %v13046_v32 = vld [vmem:[%s13382_s10 + $0x10] sm:$0xff]  }
 0x12b   : > { %20010 = vst [vmem:[#allocation17_spill] sm:$0xff] %v13663_v34  ;;  %v13665_v35 = vpop.f32.mrb[7].mxu0  ;;  %v13671_v38 = vpop.f32.mrb[7].mxu1 }
 0x12c   : > { %20011 = vst [vmem:[#allocation18_spill] sm:$0xff] %v13671_v38 }
 0x12d   : > { %10229 = vmatmul.mubr.msk.bf16.gmra.mrb[112].mxu0 %vm768_vm0, %v12031_v30  ;;  %10261 = vmatmul.mubr.msk.bf16.gmra.mrb[112].mxu1 %vm768_vm0, %v12031_v30 }
 0x12e   : > { %1187 = vmatprep.mubr.bf16.mxu0 %v19443_v1  ;;  %1540 = vmatprep.mubr.bf16.mxu1 %v19443_v1 }
 0x130   : > { %v13681_v41 = vpop.f32.mrb[8].mxu0  ;;  %v13683_v42 = vpop.f32.mrb[8].mxu1 }
 0x131   : > { %20012 = vst [vmem:[#allocation19_spill] sm:$0xff] %v13683_v42  ;;  %v13686_v44 = vpop.f32.mrb[9].mxu0  ;;  %v13688_v45 = vpop.f32.mrb[9].mxu1 }
 0x132   : > { %20013 = vst [vmem:[#allocation20_spill] sm:$0xff] %v13688_v45  ;;  %v13690_v47 = vpop.f32.mrb[10].mxu0  ;;  %v13692_v48 = vpop.f32.mrb[10].mxu1 }
 0x133   : > { %20014 = vst [vmem:[#allocation21_spill] sm:$0xff] %v13692_v48  ;;  %v13694_v49 = vpop.f32.mrb[11].mxu0  ;;  %v13700_v59 = vpop.f32.mrb[11].mxu1 }
 0x134   : > { %20015 = vst [vmem:[#allocation22_spill] sm:$0xff] %v13700_v59 }
 0x135   : > { %10230 = vmatmul.mubr.msk.bf16.gmra.mrb[116].mxu0 %vm768_vm0, %v12032_v43  ;;  %10262 = vmatmul.mubr.msk.bf16.gmra.mrb[116].mxu1 %vm768_vm0, %v12032_v43  ;;  %v12034_v43 = vld [vmem:[%s13382_s10 + $0xf8] sm:$0xff]  }
 0x136   : > { %1197 = vmatprep.mubr.bf16.mxu0 %v19443_v1  ;;  %1550 = vmatprep.mubr.bf16.mxu1 %v19443_v1 }
 0x138   : > { %v13710_v63 = vpop.f32.mrb[12].mxu0  ;;  %v13712_v0 = vpop.f32.mrb[12].mxu1 }
 0x139   : > { %20016 = vst [vmem:[#allocation23_spill] sm:$0xff] %v13712_v0  ;;  %v13715_v3 = vpop.f32.mrb[13].mxu0  ;;  %v13717_v4 = vpop.f32.mrb[13].mxu1 }
 0x13a   : > { %20017 = vst [vmem:[#allocation24_spill] sm:$0xff] %v13717_v4  ;;  %v13719_v13 = vpop.f32.mrb[14].mxu0  ;;  %v13721_v14 = vpop.f32.mrb[14].mxu1  ;;  %v419_v4 = vld [vmem:[%s19430_s1 + $0x18] sm:$0xff] }
 0x13b   : > { %20018 = vst [vmem:[#allocation25_spill] sm:$0xff] %v13721_v14  ;;  %v13723_v17 = vpop.f32.mrb[15].mxu0  ;;  %v13729_v58 = vpop.f32.mrb[15].mxu1  ;;  %v12043_v14 = vld [vmem:[%s19432_s3 + $0x44] ss:$16 sps:$4 sm:$0xff]  }
 0x13c   : > { %20019 = vst [vmem:[#allocation26_spill] sm:$0xff] %v13729_v58  ;;  %v13044_v58 = vld [vmem:[%s13382_s10] sm:$0xff]  }
 0x13d   : > { %10231 = vmatmul.mubr.msk.bf16.gmra.mrb[120].mxu0 %vm768_vm0, %v12033_v2  ;;  %10263 = vmatmul.mubr.msk.bf16.gmra.mrb[120].mxu1 %vm768_vm0, %v12033_v2 }
 0x13e   : > { %1207 = vmatprep.mubr.bf16.mxu0 %v19443_v1  ;;  %1560 = vmatprep.mubr.bf16.mxu1 %v19443_v1 }
 0x140   : > { %v13739_v40 = vpop.f32.mrb[16].mxu0  ;;  %v13741_v24 = vpop.f32.mrb[16].mxu1 }
 0x141   : > { %20020 = vst [vmem:[#allocation27_spill] sm:$0xff] %v13741_v24  ;;  %v13744_v27 = vpop.f32.mrb[17].mxu0  ;;  %v13746_v30 = vpop.f32.mrb[17].mxu1 }
 0x142   : > { %20021 = vst [vmem:[#allocation28_spill] sm:$0xff] %v13746_v30  ;;  %v13748_v50 = vpop.f32.mrb[18].mxu0  ;;  %v13750_v37 = vpop.f32.mrb[18].mxu1  ;;  %v12038_v30 = vld [vmem:[%s19432_s3 + $0x20] ss:$16 sps:$4 sm:$0xff]  }
 0x143   : > { %20022 = vst [vmem:[#allocation29_spill] sm:$0xff] %v13750_v37  ;;  %v13752_v61 = vpop.f32.mrb[19].mxu0  ;;  %v13758_v60 = vpop.f32.mrb[19].mxu1 }
 0x144   : > { %20023 = vst [vmem:[#allocation30_spill] sm:$0xff] %v13758_v60  ;;  %v20028_v60 = vmov 0  }
 0x145   : > { %10232 = vmatmul.mubr.msk.bf16.gmra.mrb[124].mxu0 %vm768_vm0, %v12034_v43  ;;  %10264 = vmatmul.mubr.msk.bf16.gmra.mrb[124].mxu1 %vm768_vm0, %v12034_v43 }
 0x146   : > { %1603 = vmatprep.mubr.bf16.mxu0 %v19443_v1  ;;  %1683 = vmatprep.mubr.bf16.mxu1 %v19443_v1  ;;  %v12040_v1 = vld [vmem:[%s19432_s3 + $0x24] ss:$16 sps:$4 sm:$0xff]  }
 0x148   : > { %v13768_v2 = vpop.f32.mrb[20].mxu0  ;;  %v13770_v36 = vpop.f32.mrb[20].mxu1 }
 0x149   : > { %20024 = vst [vmem:[#allocation31_spill] sm:$0xff] %v13770_v36  ;;  %v13772_v26 = vpop.f32.mrb[21].mxu0  ;;  %v13774_v24 = vpop.f32.mrb[21].mxu1 }
 0x14a   : > { %20025 = vst [vmem:[#allocation32_spill] sm:$0xff] %v13774_v24  ;;  %v13779_v22 = vpop.f32.mrb[22].mxu0  ;;  %v13781_v43 = vpop.f32.mrb[22].mxu1 }
 0x14b   : > { %20026 = vst [vmem:[#allocation33_spill] sm:$0xff] %v13781_v43  ;;  %v13786_v37 = vpop.f32.mrb[23].mxu0  ;;  %v13792_v0 = vpop.f32.mrb[23].mxu1 }
 0x14c   : > { %20027 = vst [vmem:[#allocation34_spill] sm:$0xff] %v13792_v0  ;;  %v12041_v0 = vld [vmem:[%s19432_s3 + $0x40] ss:$16 sps:$4 sm:$0xff]  }
 0x14d   : > { %10265 = vmatmul.mubr.msk.bf16.vlgmr.msra.gmra.mrb[128].mxu0 %vm768_vm0, %v13044_v58  ;;  %10273 = vmatmul.mubr.msk.bf16.vlgmr.msra.gmra.mrb[128].mxu1 %vm768_vm0, %v13440_v46  ;;  %v423_v46 = vld [vmem:[%s19430_s1 + $0x38] sm:$0xff] }
 0x14e   : > { %4689 = vmatpush1.bf16.msra.mxu0 %v12035_v39  ;;  %1613 = vmatprep.mubr.bf16.mxu0 %v20028_v60  ;;  %v10175_v58 = vcombine.low %v419_v4, %v423_v46 }
 0x14f   : > { %4690 = vmatprep.subr.bf16.mxu0 %v12040_v1  ;;  %1693 = vmatprep.mubr.bf16.mxu1 %v20028_v60  ;;  %v10176_v1 = vcombine.high %v419_v4, %v423_v46  ;;  %v12046_v4 = vld [vmem:[%s19432_s3 + $0x64] ss:$16 sps:$4 sm:$0xff]  }
 0x150   : > { %v13816_v39 = vpop.f32.mrb[24].mxu0  ;;  %v13818_v36 = vpop.f32.mrb[24].mxu1 }
 0x151   : > { %20029 = vst [vmem:[#allocation35_spill] sm:$0xff] %v13818_v36  ;;  %v13820_v43 = vpop.f32.mrb[25].mxu0  ;;  %v13822_v24 = vpop.f32.mrb[25].mxu1  ;;  %1924 = vmatprep.subr.bf16.mxu1 %v10176_v1  ;;  %v12052_v36 = vld [vmem:[%s19432_s3 + $0xa4] ss:$16 sps:$4 sm:$0xff]  }
 0x152   : > { %20030 = vst [vmem:[#allocation36_spill] sm:$0xff] %v13822_v24  ;;  %4691 = vmatpush1.bf16.msra.mxu0 %v12038_v30  ;;  %v13827_v42 = vpop.f32.mrb[26].mxu0  ;;  %v13829_v48 = vpop.f32.mrb[26].mxu1  ;;  %1925 = vmatpush1.bf16.msra.mxu1 %v10175_v58  ;;  %v12044_v58 = vld [vmem:[%s19432_s3 + $0x60] ss:$16 sps:$4 sm:$0xff]  }
 0x153   : > { %20031 = vst [vmem:[#allocation37_spill] sm:$0xff] %v13829_v48  ;;  %4692 = vmatprep.subr.bf16.mxu0 %v12043_v14  ;;  %v13834_v46 = vpop.f32.mrb[27].mxu0  ;;  %v13840_v59 = vpop.f32.mrb[27].mxu1  ;;  %v12049_v30 = vld [vmem:[%s19432_s3 + $0x84] ss:$16 sps:$4 sm:$0xff]  }
 0x154   : > { %20032 = vst [vmem:[#allocation38_spill] sm:$0xff] %v13840_v59  ;;  %v12050_v24 = vld [vmem:[%s19432_s3 + $0xa0] ss:$16 sps:$4 sm:$0xff]  }
 0x155   : > { %10266 = vmatmul.mubr.msk.bf16.gmra.mrb[132].mxu0 %vm768_vm0, %v13045_v29  ;;  %10274 = vmatmul.mubr.msk.bf16.gmra.mrb[132].mxu1 %vm768_vm0, %v13455_v51 }
 0x156   : > { %4693 = vmatpush1.bf16.msra.mxu0 %v12041_v0  ;;  %1623 = vmatprep.mubr.bf16.mxu0 %v20028_v60 }
 0x157   : > { %4694 = vmatprep.subr.bf16.mxu0 %v12046_v4  ;;  %1703 = vmatprep.mubr.bf16.mxu1 %v20028_v60  ;;  %v12047_v4 = vld [vmem:[%s19432_s3 + $0x80] ss:$16 sps:$4 sm:$0xff]  }
 0x158   : > { %v13858_v14 = vpop.f32.mrb[28].mxu0  ;;  %v13860_v29 = vpop.f32.mrb[28].mxu1 }
 0x159   : > { %20033 = vst [vmem:[#allocation39_spill] sm:$0xff] %v13858_v14  ;;  %20034 = vst [vmem:[#allocation40_spill] sm:$0xff] %v13860_v29  ;;  %v13862_v51 = vpop.f32.mrb[29].mxu0  ;;  %v13864_v0 = vpop.f32.mrb[29].mxu1  ;;  %v13049_v14 = vld [vmem:[%s13382_s10 + $0x28] sm:$0xff]  }
 0x15a   : > { %20035 = vst [vmem:[#allocation41_spill] sm:$0xff] %v13864_v0  ;;  %4695 = vmatpush1.bf16.msra.mxu0 %v12044_v58  ;;  %v13869_v45 = vpop.f32.mrb[30].mxu0  ;;  %v13871_v1 = vpop.f32.mrb[30].mxu1  ;;  %v12055_v58 = vld [vmem:[%s19432_s3 + $0xc4] ss:$16 sps:$4 sm:$0xff]  }
 0x15b   : > { %20036 = vst [vmem:[#allocation42_spill] sm:$0xff] %v13871_v1  ;;  %4696 = vmatprep.subr.bf16.mxu0 %v12049_v30  ;;  %v13876_v48 = vpop.f32.mrb[31].mxu0  ;;  %v13882_v59 = vpop.f32.mrb[31].mxu1 }
 0x15c   : > { %20037 = vst [vmem:[#allocation43_spill] sm:$0xff] %v13882_v59 }
 0x15d   : > { %10267 = vmatmul.mubr.msk.bf16.gmra.mrb[136].mxu0 %vm768_vm0, %v13046_v32  ;;  %10275 = vmatmul.mubr.msk.bf16.gmra.mrb[136].mxu1 %vm768_vm0, %v13464_v52  ;;  %v13194_v32 = vmov 1966171168  }
 0x15e   : > { %4697 = vmatpush1.bf16.msra.mxu0 %v12047_v4  ;;  %1633 = vmatprep.mubr.bf16.mxu0 %v20028_v60  ;;  %v2537_v34 = vunpack.c.l.s4 %v13194_v32  ;;  %v12058_v32 = vld [vmem:[%s19432_s3 + $0xe4] ss:$16 sps:$4 sm:$0xff]  }
 0x15f   : > { %4698 = vmatprep.subr.bf16.mxu0 %v12052_v36  ;;  %1713 = vmatprep.mubr.bf16.mxu1 %v20028_v60  ;;  %v12053_v36 = vld [vmem:[%s19432_s3 + $0xc0] ss:$16 sps:$4 sm:$0xff]  }
 0x160   : > { %v13900_v30 = vpop.f32.mrb[32].mxu0  ;;  %v13902_v52 = vpop.f32.mrb[32].mxu1  ;;  %v2538_v19 = vunpack.c.0.s8 %v2537_v34  ;;  %v12061_v34 = vld [vmem:[%s19432_s3 + $0x104] ss:$16 sps:$4 sm:$0xff]  }
 0x161   : > { %20038 = vst [vmem:[#allocation44_spill] sm:$0xff] %v13900_v30  ;;  %20039 = vst [vmem:[#allocation45_spill] sm:$0xff] %v13902_v52  ;;  %v13904_v4 = vpop.f32.mrb[33].mxu0  ;;  %v13906_v1 = vpop.f32.mrb[33].mxu1  ;;  %v12064_v52 = vld [vmem:[%s19432_s3 + $0x124] ss:$16 sps:$4 sm:$0xff]  }
 0x162   : > { %20040 = vst [vmem:[#allocation46_spill] sm:$0xff] %v13906_v1  ;;  %4699 = vmatpush1.bf16.msra.mxu0 %v12050_v24  ;;  %v13911_v0 = vpop.f32.mrb[34].mxu0  ;;  %v13913_v59 = vpop.f32.mrb[34].mxu1  ;;  %v12056_v24 = vld [vmem:[%s19432_s3 + $0xe0] ss:$16 sps:$4 sm:$0xff]  }
 0x163   : > { %20041 = vst [vmem:[#allocation47_spill] sm:$0xff] %v13911_v0  ;;  %20042 = vst [vmem:[#allocation48_spill] sm:$0xff] %v13913_v59  ;;  %4700 = vmatprep.subr.bf16.mxu0 %v12055_v58  ;;  %v13920_v38 = vpop.f32.mrb[35].mxu0  ;;  %v13924_v16 = vpop.f32.mrb[35].mxu1  ;;  %v13929_v58 = vshrl.u32 %v20044_v25, 7  ;;  %v13048_v0 = vld [vmem:[%s13382_s10 + $0x20] sm:$0xff]  }
 0x164   : > { %20043 = vst [vmem:[#allocation49_spill] sm:$0xff] %v13924_v16  ;;  %v12062_v59 = vld [vmem:[%s19432_s3 + $0x120] ss:$16 sps:$4 sm:$0xff]  }
 0x165   : > { %20045 = vst [vmem:[#allocation50_spill] sm:$0xff] %v13929_v58  ;;  %10268 = vmatmul.mubr.msk.bf16.gmra.mrb[140].mxu0 %vm768_vm0, %v13047_v11  ;;  %10276 = vmatmul.mubr.msk.bf16.gmra.mrb[140].mxu1 %vm768_vm0, %v13473_v53  ;;  %v13948_v11 = vsub.s32 %v2538_v19, %v13929_v58 }
 0x166   : > { %4701 = vmatpush1.bf16.msra.mxu0 %v12053_v36  ;;  %1643 = vmatprep.mubr.bf16.mxu0 %v20028_v60 }
 0x167   : > { %4702 = vmatprep.subr.bf16.mxu0 %v12058_v32  ;;  %1723 = vmatprep.mubr.bf16.mxu1 %v20028_v60  ;;  %20047 = vst [vmem:[#allocation52_spill] sm:$0xff] %v13948_v11  ;;  %v13957_v32 = vld.sshfl [vmem:[%s19431_s2] sm:$0xff pattern:$0x75316420] }
 0x168   : > { %v13945_v12 = vpop.f32.mrb[36].mxu0  ;;  %v13950_v53 = vpop.f32.mrb[36].mxu1 }
 0x169   : > { %20046 = vst [vmem:[#allocation51_spill] sm:$0xff] %v13945_v12  ;;  %20048 = vst [vmem:[#allocation53_spill] sm:$0xff] %v13950_v53  ;;  %v13952_v36 = vpop.f32.mrb[37].mxu0  ;;  %v13959_v29 = vpop.f32.mrb[37].mxu1 }
 0x16a   : > { %20049 = vst [vmem:[#allocation54_spill] sm:$0xff] %v13952_v36  ;;  %20050 = vst [vmem:[#allocation55_spill] sm:$0xff] %v13959_v29  ;;  %4703 = vmatpush1.bf16.msra.mxu0 %v12056_v24  ;;  %v13964_v25 = vpop.f32.mrb[38].mxu0  ;;  %v13966_v19 = vpop.f32.mrb[38].mxu1  ;;  %v12067_v24 = vld [vmem:[%s19432_s3 + $0x144] ss:$16 sps:$4 sm:$0xff]  }
 0x16b   : > { %20051 = vst [vmem:[#allocation56_spill] sm:$0xff] %v13964_v25  ;;  %20052 = vst [vmem:[#allocation57_spill] sm:$0xff] %v13966_v19  ;;  %4704 = vmatprep.subr.bf16.mxu0 %v12061_v34  ;;  %v13973_v1 = vpop.f32.mrb[39].mxu0  ;;  %v13977_v16 = vpop.f32.mrb[39].mxu1  ;;  %v12070_v29 = vld [vmem:[%s19432_s3 + $0x164] ss:$16 sps:$4 sm:$0xff]  }
 0x16c   : > { %20053 = vst [vmem:[#allocation58_spill] sm:$0xff] %v13973_v1  ;;  %20054 = vst [vmem:[#allocation59_spill] sm:$0xff] %v13977_v16  ;;  %v12071_v36 = vld [vmem:[%s19432_s3 + $0x180] ss:$16 sps:$4 sm:$0xff]  }
 0x16d   : > { %10269 = vmatmul.mubr.msk.bf16.gmra.mrb[144].mxu0 %vm768_vm0, %v13048_v0  ;;  %10277 = vmatmul.mubr.msk.bf16.gmra.mrb[144].mxu1 %vm768_vm0, %v13482_v54  ;;  %v2550_v0 = vcombine.high %v13957_v32, %v13957_v32 }
 0x16e   : > { %4705 = vmatpush1.bf16.msra.mxu0 %v12059_v21  ;;  %1653 = vmatprep.mubr.bf16.mxu0 %v20028_v60 }
 0x16f   : > { %4706 = vmatprep.subr.bf16.mxu0 %v12064_v52  ;;  %1733 = vmatprep.mubr.bf16.mxu1 %v20028_v60  ;;  %v12065_v52 = vld [vmem:[%s19432_s3 + $0x140] ss:$16 sps:$4 sm:$0xff]   ;;  %v14026_v1 = vrot.slane %v2550_v0, %v13948_v11  ;;  %v12073_v0 = vld [vmem:[%s19432_s3 + $0x184] ss:$16 sps:$4 sm:$0xff]  }
 0x170   : > { %v13995_v34 = vpop.f32.mrb[40].mxu0  ;;  %v13999_v54 = vpop.f32.mrb[40].mxu1 }
 0x171   : > { %20055 = vst [vmem:[#allocation60_spill] sm:$0xff] %v13995_v34  ;;  %20056 = vst [vmem:[#allocation61_spill] sm:$0xff] %v13999_v54  ;;  %v14001_v21 = vpop.f32.mrb[41].mxu0  ;;  %v14003_v30 = vpop.f32.mrb[41].mxu1 }
 0x172   : > { %20057 = vst [vmem:[#allocation62_spill] sm:$0xff] %v14001_v21  ;;  %20058 = vst [vmem:[#allocation63_spill] sm:$0xff] %v14003_v30  ;;  %4707 = vmatpush1.bf16.msra.mxu0 %v12062_v59  ;;  %v14008_v53 = vpop.f32.mrb[42].mxu0  ;;  %v14010_v19 = vpop.f32.mrb[42].mxu1  ;;  %v12068_v59 = vld [vmem:[%s19432_s3 + $0x160] ss:$16 sps:$4 sm:$0xff]  }
 0x173   : > { %20059 = vst [vmem:[#allocation64_spill] sm:$0xff] %v14008_v53  ;;  %20060 = vst [vmem:[#allocation65_spill] sm:$0xff] %v14010_v19  ;;  %4708 = vmatprep.subr.bf16.mxu0 %v12067_v24  ;;  %v14017_v12 = vpop.f32.mrb[43].mxu0  ;;  %v14021_v25 = vpop.f32.mrb[43].mxu1  ;;  %v2592_v24 = vpack.i.b16 %v14026_v1, %v14026_v1  ;;  %v14080_v53 = vrot.slane %v13957_v32, %v13948_v11  ;;  %v13050_v21 = vld [vmem:[%s13382_s10 + $0x30] sm:$0xff]  }
 0x174   : > { %20061 = vst [vmem:[#allocation66_spill] sm:$0xff] %v14021_v25  ;;  %20062 = vst [vmem:[#allocation67_spill] sm:$0xff] %v14026_v1  ;;  %v12074_v1 = vld [vmem:[%s19432_s3 + $0x1a0] ss:$16 sps:$4 sm:$0xff]   ;;  %v12079_v32 = vld [vmem:[%s19432_s3 + $0x1c4] ss:$16 sps:$4 sm:$0xff]  }
 0x175   : > { %10270 = vmatmul.mubr.msk.bf16.gmra.mrb[148].mxu0 %vm768_vm0, %v13049_v14  ;;  %10278 = vmatmul.mubr.msk.bf16.gmra.mrb[148].mxu1 %vm768_vm0, %v13491_v55  ;;  %v14047_v55 = vsub.s32 0, %v13929_v58  ;;  %v12076_v58 = vld [vmem:[%s19432_s3 + $0x1a4] ss:$16 sps:$4 sm:$0xff]   ;;  %20068 = vst [vmem:[#allocation73_spill] sm:$0xff] %v14080_v53  ;;  %v2585_v25 = vpack.i.b16 %v14080_v53, %v14080_v53 }
 0x176   : > { %4709 = vmatpush1.bf16.msra.mxu0 %v12065_v52  ;;  %1663 = vmatprep.mubr.bf16.mxu0 %v20028_v60 }
 0x177   : > { %4710 = vmatprep.subr.bf16.mxu0 %v12070_v29  ;;  %1743 = vmatprep.mubr.bf16.mxu1 %v20028_v60  ;;  %20063 = vst [vmem:[#allocation68_spill] sm:$0xff] %v14047_v55  ;;  %v14066_v30 = vrot.slane %v2592_v24, %v14047_v55  ;;  %v431_v24 = vld [vmem:[%s19430_s1 + $0x78] sm:$0xff] }
 0x178   : > { %v14044_v14 = vpop.f32.mrb[44].mxu0  ;;  %v14049_v52 = vpop.f32.mrb[44].mxu1 }
 0x179   : > { %20064 = vst [vmem:[#allocation69_spill] sm:$0xff] %v14049_v52  ;;  %v14051_v16 = vpop.f32.mrb[45].mxu0  ;;  %v14053_v29 = vpop.f32.mrb[45].mxu1 }
 0x17a   : > { %20065 = vst [vmem:[#allocation70_spill] sm:$0xff] %v14053_v29  ;;  %4711 = vmatpush1.bf16.msra.mxu0 %v12068_v59  ;;  %v14058_v54 = vpop.f32.mrb[46].mxu0  ;;  %v14060_v19 = vpop.f32.mrb[46].mxu1  ;;  %v14122_v29 = vrot.slane %v2585_v25, %v14047_v55  ;;  %v435_v25 = vld [vmem:[%s19430_s1 + $0x98] sm:$0xff] }
 0x17b   : > { %20066 = vst [vmem:[#allocation71_spill] sm:$0xff] %v14060_v19  ;;  %4712 = vmatprep.subr.bf16.mxu0 %v12073_v0  ;;  %v14070_v59 = vpop.f32.mrb[47].mxu0  ;;  %v14074_v34 = vpop.f32.mrb[47].mxu1 }
 0x17c   : > { %20067 = vst [vmem:[#allocation72_spill] sm:$0xff] %v14074_v34 }
 0x17d   : > { %10271 = vmatmul.mubr.msk.bf16.gmra.mrb[152].mxu0 %vm768_vm0, %v13050_v21  ;;  %10279 = vmatmul.mubr.msk.bf16.gmra.mrb[152].mxu1 %vm768_vm0, %v13500_v56  ;;  %v20069_v21 = vpack.c.bf16 %v13638_v23, %v13628_v18  ;;  %v12077_v23 = vld [vmem:[%s19432_s3 + $0x1c0] ss:$16 sps:$4 sm:$0xff]  }
 0x17e   : > { %4713 = vmatpush1.bf16.msra.mxu0 %v12071_v36  ;;  %1673 = vmatprep.mubr.bf16.mxu0 %v20028_v60  ;;  %v427_v36 = vld [vmem:[%s19430_s1 + $0x58] sm:$0xff] }
 0x17f   : > { %4714 = vmatprep.subr.bf16.mxu0 %v12076_v58  ;;  %v2641_v56 = vadd.bf16 %v14066_v30, %v20069_v21  ;;  %1753 = vmatprep.mubr.bf16.mxu1 %v20028_v60  ;;  %v10183_v0 = vcombine.low %v427_v36, %v431_v24  ;;  %v10184_v11 = vcombine.high %v427_v36, %v431_v24 }
 0x180   : > { %v14108_v58 = vpop.f32.mrb[48].mxu0  ;;  %v14110_v52 = vpop.f32.mrb[48].mxu1 }
 0x181   : > { %20070 = vst [vmem:[#allocation74_spill] sm:$0xff] %v14108_v58  ;;  %20071 = vst [vmem:[#allocation75_spill] sm:$0xff] %v14110_v52  ;;  %v14112_v19 = vpop.f32.mrb[49].mxu0  ;;  %v14114_v18 = vpop.f32.mrb[49].mxu1  ;;  %1926 = vmatprep.subr.bf16.mxu1 %v10184_v11  ;;  %v14127_v24 = vmax.bf16 %v20028_v60, %v2641_v56  ;;  %v439_v11 = vld [vmem:[%s19430_s1 + $0xb8] sm:$0xff]  ;;  %v20077_v52 = vpack.c.bf16 %v13665_v35, %v13657_v31 }
 0x182   : > { %20072 = vst [vmem:[#allocation76_spill] sm:$0xff] %v14114_v18  ;;  %4715 = vmatpush1.bf16.msra.mxu0 %v12074_v1  ;;  %v14119_v21 = vpop.f32.mrb[50].mxu0  ;;  %v14124_v34 = vpop.f32.mrb[50].mxu1  ;;  %v12082_v1 = vld [vmem:[%s19432_s3 + $0x1e4] ss:$16 sps:$4 sm:$0xff]   ;;  %1927 = vmatpush1.bf16.msra.mxu1 %v10183_v0  ;;  %v10192_v36 = vcombine.high %v435_v25, %v439_v11  ;;  %v13051_v58 = vld [vmem:[%s13382_s10 + $0x38] sm:$0xff]   ;;  %v20078_v0 = vpack.c.bf16 %v13632_v20, %v13623_v15 }
 0x183   : > { %20073 = vst [vmem:[#allocation77_spill] sm:$0xff] %v14119_v21  ;;  %20074 = vst [vmem:[#allocation78_spill] sm:$0xff] %v14124_v34  ;;  %4716 = vmatprep.subr.bf16.mxu0 %v12079_v32  ;;  %v14134_v53 = vpop.f32.mrb[51].mxu0  ;;  %v14144_v56 = vpop.f32.mrb[51].mxu1  ;;  %v10191_v21 = vcombine.low %v435_v25, %v439_v11  ;;  %v12080_v32 = vld [vmem:[%s19432_s3 + $0x1e0] ss:$16 sps:$4 sm:$0xff]   ;;  %v2649_v55 = vadd.bf16 %v14066_v30, %v20077_v52 }
 0x184   : > { %20075 = vst [vmem:[#allocation79_spill] sm:$0xff] %v14127_v24  ;;  %20076 = vst [vmem:[#allocation80_spill] sm:$0xff] %v14144_v56  ;;  %v2640_v34 = vadd.bf16 %v14122_v29, %v20078_v0  ;;  %1928 = vmatprep.subr.bf16.mxu1 %v10192_v36 }
 0x185   : > { %10272 = vmatmul.mubr.msk.bf16.gmra.mrb[156].mxu0 %vm768_vm0, %v13051_v58  ;;  %10280 = vmatmul.mubr.msk.bf16.gmra.mrb[156].mxu1 %vm768_vm0, %v13509_v57  ;;  %v443_v57 = vld [vmem:[%s19430_s1 + $0xd8] sm:$0xff] }
 0x186   : > { %4717 = vmatpush1.bf16.msra.mxu0 %v12077_v23  ;;  %4720 = vmatprep.mubr.bf16.mxu0 %v14127_v24  ;;  %v447_v58 = vld [vmem:[%s19430_s1 + $0xf8] sm:$0xff]  ;;  %v14189_v36 = vmax.bf16 %v20028_v60, %v2640_v34  ;;  %v20085_v34 = vpack.c.bf16 %v13694_v49, %v13686_v44 }
 0x187   : > { %4718 = vmatprep.subr.bf16.mxu0 %v12082_v1  ;;  %1763 = vmatprep.mubr.bf16.mxu1 %v20028_v60  ;;  %v10200_v35 = vcombine.high %v443_v57, %v447_v58  ;;  %v10199_v52 = vcombine.low %v443_v57, %v447_v58  ;;  %v14182_v1 = vmax.bf16 %v20028_v60, %v2649_v55 }
 0x188   : > { %v14173_v31 = vpop.f32.mrb[52].mxu0  ;;  %v14175_v15 = vpop.f32.mrb[52].mxu1  ;;  %1929 = vmatpush1.bf16.msra.mxu1 %v10191_v21  ;;  %20083 = vst [vmem:[#allocation85_spill] sm:$0xff] %v14189_v36  ;;  %v2657_v58 = vadd.bf16 %v14066_v30, %v20085_v34 }
 0x189   : > { %20079 = vst [vmem:[#allocation81_spill] sm:$0xff] %v14175_v15  ;;  %v14177_v20 = vpop.f32.mrb[53].mxu0  ;;  %v14179_v23 = vpop.f32.mrb[53].mxu1  ;;  %20081 = vst [vmem:[#allocation83_spill] sm:$0xff] %v14182_v1  ;;  %1930 = vmatprep.subr.bf16.mxu1 %v10200_v35  ;;  %v20086_v35 = vpack.c.bf16 %v13661_v33, %v13652_v28  ;;  %v20094_v28 = vpack.c.bf16 %v13690_v47, %v13681_v41  ;;  %v20102_v41 = vpack.c.bf16 %v13719_v13, %v13710_v63 }
 0x18a   : > { %20080 = vst [vmem:[#allocation82_spill] sm:$0xff] %v14179_v23  ;;  %4719 = vmatpush1.bf16.msra.mxu0 %v12080_v32  ;;  %v14184_v25 = vpop.f32.mrb[54].mxu0  ;;  %v14186_v11 = vpop.f32.mrb[54].mxu1  ;;  %v14225_v55 = vmax.bf16 %v20028_v60, %v2657_v58  ;;  %v20110_v63 = vpack.c.bf16 %v13748_v50, %v13739_v40  ;;  %v20118_v40 = vpack.c.bf16 %v13779_v22, %v13768_v2 }
 0x18b   : > { %20082 = vst [vmem:[#allocation84_spill] sm:$0xff] %v14186_v11  ;;  %v14193_v24 = vpop.f32.mrb[55].mxu0  ;;  %v14197_v32 = vpop.f32.mrb[55].mxu1  ;;  %v2648_v21 = vadd.bf16 %v14122_v29, %v20086_v35  ;;  %v2656_v58 = vadd.bf16 %v14122_v29, %v20094_v28  ;;  %v20126_v22 = vpack.c.bf16 %v13827_v42, %v13816_v39  ;;  %v20134_v42 = vld [vmem:[#allocation39_spill] sm:$0xff]  ;;  %v13052_v11 = vld [vmem:[%s13382_s10 + $0xc8] sm:$0xff]  }
 0x18c   : > { %20084 = vst [vmem:[#allocation86_spill] sm:$0xff] %v14197_v32  ;;  %1931 = vmatpush1.bf16.msra.mxu1 %v10199_v52  ;;  %20089 = vst [vmem:[#allocation89_spill] sm:$0xff] %v14225_v55  ;;  %v13053_v32 = vld [vmem:[%s13382_s10 + $0xd0] sm:$0xff]  }
 0x18d   : > { %4721 = vmatmul.mubr.bf16.vlgmr.msra.gmra.mrb[160].mxu0 %v14189_v36  ;;  %10281 = vmatmul.mubr.msk.bf16.gmra.mrb[160].mxu1 %vm768_vm0, %v13524_v62  ;;  %v14232_v34 = vmax.bf16 %v20028_v60, %v2648_v21  ;;  %v20093_v21 = vpack.c.bf16 %v13723_v17, %v13715_v3 }
 0x18e   : > { %4730 = vmatprep.mubr.bf16.mxu0 %v14182_v1  ;;  %1773 = vmatprep.mubr.bf16.mxu1 %v20028_v60 }
 0x18f   : > { %20091 = vst [vmem:[#allocation91_spill] sm:$0xff] %v14232_v34  ;;  %v2665_v35 = vadd.bf16 %v14066_v30, %v20093_v21  ;;  %v14275_v21 = vmax.bf16 %v20028_v60, %v2656_v58  ;;  %v20101_v58 = vpack.c.bf16 %v13752_v61, %v13744_v27 }
 0x190   : > { %v14216_v57 = vpop.f32.mrb[56].mxu0  ;;  %v14218_v52 = vpop.f32.mrb[56].mxu1 }
 0x191   : > { %20087 = vst [vmem:[#allocation87_spill] sm:$0xff] %v14218_v52  ;;  %v14220_v0 = vpop.f32.mrb[57].mxu0  ;;  %v14222_v62 = vpop.f32.mrb[57].mxu1  ;;  %20099 = vst [vmem:[#allocation97_spill] sm:$0xff] %v14275_v21  ;;  %v2673_v28 = vadd.bf16 %v14066_v30, %v20101_v58 }
 0x192   : > { %20088 = vst [vmem:[#allocation88_spill] sm:$0xff] %v14222_v62  ;;  %v14227_v44 = vpop.f32.mrb[58].mxu0  ;;  %v14229_v49 = vpop.f32.mrb[58].mxu1 }
 0x193   : > { %20090 = vst [vmem:[#allocation90_spill] sm:$0xff] %v14229_v49  ;;  %v14236_v33 = vpop.f32.mrb[59].mxu0  ;;  %v14240_v1 = vpop.f32.mrb[59].mxu1 }
 0x194   : > { %20092 = vst [vmem:[#allocation92_spill] sm:$0xff] %v14240_v1  ;;  %v20155_v1 = vld [vmem:[#allocation10_spill] sm:$0xff] }
 0x195   : > { %4731 = vmatmul.mubr.bf16.gmra.mrb[164].mxu0 %v14232_v34  ;;  %10282 = vmatmul.mubr.msk.bf16.gmra.mrb[164].mxu1 %vm768_vm0, %v13542_v5 }
 0x196   : > { %4740 = vmatprep.mubr.bf16.mxu0 %v14225_v55  ;;  %1783 = vmatprep.mubr.bf16.mxu1 %v20028_v60  ;;  %v14268_v55 = vmax.bf16 %v20028_v60, %v2665_v35  ;;  %v2664_v35 = vadd.bf16 %v14122_v29, %v20102_v41 }
 0x198   : > { %v14259_v36 = vpop.f32.mrb[60].mxu0  ;;  %v14261_v34 = vpop.f32.mrb[60].mxu1  ;;  %20097 = vst [vmem:[#allocation95_spill] sm:$0xff] %v14268_v55  ;;  %v14318_v58 = vmax.bf16 %v20028_v60, %v2664_v35  ;;  %v20109_v35 = vpack.c.bf16 %v13786_v37, %v13772_v26 }
 0x199   : > { %20095 = vst [vmem:[#allocation93_spill] sm:$0xff] %v14261_v34  ;;  %v14263_v52 = vpop.f32.mrb[61].mxu0  ;;  %v14265_v5 = vpop.f32.mrb[61].mxu1 }
 0x19a   : > { %20096 = vst [vmem:[#allocation94_spill] sm:$0xff] %v14265_v5  ;;  %v14270_v3 = vpop.f32.mrb[62].mxu0  ;;  %v14272_v17 = vpop.f32.mrb[62].mxu1  ;;  %20107 = vst [vmem:[#allocation103_spill] sm:$0xff] %v14318_v58  ;;  %v2681_v41 = vadd.bf16 %v14066_v30, %v20109_v35 }
 0x19b   : > { %20098 = vst [vmem:[#allocation96_spill] sm:$0xff] %v14272_v17  ;;  %v14279_v47 = vpop.f32.mrb[63].mxu0  ;;  %v14283_v49 = vpop.f32.mrb[63].mxu1 }
 0x19c   : > { %20100 = vst [vmem:[#allocation98_spill] sm:$0xff] %v14283_v49  ;;  %v12085_v49 = vld [vmem:[%s19432_s3 + $0x204] ss:$16 sps:$4 sm:$0xff]  }
 0x19d   : > { %4741 = vmatmul.mubr.bf16.gmra.mrb[168].mxu0 %v14275_v21  ;;  %10283 = vmatmul.mubr.msk.bf16.gmra.mrb[168].mxu1 %vm768_vm0, %v13551_v6 }
 0x19e   : > { %4750 = vmatprep.mubr.bf16.mxu0 %v14268_v55  ;;  %1793 = vmatprep.mubr.bf16.mxu1 %v20028_v60  ;;  %v14311_v55 = vmax.bf16 %v20028_v60, %v2673_v28  ;;  %v2672_v28 = vadd.bf16 %v14122_v29, %v20110_v63 }
 0x19f   : > { %5041 = vmatprep.subr.bf16.mxu0 %v12085_v49 }
 0x1a0   : > { %v14302_v62 = vpop.f32.mrb[64].mxu0  ;;  %v14304_v21 = vpop.f32.mrb[64].mxu1  ;;  %20105 = vst [vmem:[#allocation101_spill] sm:$0xff] %v14311_v55  ;;  %v14361_v35 = vmax.bf16 %v20028_v60, %v2672_v28  ;;  %v20117_v28 = vpack.c.bf16 %v13834_v46, %v13820_v43 }
 0x1a1   : > { %20103 = vst [vmem:[#allocation99_spill] sm:$0xff] %v14304_v21  ;;  %v14306_v34 = vpop.f32.mrb[65].mxu0  ;;  %v14308_v6 = vpop.f32.mrb[65].mxu1 }
 0x1a2   : > { %20104 = vst [vmem:[#allocation100_spill] sm:$0xff] %v14308_v6  ;;  %v14313_v27 = vpop.f32.mrb[66].mxu0  ;;  %v14315_v61 = vpop.f32.mrb[66].mxu1  ;;  %20115 = vst [vmem:[#allocation109_spill] sm:$0xff] %v14361_v35  ;;  %v2689_v63 = vadd.bf16 %v14066_v30, %v20117_v28 }
 0x1a3   : > { %20106 = vst [vmem:[#allocation102_spill] sm:$0xff] %v14315_v61  ;;  %v14322_v13 = vpop.f32.mrb[67].mxu0  ;;  %v14326_v17 = vpop.f32.mrb[67].mxu1 }
 0x1a4   : > { %20108 = vst [vmem:[#allocation104_spill] sm:$0xff] %v14326_v17 }
 0x1a5   : > { %4751 = vmatmul.mubr.bf16.gmra.mrb[172].mxu0 %v14318_v58  ;;  %10284 = vmatmul.mubr.msk.bf16.gmra.mrb[172].mxu1 %vm768_vm0, %v13560_v7 }
 0x1a6   : > { %4760 = vmatprep.mubr.bf16.mxu0 %v14311_v55  ;;  %1803 = vmatprep.mubr.bf16.mxu1 %v20028_v60  ;;  %v14354_v55 = vmax.bf16 %v20028_v60, %v2681_v41  ;;  %v2680_v41 = vadd.bf16 %v14122_v29, %v20118_v40 }
 0x1a8   : > { %v14345_v5 = vpop.f32.mrb[68].mxu0  ;;  %v14347_v58 = vpop.f32.mrb[68].mxu1  ;;  %20113 = vst [vmem:[#allocation107_spill] sm:$0xff] %v14354_v55  ;;  %v14404_v28 = vmax.bf16 %v20028_v60, %v2680_v41  ;;  %v20125_v41 = vpack.c.bf16 %v13876_v48, %v13862_v51 }
 0x1a9   : > { %20111 = vst [vmem:[#allocation105_spill] sm:$0xff] %v14347_v58  ;;  %v14349_v21 = vpop.f32.mrb[69].mxu0  ;;  %v14351_v7 = vpop.f32.mrb[69].mxu1 }
 0x1aa   : > { %20112 = vst [vmem:[#allocation106_spill] sm:$0xff] %v14351_v7  ;;  %v14356_v26 = vpop.f32.mrb[70].mxu0  ;;  %v14358_v37 = vpop.f32.mrb[70].mxu1  ;;  %20123 = vst [vmem:[#allocation115_spill] sm:$0xff] %v14404_v28  ;;  %v2697_v40 = vadd.bf16 %v14066_v30, %v20125_v41 }
 0x1ab   : > { %20114 = vst [vmem:[#allocation108_spill] sm:$0xff] %v14358_v37  ;;  %v14365_v50 = vpop.f32.mrb[71].mxu0  ;;  %v14369_v61 = vpop.f32.mrb[71].mxu1 }
 0x1ac   : > { %20116 = vst [vmem:[#allocation110_spill] sm:$0xff] %v14369_v61 }
 0x1ad   : > { %4761 = vmatmul.mubr.bf16.gmra.mrb[176].mxu0 %v14361_v35  ;;  %10285 = vmatmul.mubr.msk.bf16.gmra.mrb[176].mxu1 %vm768_vm0, %v13569_v8 }
 0x1ae   : > { %4770 = vmatprep.mubr.bf16.mxu0 %v14354_v55  ;;  %1813 = vmatprep.mubr.bf16.mxu1 %v20028_v60  ;;  %v14397_v55 = vmax.bf16 %v20028_v60, %v2689_v63  ;;  %v2688_v63 = vadd.bf16 %v14122_v29, %v20126_v22 }
 0x1b0   : > { %v14388_v6 = vpop.f32.mrb[72].mxu0  ;;  %v14390_v35 = vpop.f32.mrb[72].mxu1  ;;  %20121 = vst [vmem:[#allocation113_spill] sm:$0xff] %v14397_v55  ;;  %v14447_v41 = vmax.bf16 %v20028_v60, %v2688_v63  ;;  %v20133_v63 = vpack.c.bf16 %v13920_v38, %v13904_v4 }
 0x1b1   : > { %20119 = vst [vmem:[#allocation111_spill] sm:$0xff] %v14390_v35  ;;  %v14392_v58 = vpop.f32.mrb[73].mxu0  ;;  %v14394_v8 = vpop.f32.mrb[73].mxu1 }
 0x1b2   : > { %20120 = vst [vmem:[#allocation112_spill] sm:$0xff] %v14394_v8  ;;  %v14399_v43 = vpop.f32.mrb[74].mxu0  ;;  %v14401_v46 = vpop.f32.mrb[74].mxu1  ;;  %20131 = vst [vmem:[#allocation121_spill] sm:$0xff] %v14447_v41  ;;  %v2705_v22 = vadd.bf16 %v14066_v30, %v20133_v63 }
 0x1b3   : > { %20122 = vst [vmem:[#allocation114_spill] sm:$0xff] %v14401_v46  ;;  %v14408_v2 = vpop.f32.mrb[75].mxu0  ;;  %v14412_v37 = vpop.f32.mrb[75].mxu1 }
 0x1b4   : > { %20124 = vst [vmem:[#allocation116_spill] sm:$0xff] %v14412_v37  ;;  %v20144_v37 = vld [vmem:[#allocation54_spill] sm:$0xff] }
 0x1b5   : > { %4771 = vmatmul.mubr.bf16.gmra.mrb[180].mxu0 %v14404_v28  ;;  %10286 = vmatmul.mubr.msk.bf16.gmra.mrb[180].mxu1 %vm768_vm0, %v13578_v9 }
 0x1b6   : > { %4780 = vmatprep.mubr.bf16.mxu0 %v14397_v55  ;;  %1823 = vmatprep.mubr.bf16.mxu1 %v20028_v60  ;;  %v14440_v55 = vmax.bf16 %v20028_v60, %v2697_v40  ;;  %v20135_v40 = vpack.c.bf16 %v13869_v45, %v20134_v42  ;;  %v20143_v45 = vld [vmem:[#allocation58_spill] sm:$0xff] }
 0x1b7   : > { %v20145_v61 = vpack.c.bf16 %v20143_v45, %v20144_v37 }
 0x1b8   : > { %v14431_v7 = vpop.f32.mrb[76].mxu0  ;;  %v14433_v28 = vpop.f32.mrb[76].mxu1  ;;  %20129 = vst [vmem:[#allocation119_spill] sm:$0xff] %v14440_v55 }
 0x1b9   : > { %20127 = vst [vmem:[#allocation117_spill] sm:$0xff] %v14433_v28  ;;  %v14435_v35 = vpop.f32.mrb[77].mxu0  ;;  %v14437_v9 = vpop.f32.mrb[77].mxu1  ;;  %v2696_v28 = vadd.bf16 %v14122_v29, %v20135_v40  ;;  %v2713_v40 = vadd.bf16 %v14066_v30, %v20145_v61 }
 0x1ba   : > { %20128 = vst [vmem:[#allocation118_spill] sm:$0xff] %v14437_v9  ;;  %v14442_v48 = vpop.f32.mrb[78].mxu0  ;;  %v14444_v51 = vpop.f32.mrb[78].mxu1 }
 0x1bb   : > { %20130 = vst [vmem:[#allocation120_spill] sm:$0xff] %v14444_v51  ;;  %v14451_v39 = vpop.f32.mrb[79].mxu0  ;;  %v14455_v46 = vpop.f32.mrb[79].mxu1  ;;  %v14490_v63 = vmax.bf16 %v20028_v60, %v2696_v28  ;;  %v20142_v28 = vld [vmem:[#allocation9_spill] sm:$0xff] }
 0x1bc   : > { %20132 = vst [vmem:[#allocation122_spill] sm:$0xff] %v14455_v46 }
 0x1bd   : > { %4781 = vmatmul.mubr.bf16.gmra.mrb[184].mxu0 %v14447_v41  ;;  %10287 = vmatmul.mubr.msk.bf16.gmra.mrb[184].mxu1 %vm768_vm0, %v13587_v10  ;;  %20140 = vst [vmem:[#allocation126_spill] sm:$0xff] %v14490_v63 }
 0x1be   : > { %4790 = vmatprep.mubr.bf16.mxu0 %v14440_v55  ;;  %1833 = vmatprep.mubr.bf16.mxu1 %v20028_v60  ;;  %v14483_v55 = vmax.bf16 %v20028_v60, %v2705_v22 }
 0x1c0   : > { %v14474_v8 = vpop.f32.mrb[80].mxu0  ;;  %v14476_v41 = vpop.f32.mrb[80].mxu1  ;;  %20138 = vst [vmem:[#allocation124_spill] sm:$0xff] %v14483_v55 }
 0x1c1   : > { %20136 = vst [vmem:[#allocation39_spill] sm:$0xff] %v14476_v41  ;;  %v14478_v51 = vpop.f32.mrb[81].mxu0  ;;  %v14480_v10 = vpop.f32.mrb[81].mxu1  ;;  %v20146_v41 = vld [vmem:[#allocation47_spill] sm:$0xff] }
 0x1c2   : > { %20137 = vst [vmem:[#allocation123_spill] sm:$0xff] %v14480_v10  ;;  %v14485_v38 = vpop.f32.mrb[82].mxu0  ;;  %v14487_v4 = vpop.f32.mrb[82].mxu1 }
 0x1c3   : > { %20139 = vst [vmem:[#allocation125_spill] sm:$0xff] %v14487_v4  ;;  %v14494_v42 = vpop.f32.mrb[83].mxu0  ;;  %v14498_v9 = vpop.f32.mrb[83].mxu1  ;;  %v20147_v4 = vld [vmem:[#allocation44_spill] sm:$0xff] }
 0x1c4   : > { %20141 = vst [vmem:[#allocation127_spill] sm:$0xff] %v14498_v9  ;;  %v20148_v22 = vpack.c.bf16 %v20146_v41, %v20147_v4  ;;  %v12083_v41 = vld [vmem:[%s19432_s3 + $0x200] ss:$16 sps:$4 sm:$0xff]  }
 0x1c5   : > { %4791 = vmatmul.mubr.bf16.gmra.mrb[188].mxu0 %v14490_v63  ;;  %10288 = vmatmul.mubr.msk.bf16.gmra.mrb[188].mxu1 %vm768_vm0, %v20142_v28 }
 0x1c6   : > { %4800 = vmatprep.mubr.bf16.mxu0 %v14483_v55  ;;  %1843 = vmatprep.mubr.bf16.mxu1 %v20028_v60  ;;  %v2704_v17 = vadd.bf16 %v14122_v29, %v20148_v22  ;;  %v14526_v55 = vmax.bf16 %v20028_v60, %v2713_v40  ;;  %v20156_v22 = vld [vmem:[#allocation62_spill] sm:$0xff] }
 0x1c7   : > { %v20157_v40 = vpack.c.bf16 %v14017_v12, %v20156_v22  ;;  %5042 = vmatpush1.bf16.msra.mxu0 %v12083_v41  ;;  %v12086_v22 = vld [vmem:[%s19432_s3 + $0x220] ss:$16 sps:$4 sm:$0xff]  }
 0x1c8   : > { %v14517_v46 = vpop.f32.mrb[84].mxu0  ;;  %v14519_v63 = vpop.f32.mrb[84].mxu1  ;;  %20151 = vst [vmem:[#allocation54_spill] sm:$0xff] %v14526_v55  ;;  %v14533_v45 = vmax.bf16 %v20028_v60, %v2704_v17  ;;  %v20159_v17 = vld [vmem:[#allocation51_spill] sm:$0xff] }
 0x1c9   : > { %20149 = vst [vmem:[#allocation9_spill] sm:$0xff] %v14519_v63  ;;  %v14521_v10 = vpop.f32.mrb[85].mxu0  ;;  %v14523_v28 = vpop.f32.mrb[85].mxu1  ;;  %v2721_v63 = vadd.bf16 %v14066_v30, %v20157_v40 }
 0x1ca   : > { %20150 = vst [vmem:[#allocation58_spill] sm:$0xff] %v14523_v28  ;;  %v14528_v37 = vpop.f32.mrb[86].mxu0  ;;  %v14530_v61 = vpop.f32.mrb[86].mxu1  ;;  %20153 = vst [vmem:[#allocation44_spill] sm:$0xff] %v14533_v45 }
 0x1cb   : > { %20152 = vst [vmem:[#allocation47_spill] sm:$0xff] %v14530_v61  ;;  %v14537_v4 = vpop.f32.mrb[87].mxu0  ;;  %v14541_v9 = vpop.f32.mrb[87].mxu1  ;;  %v20158_v61 = vld [vmem:[#allocation56_spill] sm:$0xff]  ;;  %v14581_v49 = vmax.bf16 %v20028_v60, %v2721_v63 }
 0x1cc   : > { %20154 = vst [vmem:[#allocation128_spill] sm:$0xff] %v14541_v9  ;;  %v20160_v28 = vpack.c.bf16 %v20158_v61, %v20159_v17  ;;  %v12089_v17 = vld [vmem:[%s19432_s3 + $0x240] ss:$16 sps:$4 sm:$0xff]  }
 0x1cd   : > { %4801 = vmatmul.mubr.bf16.gmra.mrb[192].mxu0 %v14533_v45  ;;  %10289 = vmatmul.mubr.msk.bf16.gmra.mrb[192].mxu1 %vm768_vm0, %v20155_v1  ;;  %v12088_v1 = vld [vmem:[%s19432_s3 + $0x224] ss:$16 sps:$4 sm:$0xff]   ;;  %20163 = vst [vmem:[#allocation56_spill] sm:$0xff] %v14581_v49 }
 0x1ce   : > { %4810 = vmatprep.mubr.bf16.mxu0 %v14526_v55  ;;  %1853 = vmatprep.mubr.bf16.mxu1 %v20028_v60  ;;  %v2712_v45 = vadd.bf16 %v14122_v29, %v20160_v28 }
 0x1cf   : > { %5043 = vmatprep.subr.bf16.mxu0 %v12088_v1  ;;  %v12091_v1 = vld [vmem:[%s19432_s3 + $0x244] ss:$16 sps:$4 sm:$0xff]  }
 0x1d0   : > { %v14566_v9 = vpop.f32.mrb[88].mxu0  ;;  %v14571_v55 = vpop.f32.mrb[88].mxu1  ;;  %v14588_v41 = vmax.bf16 %v20028_v60, %v2712_v45  ;;  %5044 = vmatpush1.bf16.msra.mxu0 %v12086_v22  ;;  %v20167_v22 = vpack.c.bf16 %v14070_v59, %v14051_v16  ;;  %v20169_v45 = vld [vmem:[#allocation60_spill] sm:$0xff] }
 0x1d1   : > { %20161 = vst [vmem:[#allocation10_spill] sm:$0xff] %v14571_v55  ;;  %v14573_v12 = vpop.f32.mrb[89].mxu0  ;;  %v14578_v40 = vpop.f32.mrb[89].mxu1  ;;  %v20168_v55 = vld [vmem:[#allocation64_spill] sm:$0xff]  ;;  %5045 = vmatprep.subr.bf16.mxu0 %v12091_v1 }
 0x1d2   : > { %20162 = vst [vmem:[#allocation62_spill] sm:$0xff] %v14578_v40  ;;  %v14583_v28 = vpop.f32.mrb[90].mxu0  ;;  %v14585_v61 = vpop.f32.mrb[90].mxu1  ;;  %20165 = vst [vmem:[#allocation129_spill] sm:$0xff] %v14588_v41  ;;  %v2729_v63 = vadd.bf16 %v14066_v30, %v20167_v22  ;;  %v12092_v59 = vld [vmem:[%s19432_s3 + $0x260] ss:$16 sps:$4 sm:$0xff]  }
 0x1d3   : > { %20164 = vst [vmem:[#allocation51_spill] sm:$0xff] %v14585_v61  ;;  %v14592_v15 = vpop.f32.mrb[91].mxu0  ;;  %v14596_v23 = vpop.f32.mrb[91].mxu1  ;;  %v20170_v61 = vpack.c.bf16 %v20168_v55, %v20169_v45  ;;  %v12095_v45 = vld [vmem:[%s19432_s3 + $0x280] ss:$16 sps:$4 sm:$0xff]  }
 0x1d4   : > { %20166 = vst [vmem:[#allocation130_spill] sm:$0xff] %v14596_v23  ;;  %5046 = vmatpush1.bf16.msra.mxu0 %v12089_v17  ;;  %v14636_v55 = vmax.bf16 %v20028_v60, %v2729_v63 }
 0x1d5   : > { %4811 = vmatmul.mubr.bf16.gmra.mrb[196].mxu0 %v14588_v41  ;;  %10290 = vmatmul.mubr.msk.bf16.gmra.mrb[196].mxu1 %vm768_vm0, %v13052_v11  ;;  %v2720_v41 = vadd.bf16 %v14122_v29, %v20170_v61  ;;  %v12094_v11 = vld [vmem:[%s19432_s3 + $0x264] ss:$16 sps:$4 sm:$0xff]  }
 0x1d6   : > { %4820 = vmatprep.mubr.bf16.mxu0 %v14581_v49  ;;  %1863 = vmatprep.mubr.bf16.mxu1 %v20028_v60  ;;  %20173 = vst [vmem:[#allocation131_spill] sm:$0xff] %v14636_v55 }
 0x1d7   : > { %5047 = vmatprep.subr.bf16.mxu0 %v12094_v11  ;;  %v14643_v1 = vmax.bf16 %v20028_v60, %v2720_v41  ;;  %v12097_v11 = vld [vmem:[%s19432_s3 + $0x284] ss:$16 sps:$4 sm:$0xff]   ;;  %v20178_v41 = vpack.c.bf16 %v14058_v54, %v14044_v14 }
 0x1d8   : > { %v14621_v40 = vpop.f32.mrb[92].mxu0  ;;  %v14626_v49 = vpop.f32.mrb[92].mxu1  ;;  %5048 = vmatpush1.bf16.msra.mxu0 %v12092_v59  ;;  %v20177_v59 = vpack.c.bf16 %v14134_v53, %v14112_v19  ;;  %v12098_v19 = vld [vmem:[%s19432_s3 + $0x2a0] ss:$16 sps:$4 sm:$0xff]  }
 0x1d9   : > { %20171 = vst [vmem:[#allocation64_spill] sm:$0xff] %v14626_v49  ;;  %v14628_v16 = vpop.f32.mrb[93].mxu0  ;;  %v14633_v22 = vpop.f32.mrb[93].mxu1  ;;  %20175 = vst [vmem:[#allocation133_spill] sm:$0xff] %v14643_v1  ;;  %5049 = vmatprep.subr.bf16.mxu0 %v12097_v11 }
 0x1da   : > { %20172 = vst [vmem:[#allocation60_spill] sm:$0xff] %v14633_v22  ;;  %v14638_v61 = vpop.f32.mrb[94].mxu0  ;;  %v14640_v17 = vpop.f32.mrb[94].mxu1  ;;  %v2737_v63 = vadd.bf16 %v14066_v30, %v20177_v59  ;;  %v13054_v22 = vld [vmem:[%s13382_s10 + $0xd8] sm:$0xff]  }
 0x1db   : > { %20174 = vst [vmem:[#allocation132_spill] sm:$0xff] %v14640_v17  ;;  %v14647_v23 = vpop.f32.mrb[95].mxu0  ;;  %v14651_v18 = vpop.f32.mrb[95].mxu1 }
 0x1dc   : > { %20176 = vst [vmem:[#allocation134_spill] sm:$0xff] %v14651_v18  ;;  %5050 = vmatpush1.bf16.msra.mxu0 %v12095_v45  ;;  %v14691_v54 = vmax.bf16 %v20028_v60, %v2737_v63 }
 0x1dd   : > { %4821 = vmatmul.mubr.bf16.gmra.mrb[200].mxu0 %v14643_v1  ;;  %10291 = vmatmul.mubr.msk.bf16.gmra.mrb[200].mxu1 %vm768_vm0, %v13053_v32  ;;  %v2728_v1 = vadd.bf16 %v14122_v29, %v20178_v41  ;;  %v12100_v32 = vld [vmem:[%s19432_s3 + $0x2a4] ss:$16 sps:$4 sm:$0xff]  }
 0x1de   : > { %4830 = vmatprep.mubr.bf16.mxu0 %v14636_v55  ;;  %1873 = vmatprep.mubr.bf16.mxu1 %v20028_v60  ;;  %20182 = vst [vmem:[#allocation138_spill] sm:$0xff] %v14691_v54 }
 0x1df   : > { %5051 = vmatprep.subr.bf16.mxu0 %v12100_v32  ;;  %v14698_v11 = vmax.bf16 %v20028_v60, %v2728_v1  ;;  %v12103_v32 = vld [vmem:[%s19432_s3 + $0x2c4] ss:$16 sps:$4 sm:$0xff]   ;;  %v12101_v1 = vld [vmem:[%s19432_s3 + $0x2c0] ss:$16 sps:$4 sm:$0xff]  }
 0x1e0   : > { %v14676_v49 = vpop.f32.mrb[96].mxu0  ;;  %v14681_v55 = vpop.f32.mrb[96].mxu1  ;;  %5052 = vmatpush1.bf16.msra.mxu0 %v12098_v19  ;;  %v20186_v19 = vpack.c.bf16 %v14193_v24, %v14177_v20  ;;  %v12104_v20 = vld [vmem:[%s19432_s3 + $0x2e0] ss:$16 sps:$4 sm:$0xff]  }
 0x1e1   : > { %20179 = vst [vmem:[#allocation135_spill] sm:$0xff] %v14676_v49  ;;  %20180 = vst [vmem:[#allocation136_spill] sm:$0xff] %v14681_v55  ;;  %v14683_v53 = vpop.f32.mrb[97].mxu0  ;;  %v14688_v59 = vpop.f32.mrb[97].mxu1  ;;  %v20188_v55 = vld [vmem:[#allocation74_spill] sm:$0xff]  ;;  %5053 = vmatprep.subr.bf16.mxu0 %v12103_v32 }
 0x1e2   : > { %20181 = vst [vmem:[#allocation137_spill] sm:$0xff] %v14688_v59  ;;  %v14693_v14 = vpop.f32.mrb[98].mxu0  ;;  %v14695_v45 = vpop.f32.mrb[98].mxu1  ;;  %20184 = vst [vmem:[#allocation140_spill] sm:$0xff] %v14698_v11  ;;  %v2745_v63 = vadd.bf16 %v14066_v30, %v20186_v19  ;;  %v13055_v59 = vld [vmem:[%s13382_s10 + $0xe0] sm:$0xff]  }
 0x1e3   : > { %20183 = vst [vmem:[#allocation139_spill] sm:$0xff] %v14695_v45  ;;  %v14702_v17 = vpop.f32.mrb[99].mxu0  ;;  %v14706_v18 = vpop.f32.mrb[99].mxu1 }
 0x1e4   : > { %20185 = vst [vmem:[#allocation141_spill] sm:$0xff] %v14706_v18  ;;  %5054 = vmatpush1.bf16.msra.mxu0 %v12101_v1 }
 0x1e5   : > { %4831 = vmatmul.mubr.bf16.gmra.mrb[204].mxu0 %v14698_v11  ;;  %10292 = vmatmul.mubr.msk.bf16.gmra.mrb[204].mxu1 %vm768_vm0, %v13054_v22  ;;  %v20187_v11 = vld [vmem:[#allocation77_spill] sm:$0xff]  ;;  %v12106_v22 = vld [vmem:[%s19432_s3 + $0x2e4] ss:$16 sps:$4 sm:$0xff]  }
 0x1e6   : > { %4840 = vmatprep.mubr.bf16.mxu0 %v14691_v54  ;;  %1883 = vmatprep.mubr.bf16.mxu1 %v20028_v60  ;;  %v20189_v45 = vpack.c.bf16 %v20187_v11, %v20188_v55  ;;  %v14746_v55 = vmax.bf16 %v20028_v60, %v2745_v63 }
 0x1e7   : > { %5055 = vmatprep.subr.bf16.mxu0 %v12106_v22  ;;  %v12109_v22 = vld [vmem:[%s19432_s3 + $0x304] ss:$16 sps:$4 sm:$0xff]  }
 0x1e8   : > { %v2736_v56 = vadd.bf16 %v14122_v29, %v20189_v45  ;;  %v14731_v49 = vpop.f32.mrb[100].mxu0  ;;  %v14736_v41 = vpop.f32.mrb[100].mxu1  ;;  %20192 = vst [vmem:[#allocation142_spill] sm:$0xff] %v14746_v55  ;;  %5056 = vmatpush1.bf16.msra.mxu0 %v12104_v20  ;;  %v20196_v20 = vpack.c.bf16 %v14236_v33, %v14220_v0  ;;  %v12110_v33 = vld [vmem:[%s19432_s3 + $0x320] ss:$16 sps:$4 sm:$0xff]  }
 0x1e9   : > { %20190 = vst [vmem:[#allocation77_spill] sm:$0xff] %v14736_v41  ;;  %v14738_v24 = vpop.f32.mrb[101].mxu0  ;;  %v14743_v19 = vpop.f32.mrb[101].mxu1  ;;  %5057 = vmatprep.subr.bf16.mxu0 %v12109_v22 }
 0x1ea   : > { %20191 = vst [vmem:[#allocation74_spill] sm:$0xff] %v14743_v19  ;;  %v14748_v45 = vpop.f32.mrb[102].mxu0  ;;  %v14750_v11 = vpop.f32.mrb[102].mxu1  ;;  %v14753_v32 = vmax.bf16 %v20028_v60, %v2736_v56  ;;  %v12107_v56 = vld [vmem:[%s19432_s3 + $0x300] ss:$16 sps:$4 sm:$0xff]   ;;  %v2753_v63 = vadd.bf16 %v14066_v30, %v20196_v20  ;;  %v13056_v19 = vld [vmem:[%s13382_s10 + $0xe8] sm:$0xff]  }
 0x1eb   : > { %20193 = vst [vmem:[#allocation143_spill] sm:$0xff] %v14750_v11  ;;  %v14757_v54 = vpop.f32.mrb[103].mxu0  ;;  %v14761_v18 = vpop.f32.mrb[103].mxu1 }
 0x1ec   : > { %20194 = vst [vmem:[#allocation144_spill] sm:$0xff] %v14753_v32  ;;  %20195 = vst [vmem:[#allocation145_spill] sm:$0xff] %v14761_v18  ;;  %5058 = vmatpush1.bf16.msra.mxu0 %v12107_v56 }
 0x1ed   : > { %4841 = vmatmul.mubr.bf16.gmra.mrb[208].mxu0 %v14753_v32  ;;  %10293 = vmatmul.mubr.msk.bf16.gmra.mrb[208].mxu1 %vm768_vm0, %v13055_v59  ;;  %v20197_v32 = vpack.c.bf16 %v14184_v25, %v14173_v31  ;;  %v12112_v59 = vld [vmem:[%s19432_s3 + $0x324] ss:$16 sps:$4 sm:$0xff]   ;;  %v14801_v31 = vmax.bf16 %v20028_v60, %v2753_v63 }
 0x1ee   : > { %4850 = vmatprep.mubr.bf16.mxu0 %v14746_v55  ;;  %1893 = vmatprep.mubr.bf16.mxu1 %v20028_v60 }
 0x1ef   : > { %v2744_v41 = vadd.bf16 %v14122_v29, %v20197_v32  ;;  %20200 = vst [vmem:[#allocation148_spill] sm:$0xff] %v14801_v31  ;;  %5059 = vmatprep.subr.bf16.mxu0 %v12112_v59  ;;  %v12115_v59 = vld [vmem:[%s19432_s3 + $0x344] ss:$16 sps:$4 sm:$0xff]  }
 0x1f0   : > { %v14786_v11 = vpop.f32.mrb[104].mxu0  ;;  %v14791_v1 = vpop.f32.mrb[104].mxu1  ;;  %5060 = vmatpush1.bf16.msra.mxu0 %v12110_v33  ;;  %v20204_v33 = vpack.c.bf16 %v14279_v47, %v14263_v52  ;;  %v12116_v47 = vld [vmem:[%s19432_s3 + $0x360] ss:$16 sps:$4 sm:$0xff]  }
 0x1f1   : > { %20198 = vst [vmem:[#allocation146_spill] sm:$0xff] %v14791_v1  ;;  %v14793_v0 = vpop.f32.mrb[105].mxu0  ;;  %v14798_v20 = vpop.f32.mrb[105].mxu1  ;;  %v14808_v22 = vmax.bf16 %v20028_v60, %v2744_v41  ;;  %v12113_v41 = vld [vmem:[%s19432_s3 + $0x340] ss:$16 sps:$4 sm:$0xff]   ;;  %5061 = vmatprep.subr.bf16.mxu0 %v12115_v59 }
 0x1f2   : > { %20199 = vst [vmem:[#allocation147_spill] sm:$0xff] %v14798_v20  ;;  %v14803_v25 = vpop.f32.mrb[106].mxu0  ;;  %v14805_v32 = vpop.f32.mrb[106].mxu1  ;;  %v2761_v63 = vadd.bf16 %v14066_v30, %v20204_v33  ;;  %v13057_v20 = vld [vmem:[%s13382_s10 + $0xf0] sm:$0xff]  }
 0x1f3   : > { %20201 = vst [vmem:[#allocation149_spill] sm:$0xff] %v14805_v32  ;;  %20202 = vst [vmem:[#allocation150_spill] sm:$0xff] %v14808_v22  ;;  %v14812_v55 = vpop.f32.mrb[107].mxu0  ;;  %v14816_v18 = vpop.f32.mrb[107].mxu1 }
 0x1f4   : > { %20203 = vst [vmem:[#allocation151_spill] sm:$0xff] %v14816_v18  ;;  %5062 = vmatpush1.bf16.msra.mxu0 %v12113_v41 }
 0x1f5   : > { %4851 = vmatmul.mubr.bf16.gmra.mrb[212].mxu0 %v14808_v22  ;;  %10294 = vmatmul.mubr.msk.bf16.gmra.mrb[212].mxu1 %vm768_vm0, %v13056_v19  ;;  %v20205_v22 = vpack.c.bf16 %v14227_v44, %v14216_v57  ;;  %v12118_v19 = vld [vmem:[%s19432_s3 + $0x364] ss:$16 sps:$4 sm:$0xff]   ;;  %v14856_v57 = vmax.bf16 %v20028_v60, %v2761_v63 }
 0x1f6   : > { %4860 = vmatprep.mubr.bf16.mxu0 %v14801_v31  ;;  %1903 = vmatprep.mubr.bf16.mxu1 %v20028_v60 }
 0x1f7   : > { %v2752_v1 = vadd.bf16 %v14122_v29, %v20205_v22  ;;  %20208 = vst [vmem:[#allocation154_spill] sm:$0xff] %v14856_v57  ;;  %5063 = vmatprep.subr.bf16.mxu0 %v12118_v19  ;;  %v12122_v19 = vld [vmem:[%s19432_s3 + $0x384] ss:$16 sps:$4 sm:$0xff]  }
 0x1f8   : > { %v14841_v32 = vpop.f32.mrb[108].mxu0  ;;  %v14846_v56 = vpop.f32.mrb[108].mxu1  ;;  %5064 = vmatpush1.bf16.msra.mxu0 %v12116_v47  ;;  %v20212_v47 = vpack.c.bf16 %v14322_v13, %v14306_v34  ;;  %v12123_v13 = vld [vmem:[%s19432_s3 + $0x3a0] ss:$16 sps:$4 sm:$0xff]  }
 0x1f9   : > { %20206 = vst [vmem:[#allocation152_spill] sm:$0xff] %v14846_v56  ;;  %v14848_v52 = vpop.f32.mrb[109].mxu0  ;;  %v14853_v33 = vpop.f32.mrb[109].mxu1  ;;  %v14863_v59 = vmax.bf16 %v20028_v60, %v2752_v1  ;;  %v12120_v1 = vld [vmem:[%s19432_s3 + $0x380] ss:$16 sps:$4 sm:$0xff]   ;;  %5065 = vmatprep.subr.bf16.mxu0 %v12122_v19 }
 0x1fa   : > { %20207 = vst [vmem:[#allocation153_spill] sm:$0xff] %v14853_v33  ;;  %v14858_v44 = vpop.f32.mrb[110].mxu0  ;;  %v14860_v22 = vpop.f32.mrb[110].mxu1  ;;  %v2769_v63 = vadd.bf16 %v14066_v30, %v20212_v47  ;;  %v13058_v33 = vld [vmem:[%s13382_s10 + $0xf8] sm:$0xff]  }
 0x1fb   : > { %20209 = vst [vmem:[#allocation155_spill] sm:$0xff] %v14860_v22  ;;  %20210 = vst [vmem:[#allocation156_spill] sm:$0xff] %v14863_v59  ;;  %v14867_v31 = vpop.f32.mrb[111].mxu0  ;;  %v14871_v18 = vpop.f32.mrb[111].mxu1 }
 0x1fc   : > { %20211 = vst [vmem:[#allocation157_spill] sm:$0xff] %v14871_v18  ;;  %5066 = vmatpush1.bf16.msra.mxu0 %v12120_v1 }
 0x1fd   : > { %4861 = vmatmul.mubr.bf16.gmra.mrb[216].mxu0 %v14863_v59  ;;  %10295 = vmatmul.mubr.msk.bf16.gmra.mrb[216].mxu1 %vm768_vm0, %v13057_v20  ;;  %v20213_v59 = vpack.c.bf16 %v14270_v3, %v14259_v36  ;;  %v12125_v20 = vld [vmem:[%s19432_s3 + $0x3a4] ss:$16 sps:$4 sm:$0xff]   ;;  %v14911_v36 = vmax.bf16 %v20028_v60, %v2769_v63 }
 0x1fe   : > { %4870 = vmatprep.mubr.bf16.mxu0 %v14856_v57  ;;  %1913 = vmatprep.mubr.bf16.mxu1 %v20028_v60 }
 0x1ff   : > { %v2760_v56 = vadd.bf16 %v14122_v29, %v20213_v59  ;;  %20216 = vst [vmem:[#allocation160_spill] sm:$0xff] %v14911_v36  ;;  %5067 = vmatprep.subr.bf16.mxu0 %v12125_v20  ;;  %v12128_v20 = vld [vmem:[%s19432_s3 + $0x3c4] ss:$16 sps:$4 sm:$0xff]  }
 0x200   : > { %v14896_v22 = vpop.f32.mrb[112].mxu0  ;;  %v14901_v41 = vpop.f32.mrb[112].mxu1  ;;  %5068 = vmatpush1.bf16.msra.mxu0 %v12123_v13  ;;  %v20220_v13 = vpack.c.bf16 %v14365_v50, %v14349_v21  ;;  %v12129_v50 = vld [vmem:[%s19432_s3 + $0x3e0] ss:$16 sps:$4 sm:$0xff]  }
 0x201   : > { %20214 = vst [vmem:[#allocation158_spill] sm:$0xff] %v14901_v41  ;;  %v14903_v34 = vpop.f32.mrb[113].mxu0  ;;  %v14908_v47 = vpop.f32.mrb[113].mxu1  ;;  %v14918_v19 = vmax.bf16 %v20028_v60, %v2760_v56  ;;  %v12126_v56 = vld [vmem:[%s19432_s3 + $0x3c0] ss:$16 sps:$4 sm:$0xff]   ;;  %5069 = vmatprep.subr.bf16.mxu0 %v12128_v20 }
 0x202   : > { %20215 = vst [vmem:[#allocation159_spill] sm:$0xff] %v14908_v47  ;;  %v14913_v3 = vpop.f32.mrb[114].mxu0  ;;  %v14915_v59 = vpop.f32.mrb[114].mxu1  ;;  %v2777_v63 = vadd.bf16 %v14066_v30, %v20220_v13  ;;  %v13059_v47 = vld [vmem:[%s13382_s10] sm:$0xff]  }
 0x203   : > { %20217 = vst [vmem:[#allocation161_spill] sm:$0xff] %v14915_v59  ;;  %20218 = vst [vmem:[#allocation162_spill] sm:$0xff] %v14918_v19  ;;  %v14922_v57 = vpop.f32.mrb[115].mxu0  ;;  %v14926_v18 = vpop.f32.mrb[115].mxu1 }
 0x204   : > { %20219 = vst [vmem:[#allocation163_spill] sm:$0xff] %v14926_v18  ;;  %5070 = vmatpush1.bf16.msra.mxu0 %v12126_v56 }
 0x205   : > { %4871 = vmatmul.mubr.bf16.gmra.mrb[220].mxu0 %v14918_v19  ;;  %10296 = vmatmul.mubr.msk.bf16.gmra.mrb[220].mxu1 %vm768_vm0, %v13058_v33  ;;  %v20221_v19 = vpack.c.bf16 %v14313_v27, %v14302_v62  ;;  %v12131_v33 = vld [vmem:[%s19432_s3 + $0x3e4] ss:$16 sps:$4 sm:$0xff]   ;;  %v14966_v62 = vmax.bf16 %v20028_v60, %v2777_v63 }
 0x206   : > { %4880 = vmatprep.mubr.bf16.mxu0 %v14911_v36  ;;  %1956 = vmatprep.mubr.bf16.mxu1 %v20028_v60 }
 0x207   : > { %v2768_v41 = vadd.bf16 %v14122_v29, %v20221_v19  ;;  %20224 = vst [vmem:[#allocation166_spill] sm:$0xff] %v14966_v62  ;;  %5071 = vmatprep.subr.bf16.mxu0 %v12131_v33  ;;  %v12132_v33 = vld [vmem:[%s19432_s3 + $0x8] ss:$16 sps:$4 sm:$0xff]  }
 0x208   : > { %v14951_v59 = vpop.f32.mrb[116].mxu0  ;;  %v14956_v1 = vpop.f32.mrb[116].mxu1  ;;  %5072 = vmatpush1.bf16.msra.mxu0 %v12129_v50  ;;  %v20228_v50 = vpack.c.bf16 %v14408_v2, %v14392_v58 }
 0x209   : > { %20222 = vst [vmem:[#allocation164_spill] sm:$0xff] %v14956_v1  ;;  %v14958_v21 = vpop.f32.mrb[117].mxu0  ;;  %v14963_v13 = vpop.f32.mrb[117].mxu1  ;;  %v14973_v20 = vmax.bf16 %v20028_v60, %v2768_v41  ;;  %v12134_v41 = vld [vmem:[%s19432_s3 + $0xc] ss:$16 sps:$4 sm:$0xff]   ;;  %v20229_v1 = vpack.c.bf16 %v14356_v26, %v14345_v5  ;;  %v20236_v26 = vpack.c.bf16 %v14451_v39, %v14435_v35 }
 0x20a   : > { %20223 = vst [vmem:[#allocation165_spill] sm:$0xff] %v14963_v13  ;;  %v14968_v27 = vpop.f32.mrb[118].mxu0  ;;  %v14970_v19 = vpop.f32.mrb[118].mxu1  ;;  %v2785_v63 = vadd.bf16 %v14066_v30, %v20228_v50  ;;  %6100 = vmatprep.subr.bf16.mxu1 %v12134_v41 }
 0x20b   : > { %20225 = vst [vmem:[#allocation167_spill] sm:$0xff] %v14970_v19  ;;  %20226 = vst [vmem:[#allocation168_spill] sm:$0xff] %v14973_v20  ;;  %v14977_v36 = vpop.f32.mrb[119].mxu0  ;;  %v14981_v18 = vpop.f32.mrb[119].mxu1 }
 0x20c   : > { %20227 = vst [vmem:[#allocation169_spill] sm:$0xff] %v14981_v18  ;;  %v15015_v58 = vmax.bf16 %v20028_v60, %v2785_v63  ;;  %v20237_v63 = vpack.c.bf16 %v14399_v43, %v14388_v6  ;;  %v13061_v18 = vld [vmem:[%s13382_s10 + $0x10] sm:$0xff]  }
 0x20d   : > { %4881 = vmatmul.mubr.bf16.gmra.mrb[224].mxu0 %v14973_v20  ;;  %10297 = vmatmul.mubr.msk.bf16.vlgmr.msra.gmra.mrb[224].mxu1 %vm768_vm0, %v13059_v47  ;;  %v2776_v20 = vadd.bf16 %v14122_v29, %v20229_v1 }
 0x20e   : > { %4890 = vmatprep.mubr.bf16.mxu0 %v14966_v62  ;;  %1966 = vmatprep.mubr.bf16.mxu1 %v20028_v60  ;;  %20232 = vst [vmem:[#allocation172_spill] sm:$0xff] %v15015_v58 }
 0x20f   : > { %6101 = vmatpush1.bf16.msra.mxu1 %v12132_v33  ;;  %v15022_v5 = vmax.bf16 %v20028_v60, %v2776_v20  ;;  %v13060_v20 = vld [vmem:[%s13382_s10 + $0x8] sm:$0xff]   ;;  %v2793_v33 = vadd.bf16 %v14066_v30, %v20236_v26 }
 0x210   : > { %v15006_v19 = vpop.f32.mrb[120].mxu0  ;;  %v15008_v47 = vpop.f32.mrb[120].mxu1 }
 0x211   : > { %20230 = vst [vmem:[#allocation170_spill] sm:$0xff] %v15008_v47  ;;  %v15010_v56 = vpop.f32.mrb[121].mxu0  ;;  %v15012_v62 = vpop.f32.mrb[121].mxu1  ;;  %20234 = vst [vmem:[#allocation174_spill] sm:$0xff] %v15022_v5  ;;  %v15058_v35 = vmax.bf16 %v20028_v60, %v2793_v33 }
 0x212   : > { %20231 = vst [vmem:[#allocation171_spill] sm:$0xff] %v15012_v62  ;;  %v15017_v2 = vpop.f32.mrb[122].mxu0  ;;  %v15019_v50 = vpop.f32.mrb[122].mxu1 }
 0x213   : > { %20233 = vst [vmem:[#allocation173_spill] sm:$0xff] %v15019_v50  ;;  %v15026_v1 = vpop.f32.mrb[123].mxu0  ;;  %v15030_v41 = vpop.f32.mrb[123].mxu1  ;;  %20240 = vst [vmem:[#allocation178_spill] sm:$0xff] %v15058_v35  ;;  %v20243_v50 = vpack.c.bf16 %v14494_v42, %v14478_v51 }
 0x214   : > { %20235 = vst [vmem:[#allocation175_spill] sm:$0xff] %v15030_v41  ;;  %v12135_v41 = vld [vmem:[%s19432_s3 + $0x28] ss:$16 sps:$4 sm:$0xff]  }
 0x215   : > { %4891 = vmatmul.mubr.bf16.gmra.mrb[228].mxu0 %v15022_v5  ;;  %10298 = vmatmul.mubr.msk.bf16.gmra.mrb[228].mxu1 %vm768_vm0, %v13060_v20  ;;  %v2784_v5 = vadd.bf16 %v14122_v29, %v20237_v63  ;;  %v2801_v33 = vadd.bf16 %v14066_v30, %v20243_v50 }
 0x216   : > { %4900 = vmatprep.mubr.bf16.mxu0 %v15015_v58  ;;  %1976 = vmatprep.mubr.bf16.mxu1 %v20028_v60 }
 0x217   : > { %v15065_v6 = vmax.bf16 %v20028_v60, %v2784_v5  ;;  %v12137_v5 = vld [vmem:[%s19432_s3 + $0x2c] ss:$16 sps:$4 sm:$0xff]   ;;  %v15107_v51 = vmax.bf16 %v20028_v60, %v2801_v33  ;;  %v20253_v33 = vpack.c.bf16 %v14485_v38, %v14474_v8  ;;  %v20260_v38 = vpack.c.bf16 %v14592_v15, %v14573_v12 }
 0x218   : > { %v15049_v47 = vpop.f32.mrb[124].mxu0  ;;  %v15051_v13 = vpop.f32.mrb[124].mxu1  ;;  %6102 = vmatprep.subr.bf16.mxu1 %v12137_v5 }
 0x219   : > { %20238 = vst [vmem:[#allocation176_spill] sm:$0xff] %v15051_v13  ;;  %v15053_v20 = vpop.f32.mrb[125].mxu0  ;;  %v15055_v58 = vpop.f32.mrb[125].mxu1  ;;  %20242 = vst [vmem:[#allocation180_spill] sm:$0xff] %v15065_v6  ;;  %v20244_v13 = vpack.c.bf16 %v14442_v48, %v14431_v7  ;;  %6103 = vmatpush1.bf16.msra.mxu1 %v12135_v41  ;;  %v20252_v48 = vpack.c.bf16 %v14537_v4, %v14521_v10  ;;  %v2800_v5 = vadd.bf16 %v14122_v29, %v20253_v33 }
 0x21a   : > { %20239 = vst [vmem:[#allocation177_spill] sm:$0xff] %v15055_v58  ;;  %v15060_v39 = vpop.f32.mrb[126].mxu0  ;;  %v15062_v26 = vpop.f32.mrb[126].mxu1  ;;  %20248 = vst [vmem:[#allocation184_spill] sm:$0xff] %v15107_v51 }
 0x21b   : > { %20241 = vst [vmem:[#allocation179_spill] sm:$0xff] %v15062_v26  ;;  %v15069_v63 = vpop.f32.mrb[127].mxu0  ;;  %v15073_v62 = vpop.f32.mrb[127].mxu1  ;;  %v15157_v8 = vmax.bf16 %v20028_v60, %v2800_v5  ;;  %v13063_v5 = vld [vmem:[%s13382_s10 + $0x20] sm:$0xff]  }
 0x21d   : > { %4901 = vmatmul.mubr.bf16.gmra.mrb[232].mxu0 %v15065_v6  ;;  %10299 = vmatmul.mubr.msk.bf16.gmra.mrb[232].mxu1 %vm768_vm0, %v13061_v18  ;;  %v2792_v6 = vadd.bf16 %v14122_v29, %v20244_v13  ;;  %20258 = vst [vmem:[#allocation192_spill] sm:$0xff] %v15157_v8 }
 0x21e   : > { %4910 = vmatprep.mubr.bf16.mxu0 %v15058_v35  ;;  %1986 = vmatprep.mubr.bf16.mxu1 %v20028_v60 }
 0x21f   : > { %v15114_v7 = vmax.bf16 %v20028_v60, %v2792_v6  ;;  %v13062_v6 = vld [vmem:[%s13382_s10 + $0x18] sm:$0xff]  }
 0x220   : > { %v15098_v26 = vpop.f32.mrb[128].mxu0  ;;  %v15100_v18 = vpop.f32.mrb[128].mxu1 }
 0x221   : > { %20245 = vst [vmem:[#allocation181_spill] sm:$0xff] %v15098_v26  ;;  %20246 = vst [vmem:[#allocation182_spill] sm:$0xff] %v15100_v18  ;;  %v15102_v43 = vpop.f32.mrb[129].mxu0  ;;  %v15104_v35 = vpop.f32.mrb[129].mxu1  ;;  %v2809_v26 = vadd.bf16 %v14066_v30, %v20252_v48 }
 0x222   : > { %20247 = vst [vmem:[#allocation183_spill] sm:$0xff] %v15104_v35  ;;  %v15109_v42 = vpop.f32.mrb[130].mxu0  ;;  %v15111_v50 = vpop.f32.mrb[130].mxu1  ;;  %20250 = vst [vmem:[#allocation186_spill] sm:$0xff] %v15114_v7 }
 0x223   : > { %20249 = vst [vmem:[#allocation185_spill] sm:$0xff] %v15111_v50  ;;  %v15118_v13 = vpop.f32.mrb[131].mxu0  ;;  %v15120_v41 = vpop.f32.mrb[131].mxu1  ;;  %v15150_v10 = vmax.bf16 %v20028_v60, %v2809_v26  ;;  %v20261_v26 = vpack.c.bf16 %v14528_v37, %v14517_v46 }
 0x224   : > { %20251 = vst [vmem:[#allocation187_spill] sm:$0xff] %v15120_v41 }
 0x225   : > { %4911 = vmatmul.mubr.bf16.gmra.mrb[236].mxu0 %v15114_v7  ;;  %10300 = vmatmul.mubr.msk.bf16.gmra.mrb[236].mxu1 %vm768_vm0, %v13062_v6  ;;  %20256 = vst [vmem:[#allocation190_spill] sm:$0xff] %v15150_v10  ;;  %v2817_v7 = vadd.bf16 %v14066_v30, %v20260_v38  ;;  %v2808_v41 = vadd.bf16 %v14122_v29, %v20261_v26 }
 0x226   : > { %4920 = vmatprep.mubr.bf16.mxu0 %v15107_v51  ;;  %1996 = vmatprep.mubr.bf16.mxu1 %v20028_v60  ;;  %v12140_v51 = vld [vmem:[%s19432_s3 + $0x4c] ss:$16 sps:$4 sm:$0xff]  }
 0x227   : > { %v15199_v46 = vmax.bf16 %v20028_v60, %v2817_v7  ;;  %6104 = vmatprep.subr.bf16.mxu1 %v12140_v51 }
 0x228   : > { %v15141_v18 = vpop.f32.mrb[132].mxu0  ;;  %v15143_v58 = vpop.f32.mrb[132].mxu1 }
 0x229   : > { %20254 = vst [vmem:[#allocation188_spill] sm:$0xff] %v15143_v58  ;;  %v15145_v6 = vpop.f32.mrb[133].mxu0  ;;  %v15147_v50 = vpop.f32.mrb[133].mxu1  ;;  %20264 = vst [vmem:[#allocation196_spill] sm:$0xff] %v15199_v46 }
 0x22a   : > { %20255 = vst [vmem:[#allocation189_spill] sm:$0xff] %v15147_v50  ;;  %v15152_v4 = vpop.f32.mrb[134].mxu0  ;;  %v15154_v48 = vpop.f32.mrb[134].mxu1 }
 0x22b   : > { %20257 = vst [vmem:[#allocation191_spill] sm:$0xff] %v15154_v48  ;;  %v15161_v33 = vpop.f32.mrb[135].mxu0  ;;  %v15163_v35 = vpop.f32.mrb[135].mxu1  ;;  %v15206_v48 = vmax.bf16 %v20028_v60, %v2808_v41  ;;  %v13064_v41 = vld [vmem:[%s13382_s10 + $0x28] sm:$0xff]  }
 0x22c   : > { %20259 = vst [vmem:[#allocation193_spill] sm:$0xff] %v15163_v35 }
 0x22d   : > { %4921 = vmatmul.mubr.bf16.gmra.mrb[240].mxu0 %v15157_v8  ;;  %10301 = vmatmul.mubr.msk.bf16.gmra.mrb[240].mxu1 %vm768_vm0, %v13063_v5  ;;  %v12138_v5 = vld [vmem:[%s19432_s3 + $0x48] ss:$16 sps:$4 sm:$0xff]   ;;  %20266 = vst [vmem:[#allocation198_spill] sm:$0xff] %v15206_v48  ;;  %v20269_v8 = vpack.c.bf16 %v14583_v28, %v14566_v9  ;;  %v20276_v28 = vpack.c.bf16 %v14702_v17, %v14683_v53 }
 0x22e   : > { %4930 = vmatprep.mubr.bf16.mxu0 %v15150_v10  ;;  %2006 = vmatprep.mubr.bf16.mxu1 %v20028_v60 }
 0x22f   : > { %6105 = vmatpush1.bf16.msra.mxu1 %v12138_v5  ;;  %v20268_v5 = vpack.c.bf16 %v14647_v23, %v14628_v16  ;;  %v2816_v7 = vadd.bf16 %v14122_v29, %v20269_v8 }
 0x230   : > { %v15184_v58 = vpop.f32.mrb[136].mxu0  ;;  %v15192_v15 = vpop.f32.mrb[136].mxu1 }
 0x231   : > { %20262 = vst [vmem:[#allocation194_spill] sm:$0xff] %v15192_v15  ;;  %v15194_v12 = vpop.f32.mrb[137].mxu0  ;;  %v15196_v38 = vpop.f32.mrb[137].mxu1  ;;  %v2825_v50 = vadd.bf16 %v14066_v30, %v20268_v5  ;;  %v15249_v9 = vmax.bf16 %v20028_v60, %v2816_v7  ;;  %v13065_v7 = vld [vmem:[%s13382_s10 + $0x30] sm:$0xff]  }
 0x232   : > { %20263 = vst [vmem:[#allocation195_spill] sm:$0xff] %v15196_v38  ;;  %v15201_v37 = vpop.f32.mrb[138].mxu0  ;;  %v15203_v26 = vpop.f32.mrb[138].mxu1 }
 0x233   : > { %20265 = vst [vmem:[#allocation197_spill] sm:$0xff] %v15203_v26  ;;  %v15210_v35 = vpop.f32.mrb[139].mxu0  ;;  %v15212_v10 = vpop.f32.mrb[139].mxu1  ;;  %v15242_v23 = vmax.bf16 %v20028_v60, %v2825_v50  ;;  %20274 = vst [vmem:[#allocation204_spill] sm:$0xff] %v15249_v9  ;;  %v20277_v50 = vpack.c.bf16 %v14638_v61, %v14621_v40 }
 0x234   : > { %20267 = vst [vmem:[#allocation199_spill] sm:$0xff] %v15212_v10 }
 0x235   : > { %4931 = vmatmul.mubr.bf16.gmra.mrb[244].mxu0 %v15206_v48  ;;  %10302 = vmatmul.mubr.msk.bf16.gmra.mrb[244].mxu1 %vm768_vm0, %v13064_v41  ;;  %20272 = vst [vmem:[#allocation202_spill] sm:$0xff] %v15242_v23  ;;  %v2833_v48 = vadd.bf16 %v14066_v30, %v20276_v28  ;;  %v2824_v10 = vadd.bf16 %v14122_v29, %v20277_v50 }
 0x236   : > { %4940 = vmatprep.mubr.bf16.mxu0 %v15199_v46  ;;  %2016 = vmatprep.mubr.bf16.mxu1 %v20028_v60  ;;  %v12143_v46 = vld [vmem:[%s19432_s3 + $0x6c] ss:$16 sps:$4 sm:$0xff]  }
 0x237   : > { %v15291_v40 = vmax.bf16 %v20028_v60, %v2833_v48  ;;  %6106 = vmatprep.subr.bf16.mxu1 %v12143_v46  ;;  %v13066_v46 = vld [vmem:[%s13382_s10 + $0x38] sm:$0xff]  }
 0x238   : > { %v15233_v15 = vpop.f32.mrb[140].mxu0  ;;  %v15235_v51 = vpop.f32.mrb[140].mxu1  ;;  %v20286_v48 = vld [vmem:[#allocation135_spill] sm:$0xff] }
 0x239   : > { %20270 = vst [vmem:[#allocation200_spill] sm:$0xff] %v15235_v51  ;;  %v15237_v41 = vpop.f32.mrb[141].mxu0  ;;  %v15239_v26 = vpop.f32.mrb[141].mxu1  ;;  %20281 = vst [vmem:[#allocation209_spill] sm:$0xff] %v15291_v40 }
 0x23a   : > { %20271 = vst [vmem:[#allocation201_spill] sm:$0xff] %v15239_v26  ;;  %v15244_v16 = vpop.f32.mrb[142].mxu0  ;;  %v15246_v5 = vpop.f32.mrb[142].mxu1 }
 0x23b   : > { %20273 = vst [vmem:[#allocation203_spill] sm:$0xff] %v15246_v5  ;;  %v15253_v8 = vpop.f32.mrb[143].mxu0  ;;  %v15255_v38 = vpop.f32.mrb[143].mxu1  ;;  %v15298_v5 = vmax.bf16 %v20028_v60, %v2824_v10 }
 0x23c   : > { %20275 = vst [vmem:[#allocation205_spill] sm:$0xff] %v15255_v38 }
 0x23d   : > { %4941 = vmatmul.mubr.bf16.gmra.mrb[248].mxu0 %v15249_v9  ;;  %10303 = vmatmul.mubr.msk.bf16.gmra.mrb[248].mxu1 %vm768_vm0, %v13065_v7  ;;  %v12141_v7 = vld [vmem:[%s19432_s3 + $0x68] ss:$16 sps:$4 sm:$0xff]   ;;  %20283 = vst [vmem:[#allocation211_spill] sm:$0xff] %v15298_v5 }
 0x23e   : > { %4950 = vmatprep.mubr.bf16.mxu0 %v15242_v23  ;;  %2026 = vmatprep.mubr.bf16.mxu1 %v20028_v60 }
 0x23f   : > { %6107 = vmatpush1.bf16.msra.mxu1 %v12141_v7  ;;  %v20285_v7 = vpack.c.bf16 %v14757_v54, %v14738_v24 }
 0x240   : > { %v15276_v51 = vpop.f32.mrb[144].mxu0  ;;  %v15284_v17 = vpop.f32.mrb[144].mxu1 }
 0x241   : > { %20278 = vst [vmem:[#allocation206_spill] sm:$0xff] %v15276_v51  ;;  %20279 = vst [vmem:[#allocation207_spill] sm:$0xff] %v15284_v17  ;;  %v15286_v53 = vpop.f32.mrb[145].mxu0  ;;  %v15288_v28 = vpop.f32.mrb[145].mxu1  ;;  %v2841_v26 = vadd.bf16 %v14066_v30, %v20285_v7  ;;  %v20287_v51 = vpack.c.bf16 %v14693_v14, %v20286_v48  ;;  %v20294_v48 = vpack.c.bf16 %v14812_v55, %v14793_v0 }
 0x242   : > { %20280 = vst [vmem:[#allocation208_spill] sm:$0xff] %v15288_v28  ;;  %v15293_v61 = vpop.f32.mrb[146].mxu0  ;;  %v15295_v50 = vpop.f32.mrb[146].mxu1 }
 0x243   : > { %20282 = vst [vmem:[#allocation210_spill] sm:$0xff] %v15295_v50  ;;  %v15302_v38 = vpop.f32.mrb[147].mxu0  ;;  %v15304_v23 = vpop.f32.mrb[147].mxu1  ;;  %v2832_v9 = vadd.bf16 %v14122_v29, %v20287_v51  ;;  %v15334_v54 = vmax.bf16 %v20028_v60, %v2841_v26 }
 0x244   : > { %20284 = vst [vmem:[#allocation212_spill] sm:$0xff] %v15304_v23  ;;  %v20295_v23 = vpack.c.bf16 %v14748_v45, %v14731_v49 }
 0x245   : > { %4951 = vmatmul.mubr.bf16.gmra.mrb[252].mxu0 %v15298_v5  ;;  %10304 = vmatmul.mubr.msk.bf16.gmra.mrb[252].mxu1 %vm768_vm0, %v13066_v46  ;;  %20290 = vst [vmem:[#allocation214_spill] sm:$0xff] %v15334_v54  ;;  %v15339_v14 = vmax.bf16 %v20028_v60, %v2832_v9  ;;  %v2849_v5 = vadd.bf16 %v14066_v30, %v20294_v48  ;;  %v12146_v9 = vld [vmem:[%s19432_s3 + $0x8c] ss:$16 sps:$4 sm:$0xff]  }
 0x246   : > { %4960 = vmatprep.mubr.bf16.mxu0 %v15291_v40  ;;  %2036 = vmatprep.mubr.bf16.mxu1 %v20028_v60  ;;  %v13067_v40 = vld [vmem:[%s13382_s10 + $0x40] sm:$0xff]   ;;  %v2840_v26 = vadd.bf16 %v14122_v29, %v20295_v23 }
 0x247   : > { %20291 = vst [vmem:[#allocation215_spill] sm:$0xff] %v15339_v14  ;;  %v15383_v45 = vmax.bf16 %v20028_v60, %v2849_v5  ;;  %6108 = vmatprep.subr.bf16.mxu1 %v12146_v9  ;;  %v13068_v9 = vld [vmem:[%s13382_s10 + $0x48] sm:$0xff]   ;;  %v20303_v5 = vpack.c.bf16 %v14803_v25, %v14786_v11 }
 0x248   : > { %v15325_v17 = vpop.f32.mrb[148].mxu0  ;;  %v15327_v10 = vpop.f32.mrb[148].mxu1  ;;  %v15388_v48 = vmax.bf16 %v20028_v60, %v2840_v26 }
 0x249   : > { %20288 = vst [vmem:[#allocation135_spill] sm:$0xff] %v15327_v10  ;;  %v15329_v46 = vpop.f32.mrb[149].mxu0  ;;  %v15331_v50 = vpop.f32.mrb[149].mxu1  ;;  %20298 = vst [vmem:[#allocation220_spill] sm:$0xff] %v15383_v45 }
 0x24a   : > { %20289 = vst [vmem:[#allocation213_spill] sm:$0xff] %v15331_v50  ;;  %v15336_v24 = vpop.f32.mrb[150].mxu0  ;;  %v15341_v51 = vpop.f32.mrb[150].mxu1  ;;  %20299 = vst [vmem:[#allocation221_spill] sm:$0xff] %v15388_v48 }
 0x24b   : > { %20292 = vst [vmem:[#allocation216_spill] sm:$0xff] %v15341_v51  ;;  %v15345_v7 = vpop.f32.mrb[151].mxu0  ;;  %v15347_v28 = vpop.f32.mrb[151].mxu1 }
 0x24c   : > { %20293 = vst [vmem:[#allocation217_spill] sm:$0xff] %v15347_v28 }
 0x24d   : > { %4961 = vmatmul.mubr.bf16.gmra.mrb[0].mxu0 %v15339_v14  ;;  %10305 = vmatmul.mubr.msk.bf16.gmra.mrb[0].mxu1 %vm768_vm0, %v13067_v40  ;;  %v12144_v40 = vld [vmem:[%s19432_s3 + $0x88] ss:$16 sps:$4 sm:$0xff]   ;;  %v2848_v14 = vadd.bf16 %v14122_v29, %v20303_v5  ;;  %v20307_v5 = vpack.c.bf16 %v14922_v57, %v14903_v34 }
 0x24e   : > { %4970 = vmatprep.mubr.bf16.mxu0 %v15334_v54  ;;  %2046 = vmatprep.mubr.bf16.mxu1 %v20028_v60 }
 0x24f   : > { %6109 = vmatpush1.bf16.msra.mxu1 %v12144_v40  ;;  %v20302_v40 = vpack.c.bf16 %v14867_v31, %v14848_v52  ;;  %v15431_v11 = vmax.bf16 %v20028_v60, %v2848_v14  ;;  %v12147_v14 = vld [vmem:[%s19432_s3 + $0xa8] ss:$16 sps:$4 sm:$0xff]  }
 0x250   : > { %v15368_v10 = vpop.f32.mrb[152].mxu0  ;;  %v15376_v55 = vpop.f32.mrb[152].mxu1 }
 0x251   : > { %20296 = vst [vmem:[#allocation218_spill] sm:$0xff] %v15376_v55  ;;  %v15378_v0 = vpop.f32.mrb[153].mxu0  ;;  %v15380_v49 = vpop.f32.mrb[153].mxu1  ;;  %v2857_v50 = vadd.bf16 %v14066_v30, %v20302_v40 }
 0x252   : > { %20297 = vst [vmem:[#allocation219_spill] sm:$0xff] %v15380_v49  ;;  %v15385_v23 = vpop.f32.mrb[154].mxu0  ;;  %v15390_v51 = vpop.f32.mrb[154].mxu1 }
 0x253   : > { %20300 = vst [vmem:[#allocation222_spill] sm:$0xff] %v15390_v51  ;;  %v15394_v28 = vpop.f32.mrb[155].mxu0  ;;  %v15396_v54 = vpop.f32.mrb[155].mxu1  ;;  %v15426_v31 = vmax.bf16 %v20028_v60, %v2857_v50 }
 0x254   : > { %20301 = vst [vmem:[#allocation223_spill] sm:$0xff] %v15396_v54  ;;  %v20308_v54 = vpack.c.bf16 %v14858_v44, %v14841_v32 }
 0x255   : > { %4971 = vmatmul.mubr.bf16.gmra.mrb[4].mxu0 %v15388_v48  ;;  %10306 = vmatmul.mubr.msk.bf16.gmra.mrb[4].mxu1 %vm768_vm0, %v13068_v9  ;;  %v2865_v48 = vadd.bf16 %v14066_v30, %v20307_v5  ;;  %v12152_v5 = vld [vmem:[%s19432_s3 + $0xcc] ss:$16 sps:$4 sm:$0xff]  }
 0x256   : > { %4980 = vmatprep.mubr.bf16.mxu0 %v15383_v45  ;;  %2056 = vmatprep.mubr.bf16.mxu1 %v20028_v60  ;;  %v13069_v45 = vld [vmem:[%s13382_s10 + $0x50] sm:$0xff]   ;;  %v2856_v50 = vadd.bf16 %v14122_v29, %v20308_v54 }
 0x257   : > { %v15471_v34 = vmax.bf16 %v20028_v60, %v2865_v48  ;;  %v12150_v48 = vld [vmem:[%s19432_s3 + $0xc8] ss:$16 sps:$4 sm:$0xff]  }
 0x258   : > { %v15417_v55 = vpop.f32.mrb[156].mxu0  ;;  %v15419_v26 = vpop.f32.mrb[156].mxu1  ;;  %v15474_v32 = vmax.bf16 %v20028_v60, %v2856_v50 }
 0x259   : > { %20304 = vst [vmem:[#allocation224_spill] sm:$0xff] %v15419_v26  ;;  %v15421_v9 = vpop.f32.mrb[157].mxu0  ;;  %v15423_v51 = vpop.f32.mrb[157].mxu1 }
 0x25a   : > { %20305 = vst [vmem:[#allocation225_spill] sm:$0xff] %v15423_v51  ;;  %v15428_v52 = vpop.f32.mrb[158].mxu0  ;;  %v15433_v25 = vpop.f32.mrb[158].mxu1 }
 0x25b   : > { %20306 = vst [vmem:[#allocation226_spill] sm:$0xff] %v15433_v25  ;;  %v15437_v40 = vpop.f32.mrb[159].mxu0  ;;  %v15439_v49 = vpop.f32.mrb[159].mxu1  ;;  %v20313_v25 = vpack.c.bf16 %v14913_v3, %v14896_v22 }
 0x25d   : > { %4981 = vmatmul.mubr.bf16.gmra.mrb[8].mxu0 %v15431_v11  ;;  %10307 = vmatmul.mubr.msk.bf16.gmra.mrb[8].mxu1 %vm768_vm0, %v13069_v45  ;;  %v12149_v45 = vld [vmem:[%s19432_s3 + $0xac] ss:$16 sps:$4 sm:$0xff]  }
 0x25e   : > { %4990 = vmatprep.mubr.bf16.mxu0 %v15426_v31  ;;  %2066 = vmatprep.mubr.bf16.mxu1 %v20028_v60 }
 0x25f   : > { %6110 = vmatprep.subr.bf16.mxu1 %v12149_v45  ;;  %v13070_v45 = vld [vmem:[%s13382_s10 + $0x58] sm:$0xff]  }
 0x260   : > { %v15466_v26 = vpop.f32.mrb[160].mxu1  ;;  %6111 = vmatpush1.bf16.msra.mxu1 %v12147_v14  ;;  %v20312_v14 = vpack.c.bf16 %v14977_v36, %v14958_v21  ;;  %v12153_v36 = vld [vmem:[%s19432_s3 + $0xe8] ss:$16 sps:$4 sm:$0xff]  }
 0x261   : > { %20309 = vst [vmem:[#allocation227_spill] sm:$0xff] %v15466_v26  ;;  %v15468_v57 = vpop.f32.mrb[161].mxu1  ;;  %v2864_v26 = vadd.bf16 %v14122_v29, %v20313_v25  ;;  %6112 = vmatprep.subr.bf16.mxu1 %v12152_v5 }
 0x262   : > { %20310 = vst [vmem:[#allocation228_spill] sm:$0xff] %v15468_v57  ;;  %v15476_v44 = vpop.f32.mrb[162].mxu1  ;;  %v2873_v51 = vadd.bf16 %v14066_v30, %v20312_v14  ;;  %v20319_v14 = vpack.c.bf16 %v14968_v27, %v14951_v59  ;;  %v20733_v57 = vld [vmem:[#allocation148_spill] sm:$0xff] }
 0x263   : > { %20311 = vst [vmem:[#allocation229_spill] sm:$0xff] %v15476_v44  ;;  %v15478_v54 = vpop.f32.mrb[163].mxu1  ;;  %v15517_v3 = vmax.bf16 %v20028_v60, %v2864_v26 }
 0x264   : > { %6113 = vmatpush1.bf16.msra.mxu1 %v12150_v48  ;;  %v15514_v22 = vmax.bf16 %v20028_v60, %v2873_v51  ;;  %v12158_v48 = vld [vmem:[%s19432_s3 + $0x10c] ss:$16 sps:$4 sm:$0xff]   ;;  %v12156_v51 = vld [vmem:[%s19432_s3 + $0x108] ss:$16 sps:$4 sm:$0xff]  }
 0x265   : > { %4991 = vmatmul.mubr.bf16.gmra.mrb[12].mxu0 %v15474_v32  ;;  %10308 = vmatmul.mubr.msk.bf16.gmra.mrb[12].mxu1 %vm768_vm0, %v13070_v45  ;;  %v12155_v45 = vld [vmem:[%s19432_s3 + $0xec] ss:$16 sps:$4 sm:$0xff]  }
 0x266   : > { %5000 = vmatprep.mubr.bf16.mxu0 %v15471_v34  ;;  %2076 = vmatprep.mubr.bf16.mxu1 %v20028_v60 }
 0x267   : > { %6114 = vmatprep.subr.bf16.mxu1 %v12155_v45  ;;  %v13071_v45 = vld [vmem:[%s13382_s10 + $0x60] sm:$0xff]  }
 0x268   : > { %v15506_v50 = vpop.f32.mrb[164].mxu1  ;;  %6115 = vmatpush1.bf16.msra.mxu1 %v12153_v36  ;;  %v20318_v36 = vpack.c.bf16 %v15026_v1, %v15010_v56  ;;  %v12159_v56 = vld [vmem:[%s19432_s3 + $0x128] ss:$16 sps:$4 sm:$0xff]  }
 0x269   : > { %20314 = vst [vmem:[#allocation230_spill] sm:$0xff] %v15506_v50  ;;  %v15511_v21 = vpop.f32.mrb[165].mxu1  ;;  %v2872_v50 = vadd.bf16 %v14122_v29, %v20319_v14  ;;  %6116 = vmatprep.subr.bf16.mxu1 %v12158_v48  ;;  %v20323_v14 = vld [vmem:[#allocation67_spill] sm:$0xff] }
 0x26a   : > { %20315 = vst [vmem:[#allocation231_spill] sm:$0xff] %v15511_v21  ;;  %v15519_v25 = vpop.f32.mrb[166].mxu1  ;;  %v2881_v44 = vadd.bf16 %v14066_v30, %v20318_v36 }
 0x26b   : > { %20316 = vst [vmem:[#allocation232_spill] sm:$0xff] %v15519_v25  ;;  %v15521_v5 = vpop.f32.mrb[167].mxu1  ;;  %v15560_v27 = vmax.bf16 %v20028_v60, %v2872_v50  ;;  %v12164_v25 = vld [vmem:[%s19432_s3 + $0x14c] ss:$16 sps:$4 sm:$0xff]   ;;  %v12162_v50 = vld [vmem:[%s19432_s3 + $0x148] ss:$16 sps:$4 sm:$0xff]  }
 0x26c   : > { %20317 = vst [vmem:[#allocation233_spill] sm:$0xff] %v15521_v5  ;;  %6117 = vmatpush1.bf16.msra.mxu1 %v12156_v51  ;;  %v15557_v59 = vmax.bf16 %v20028_v60, %v2881_v44  ;;  %v2582_v51 = vcombine.high %v20323_v14, %v20323_v14  ;;  %v13072_v14 = vld [vmem:[%s13382_s10 + $0x68] sm:$0xff]   ;;  %v20326_v44 = vpack.c.bf16 %v15017_v2, %v15006_v19 }
 0x26d   : > { %5001 = vmatmul.mubr.bf16.gmra.mrb[16].mxu0 %v15517_v3  ;;  %10309 = vmatmul.mubr.msk.bf16.gmra.mrb[16].mxu1 %vm768_vm0, %v13071_v45  ;;  %v12161_v45 = vld [vmem:[%s19432_s3 + $0x12c] ss:$16 sps:$4 sm:$0xff]  }
 0x26e   : > { %5010 = vmatprep.mubr.bf16.mxu0 %v15514_v22  ;;  %2086 = vmatprep.mubr.bf16.mxu1 %v20028_v60  ;;  %v20329_v2 = vld [vmem:[#allocation73_spill] sm:$0xff] }
 0x26f   : > { %6118 = vmatprep.subr.bf16.mxu1 %v12161_v45 }
 0x270   : > { %v15549_v26 = vpop.f32.mrb[168].mxu1  ;;  %6119 = vmatpush1.bf16.msra.mxu1 %v12159_v56  ;;  %v20325_v56 = vpack.c.bf16 %v15069_v63, %v15053_v20  ;;  %v2580_v63 = vcombine.high %v20329_v2, %v20329_v2  ;;  %v13073_v2 = vld [vmem:[%s13382_s10 + $0x70] sm:$0xff]  }
 0x271   : > { %20320 = vst [vmem:[#allocation234_spill] sm:$0xff] %v15549_v26  ;;  %v15554_v1 = vpop.f32.mrb[169].mxu1  ;;  %v2880_v26 = vadd.bf16 %v14122_v29, %v20326_v44  ;;  %6120 = vmatprep.subr.bf16.mxu1 %v12164_v25  ;;  %v20331_v44 = vld [vmem:[#allocation68_spill] sm:$0xff] }
 0x272   : > { %20321 = vst [vmem:[#allocation235_spill] sm:$0xff] %v15554_v1  ;;  %v15562_v48 = vpop.f32.mrb[170].mxu1  ;;  %v2889_v21 = vadd.bf16 %v14066_v30, %v20325_v56  ;;  %v12165_v30 = vld [vmem:[%s19432_s3 + $0x168] ss:$16 sps:$4 sm:$0xff]   ;;  %v20333_v1 = vpack.c.bf16 %v15060_v39, %v15049_v47 }
 0x273   : > { %20322 = vst [vmem:[#allocation236_spill] sm:$0xff] %v15562_v48  ;;  %v15566_v36 = vpop.f32.mrb[171].mxu1  ;;  %v2606_v48 = vpack.i.b16 %v2582_v51, %v2582_v51  ;;  %v15607_v25 = vmax.bf16 %v20028_v60, %v2880_v26  ;;  %v12168_v26 = vld [vmem:[%s19432_s3 + $0x188] ss:$16 sps:$4 sm:$0xff]  }
 0x274   : > { %20324 = vst [vmem:[#allocation67_spill] sm:$0xff] %v15566_v36  ;;  %6121 = vmatpush1.bf16.msra.mxu1 %v12162_v50  ;;  %v15602_v19 = vmax.bf16 %v20028_v60, %v2889_v21  ;;  %v12170_v21 = vld [vmem:[%s19432_s3 + $0x18c] ss:$16 sps:$4 sm:$0xff]  }
 0x275   : > { %5011 = vmatmul.mubr.bf16.gmra.mrb[20].mxu0 %v15560_v27  ;;  %10310 = vmatmul.mubr.msk.bf16.gmra.mrb[20].mxu1 %vm768_vm0, %v13072_v14  ;;  %v12167_v14 = vld [vmem:[%s19432_s3 + $0x16c] ss:$16 sps:$4 sm:$0xff]   ;;  %v15612_v50 = vrot.slane %v2606_v48, %v20331_v44 }
 0x276   : > { %5020 = vmatprep.mubr.bf16.mxu0 %v15557_v59  ;;  %2096 = vmatprep.mubr.bf16.mxu1 %v20028_v60 }
 0x277   : > { %6122 = vmatprep.subr.bf16.mxu1 %v12167_v14  ;;  %v2888_v14 = vadd.bf16 %v14122_v29, %v20333_v1  ;;  %v12171_v29 = vld [vmem:[%s19432_s3 + $0x1a8] ss:$16 sps:$4 sm:$0xff]  }
 0x278   : > { %v15594_v45 = vpop.f32.mrb[172].mxu1  ;;  %6123 = vmatpush1.bf16.msra.mxu1 %v12165_v30  ;;  %v2599_v30 = vpack.i.b16 %v2580_v63, %v2580_v63 }
 0x279   : > { %20327 = vst [vmem:[#allocation237_spill] sm:$0xff] %v15594_v45  ;;  %v15599_v20 = vpop.f32.mrb[173].mxu1  ;;  %6124 = vmatprep.subr.bf16.mxu1 %v12170_v21  ;;  %v20334_v45 = vld [vmem:[#allocation14_spill] sm:$0xff]  ;;  %v15653_v1 = vmax.bf16 %v20028_v60, %v2888_v14  ;;  %v12176_v21 = vld [vmem:[%s19432_s3 + $0x1cc] ss:$16 sps:$4 sm:$0xff]  }
 0x27a   : > { %20328 = vst [vmem:[#allocation238_spill] sm:$0xff] %v15599_v20  ;;  %v15609_v51 = vpop.f32.mrb[174].mxu1  ;;  %v15650_v39 = vrot.slane %v2599_v30, %v20331_v44  ;;  %v12174_v14 = vld [vmem:[%s19432_s3 + $0x1c8] ss:$16 sps:$4 sm:$0xff]  }
 0x27b   : > { %20330 = vst [vmem:[#allocation73_spill] sm:$0xff] %v15609_v51  ;;  %v15614_v56 = vpop.f32.mrb[175].mxu1  ;;  %v20335_v51 = vld [vmem:[#allocation12_spill] sm:$0xff]  ;;  %20339 = vst [vmem:[#allocation239_spill] sm:$0xff] %v15653_v1 }
 0x27c   : > { %20332 = vst [vmem:[#allocation68_spill] sm:$0xff] %v15614_v56  ;;  %v20336_v36 = vpack.c.bf16 %v20334_v45, %v20335_v51  ;;  %6125 = vmatpush1.bf16.msra.mxu1 %v12168_v26  ;;  %v20346_v26 = vld [vmem:[#allocation18_spill] sm:$0xff] }
 0x27d   : > { %5021 = vmatmul.mubr.bf16.gmra.mrb[24].mxu0 %v15607_v25  ;;  %10311 = vmatmul.mubr.msk.bf16.gmra.mrb[24].mxu1 %vm768_vm0, %v13073_v2  ;;  %v12173_v2 = vld [vmem:[%s19432_s3 + $0x1ac] ss:$16 sps:$4 sm:$0xff]  }
 0x27e   : > { %5030 = vmatprep.mubr.bf16.mxu0 %v15602_v19  ;;  %2106 = vmatprep.mubr.bf16.mxu1 %v20028_v60  ;;  %v2643_v5 = vadd.bf16 %v15612_v50, %v20336_v36 }
 0x27f   : > { %6126 = vmatprep.subr.bf16.mxu1 %v12173_v2  ;;  %v13074_v2 = vld [vmem:[%s13382_s10 + $0x78] sm:$0xff]  }
 0x280   : > { %v15642_v63 = vpop.f32.mrb[176].mxu1  ;;  %v15660_v51 = vmax.bf16 %v20028_v60, %v2643_v5  ;;  %6127 = vmatpush1.bf16.msra.mxu1 %v12171_v29  ;;  %v20343_v5 = vld [vmem:[#allocation13_spill] sm:$0xff]  ;;  %v20344_v29 = vld [vmem:[#allocation11_spill] sm:$0xff] }
 0x281   : > { %20337 = vst [vmem:[#allocation14_spill] sm:$0xff] %v15642_v63  ;;  %v15647_v47 = vpop.f32.mrb[177].mxu1  ;;  %v20345_v48 = vpack.c.bf16 %v20343_v5, %v20344_v29  ;;  %6128 = vmatprep.subr.bf16.mxu1 %v12176_v21  ;;  %v20347_v63 = vld [vmem:[#allocation16_spill] sm:$0xff] }
 0x282   : > { %20338 = vst [vmem:[#allocation12_spill] sm:$0xff] %v15647_v47  ;;  %v15655_v36 = vpop.f32.mrb[178].mxu1  ;;  %20342 = vst [vmem:[#allocation242_spill] sm:$0xff] %v15660_v51  ;;  %v20356_v47 = vld [vmem:[#allocation15_spill] sm:$0xff] }
 0x283   : > { %20340 = vst [vmem:[#allocation240_spill] sm:$0xff] %v15655_v36  ;;  %v15657_v45 = vpop.f32.mrb[179].mxu1  ;;  %v2642_v20 = vadd.bf16 %v15650_v39, %v20345_v48  ;;  %v20348_v36 = vpack.c.bf16 %v20346_v26, %v20347_v63  ;;  %v12177_v48 = vld [vmem:[%s19432_s3 + $0x1e8] ss:$16 sps:$4 sm:$0xff]  }
 0x284   : > { %20341 = vst [vmem:[#allocation241_spill] sm:$0xff] %v15657_v45  ;;  %6129 = vmatpush1.bf16.msra.mxu1 %v12174_v14  ;;  %v20359_v14 = vld [vmem:[#allocation20_spill] sm:$0xff] }
 0x285   : > { %5031 = vmatmul.mubr.bf16.gmra.mrb[28].mxu0 %v15653_v1  ;;  %10312 = vmatmul.mubr.msk.bf16.gmra.mrb[28].mxu1 %vm768_vm0, %v13074_v2  ;;  %v2651_v56 = vadd.bf16 %v15612_v50, %v20348_v36  ;;  %v12179_v2 = vld [vmem:[%s19432_s3 + $0x1ec] ss:$16 sps:$4 sm:$0xff]   ;;  %v15696_v21 = vmax.bf16 %v20028_v60, %v2642_v20 }
 0x286   : > { %5073 = vmatprep.mubr.bf16.mxu0 %v15660_v51  ;;  %2116 = vmatprep.mubr.bf16.mxu1 %v20028_v60  ;;  %v20355_v20 = vld [vmem:[#allocation17_spill] sm:$0xff] }
 0x287   : > { %6130 = vmatprep.subr.bf16.mxu1 %v12179_v2  ;;  %20351 = vst [vmem:[#allocation18_spill] sm:$0xff] %v15696_v21  ;;  %v15703_v26 = vmax.bf16 %v20028_v60, %v2651_v56  ;;  %v13075_v2 = vld [vmem:[%s13382_s10 + $0x80] sm:$0xff]   ;;  %v20357_v45 = vpack.c.bf16 %v20355_v20, %v20356_v47  ;;  %v20367_v20 = vld [vmem:[#allocation21_spill] sm:$0xff] }
 0x288   : > { %v15688_v30 = vpop.f32.mrb[180].mxu1  ;;  %6131 = vmatpush1.bf16.msra.mxu1 %v12177_v48  ;;  %v20358_v48 = vld [vmem:[#allocation22_spill] sm:$0xff] }
 0x289   : > { %20349 = vst [vmem:[#allocation13_spill] sm:$0xff] %v15688_v30  ;;  %v15693_v5 = vpop.f32.mrb[181].mxu1  ;;  %20354 = vst [vmem:[#allocation244_spill] sm:$0xff] %v15703_v26  ;;  %v2650_v56 = vadd.bf16 %v15650_v39, %v20357_v45  ;;  %v20360_v30 = vpack.c.bf16 %v20358_v48, %v20359_v14  ;;  %v13076_v14 = vld [vmem:[%s13382_s10 + $0x88] sm:$0xff]  }
 0x28a   : > { %20350 = vst [vmem:[#allocation11_spill] sm:$0xff] %v15693_v5  ;;  %v15698_v63 = vpop.f32.mrb[182].mxu1  ;;  %v20371_v45 = vld [vmem:[#allocation24_spill] sm:$0xff] }
 0x28b   : > { %20352 = vst [vmem:[#allocation16_spill] sm:$0xff] %v15698_v63  ;;  %v15700_v36 = vpop.f32.mrb[183].mxu1  ;;  %v2659_v63 = vadd.bf16 %v15612_v50, %v20360_v30 }
 0x28c   : > { %20353 = vst [vmem:[#allocation243_spill] sm:$0xff] %v15700_v36 }
 0x28d   : > { %5074 = vmatmul.mubr.bf16.vlgmr.msra.gmra.mrb[160].mxu0 %v15696_v21  ;;  %10313 = vmatmul.mubr.msk.bf16.gmra.mrb[32].mxu1 %vm768_vm0, %v13075_v2  ;;  %v15729_v2 = vmax.bf16 %v20028_v60, %v2650_v56  ;;  %v15734_v47 = vmax.bf16 %v20028_v60, %v2659_v63  ;;  %v20368_v56 = vld [vmem:[#allocation19_spill] sm:$0xff] }
 0x28e   : > { %5083 = vmatprep.mubr.bf16.mxu0 %v15703_v26  ;;  %2126 = vmatprep.mubr.bf16.mxu1 %v20028_v60  ;;  %v20369_v48 = vpack.c.bf16 %v20367_v20, %v20368_v56  ;;  %v20370_v26 = vld [vmem:[#allocation26_spill] sm:$0xff]  ;;  %v20383_v56 = vld [vmem:[#allocation28_spill] sm:$0xff] }
 0x28f   : > { %20364 = vst [vmem:[#allocation20_spill] sm:$0xff] %v15729_v2  ;;  %20366 = vst [vmem:[#allocation246_spill] sm:$0xff] %v15734_v47 }
 0x290   : > { %v15722_v21 = vpop.f32.mrb[184].mxu1  ;;  %v2658_v63 = vadd.bf16 %v15650_v39, %v20369_v48  ;;  %v20380_v48 = vld [vmem:[#allocation23_spill] sm:$0xff] }
 0x291   : > { %20361 = vst [vmem:[#allocation17_spill] sm:$0xff] %v15722_v21  ;;  %v15724_v29 = vpop.f32.mrb[185].mxu1  ;;  %v20372_v21 = vpack.c.bf16 %v20370_v26, %v20371_v45  ;;  %v13077_v26 = vld [vmem:[%s13382_s10 + $0x90] sm:$0xff]  }
 0x292   : > { %20362 = vst [vmem:[#allocation15_spill] sm:$0xff] %v15724_v29  ;;  %v15726_v5 = vpop.f32.mrb[186].mxu1  ;;  %v20379_v45 = vld [vmem:[#allocation25_spill] sm:$0xff] }
 0x293   : > { %20363 = vst [vmem:[#allocation22_spill] sm:$0xff] %v15726_v5  ;;  %v15731_v36 = vpop.f32.mrb[187].mxu1  ;;  %v2667_v5 = vadd.bf16 %v15612_v50, %v20372_v21 }
 0x294   : > { %20365 = vst [vmem:[#allocation245_spill] sm:$0xff] %v15731_v36 }
 0x295   : > { %5084 = vmatmul.mubr.bf16.gmra.mrb[164].mxu0 %v15729_v2  ;;  %10314 = vmatmul.mubr.msk.bf16.gmra.mrb[36].mxu1 %vm768_vm0, %v13076_v14  ;;  %v15760_v14 = vmax.bf16 %v20028_v60, %v2658_v63  ;;  %v15765_v20 = vmax.bf16 %v20028_v60, %v2667_v5  ;;  %v20381_v63 = vpack.c.bf16 %v20379_v45, %v20380_v48 }
 0x296   : > { %5093 = vmatprep.mubr.bf16.mxu0 %v15734_v47  ;;  %2136 = vmatprep.mubr.bf16.mxu1 %v20028_v60  ;;  %v20382_v47 = vld [vmem:[#allocation30_spill] sm:$0xff] }
 0x297   : > { %20376 = vst [vmem:[#allocation24_spill] sm:$0xff] %v15760_v14  ;;  %20378 = vst [vmem:[#allocation248_spill] sm:$0xff] %v15765_v20  ;;  %v2666_v5 = vadd.bf16 %v15650_v39, %v20381_v63 }
 0x298   : > { %v15753_v2 = vpop.f32.mrb[188].mxu1 }
 0x299   : > { %20373 = vst [vmem:[#allocation21_spill] sm:$0xff] %v15753_v2  ;;  %v15755_v30 = vpop.f32.mrb[189].mxu1  ;;  %v20384_v2 = vpack.c.bf16 %v20382_v47, %v20383_v56  ;;  %v13078_v47 = vld [vmem:[%s13382_s10 + $0x98] sm:$0xff]   ;;  %v20391_v56 = vld [vmem:[#allocation29_spill] sm:$0xff] }
 0x29a   : > { %20374 = vst [vmem:[#allocation19_spill] sm:$0xff] %v15755_v30  ;;  %v15757_v29 = vpop.f32.mrb[190].mxu1 }
 0x29b   : > { %20375 = vst [vmem:[#allocation26_spill] sm:$0xff] %v15757_v29  ;;  %v15762_v36 = vpop.f32.mrb[191].mxu1  ;;  %v2675_v29 = vadd.bf16 %v15612_v50, %v20384_v2 }
 0x29c   : > { %20377 = vst [vmem:[#allocation247_spill] sm:$0xff] %v15762_v36 }
 0x29d   : > { %5094 = vmatmul.mubr.bf16.gmra.mrb[168].mxu0 %v15760_v14  ;;  %10315 = vmatmul.mubr.msk.bf16.gmra.mrb[40].mxu1 %vm768_vm0, %v13077_v26  ;;  %v15791_v26 = vmax.bf16 %v20028_v60, %v2666_v5  ;;  %v15798_v63 = vmax.bf16 %v20028_v60, %v2675_v29  ;;  %v20392_v5 = vld [vmem:[#allocation27_spill] sm:$0xff]  ;;  %v20394_v29 = vld [vmem:[#allocation34_spill] sm:$0xff] }
 0x29e   : > { %5103 = vmatprep.mubr.bf16.mxu0 %v15765_v20  ;;  %2146 = vmatprep.mubr.bf16.mxu1 %v20028_v60  ;;  %v20393_v36 = vpack.c.bf16 %v20391_v56, %v20392_v5 }
 0x29f   : > { %20388 = vst [vmem:[#allocation28_spill] sm:$0xff] %v15791_v26  ;;  %20390 = vst [vmem:[#allocation250_spill] sm:$0xff] %v15798_v63 }
 0x2a0   : > { %v15784_v14 = vpop.f32.mrb[192].mxu1  ;;  %v2674_v45 = vadd.bf16 %v15650_v39, %v20393_v36 }
 0x2a1   : > { %20385 = vst [vmem:[#allocation25_spill] sm:$0xff] %v15784_v14  ;;  %v15786_v21 = vpop.f32.mrb[193].mxu1  ;;  %v20395_v14 = vld [vmem:[#allocation32_spill] sm:$0xff] }
 0x2a2   : > { %20386 = vst [vmem:[#allocation23_spill] sm:$0xff] %v15786_v21  ;;  %v15788_v30 = vpop.f32.mrb[194].mxu1 }
 0x2a3   : > { %20387 = vst [vmem:[#allocation30_spill] sm:$0xff] %v15788_v30  ;;  %v15795_v48 = vpop.f32.mrb[195].mxu1  ;;  %v20396_v30 = vpack.c.bf16 %v20394_v29, %v20395_v14  ;;  %v13079_v14 = vld [vmem:[%s13382_s10 + $0xa0] sm:$0xff]  }
 0x2a4   : > { %20389 = vst [vmem:[#allocation249_spill] sm:$0xff] %v15795_v48  ;;  %v20404_v29 = vld [vmem:[#allocation31_spill] sm:$0xff] }
 0x2a5   : > { %5104 = vmatmul.mubr.bf16.gmra.mrb[172].mxu0 %v15791_v26  ;;  %10316 = vmatmul.mubr.msk.bf16.gmra.mrb[44].mxu1 %vm768_vm0, %v13078_v47  ;;  %v2683_v26 = vadd.bf16 %v15612_v50, %v20396_v30  ;;  %v15822_v47 = vmax.bf16 %v20028_v60, %v2674_v45  ;;  %v20403_v45 = vld [vmem:[#allocation33_spill] sm:$0xff] }
 0x2a6   : > { %5113 = vmatprep.mubr.bf16.mxu0 %v15798_v63  ;;  %2156 = vmatprep.mubr.bf16.mxu1 %v20028_v60  ;;  %v20405_v48 = vpack.c.bf16 %v20403_v45, %v20404_v29 }
 0x2a7   : > { %20400 = vst [vmem:[#allocation32_spill] sm:$0xff] %v15822_v47  ;;  %v15829_v5 = vmax.bf16 %v20028_v60, %v2683_v26  ;;  %v20406_v26 = vld [vmem:[#allocation38_spill] sm:$0xff] }
 0x2a8   : > { %v15815_v20 = vpop.f32.mrb[196].mxu1  ;;  %v2682_v56 = vadd.bf16 %v15650_v39, %v20405_v48 }
 0x2a9   : > { %20397 = vst [vmem:[#allocation29_spill] sm:$0xff] %v15815_v20  ;;  %v15817_v2 = vpop.f32.mrb[197].mxu1  ;;  %20402 = vst [vmem:[#allocation252_spill] sm:$0xff] %v15829_v5  ;;  %v20407_v20 = vld [vmem:[#allocation36_spill] sm:$0xff] }
 0x2aa   : > { %20398 = vst [vmem:[#allocation27_spill] sm:$0xff] %v15817_v2  ;;  %v15819_v21 = vpop.f32.mrb[198].mxu1 }
 0x2ab   : > { %20399 = vst [vmem:[#allocation34_spill] sm:$0xff] %v15819_v21  ;;  %v15826_v36 = vpop.f32.mrb[199].mxu1  ;;  %v20408_v21 = vpack.c.bf16 %v20406_v26, %v20407_v20  ;;  %v20416_v26 = vld [vmem:[#allocation35_spill] sm:$0xff] }
 0x2ac   : > { %20401 = vst [vmem:[#allocation251_spill] sm:$0xff] %v15826_v36 }
 0x2ad   : > { %5114 = vmatmul.mubr.bf16.gmra.mrb[176].mxu0 %v15822_v47  ;;  %10317 = vmatmul.mubr.msk.bf16.gmra.mrb[48].mxu1 %vm768_vm0, %v13079_v14  ;;  %v2691_v47 = vadd.bf16 %v15612_v50, %v20408_v21  ;;  %v15853_v14 = vmax.bf16 %v20028_v60, %v2682_v56  ;;  %v13080_v21 = vld [vmem:[%s13382_s10 + $0xa8] sm:$0xff]  }
 0x2ae   : > { %5123 = vmatprep.mubr.bf16.mxu0 %v15829_v5  ;;  %2166 = vmatprep.mubr.bf16.mxu1 %v20028_v60  ;;  %v20415_v56 = vld [vmem:[#allocation37_spill] sm:$0xff] }
 0x2af   : > { %20412 = vst [vmem:[#allocation36_spill] sm:$0xff] %v15853_v14  ;;  %v15860_v29 = vmax.bf16 %v20028_v60, %v2691_v47  ;;  %v20417_v36 = vpack.c.bf16 %v20415_v56, %v20416_v26  ;;  %v20418_v47 = vld [vmem:[#allocation43_spill] sm:$0xff] }
 0x2b0   : > { %v15846_v63 = vpop.f32.mrb[200].mxu1 }
 0x2b1   : > { %20409 = vst [vmem:[#allocation33_spill] sm:$0xff] %v15846_v63  ;;  %v15848_v30 = vpop.f32.mrb[201].mxu1  ;;  %20414 = vst [vmem:[#allocation254_spill] sm:$0xff] %v15860_v29  ;;  %v2690_v45 = vadd.bf16 %v15650_v39, %v20417_v36  ;;  %v20419_v63 = vld [vmem:[#allocation41_spill] sm:$0xff] }
 0x2b2   : > { %20410 = vst [vmem:[#allocation31_spill] sm:$0xff] %v15848_v30  ;;  %v15850_v2 = vpop.f32.mrb[202].mxu1 }
 0x2b3   : > { %20411 = vst [vmem:[#allocation38_spill] sm:$0xff] %v15850_v2  ;;  %v15857_v48 = vpop.f32.mrb[203].mxu1  ;;  %v20420_v2 = vpack.c.bf16 %v20418_v47, %v20419_v63  ;;  %v20428_v47 = vld [vmem:[#allocation40_spill] sm:$0xff] }
 0x2b4   : > { %20413 = vst [vmem:[#allocation253_spill] sm:$0xff] %v15857_v48 }
 0x2b5   : > { %5124 = vmatmul.mubr.bf16.gmra.mrb[180].mxu0 %v15853_v14  ;;  %10318 = vmatmul.mubr.msk.bf16.gmra.mrb[52].mxu1 %vm768_vm0, %v13080_v21  ;;  %v2699_v14 = vadd.bf16 %v15612_v50, %v20420_v2  ;;  %v15884_v21 = vmax.bf16 %v20028_v60, %v2690_v45  ;;  %v13081_v2 = vld [vmem:[%s13382_s10 + $0xb0] sm:$0xff]  }
 0x2b6   : > { %5133 = vmatprep.mubr.bf16.mxu0 %v15860_v29  ;;  %2176 = vmatprep.mubr.bf16.mxu1 %v20028_v60  ;;  %v20427_v45 = vld [vmem:[#allocation42_spill] sm:$0xff] }
 0x2b7   : > { %20424 = vst [vmem:[#allocation41_spill] sm:$0xff] %v15884_v21  ;;  %v15891_v26 = vmax.bf16 %v20028_v60, %v2699_v14  ;;  %v20429_v48 = vpack.c.bf16 %v20427_v45, %v20428_v47  ;;  %v20430_v14 = vld [vmem:[#allocation49_spill] sm:$0xff] }
 0x2b8   : > { %v15877_v5 = vpop.f32.mrb[204].mxu1 }
 0x2b9   : > { %20421 = vst [vmem:[#allocation37_spill] sm:$0xff] %v15877_v5  ;;  %v15879_v20 = vpop.f32.mrb[205].mxu1  ;;  %20426 = vst [vmem:[#allocation256_spill] sm:$0xff] %v15891_v26  ;;  %v2698_v56 = vadd.bf16 %v15650_v39, %v20429_v48  ;;  %v20431_v5 = vld [vmem:[#allocation46_spill] sm:$0xff] }
 0x2ba   : > { %20422 = vst [vmem:[#allocation35_spill] sm:$0xff] %v15879_v20  ;;  %v15881_v30 = vpop.f32.mrb[206].mxu1 }
 0x2bb   : > { %20423 = vst [vmem:[#allocation43_spill] sm:$0xff] %v15881_v30  ;;  %v15888_v36 = vpop.f32.mrb[207].mxu1  ;;  %v20432_v30 = vpack.c.bf16 %v20430_v14, %v20431_v5  ;;  %v20440_v14 = vld [vmem:[#allocation45_spill] sm:$0xff] }
 0x2bc   : > { %20425 = vst [vmem:[#allocation255_spill] sm:$0xff] %v15888_v36 }
 0x2bd   : > { %5134 = vmatmul.mubr.bf16.gmra.mrb[184].mxu0 %v15884_v21  ;;  %10319 = vmatmul.mubr.msk.bf16.gmra.mrb[56].mxu1 %vm768_vm0, %v13081_v2  ;;  %v2707_v21 = vadd.bf16 %v15612_v50, %v20432_v30  ;;  %v15915_v2 = vmax.bf16 %v20028_v60, %v2698_v56  ;;  %v13082_v30 = vld [vmem:[%s13382_s10 + $0xb8] sm:$0xff]   ;;  %v20439_v56 = vld [vmem:[#allocation48_spill] sm:$0xff] }
 0x2be   : > { %5143 = vmatprep.mubr.bf16.mxu0 %v15891_v26  ;;  %2186 = vmatprep.mubr.bf16.mxu1 %v20028_v60  ;;  %v20441_v36 = vpack.c.bf16 %v20439_v56, %v20440_v14  ;;  %v20452_v56 = vld [vmem:[#allocation53_spill] sm:$0xff] }
 0x2bf   : > { %20436 = vst [vmem:[#allocation46_spill] sm:$0xff] %v15915_v2  ;;  %v15922_v47 = vmax.bf16 %v20028_v60, %v2707_v21  ;;  %v20442_v21 = vld [vmem:[#allocation59_spill] sm:$0xff] }
 0x2c0   : > { %v15908_v29 = vpop.f32.mrb[208].mxu1  ;;  %v2706_v45 = vadd.bf16 %v15650_v39, %v20441_v36 }
 0x2c1   : > { %20433 = vst [vmem:[#allocation42_spill] sm:$0xff] %v15908_v29  ;;  %v15910_v63 = vpop.f32.mrb[209].mxu1  ;;  %20438 = vst [vmem:[#allocation258_spill] sm:$0xff] %v15922_v47  ;;  %v20443_v29 = vld [vmem:[#allocation55_spill] sm:$0xff] }
 0x2c2   : > { %20434 = vst [vmem:[#allocation40_spill] sm:$0xff] %v15910_v63  ;;  %v15912_v20 = vpop.f32.mrb[210].mxu1  ;;  %v15946_v63 = vmax.bf16 %v20028_v60, %v2706_v45 }
 0x2c3   : > { %20435 = vst [vmem:[#allocation49_spill] sm:$0xff] %v15912_v20  ;;  %v15919_v48 = vpop.f32.mrb[211].mxu1  ;;  %v20444_v20 = vpack.c.bf16 %v20442_v21, %v20443_v29  ;;  %v12182_v29 = vld [vmem:[%s19432_s3 + $0x404] ss:$16 sps:$4 sm:$0xff]  }
 0x2c4   : > { %20437 = vst [vmem:[#allocation257_spill] sm:$0xff] %v15919_v48  ;;  %20448 = vst [vmem:[#allocation55_spill] sm:$0xff] %v15946_v63  ;;  %v13083_v21 = vld [vmem:[%s13382_s10 + $0xc0] sm:$0xff]   ;;  %5394 = vmatprep.subr.bf16.mxu0 %v12182_v29  ;;  %v20454_v48 = vld [vmem:[#allocation66_spill] sm:$0xff] }
 0x2c5   : > { %5144 = vmatmul.mubr.bf16.gmra.mrb[188].mxu0 %v15915_v2  ;;  %10320 = vmatmul.mubr.msk.bf16.gmra.mrb[60].mxu1 %vm768_vm0, %v13082_v30  ;;  %v2715_v2 = vadd.bf16 %v15612_v50, %v20444_v20  ;;  %v12180_v20 = vld [vmem:[%s19432_s3 + $0x400] ss:$16 sps:$4 sm:$0xff]  }
 0x2c6   : > { %5153 = vmatprep.mubr.bf16.mxu0 %v15922_v47  ;;  %2196 = vmatprep.mubr.bf16.mxu1 %v20028_v60 }
 0x2c7   : > { %v15953_v14 = vmax.bf16 %v20028_v60, %v2715_v2  ;;  %v20451_v2 = vld [vmem:[#allocation57_spill] sm:$0xff]  ;;  %5395 = vmatpush1.bf16.msra.mxu0 %v12180_v20 }
 0x2c8   : > { %v15939_v26 = vpop.f32.mrb[212].mxu1 }
 0x2c9   : > { %20445 = vst [vmem:[#allocation48_spill] sm:$0xff] %v15939_v26  ;;  %v15941_v5 = vpop.f32.mrb[213].mxu1  ;;  %20450 = vst [vmem:[#allocation260_spill] sm:$0xff] %v15953_v14  ;;  %v20453_v26 = vpack.c.bf16 %v20451_v2, %v20452_v56  ;;  %v12188_v2 = vld [vmem:[%s19432_s3 + $0x444] ss:$16 sps:$4 sm:$0xff]  }
 0x2ca   : > { %20446 = vst [vmem:[#allocation45_spill] sm:$0xff] %v15941_v5  ;;  %v15943_v30 = vpop.f32.mrb[214].mxu1  ;;  %v20466_v5 = vld [vmem:[#allocation72_spill] sm:$0xff] }
 0x2cb   : > { %20447 = vst [vmem:[#allocation59_spill] sm:$0xff] %v15943_v30  ;;  %v15950_v36 = vpop.f32.mrb[215].mxu1  ;;  %v2714_v30 = vadd.bf16 %v15650_v39, %v20453_v26  ;;  %v12183_v26 = vld [vmem:[%s19432_s3 + $0x420] ss:$16 sps:$4 sm:$0xff]  }
 0x2cc   : > { %20449 = vst [vmem:[#allocation259_spill] sm:$0xff] %v15950_v36  ;;  %v20467_v36 = vld [vmem:[#allocation70_spill] sm:$0xff] }
 0x2cd   : > { %5154 = vmatmul.mubr.bf16.gmra.mrb[192].mxu0 %v15946_v63  ;;  %10321 = vmatmul.mubr.msk.bf16.gmra.mrb[64].mxu1 %vm768_vm0, %v13083_v21  ;;  %v20455_v63 = vld [vmem:[#allocation63_spill] sm:$0xff]  ;;  %v12185_v21 = vld [vmem:[%s19432_s3 + $0x424] ss:$16 sps:$4 sm:$0xff]  }
 0x2ce   : > { %5163 = vmatprep.mubr.bf16.mxu0 %v15953_v14  ;;  %2206 = vmatprep.mubr.bf16.mxu1 %v20028_v60  ;;  %v20456_v47 = vpack.c.bf16 %v20454_v48, %v20455_v63  ;;  %v15989_v63 = vmax.bf16 %v20028_v60, %v2714_v30  ;;  %v12186_v30 = vld [vmem:[%s19432_s3 + $0x440] ss:$16 sps:$4 sm:$0xff]   ;;  %v13084_v48 = vld [vmem:[%s13382_s10 + $0xc8] sm:$0xff]  }
 0x2cf   : > { %5396 = vmatprep.subr.bf16.mxu0 %v12185_v21 }
 0x2d0   : > { %v2723_v51 = vadd.bf16 %v15612_v50, %v20456_v47  ;;  %v15979_v45 = vpop.f32.mrb[216].mxu1  ;;  %20460 = vst [vmem:[#allocation63_spill] sm:$0xff] %v15989_v63  ;;  %5397 = vmatpush1.bf16.msra.mxu0 %v12183_v26  ;;  %v20464_v26 = vld [vmem:[#allocation61_spill] sm:$0xff] }
 0x2d1   : > { %20457 = vst [vmem:[#allocation57_spill] sm:$0xff] %v15979_v45  ;;  %v15984_v56 = vpop.f32.mrb[217].mxu1  ;;  %5398 = vmatprep.subr.bf16.mxu0 %v12188_v2 }
 0x2d2   : > { %20458 = vst [vmem:[#allocation53_spill] sm:$0xff] %v15984_v56  ;;  %v15986_v29 = vpop.f32.mrb[218].mxu1  ;;  %v15996_v20 = vmax.bf16 %v20028_v60, %v2723_v51  ;;  %v20463_v51 = vld [vmem:[#allocation65_spill] sm:$0xff]  ;;  %v20478_v56 = vld [vmem:[#allocation80_spill] sm:$0xff] }
 0x2d3   : > { %20459 = vst [vmem:[#allocation66_spill] sm:$0xff] %v15986_v29  ;;  %v15993_v47 = vpop.f32.mrb[219].mxu1  ;;  %v20465_v45 = vpack.c.bf16 %v20463_v51, %v20464_v26  ;;  %v12194_v26 = vld [vmem:[%s19432_s3 + $0x484] ss:$16 sps:$4 sm:$0xff]  }
 0x2d4   : > { %20461 = vst [vmem:[#allocation261_spill] sm:$0xff] %v15993_v47  ;;  %20462 = vst [vmem:[#allocation262_spill] sm:$0xff] %v15996_v20  ;;  %5399 = vmatpush1.bf16.msra.mxu0 %v12186_v30  ;;  %v20479_v47 = vld [vmem:[#allocation76_spill] sm:$0xff] }
 0x2d5   : > { %5164 = vmatmul.mubr.bf16.gmra.mrb[196].mxu0 %v15989_v63  ;;  %10322 = vmatmul.mubr.msk.bf16.gmra.mrb[68].mxu1 %vm768_vm0, %v13084_v48  ;;  %v2722_v29 = vadd.bf16 %v15650_v39, %v20465_v45  ;;  %v20468_v63 = vpack.c.bf16 %v20466_v5, %v20467_v36  ;;  %v12191_v48 = vld [vmem:[%s19432_s3 + $0x464] ss:$16 sps:$4 sm:$0xff]   ;;  %v12189_v45 = vld [vmem:[%s19432_s3 + $0x460] ss:$16 sps:$4 sm:$0xff]  }
 0x2d6   : > { %5173 = vmatprep.mubr.bf16.mxu0 %v15996_v20  ;;  %2216 = vmatprep.mubr.bf16.mxu1 %v20028_v60  ;;  %v13085_v36 = vld [vmem:[%s13382_s10 + $0xd0] sm:$0xff]  }
 0x2d7   : > { %v2731_v14 = vadd.bf16 %v15612_v50, %v20468_v63  ;;  %5400 = vmatprep.subr.bf16.mxu0 %v12191_v48  ;;  %v16032_v5 = vmax.bf16 %v20028_v60, %v2722_v29  ;;  %v12192_v29 = vld [vmem:[%s19432_s3 + $0x480] ss:$16 sps:$4 sm:$0xff]  }
 0x2d8   : > { %v16022_v21 = vpop.f32.mrb[220].mxu1  ;;  %5401 = vmatpush1.bf16.msra.mxu0 %v12189_v45  ;;  %v20476_v45 = vld [vmem:[#allocation69_spill] sm:$0xff] }
 0x2d9   : > { %20469 = vst [vmem:[#allocation65_spill] sm:$0xff] %v16022_v21  ;;  %v16027_v51 = vpop.f32.mrb[221].mxu1  ;;  %20472 = vst [vmem:[#allocation70_spill] sm:$0xff] %v16032_v5  ;;  %v16039_v30 = vmax.bf16 %v20028_v60, %v2731_v14  ;;  %v20475_v14 = vld [vmem:[#allocation71_spill] sm:$0xff]  ;;  %5402 = vmatprep.subr.bf16.mxu0 %v12194_v26 }
 0x2da   : > { %20470 = vst [vmem:[#allocation61_spill] sm:$0xff] %v16027_v51  ;;  %v16029_v2 = vpop.f32.mrb[222].mxu1  ;;  %v20477_v21 = vpack.c.bf16 %v20475_v14, %v20476_v45  ;;  %v12200_v45 = vld [vmem:[%s19432_s3 + $0x4c4] ss:$16 sps:$4 sm:$0xff]  }
 0x2db   : > { %20471 = vst [vmem:[#allocation72_spill] sm:$0xff] %v16029_v2  ;;  %v16036_v63 = vpop.f32.mrb[223].mxu1  ;;  %20474 = vst [vmem:[#allocation264_spill] sm:$0xff] %v16039_v30 }
 0x2dc   : > { %20473 = vst [vmem:[#allocation263_spill] sm:$0xff] %v16036_v63  ;;  %v2730_v2 = vadd.bf16 %v15650_v39, %v20477_v21  ;;  %5403 = vmatpush1.bf16.msra.mxu0 %v12192_v29  ;;  %v12195_v21 = vld [vmem:[%s19432_s3 + $0x4a0] ss:$16 sps:$4 sm:$0xff]  }
 0x2dd   : > { %5174 = vmatmul.mubr.bf16.gmra.mrb[200].mxu0 %v16032_v5  ;;  %10323 = vmatmul.mubr.msk.bf16.gmra.mrb[72].mxu1 %vm768_vm0, %v13085_v36  ;;  %v20480_v5 = vpack.c.bf16 %v20478_v56, %v20479_v47  ;;  %v12197_v36 = vld [vmem:[%s19432_s3 + $0x4a4] ss:$16 sps:$4 sm:$0xff]   ;;  %v13086_v47 = vld [vmem:[%s13382_s10 + $0xd8] sm:$0xff]  }
 0x2de   : > { %5183 = vmatprep.mubr.bf16.mxu0 %v16039_v30  ;;  %2226 = vmatprep.mubr.bf16.mxu1 %v20028_v60  ;;  %v16075_v56 = vmax.bf16 %v20028_v60, %v2730_v2  ;;  %v12198_v2 = vld [vmem:[%s19432_s3 + $0x4c0] ss:$16 sps:$4 sm:$0xff]  }
 0x2df   : > { %v2739_v20 = vadd.bf16 %v15612_v50, %v20480_v5  ;;  %5404 = vmatprep.subr.bf16.mxu0 %v12197_v36  ;;  %v20490_v36 = vld [vmem:[#allocation86_spill] sm:$0xff] }
 0x2e0   : > { %v16065_v48 = vpop.f32.mrb[224].mxu1  ;;  %20484 = vst [vmem:[#allocation76_spill] sm:$0xff] %v16075_v56  ;;  %5405 = vmatpush1.bf16.msra.mxu0 %v12195_v21  ;;  %v20488_v21 = vld [vmem:[#allocation75_spill] sm:$0xff] }
 0x2e1   : > { %20481 = vst [vmem:[#allocation71_spill] sm:$0xff] %v16065_v48  ;;  %v16070_v14 = vpop.f32.mrb[225].mxu1  ;;  %v16082_v29 = vmax.bf16 %v20028_v60, %v2739_v20  ;;  %v20487_v20 = vld [vmem:[#allocation78_spill] sm:$0xff]  ;;  %5406 = vmatprep.subr.bf16.mxu0 %v12200_v45 }
 0x2e2   : > { %20482 = vst [vmem:[#allocation69_spill] sm:$0xff] %v16070_v14  ;;  %v16072_v26 = vpop.f32.mrb[226].mxu1  ;;  %v20489_v48 = vpack.c.bf16 %v20487_v20, %v20488_v21  ;;  %v20491_v14 = vld [vmem:[#allocation82_spill] sm:$0xff] }
 0x2e3   : > { %20483 = vst [vmem:[#allocation80_spill] sm:$0xff] %v16072_v26  ;;  %v16079_v5 = vpop.f32.mrb[227].mxu1  ;;  %20486 = vst [vmem:[#allocation266_spill] sm:$0xff] %v16082_v29  ;;  %v12206_v21 = vld [vmem:[%s19432_s3 + $0x504] ss:$16 sps:$4 sm:$0xff]  }
 0x2e4   : > { %20485 = vst [vmem:[#allocation265_spill] sm:$0xff] %v16079_v5  ;;  %v2738_v26 = vadd.bf16 %v15650_v39, %v20489_v48  ;;  %v20492_v5 = vpack.c.bf16 %v20490_v36, %v20491_v14  ;;  %5407 = vmatpush1.bf16.msra.mxu0 %v12198_v2  ;;  %v12201_v48 = vld [vmem:[%s19432_s3 + $0x4e0] ss:$16 sps:$4 sm:$0xff]  }
 0x2e5   : > { %5184 = vmatmul.mubr.bf16.gmra.mrb[204].mxu0 %v16075_v56  ;;  %10324 = vmatmul.mubr.msk.bf16.gmra.mrb[76].mxu1 %vm768_vm0, %v13086_v47  ;;  %v12203_v47 = vld [vmem:[%s19432_s3 + $0x4e4] ss:$16 sps:$4 sm:$0xff]  }
 0x2e6   : > { %5193 = vmatprep.mubr.bf16.mxu0 %v16082_v29  ;;  %2236 = vmatprep.mubr.bf16.mxu1 %v20028_v60  ;;  %v2747_v51 = vadd.bf16 %v15612_v50, %v20492_v5  ;;  %v16118_v14 = vmax.bf16 %v20028_v60, %v2738_v26  ;;  %v12204_v26 = vld [vmem:[%s19432_s3 + $0x500] ss:$16 sps:$4 sm:$0xff]  }
 0x2e7   : > { %5408 = vmatprep.subr.bf16.mxu0 %v12203_v47  ;;  %v13087_v5 = vld [vmem:[%s13382_s10 + $0xe0] sm:$0xff]  }
 0x2e8   : > { %v16108_v63 = vpop.f32.mrb[228].mxu1  ;;  %20496 = vst [vmem:[#allocation82_spill] sm:$0xff] %v16118_v14  ;;  %v16125_v2 = vmax.bf16 %v20028_v60, %v2747_v51  ;;  %5409 = vmatpush1.bf16.msra.mxu0 %v12201_v48  ;;  %v20499_v51 = vld [vmem:[#allocation84_spill] sm:$0xff]  ;;  %v20500_v48 = vld [vmem:[#allocation81_spill] sm:$0xff]  ;;  %v20538_v29 = vld [vmem:[#allocation79_spill] sm:$0xff] }
 0x2e9   : > { %20493 = vst [vmem:[#allocation78_spill] sm:$0xff] %v16108_v63  ;;  %v16113_v20 = vpop.f32.mrb[229].mxu1  ;;  %v20501_v63 = vpack.c.bf16 %v20499_v51, %v20500_v48  ;;  %5410 = vmatprep.subr.bf16.mxu0 %v12206_v21  ;;  %v20502_v47 = vld [vmem:[#allocation92_spill] sm:$0xff] }
 0x2ea   : > { %20494 = vst [vmem:[#allocation75_spill] sm:$0xff] %v16113_v20  ;;  %v16115_v45 = vpop.f32.mrb[230].mxu1  ;;  %20498 = vst [vmem:[#allocation268_spill] sm:$0xff] %v16125_v2  ;;  %v20503_v20 = vld [vmem:[#allocation88_spill] sm:$0xff] }
 0x2eb   : > { %20495 = vst [vmem:[#allocation86_spill] sm:$0xff] %v16115_v45  ;;  %v16122_v36 = vpop.f32.mrb[231].mxu1  ;;  %v2746_v45 = vadd.bf16 %v15650_v39, %v20501_v63  ;;  %v12207_v63 = vld [vmem:[%s19432_s3 + $0x520] ss:$16 sps:$4 sm:$0xff]   ;;  %v12212_v48 = vld [vmem:[%s19432_s3 + $0x544] ss:$16 sps:$4 sm:$0xff]  }
 0x2ec   : > { %20497 = vst [vmem:[#allocation267_spill] sm:$0xff] %v16122_v36  ;;  %v20504_v36 = vpack.c.bf16 %v20502_v47, %v20503_v20  ;;  %5411 = vmatpush1.bf16.msra.mxu0 %v12204_v26 }
 0x2ed   : > { %5194 = vmatmul.mubr.bf16.gmra.mrb[208].mxu0 %v16118_v14  ;;  %10325 = vmatmul.mubr.msk.bf16.gmra.mrb[80].mxu1 %vm768_vm0, %v13087_v5  ;;  %v12209_v5 = vld [vmem:[%s19432_s3 + $0x524] ss:$16 sps:$4 sm:$0xff]   ;;  %v16161_v20 = vmax.bf16 %v20028_v60, %v2746_v45  ;;  %v12210_v45 = vld [vmem:[%s19432_s3 + $0x540] ss:$16 sps:$4 sm:$0xff]  }
 0x2ee   : > { %5203 = vmatprep.mubr.bf16.mxu0 %v16125_v2  ;;  %2246 = vmatprep.mubr.bf16.mxu1 %v20028_v60  ;;  %v2755_v14 = vadd.bf16 %v15612_v50, %v20504_v36  ;;  %v13088_v36 = vld [vmem:[%s13382_s10 + $0xe8] sm:$0xff]  }
 0x2ef   : > { %5412 = vmatprep.subr.bf16.mxu0 %v12209_v5  ;;  %20508 = vst [vmem:[#allocation88_spill] sm:$0xff] %v16161_v20  ;;  %v20514_v5 = vld [vmem:[#allocation98_spill] sm:$0xff] }
 0x2f0   : > { %v16151_v2 = vpop.f32.mrb[232].mxu1  ;;  %v16168_v26 = vmax.bf16 %v20028_v60, %v2755_v14  ;;  %5413 = vmatpush1.bf16.msra.mxu0 %v12207_v63  ;;  %v20511_v14 = vld [vmem:[#allocation90_spill] sm:$0xff]  ;;  %v20512_v63 = vld [vmem:[#allocation87_spill] sm:$0xff] }
 0x2f1   : > { %20505 = vst [vmem:[#allocation84_spill] sm:$0xff] %v16151_v2  ;;  %v16156_v51 = vpop.f32.mrb[233].mxu1  ;;  %v20513_v2 = vpack.c.bf16 %v20511_v14, %v20512_v63  ;;  %5414 = vmatprep.subr.bf16.mxu0 %v12212_v48  ;;  %v12218_v63 = vld [vmem:[%s19432_s3 + $0x584] ss:$16 sps:$4 sm:$0xff]  }
 0x2f2   : > { %20506 = vst [vmem:[#allocation81_spill] sm:$0xff] %v16156_v51  ;;  %v16158_v21 = vpop.f32.mrb[234].mxu1  ;;  %20510 = vst [vmem:[#allocation270_spill] sm:$0xff] %v16168_v26  ;;  %v20515_v51 = vld [vmem:[#allocation94_spill] sm:$0xff] }
 0x2f3   : > { %20507 = vst [vmem:[#allocation92_spill] sm:$0xff] %v16158_v21  ;;  %v16165_v47 = vpop.f32.mrb[235].mxu1  ;;  %v2754_v21 = vadd.bf16 %v15650_v39, %v20513_v2  ;;  %v12213_v2 = vld [vmem:[%s19432_s3 + $0x560] ss:$16 sps:$4 sm:$0xff]  }
 0x2f4   : > { %20509 = vst [vmem:[#allocation269_spill] sm:$0xff] %v16165_v47  ;;  %v20516_v47 = vpack.c.bf16 %v20514_v5, %v20515_v51  ;;  %5415 = vmatpush1.bf16.msra.mxu0 %v12210_v45 }
 0x2f5   : > { %5204 = vmatmul.mubr.bf16.gmra.mrb[212].mxu0 %v16161_v20  ;;  %10326 = vmatmul.mubr.msk.bf16.gmra.mrb[84].mxu1 %vm768_vm0, %v13088_v36  ;;  %v12215_v36 = vld [vmem:[%s19432_s3 + $0x564] ss:$16 sps:$4 sm:$0xff]   ;;  %v16204_v51 = vmax.bf16 %v20028_v60, %v2754_v21  ;;  %v12216_v21 = vld [vmem:[%s19432_s3 + $0x580] ss:$16 sps:$4 sm:$0xff]  }
 0x2f6   : > { %5213 = vmatprep.mubr.bf16.mxu0 %v16168_v26  ;;  %2256 = vmatprep.mubr.bf16.mxu1 %v20028_v60  ;;  %v2763_v20 = vadd.bf16 %v15612_v50, %v20516_v47  ;;  %v13089_v47 = vld [vmem:[%s13382_s10 + $0xf0] sm:$0xff]  }
 0x2f7   : > { %5416 = vmatprep.subr.bf16.mxu0 %v12215_v36  ;;  %20520 = vst [vmem:[#allocation94_spill] sm:$0xff] %v16204_v51  ;;  %v20526_v36 = vld [vmem:[#allocation104_spill] sm:$0xff] }
 0x2f8   : > { %v16194_v26 = vpop.f32.mrb[236].mxu1  ;;  %v16211_v45 = vmax.bf16 %v20028_v60, %v2763_v20  ;;  %5417 = vmatpush1.bf16.msra.mxu0 %v12213_v2  ;;  %v20523_v20 = vld [vmem:[#allocation96_spill] sm:$0xff]  ;;  %v20524_v2 = vld [vmem:[#allocation93_spill] sm:$0xff] }
 0x2f9   : > { %20517 = vst [vmem:[#allocation90_spill] sm:$0xff] %v16194_v26  ;;  %v16199_v14 = vpop.f32.mrb[237].mxu1  ;;  %v20525_v26 = vpack.c.bf16 %v20523_v20, %v20524_v2  ;;  %5418 = vmatprep.subr.bf16.mxu0 %v12218_v63  ;;  %v12224_v2 = vld [vmem:[%s19432_s3 + $0x5c4] ss:$16 sps:$4 sm:$0xff]  }
 0x2fa   : > { %20518 = vst [vmem:[#allocation87_spill] sm:$0xff] %v16199_v14  ;;  %v16201_v48 = vpop.f32.mrb[238].mxu1  ;;  %20522 = vst [vmem:[#allocation272_spill] sm:$0xff] %v16211_v45  ;;  %v20527_v14 = vld [vmem:[#allocation100_spill] sm:$0xff] }
 0x2fb   : > { %20519 = vst [vmem:[#allocation98_spill] sm:$0xff] %v16201_v48  ;;  %v16208_v5 = vpop.f32.mrb[239].mxu1  ;;  %v2762_v48 = vadd.bf16 %v15650_v39, %v20525_v26  ;;  %v12219_v26 = vld [vmem:[%s19432_s3 + $0x5a0] ss:$16 sps:$4 sm:$0xff]  }
 0x2fc   : > { %20521 = vst [vmem:[#allocation271_spill] sm:$0xff] %v16208_v5  ;;  %v20528_v5 = vpack.c.bf16 %v20526_v36, %v20527_v14  ;;  %5419 = vmatpush1.bf16.msra.mxu0 %v12216_v21 }
 0x2fd   : > { %5214 = vmatmul.mubr.bf16.gmra.mrb[216].mxu0 %v16204_v51  ;;  %10327 = vmatmul.mubr.msk.bf16.gmra.mrb[88].mxu1 %vm768_vm0, %v13089_v47  ;;  %v12221_v47 = vld [vmem:[%s19432_s3 + $0x5a4] ss:$16 sps:$4 sm:$0xff]   ;;  %v16247_v14 = vmax.bf16 %v20028_v60, %v2762_v48  ;;  %v12222_v48 = vld [vmem:[%s19432_s3 + $0x5c0] ss:$16 sps:$4 sm:$0xff]  }
 0x2fe   : > { %5223 = vmatprep.mubr.bf16.mxu0 %v16211_v45  ;;  %2266 = vmatprep.mubr.bf16.mxu1 %v20028_v60  ;;  %v2771_v51 = vadd.bf16 %v15612_v50, %v20528_v5  ;;  %v13090_v5 = vld [vmem:[%s13382_s10 + $0xf8] sm:$0xff]  }
 0x2ff   : > { %5420 = vmatprep.subr.bf16.mxu0 %v12221_v47  ;;  %20532 = vst [vmem:[#allocation100_spill] sm:$0xff] %v16247_v14  ;;  %v20539_v47 = vld [vmem:[#allocation110_spill] sm:$0xff] }
 0x300   : > { %v16237_v45 = vpop.f32.mrb[240].mxu1  ;;  %v16254_v21 = vmax.bf16 %v20028_v60, %v2771_v51  ;;  %5421 = vmatpush1.bf16.msra.mxu0 %v12219_v26  ;;  %v20535_v51 = vld [vmem:[#allocation102_spill] sm:$0xff]  ;;  %v20536_v26 = vld [vmem:[#allocation99_spill] sm:$0xff] }
 0x301   : > { %20529 = vst [vmem:[#allocation96_spill] sm:$0xff] %v16237_v45  ;;  %v16242_v20 = vpop.f32.mrb[241].mxu1  ;;  %v20537_v45 = vpack.c.bf16 %v20535_v51, %v20536_v26  ;;  %5422 = vmatprep.subr.bf16.mxu0 %v12224_v2  ;;  %v12225_v51 = vld [vmem:[%s19432_s3 + $0x5e0] ss:$16 sps:$4 sm:$0xff]  }
 0x302   : > { %20530 = vst [vmem:[#allocation93_spill] sm:$0xff] %v16242_v20  ;;  %v16244_v63 = vpop.f32.mrb[242].mxu1  ;;  %20534 = vst [vmem:[#allocation274_spill] sm:$0xff] %v16254_v21  ;;  %v20540_v20 = vld [vmem:[#allocation106_spill] sm:$0xff]  ;;  %v20548_v26 = vld [vmem:[#allocation85_spill] sm:$0xff] }
 0x303   : > { %20531 = vst [vmem:[#allocation104_spill] sm:$0xff] %v16244_v63  ;;  %v16251_v36 = vpop.f32.mrb[243].mxu1  ;;  %v2770_v63 = vadd.bf16 %v15650_v39, %v20537_v45 }
 0x304   : > { %20533 = vst [vmem:[#allocation273_spill] sm:$0xff] %v16251_v36  ;;  %v20541_v36 = vpack.c.bf16 %v20539_v47, %v20540_v20  ;;  %5423 = vmatpush1.bf16.msra.mxu0 %v12222_v48  ;;  %v20553_v48 = vld [vmem:[#allocation116_spill] sm:$0xff] }
 0x305   : > { %5224 = vmatmul.mubr.bf16.gmra.mrb[220].mxu0 %v16247_v14  ;;  %10328 = vmatmul.mubr.msk.bf16.gmra.mrb[92].mxu1 %vm768_vm0, %v13090_v5  ;;  %v12227_v5 = vld [vmem:[%s19432_s3 + $0x5e4] ss:$16 sps:$4 sm:$0xff]   ;;  %v16290_v20 = vmax.bf16 %v20028_v60, %v2770_v63 }
 0x306   : > { %5233 = vmatprep.mubr.bf16.mxu0 %v16254_v21  ;;  %6132 = vmatprep.mubr.bf16.mxu1 %v20538_v29  ;;  %v2779_v14 = vadd.bf16 %v15612_v50, %v20541_v36  ;;  %v20549_v63 = vld [vmem:[#allocation108_spill] sm:$0xff] }
 0x307   : > { %5424 = vmatprep.subr.bf16.mxu0 %v12227_v5  ;;  %20545 = vst [vmem:[#allocation110_spill] sm:$0xff] %v16290_v20  ;;  %v20550_v5 = vld [vmem:[#allocation105_spill] sm:$0xff] }
 0x308   : > { %v16280_v56 = vpop.f32.mrb[244].mxu1  ;;  %v16297_v47 = vmax.bf16 %v20028_v60, %v2779_v14  ;;  %5425 = vmatpush1.bf16.msra.mxu0 %v12225_v51  ;;  %v20551_v21 = vpack.c.bf16 %v20549_v63, %v20550_v5  ;;  %v12228_v14 = vld [vmem:[%s19432_s3 + $0x208] ss:$16 sps:$4 sm:$0xff]   ;;  %v12230_v51 = vld [vmem:[%s19432_s3 + $0x20c] ss:$16 sps:$4 sm:$0xff]  }
 0x309   : > { %20542 = vst [vmem:[#allocation102_spill] sm:$0xff] %v16280_v56  ;;  %v16285_v45 = vpop.f32.mrb[245].mxu1  ;;  %v20552_v56 = vld [vmem:[#allocation83_spill] sm:$0xff]  ;;  %6453 = vmatprep.subr.bf16.mxu1 %v12230_v51  ;;  %v20566_v5 = vld [vmem:[#allocation89_spill] sm:$0xff] }
 0x30a   : > { %20543 = vst [vmem:[#allocation99_spill] sm:$0xff] %v16285_v45  ;;  %v16287_v29 = vpop.f32.mrb[246].mxu1  ;;  %20547 = vst [vmem:[#allocation275_spill] sm:$0xff] %v16297_v47  ;;  %v2778_v36 = vadd.bf16 %v15650_v39, %v20551_v21  ;;  %v20562_v51 = vld [vmem:[#allocation91_spill] sm:$0xff] }
 0x30b   : > { %20544 = vst [vmem:[#allocation79_spill] sm:$0xff] %v16287_v29  ;;  %v16294_v2 = vpop.f32.mrb[247].mxu1  ;;  %v20554_v29 = vld [vmem:[#allocation112_spill] sm:$0xff] }
 0x30c   : > { %20546 = vst [vmem:[#allocation106_spill] sm:$0xff] %v16294_v2  ;;  %v16326_v21 = vmax.bf16 %v20028_v60, %v2778_v36  ;;  %v20564_v36 = vld [vmem:[#allocation111_spill] sm:$0xff] }
 0x30d   : > { %5234 = vmatmul.mubr.bf16.gmra.mrb[224].mxu0 %v16290_v20  ;;  %6133 = vmatmul.mubr.bf16.vlgmr.msra.gmra.mrb[96].mxu1 %v20548_v26  ;;  %v20555_v26 = vpack.c.bf16 %v20553_v48, %v20554_v29 }
 0x30e   : > { %5243 = vmatprep.mubr.bf16.mxu0 %v16297_v47  ;;  %6142 = vmatprep.mubr.bf16.mxu1 %v20552_v56  ;;  %20559 = vst [vmem:[#allocation83_spill] sm:$0xff] %v16326_v21 }
 0x30f   : > { %v2787_v45 = vadd.bf16 %v15612_v50, %v20555_v26  ;;  %6454 = vmatpush1.bf16.msra.mxu1 %v12228_v14  ;;  %v20563_v14 = vld [vmem:[#allocation114_spill] sm:$0xff] }
 0x310   : > { %v16319_v2 = vpop.f32.mrb[248].mxu1  ;;  %v20565_v26 = vpack.c.bf16 %v20563_v14, %v20564_v36  ;;  %v20580_v14 = vld [vmem:[#allocation95_spill] sm:$0xff] }
 0x311   : > { %20556 = vst [vmem:[#allocation85_spill] sm:$0xff] %v16319_v2  ;;  %v16321_v63 = vpop.f32.mrb[249].mxu1  ;;  %v16333_v29 = vmax.bf16 %v20028_v60, %v2787_v45  ;;  %v20567_v2 = vld [vmem:[#allocation122_spill] sm:$0xff] }
 0x312   : > { %20557 = vst [vmem:[#allocation108_spill] sm:$0xff] %v16321_v63  ;;  %v16323_v56 = vpop.f32.mrb[250].mxu1  ;;  %v2786_v20 = vadd.bf16 %v15650_v39, %v20565_v26  ;;  %v20577_v26 = vld [vmem:[#allocation120_spill] sm:$0xff] }
 0x313   : > { %20558 = vst [vmem:[#allocation105_spill] sm:$0xff] %v16323_v56  ;;  %v16330_v47 = vpop.f32.mrb[251].mxu1  ;;  %20561 = vst [vmem:[#allocation112_spill] sm:$0xff] %v16333_v29  ;;  %v20568_v56 = vld [vmem:[#allocation118_spill] sm:$0xff] }
 0x314   : > { %20560 = vst [vmem:[#allocation116_spill] sm:$0xff] %v16330_v47  ;;  %v20569_v45 = vpack.c.bf16 %v20567_v2, %v20568_v56  ;;  %v20576_v56 = vld [vmem:[#allocation97_spill] sm:$0xff] }
 0x315   : > { %5244 = vmatmul.mubr.bf16.gmra.mrb[228].mxu0 %v16326_v21  ;;  %6143 = vmatmul.mubr.bf16.gmra.mrb[100].mxu1 %v20562_v51  ;;  %v16356_v51 = vmax.bf16 %v20028_v60, %v2786_v20  ;;  %v20578_v20 = vld [vmem:[#allocation117_spill] sm:$0xff] }
 0x316   : > { %5253 = vmatprep.mubr.bf16.mxu0 %v16333_v29  ;;  %6152 = vmatprep.mubr.bf16.mxu1 %v20566_v5  ;;  %v2795_v30 = vadd.bf16 %v15612_v50, %v20569_v45  ;;  %v20579_v45 = vpack.c.bf16 %v20577_v26, %v20578_v20  ;;  %v12233_v2 = vld [vmem:[%s19432_s3 + $0x22c] ss:$16 sps:$4 sm:$0xff]  }
 0x317   : > { %20573 = vst [vmem:[#allocation89_spill] sm:$0xff] %v16356_v51  ;;  %6455 = vmatprep.subr.bf16.mxu1 %v12233_v2  ;;  %v20590_v2 = vld [vmem:[#allocation103_spill] sm:$0xff] }
 0x318   : > { %v16349_v1 = vpop.f32.mrb[252].mxu1  ;;  %v16363_v5 = vmax.bf16 %v20028_v60, %v2795_v30  ;;  %v2794_v47 = vadd.bf16 %v15650_v39, %v20579_v45  ;;  %v12231_v30 = vld [vmem:[%s19432_s3 + $0x228] ss:$16 sps:$4 sm:$0xff]  }
 0x319   : > { %20570 = vst [vmem:[#allocation91_spill] sm:$0xff] %v16349_v1  ;;  %v16351_v48 = vpop.f32.mrb[253].mxu1  ;;  %v20581_v1 = vld [vmem:[#allocation127_spill] sm:$0xff]  ;;  %6456 = vmatpush1.bf16.msra.mxu1 %v12231_v30  ;;  %v20591_v30 = vld [vmem:[#allocation125_spill] sm:$0xff] }
 0x31a   : > { %20571 = vst [vmem:[#allocation114_spill] sm:$0xff] %v16351_v48  ;;  %v16353_v63 = vpop.f32.mrb[254].mxu1  ;;  %20575 = vst [vmem:[#allocation118_spill] sm:$0xff] %v16363_v5  ;;  %v16392_v20 = vmax.bf16 %v20028_v60, %v2794_v47  ;;  %v20592_v47 = vld [vmem:[#allocation39_spill] sm:$0xff]  ;;  %v20594_v45 = vld [vmem:[#allocation101_spill] sm:$0xff] }
 0x31b   : > { %20572 = vst [vmem:[#allocation111_spill] sm:$0xff] %v16353_v63  ;;  %v16360_v36 = vpop.f32.mrb[255].mxu1  ;;  %v20582_v63 = vld [vmem:[#allocation123_spill] sm:$0xff] }
 0x31c   : > { %20574 = vst [vmem:[#allocation122_spill] sm:$0xff] %v16360_v36  ;;  %20587 = vst [vmem:[#allocation95_spill] sm:$0xff] %v16392_v20 }
 0x31d   : > { %5254 = vmatmul.mubr.bf16.gmra.mrb[232].mxu0 %v16356_v51  ;;  %6153 = vmatmul.mubr.bf16.gmra.mrb[104].mxu1 %v20576_v56  ;;  %v20583_v56 = vpack.c.bf16 %v20581_v1, %v20582_v63 }
 0x31e   : > { %5263 = vmatprep.mubr.bf16.mxu0 %v16363_v5  ;;  %6162 = vmatprep.mubr.bf16.mxu1 %v20580_v14 }
 0x31f   : > { %v2803_v48 = vadd.bf16 %v15612_v50, %v20583_v56  ;;  %v20593_v56 = vpack.c.bf16 %v20591_v30, %v20592_v47  ;;  %v20608_v30 = vld [vmem:[#allocation107_spill] sm:$0xff] }
 0x320   : > { %v16385_v36 = vpop.f32.mrb[0].mxu1 }
 0x321   : > { %20584 = vst [vmem:[#allocation97_spill] sm:$0xff] %v16385_v36  ;;  %v16387_v26 = vpop.f32.mrb[1].mxu1  ;;  %v16399_v1 = vmax.bf16 %v20028_v60, %v2803_v48  ;;  %v2802_v51 = vadd.bf16 %v15650_v39, %v20593_v56  ;;  %v20595_v36 = vld [vmem:[#allocation128_spill] sm:$0xff]  ;;  %v20605_v56 = vld [vmem:[#allocation47_spill] sm:$0xff] }
 0x322   : > { %20585 = vst [vmem:[#allocation120_spill] sm:$0xff] %v16387_v26  ;;  %v16389_v14 = vpop.f32.mrb[2].mxu1 }
 0x323   : > { %20586 = vst [vmem:[#allocation117_spill] sm:$0xff] %v16389_v14  ;;  %v16396_v5 = vpop.f32.mrb[3].mxu1  ;;  %20589 = vst [vmem:[#allocation123_spill] sm:$0xff] %v16399_v1  ;;  %v20596_v14 = vld [vmem:[#allocation58_spill] sm:$0xff] }
 0x324   : > { %20588 = vst [vmem:[#allocation127_spill] sm:$0xff] %v16396_v5  ;;  %v20597_v48 = vpack.c.bf16 %v20595_v36, %v20596_v14  ;;  %v20604_v14 = vld [vmem:[#allocation109_spill] sm:$0xff] }
 0x325   : > { %5264 = vmatmul.mubr.bf16.gmra.mrb[236].mxu0 %v16392_v20  ;;  %6163 = vmatmul.mubr.bf16.gmra.mrb[108].mxu1 %v20590_v2  ;;  %v16422_v2 = vmax.bf16 %v20028_v60, %v2802_v51  ;;  %v20606_v51 = vld [vmem:[#allocation9_spill] sm:$0xff] }
 0x326   : > { %5273 = vmatprep.mubr.bf16.mxu0 %v16399_v1  ;;  %6172 = vmatprep.mubr.bf16.mxu1 %v20594_v45  ;;  %v2811_v29 = vadd.bf16 %v15612_v50, %v20597_v48  ;;  %v20607_v48 = vpack.c.bf16 %v20605_v56, %v20606_v51  ;;  %v12234_v36 = vld [vmem:[%s19432_s3 + $0x248] ss:$16 sps:$4 sm:$0xff]  }
 0x327   : > { %20601 = vst [vmem:[#allocation101_spill] sm:$0xff] %v16422_v2 }
 0x328   : > { %v16415_v21 = vpop.f32.mrb[4].mxu1  ;;  %v16429_v45 = vmax.bf16 %v20028_v60, %v2811_v29  ;;  %v2810_v5 = vadd.bf16 %v15650_v39, %v20607_v48 }
 0x329   : > { %20598 = vst [vmem:[#allocation103_spill] sm:$0xff] %v16415_v21  ;;  %v16417_v63 = vpop.f32.mrb[5].mxu1  ;;  %v20609_v21 = vld [vmem:[#allocation130_spill] sm:$0xff] }
 0x32a   : > { %20599 = vst [vmem:[#allocation125_spill] sm:$0xff] %v16417_v63  ;;  %v16419_v26 = vpop.f32.mrb[6].mxu1  ;;  %20603 = vst [vmem:[#allocation58_spill] sm:$0xff] %v16429_v45 }
 0x32b   : > { %20600 = vst [vmem:[#allocation39_spill] sm:$0xff] %v16419_v26  ;;  %v16426_v47 = vpop.f32.mrb[7].mxu1  ;;  %v20610_v26 = vld [vmem:[#allocation62_spill] sm:$0xff] }
 0x32c   : > { %20602 = vst [vmem:[#allocation128_spill] sm:$0xff] %v16426_v47  ;;  %v20611_v29 = vpack.c.bf16 %v20609_v21, %v20610_v26  ;;  %v20620_v47 = vld [vmem:[#allocation10_spill] sm:$0xff]  ;;  %v20622_v21 = vld [vmem:[#allocation113_spill] sm:$0xff] }
 0x32d   : > { %5274 = vmatmul.mubr.bf16.gmra.mrb[240].mxu0 %v16422_v2  ;;  %6173 = vmatmul.mubr.bf16.gmra.mrb[112].mxu1 %v20604_v14  ;;  %v12236_v14 = vld [vmem:[%s19432_s3 + $0x24c] ss:$16 sps:$4 sm:$0xff]  }
 0x32e   : > { %5283 = vmatprep.mubr.bf16.mxu0 %v16429_v45  ;;  %6182 = vmatprep.mubr.bf16.mxu1 %v20608_v30  ;;  %v2819_v1 = vadd.bf16 %v15612_v50, %v20611_v29  ;;  %v16458_v30 = vmax.bf16 %v20028_v60, %v2810_v5  ;;  %v20619_v5 = vld [vmem:[#allocation51_spill] sm:$0xff] }
 0x32f   : > { %6457 = vmatprep.subr.bf16.mxu1 %v12236_v14  ;;  %v20618_v14 = vld [vmem:[#allocation115_spill] sm:$0xff] }
 0x330   : > { %v16451_v63 = vpop.f32.mrb[8].mxu1  ;;  %20615 = vst [vmem:[#allocation107_spill] sm:$0xff] %v16458_v30  ;;  %6458 = vmatpush1.bf16.msra.mxu1 %v12234_v36  ;;  %v16465_v48 = vmax.bf16 %v20028_v60, %v2819_v1  ;;  %v20621_v36 = vpack.c.bf16 %v20619_v5, %v20620_v47  ;;  %v20636_v47 = vld [vmem:[#allocation119_spill] sm:$0xff] }
 0x331   : > { %20612 = vst [vmem:[#allocation109_spill] sm:$0xff] %v16451_v63  ;;  %v16453_v56 = vpop.f32.mrb[9].mxu1  ;;  %v20623_v63 = vld [vmem:[#allocation134_spill] sm:$0xff] }
 0x332   : > { %20613 = vst [vmem:[#allocation47_spill] sm:$0xff] %v16453_v56  ;;  %v16455_v51 = vpop.f32.mrb[10].mxu1  ;;  %20617 = vst [vmem:[#allocation62_spill] sm:$0xff] %v16465_v48  ;;  %v2818_v45 = vadd.bf16 %v15650_v39, %v20621_v36  ;;  %v20633_v36 = vld [vmem:[#allocation132_spill] sm:$0xff] }
 0x333   : > { %20614 = vst [vmem:[#allocation9_spill] sm:$0xff] %v16455_v51  ;;  %v16462_v26 = vpop.f32.mrb[11].mxu1  ;;  %v20624_v51 = vld [vmem:[#allocation60_spill] sm:$0xff] }
 0x334   : > { %20616 = vst [vmem:[#allocation130_spill] sm:$0xff] %v16462_v26  ;;  %v20625_v1 = vpack.c.bf16 %v20623_v63, %v20624_v51  ;;  %v20632_v51 = vld [vmem:[#allocation121_spill] sm:$0xff] }
 0x335   : > { %5284 = vmatmul.mubr.bf16.gmra.mrb[244].mxu0 %v16458_v30  ;;  %6183 = vmatmul.mubr.bf16.gmra.mrb[116].mxu1 %v20618_v14  ;;  %v16488_v14 = vmax.bf16 %v20028_v60, %v2818_v45  ;;  %v20634_v45 = vld [vmem:[#allocation64_spill] sm:$0xff] }
 0x336   : > { %5293 = vmatprep.mubr.bf16.mxu0 %v16465_v48  ;;  %6192 = vmatprep.mubr.bf16.mxu1 %v20622_v21  ;;  %v2827_v2 = vadd.bf16 %v15612_v50, %v20625_v1  ;;  %v20635_v1 = vpack.c.bf16 %v20633_v36, %v20634_v45  ;;  %v12237_v63 = vld [vmem:[%s19432_s3 + $0x268] ss:$16 sps:$4 sm:$0xff]  }
 0x337   : > { %20629 = vst [vmem:[#allocation113_spill] sm:$0xff] %v16488_v14 }
 0x338   : > { %v16481_v20 = vpop.f32.mrb[12].mxu1  ;;  %v16495_v21 = vmax.bf16 %v20028_v60, %v2827_v2  ;;  %v2826_v26 = vadd.bf16 %v15650_v39, %v20635_v1 }
 0x339   : > { %20626 = vst [vmem:[#allocation115_spill] sm:$0xff] %v16481_v20  ;;  %v16483_v29 = vpop.f32.mrb[13].mxu1  ;;  %v20637_v20 = vld [vmem:[#allocation141_spill] sm:$0xff] }
 0x33a   : > { %20627 = vst [vmem:[#allocation51_spill] sm:$0xff] %v16483_v29  ;;  %v16485_v56 = vpop.f32.mrb[14].mxu1  ;;  %20631 = vst [vmem:[#allocation60_spill] sm:$0xff] %v16495_v21 }
 0x33b   : > { %20628 = vst [vmem:[#allocation10_spill] sm:$0xff] %v16485_v56  ;;  %v16492_v5 = vpop.f32.mrb[15].mxu1  ;;  %v20638_v56 = vld [vmem:[#allocation137_spill] sm:$0xff] }
 0x33c   : > { %20630 = vst [vmem:[#allocation134_spill] sm:$0xff] %v16492_v5  ;;  %v20639_v2 = vpack.c.bf16 %v20637_v20, %v20638_v56  ;;  %v20648_v5 = vld [vmem:[#allocation136_spill] sm:$0xff] }
 0x33d   : > { %5294 = vmatmul.mubr.bf16.gmra.mrb[248].mxu0 %v16488_v14  ;;  %6193 = vmatmul.mubr.bf16.gmra.mrb[120].mxu1 %v20632_v51  ;;  %v12239_v51 = vld [vmem:[%s19432_s3 + $0x26c] ss:$16 sps:$4 sm:$0xff]   ;;  %v20650_v20 = vld [vmem:[#allocation124_spill] sm:$0xff] }
 0x33e   : > { %5303 = vmatprep.mubr.bf16.mxu0 %v16495_v21  ;;  %6202 = vmatprep.mubr.bf16.mxu1 %v20636_v47  ;;  %v2835_v48 = vadd.bf16 %v15612_v50, %v20639_v2  ;;  %v16524_v47 = vmax.bf16 %v20028_v60, %v2826_v26  ;;  %v20647_v26 = vld [vmem:[#allocation139_spill] sm:$0xff] }
 0x33f   : > { %6459 = vmatprep.subr.bf16.mxu1 %v12239_v51  ;;  %v20646_v51 = vld [vmem:[#allocation126_spill] sm:$0xff] }
 0x340   : > { %v16517_v29 = vpop.f32.mrb[16].mxu1  ;;  %20643 = vst [vmem:[#allocation119_spill] sm:$0xff] %v16524_v47  ;;  %6460 = vmatpush1.bf16.msra.mxu1 %v12237_v63  ;;  %v16531_v1 = vmax.bf16 %v20028_v60, %v2835_v48  ;;  %v20649_v63 = vpack.c.bf16 %v20647_v26, %v20648_v5  ;;  %v20664_v5 = vld [vmem:[#allocation54_spill] sm:$0xff] }
 0x341   : > { %20640 = vst [vmem:[#allocation121_spill] sm:$0xff] %v16517_v29  ;;  %v16519_v36 = vpop.f32.mrb[17].mxu1  ;;  %v20651_v29 = vld [vmem:[#allocation145_spill] sm:$0xff] }
 0x342   : > { %20641 = vst [vmem:[#allocation132_spill] sm:$0xff] %v16519_v36  ;;  %v16521_v45 = vpop.f32.mrb[18].mxu1  ;;  %20645 = vst [vmem:[#allocation137_spill] sm:$0xff] %v16531_v1  ;;  %v2834_v21 = vadd.bf16 %v15650_v39, %v20649_v63  ;;  %v20662_v63 = vld [vmem:[#allocation77_spill] sm:$0xff] }
 0x343   : > { %20642 = vst [vmem:[#allocation64_spill] sm:$0xff] %v16521_v45  ;;  %v16528_v56 = vpop.f32.mrb[19].mxu1  ;;  %v20652_v45 = vld [vmem:[#allocation74_spill] sm:$0xff] }
 0x344   : > { %20644 = vst [vmem:[#allocation141_spill] sm:$0xff] %v16528_v56  ;;  %v20653_v48 = vpack.c.bf16 %v20651_v29, %v20652_v45  ;;  %v20660_v45 = vld [vmem:[#allocation44_spill] sm:$0xff] }
 0x345   : > { %5304 = vmatmul.mubr.bf16.gmra.mrb[252].mxu0 %v16524_v47  ;;  %6203 = vmatmul.mubr.bf16.gmra.mrb[124].mxu1 %v20646_v51  ;;  %v16552_v51 = vmax.bf16 %v20028_v60, %v2834_v21  ;;  %v20661_v21 = vld [vmem:[#allocation143_spill] sm:$0xff] }
 0x346   : > { %5313 = vmatprep.mubr.bf16.mxu0 %v16531_v1  ;;  %6212 = vmatprep.mubr.bf16.mxu1 %v20650_v20  ;;  %v2843_v14 = vadd.bf16 %v15612_v50, %v20653_v48  ;;  %v20663_v48 = vpack.c.bf16 %v20661_v21, %v20662_v63  ;;  %v12240_v29 = vld [vmem:[%s19432_s3 + $0x288] ss:$16 sps:$4 sm:$0xff]  }
 0x347   : > { %20656 = vst [vmem:[#allocation136_spill] sm:$0xff] %v16552_v51 }
 0x348   : > { %v16547_v30 = vpop.f32.mrb[20].mxu1  ;;  %v16561_v20 = vmax.bf16 %v20028_v60, %v2843_v14  ;;  %v2842_v56 = vadd.bf16 %v15650_v39, %v20663_v48 }
 0x349   : > { %20654 = vst [vmem:[#allocation126_spill] sm:$0xff] %v16547_v30  ;;  %v16549_v2 = vpop.f32.mrb[21].mxu1  ;;  %v20665_v30 = vld [vmem:[#allocation151_spill] sm:$0xff] }
 0x34a   : > { %20655 = vst [vmem:[#allocation139_spill] sm:$0xff] %v16549_v2  ;;  %v16554_v36 = vpop.f32.mrb[22].mxu1  ;;  %20659 = vst [vmem:[#allocation74_spill] sm:$0xff] %v16561_v20 }
 0x34b   : > { %20657 = vst [vmem:[#allocation124_spill] sm:$0xff] %v16554_v36  ;;  %v16558_v26 = vpop.f32.mrb[23].mxu1  ;;  %v20666_v36 = vld [vmem:[#allocation147_spill] sm:$0xff] }
 0x34c   : > { %20658 = vst [vmem:[#allocation145_spill] sm:$0xff] %v16558_v26  ;;  %v20667_v14 = vpack.c.bf16 %v20665_v30, %v20666_v36  ;;  %v20676_v26 = vld [vmem:[#allocation146_spill] sm:$0xff]  ;;  %v20678_v30 = vld [vmem:[#allocation56_spill] sm:$0xff] }
 0x34d   : > { %5314 = vmatmul.mubr.bf16.gmra.mrb[0].mxu0 %v16552_v51  ;;  %6213 = vmatmul.mubr.bf16.gmra.mrb[128].mxu1 %v20660_v45  ;;  %v12242_v45 = vld [vmem:[%s19432_s3 + $0x28c] ss:$16 sps:$4 sm:$0xff]  }
 0x34e   : > { %5323 = vmatprep.mubr.bf16.mxu0 %v16561_v20  ;;  %6222 = vmatprep.mubr.bf16.mxu1 %v20664_v5  ;;  %v2851_v1 = vadd.bf16 %v15612_v50, %v20667_v14  ;;  %v16588_v5 = vmax.bf16 %v20028_v60, %v2842_v56  ;;  %v20675_v56 = vld [vmem:[#allocation149_spill] sm:$0xff] }
 0x34f   : > { %6461 = vmatprep.subr.bf16.mxu1 %v12242_v45  ;;  %v20674_v45 = vld [vmem:[#allocation129_spill] sm:$0xff] }
 0x350   : > { %v16583_v2 = vpop.f32.mrb[24].mxu1  ;;  %20670 = vst [vmem:[#allocation77_spill] sm:$0xff] %v16588_v5  ;;  %6462 = vmatpush1.bf16.msra.mxu1 %v12240_v29  ;;  %v16597_v48 = vmax.bf16 %v20028_v60, %v2851_v1  ;;  %v20677_v29 = vpack.c.bf16 %v20675_v56, %v20676_v26  ;;  %v20692_v26 = vld [vmem:[#allocation131_spill] sm:$0xff] }
 0x351   : > { %20668 = vst [vmem:[#allocation44_spill] sm:$0xff] %v16583_v2  ;;  %v16585_v21 = vpop.f32.mrb[25].mxu1  ;;  %v20679_v2 = vld [vmem:[#allocation157_spill] sm:$0xff] }
 0x352   : > { %20669 = vst [vmem:[#allocation143_spill] sm:$0xff] %v16585_v21  ;;  %v16590_v63 = vpop.f32.mrb[26].mxu1  ;;  %20673 = vst [vmem:[#allocation147_spill] sm:$0xff] %v16597_v48  ;;  %v2850_v20 = vadd.bf16 %v15650_v39, %v20677_v29  ;;  %v20690_v29 = vld [vmem:[#allocation152_spill] sm:$0xff] }
 0x353   : > { %20671 = vst [vmem:[#allocation54_spill] sm:$0xff] %v16590_v63  ;;  %v16594_v36 = vpop.f32.mrb[27].mxu1  ;;  %v20680_v63 = vld [vmem:[#allocation153_spill] sm:$0xff] }
 0x354   : > { %20672 = vst [vmem:[#allocation151_spill] sm:$0xff] %v16594_v36  ;;  %v20681_v1 = vpack.c.bf16 %v20679_v2, %v20680_v63  ;;  %v20688_v63 = vld [vmem:[#allocation133_spill] sm:$0xff] }
 0x355   : > { %5324 = vmatmul.mubr.bf16.gmra.mrb[4].mxu0 %v16588_v5  ;;  %6223 = vmatmul.mubr.bf16.gmra.mrb[132].mxu1 %v20674_v45  ;;  %v16618_v45 = vmax.bf16 %v20028_v60, %v2850_v20  ;;  %v20689_v20 = vld [vmem:[#allocation155_spill] sm:$0xff]  ;;  %v20721_v5 = vld [vmem:[#allocation142_spill] sm:$0xff] }
 0x356   : > { %5333 = vmatprep.mubr.bf16.mxu0 %v16597_v48  ;;  %6232 = vmatprep.mubr.bf16.mxu1 %v20678_v30  ;;  %v2859_v51 = vadd.bf16 %v15612_v50, %v20681_v1  ;;  %v20691_v1 = vpack.c.bf16 %v20689_v20, %v20690_v29  ;;  %v12243_v2 = vld [vmem:[%s19432_s3 + $0x2a8] ss:$16 sps:$4 sm:$0xff]  }
 0x357   : > { %20684 = vst [vmem:[#allocation146_spill] sm:$0xff] %v16618_v45 }
 0x358   : > { %v16613_v47 = vpop.f32.mrb[28].mxu1  ;;  %v16627_v30 = vmax.bf16 %v20028_v60, %v2859_v51  ;;  %v2858_v36 = vadd.bf16 %v15650_v39, %v20691_v1 }
 0x359   : > { %20682 = vst [vmem:[#allocation129_spill] sm:$0xff] %v16613_v47  ;;  %v16615_v14 = vpop.f32.mrb[29].mxu1  ;;  %v20693_v47 = vld [vmem:[#allocation163_spill] sm:$0xff] }
 0x35a   : > { %20683 = vst [vmem:[#allocation149_spill] sm:$0xff] %v16615_v14  ;;  %v16620_v21 = vpop.f32.mrb[30].mxu1  ;;  %20687 = vst [vmem:[#allocation153_spill] sm:$0xff] %v16627_v30 }
 0x35b   : > { %20685 = vst [vmem:[#allocation56_spill] sm:$0xff] %v16620_v21  ;;  %v16624_v56 = vpop.f32.mrb[31].mxu1  ;;  %v20694_v21 = vld [vmem:[#allocation159_spill] sm:$0xff] }
 0x35c   : > { %20686 = vst [vmem:[#allocation157_spill] sm:$0xff] %v16624_v56  ;;  %v20695_v51 = vpack.c.bf16 %v20693_v47, %v20694_v21  ;;  %v20703_v47 = vld [vmem:[#allocation161_spill] sm:$0xff]  ;;  %v20706_v56 = vld [vmem:[#allocation138_spill] sm:$0xff] }
 0x35d   : > { %5334 = vmatmul.mubr.bf16.gmra.mrb[8].mxu0 %v16618_v45  ;;  %6233 = vmatmul.mubr.bf16.gmra.mrb[136].mxu1 %v20688_v63  ;;  %v12245_v63 = vld [vmem:[%s19432_s3 + $0x2ac] ss:$16 sps:$4 sm:$0xff]  }
 0x35e   : > { %5343 = vmatprep.mubr.bf16.mxu0 %v16627_v30  ;;  %6242 = vmatprep.mubr.bf16.mxu1 %v20692_v26  ;;  %v2867_v48 = vadd.bf16 %v15612_v50, %v20695_v51  ;;  %v16654_v26 = vmax.bf16 %v20028_v60, %v2858_v36  ;;  %v12248_v51 = vld [vmem:[%s19432_s3 + $0x2cc] ss:$16 sps:$4 sm:$0xff]   ;;  %v12246_v36 = vld [vmem:[%s19432_s3 + $0x2c8] ss:$16 sps:$4 sm:$0xff]  }
 0x35f   : > { %6463 = vmatprep.subr.bf16.mxu1 %v12245_v63  ;;  %v12251_v63 = vld [vmem:[%s19432_s3 + $0x2ec] ss:$16 sps:$4 sm:$0xff]  }
 0x360   : > { %v16649_v14 = vpop.f32.mrb[32].mxu1  ;;  %20698 = vst [vmem:[#allocation152_spill] sm:$0xff] %v16654_v26  ;;  %6464 = vmatpush1.bf16.msra.mxu1 %v12243_v2  ;;  %v16663_v1 = vmax.bf16 %v20028_v60, %v2867_v48  ;;  %v20702_v2 = vld [vmem:[#allocation140_spill] sm:$0xff]  ;;  %v20704_v48 = vld [vmem:[#allocation158_spill] sm:$0xff] }
 0x361   : > { %20696 = vst [vmem:[#allocation133_spill] sm:$0xff] %v16649_v14  ;;  %v16651_v20 = vpop.f32.mrb[33].mxu1  ;;  %v20705_v14 = vpack.c.bf16 %v20703_v47, %v20704_v48  ;;  %6465 = vmatprep.subr.bf16.mxu1 %v12248_v51 }
 0x362   : > { %20697 = vst [vmem:[#allocation155_spill] sm:$0xff] %v16651_v20  ;;  %v16656_v29 = vpop.f32.mrb[34].mxu1  ;;  %20701 = vst [vmem:[#allocation159_spill] sm:$0xff] %v16663_v1  ;;  %v20707_v20 = vld [vmem:[#allocation169_spill] sm:$0xff] }
 0x363   : > { %20699 = vst [vmem:[#allocation131_spill] sm:$0xff] %v16656_v29  ;;  %v16660_v21 = vpop.f32.mrb[35].mxu1  ;;  %v2866_v29 = vadd.bf16 %v15650_v39, %v20705_v14  ;;  %v13091_v14 = vld [vmem:[%s19431_s2] sm:$0xff] }
 0x364   : > { %20700 = vst [vmem:[#allocation163_spill] sm:$0xff] %v16660_v21  ;;  %v20708_v21 = vld [vmem:[#allocation165_spill] sm:$0xff]  ;;  %6466 = vmatpush1.bf16.msra.mxu1 %v12246_v36 }
 0x365   : > { %5344 = vmatmul.mubr.bf16.gmra.mrb[12].mxu0 %v16654_v26  ;;  %6243 = vmatmul.mubr.bf16.gmra.mrb[140].mxu1 %v20702_v2  ;;  %v20709_v26 = vpack.c.bf16 %v20707_v20, %v20708_v21  ;;  %v12249_v2 = vld [vmem:[%s19432_s3 + $0x2e8] ss:$16 sps:$4 sm:$0xff]   ;;  %v16699_v48 = vmax.bf16 %v20028_v60, %v2866_v29 }
 0x366   : > { %5353 = vmatprep.mubr.bf16.mxu0 %v16663_v1  ;;  %6252 = vmatprep.mubr.bf16.mxu1 %v20706_v56  ;;  %v2535_v56 = vcombine.high %v13091_v14, %v13091_v14  ;;  %v12252_v29 = vld [vmem:[%s19432_s3 + $0x308] ss:$16 sps:$4 sm:$0xff]   ;;  %v12257_v14 = vld [vmem:[%s19432_s3 + $0x32c] ss:$16 sps:$4 sm:$0xff]  }
 0x367   : > { %v2875_v30 = vadd.bf16 %v15612_v50, %v20709_v26  ;;  %6467 = vmatprep.subr.bf16.mxu1 %v12251_v63  ;;  %20712 = vst [vmem:[#allocation158_spill] sm:$0xff] %v16699_v48  ;;  %v12254_v63 = vld [vmem:[%s19432_s3 + $0x30c] ss:$16 sps:$4 sm:$0xff]   ;;  %v20716_v26 = vld [vmem:[#allocation52_spill] sm:$0xff] }
 0x368   : > { %v16691_v47 = vpop.f32.mrb[36].mxu1  ;;  %6468 = vmatpush1.bf16.msra.mxu1 %v12249_v2  ;;  %v20719_v2 = vld [vmem:[#allocation164_spill] sm:$0xff] }
 0x369   : > { %20710 = vst [vmem:[#allocation140_spill] sm:$0xff] %v16691_v47  ;;  %v16696_v51 = vpop.f32.mrb[37].mxu1  ;;  %v16708_v36 = vmax.bf16 %v20028_v60, %v2875_v30  ;;  %v2549_v47 = vrot.slane %v2535_v56, %v20716_v26  ;;  %v20718_v30 = vld [vmem:[#allocation167_spill] sm:$0xff]  ;;  %6469 = vmatprep.subr.bf16.mxu1 %v12254_v63 }
 0x36a   : > { %20711 = vst [vmem:[#allocation161_spill] sm:$0xff] %v16696_v51  ;;  %v16701_v20 = vpop.f32.mrb[38].mxu1  ;;  %v20720_v1 = vpack.c.bf16 %v20718_v30, %v20719_v2  ;;  %v20722_v51 = vld [vmem:[#allocation175_spill] sm:$0xff] }
 0x36b   : > { %20713 = vst [vmem:[#allocation138_spill] sm:$0xff] %v16701_v20  ;;  %v16705_v21 = vpop.f32.mrb[39].mxu1  ;;  %20715 = vst [vmem:[#allocation165_spill] sm:$0xff] %v16708_v36  ;;  %v20717_v20 = vld [vmem:[#allocation144_spill] sm:$0xff] }
 0x36c   : > { %20714 = vst [vmem:[#allocation169_spill] sm:$0xff] %v16705_v21  ;;  %v2874_v45 = vadd.bf16 %v15650_v39, %v20720_v1  ;;  %v20723_v21 = vld [vmem:[#allocation171_spill] sm:$0xff]  ;;  %6470 = vmatpush1.bf16.msra.mxu1 %v12252_v29  ;;  %v2551_v1 = vcombine.high %v2549_v47, %v2549_v47 }
 0x36d   : > { %5354 = vmatmul.mubr.bf16.gmra.mrb[16].mxu0 %v16699_v48  ;;  %6253 = vmatmul.mubr.bf16.gmra.mrb[144].mxu1 %v20717_v20  ;;  %v20724_v48 = vpack.c.bf16 %v20722_v51, %v20723_v21  ;;  %v12255_v20 = vld [vmem:[%s19432_s3 + $0x328] ss:$16 sps:$4 sm:$0xff]   ;;  %v12263_v29 = vld [vmem:[%s19432_s3 + $0x36c] ss:$16 sps:$4 sm:$0xff]  }
 0x36e   : > { %5363 = vmatprep.mubr.bf16.mxu0 %v16708_v36  ;;  %6262 = vmatprep.mubr.bf16.mxu1 %v20721_v5  ;;  %v16742_v63 = vmax.bf16 %v20028_v60, %v2874_v45  ;;  %v12258_v45 = vld [vmem:[%s19432_s3 + $0x348] ss:$16 sps:$4 sm:$0xff]   ;;  %v16763_v51 = vrot.slane %v2551_v1, %v20716_v26 }
 0x36f   : > { %v2883_v56 = vadd.bf16 %v15612_v50, %v20724_v48  ;;  %6471 = vmatprep.subr.bf16.mxu1 %v12257_v14  ;;  %v12260_v14 = vld [vmem:[%s19432_s3 + $0x34c] ss:$16 sps:$4 sm:$0xff]  }
 0x370   : > { %v16737_v30 = vpop.f32.mrb[40].mxu1  ;;  %6472 = vmatpush1.bf16.msra.mxu1 %v12255_v20  ;;  %v20731_v20 = vld [vmem:[#allocation170_spill] sm:$0xff] }
 0x371   : > { %20725 = vst [vmem:[#allocation144_spill] sm:$0xff] %v16737_v30  ;;  %v16739_v5 = vpop.f32.mrb[41].mxu1  ;;  %v16751_v21 = vmax.bf16 %v20028_v60, %v2883_v56  ;;  %v20729_v30 = vld [vmem:[#allocation150_spill] sm:$0xff]  ;;  %v20730_v56 = vld [vmem:[#allocation173_spill] sm:$0xff]  ;;  %6473 = vmatprep.subr.bf16.mxu1 %v12260_v14 }
 0x372   : > { %20726 = vst [vmem:[#allocation167_spill] sm:$0xff] %v16739_v5  ;;  %v16744_v2 = vpop.f32.mrb[42].mxu1  ;;  %v20734_v5 = vld [vmem:[#allocation177_spill] sm:$0xff] }
 0x373   : > { %20727 = vst [vmem:[#allocation164_spill] sm:$0xff] %v16744_v2  ;;  %v16748_v48 = vpop.f32.mrb[43].mxu1  ;;  %v20732_v2 = vpack.c.bf16 %v20730_v56, %v20731_v20  ;;  %v20735_v1 = vpack.c.bf16 %v15073_v62, %v20734_v5  ;;  %v20739_v62 = vld [vmem:[#allocation156_spill] sm:$0xff] }
 0x374   : > { %20728 = vst [vmem:[#allocation142_spill] sm:$0xff] %v16748_v48  ;;  %6474 = vmatpush1.bf16.msra.mxu1 %v12258_v45  ;;  %v16804_v45 = vrot.slane %v2549_v47, %v20716_v26 }
 0x375   : > { %5364 = vmatmul.mubr.bf16.gmra.mrb[20].mxu0 %v16742_v63  ;;  %6263 = vmatmul.mubr.bf16.gmra.mrb[148].mxu1 %v20729_v30  ;;  %v2882_v36 = vadd.bf16 %v15650_v39, %v20732_v2  ;;  %v2891_v48 = vadd.bf16 %v15612_v50, %v20735_v1  ;;  %v12261_v30 = vld [vmem:[%s19432_s3 + $0x368] ss:$16 sps:$4 sm:$0xff]  }
 0x376   : > { %5373 = vmatprep.mubr.bf16.mxu0 %v16751_v21  ;;  %6272 = vmatprep.mubr.bf16.mxu1 %v20733_v57  ;;  %v2620_v57 = vpack.i.b16 %v16763_v51, %v16763_v51  ;;  %v12264_v1 = vld [vmem:[%s19432_s3 + $0x388] ss:$16 sps:$4 sm:$0xff]  }
 0x377   : > { %6475 = vmatprep.subr.bf16.mxu1 %v12263_v29  ;;  %v16789_v14 = vmax.bf16 %v20028_v60, %v2882_v36  ;;  %v16798_v5 = vmax.bf16 %v20028_v60, %v2891_v48  ;;  %v12266_v29 = vld [vmem:[%s19432_s3 + $0x38c] ss:$16 sps:$4 sm:$0xff]  }
 0x378   : > { %v16782_v56 = vpop.f32.mrb[44].mxu1  ;;  %6476 = vmatpush1.bf16.msra.mxu1 %v12261_v30  ;;  %v16815_v48 = vrot.slane %v2620_v57, %v20331_v44  ;;  %v20740_v30 = vld [vmem:[#allocation179_spill] sm:$0xff] }
 0x379   : > { %20736 = vst [vmem:[#allocation175_spill] sm:$0xff] %v16782_v56  ;;  %v16784_v2 = vpop.f32.mrb[45].mxu1  ;;  %v20741_v56 = vld [vmem:[#allocation176_spill] sm:$0xff]  ;;  %6477 = vmatprep.subr.bf16.mxu1 %v12266_v29  ;;  %v12269_v36 = vld [vmem:[%s19432_s3 + $0x3ac] ss:$16 sps:$4 sm:$0xff]  }
 0x37a   : > { %20737 = vst [vmem:[#allocation171_spill] sm:$0xff] %v16784_v2  ;;  %v16791_v20 = vpop.f32.mrb[46].mxu1  ;;  %v20742_v47 = vpack.c.bf16 %v20740_v30, %v20741_v56  ;;  %v12267_v57 = vld [vmem:[%s19432_s3 + $0x3a8] ss:$16 sps:$4 sm:$0xff]  }
 0x37b   : > { %20738 = vst [vmem:[#allocation150_spill] sm:$0xff] %v16791_v20  ;;  %v16795_v50 = vpop.f32.mrb[47].mxu1  ;;  %v20743_v20 = vld [vmem:[#allocation154_spill] sm:$0xff] }
 0x37c   : > { %v2890_v26 = vadd.bf16 %v15650_v39, %v20742_v47  ;;  %6478 = vmatpush1.bf16.msra.mxu1 %v12264_v1  ;;  %v2613_v39 = vpack.i.b16 %v16804_v45, %v16804_v45 }
 0x37d   : > { %5374 = vmatmul.mubr.bf16.gmra.mrb[24].mxu0 %v16789_v14  ;;  %6273 = vmatmul.mubr.bf16.gmra.mrb[152].mxu1 %v20739_v62  ;;  %v20744_v62 = vpack.c.bf16 %v15118_v13, %v15102_v43  ;;  %v20748_v43 = vld [vmem:[#allocation162_spill] sm:$0xff] }
 0x37e   : > { %5383 = vmatprep.mubr.bf16.mxu0 %v16798_v5  ;;  %6282 = vmatprep.mubr.bf16.mxu1 %v20743_v20  ;;  %v16839_v29 = vmax.bf16 %v20028_v60, %v2890_v26  ;;  %v16854_v47 = vrot.slane %v2613_v39, %v20331_v44  ;;  %v20751_v39 = vld [vmem:[#allocation160_spill] sm:$0xff]  ;;  %v12275_v26 = vld [vmem:[%s19432_s3 + $0x3ec] ss:$16 sps:$4 sm:$0xff]  }
 0x37f   : > { %v2645_v2 = vadd.bf16 %v16815_v48, %v20744_v62  ;;  %6479 = vmatprep.subr.bf16.mxu1 %v12269_v36  ;;  %v12272_v36 = vld [vmem:[%s19432_s3 + $0x3cc] ss:$16 sps:$4 sm:$0xff]   ;;  %v12270_v62 = vld [vmem:[%s19432_s3 + $0x3c8] ss:$16 sps:$4 sm:$0xff]  }
 0x380   : > { %v16834_v56 = vpop.f32.mrb[48].mxu1  ;;  %6480 = vmatpush1.bf16.msra.mxu1 %v12267_v57 }
 0x381   : > { %20745 = vst [vmem:[#allocation173_spill] sm:$0xff] %v16834_v56  ;;  %v16836_v20 = vpop.f32.mrb[49].mxu1  ;;  %v16848_v1 = vmax.bf16 %v20028_v60, %v2645_v2  ;;  %v20749_v2 = vld [vmem:[#allocation181_spill] sm:$0xff]  ;;  %6481 = vmatprep.subr.bf16.mxu1 %v12272_v36 }
 0x382   : > { %20746 = vst [vmem:[#allocation170_spill] sm:$0xff] %v16836_v20  ;;  %v16841_v30 = vpop.f32.mrb[50].mxu1  ;;  %v20750_v57 = vpack.c.bf16 %v15109_v42, %v20749_v2 }
 0x383   : > { %20747 = vst [vmem:[#allocation148_spill] sm:$0xff] %v16841_v30  ;;  %v16845_v13 = vpop.f32.mrb[51].mxu1  ;;  %v20752_v30 = vpack.c.bf16 %v15161_v33, %v15145_v6 }
 0x384   : > { %v2644_v56 = vadd.bf16 %v16854_v47, %v20750_v57  ;;  %6482 = vmatpush1.bf16.msra.mxu1 %v12270_v62 }
 0x385   : > { %5384 = vmatmul.mubr.bf16.gmra.mrb[28].mxu0 %v16839_v29  ;;  %6283 = vmatmul.mubr.bf16.gmra.mrb[156].mxu1 %v20748_v43  ;;  %v2653_v20 = vadd.bf16 %v16815_v48, %v20752_v30  ;;  %v12273_v43 = vld [vmem:[%s19432_s3 + $0x3e8] ss:$16 sps:$4 sm:$0xff]  }
 0x386   : > { %5426 = vmatprep.mubr.bf16.mxu0 %v16848_v1  ;;  %6292 = vmatprep.mubr.bf16.mxu1 %v20751_v39  ;;  %v16884_v36 = vmax.bf16 %v20028_v60, %v2644_v56  ;;  %v20756_v56 = vld [vmem:[#allocation166_spill] sm:$0xff]  ;;  %v20757_v39 = vpack.c.bf16 %v15152_v4, %v15141_v18 }
 0x387   : > { %6483 = vmatprep.subr.bf16.mxu1 %v12275_v26  ;;  %v16893_v30 = vmax.bf16 %v20028_v60, %v2653_v20  ;;  %v20755_v26 = vld [vmem:[#allocation168_spill] sm:$0xff]  ;;  %v20758_v20 = vpack.c.bf16 %v15210_v35, %v15194_v12  ;;  %v20761_v12 = vld [vmem:[#allocation174_spill] sm:$0xff] }
 0x388   : > { %v16879_v42 = vpop.f32.mrb[52].mxu1  ;;  %6484 = vmatpush1.bf16.msra.mxu1 %v12273_v43  ;;  %v2652_v6 = vadd.bf16 %v16854_v47, %v20757_v39  ;;  %v20762_v39 = vld [vmem:[#allocation172_spill] sm:$0xff] }
 0x389   : > { %20753 = vst [vmem:[#allocation177_spill] sm:$0xff] %v16879_v42  ;;  %v16881_v2 = vpop.f32.mrb[53].mxu1  ;;  %v2661_v43 = vadd.bf16 %v16815_v48, %v20758_v20 }
 0x38a   : > { %v16886_v57 = vpop.f32.mrb[54].mxu1 }
 0x38b   : > { %20754 = vst [vmem:[#allocation156_spill] sm:$0xff] %v16886_v57  ;;  %v16890_v33 = vpop.f32.mrb[55].mxu1  ;;  %v16923_v4 = vmax.bf16 %v20028_v60, %v2661_v43  ;;  %v20764_v43 = vpack.c.bf16 %v15253_v8, %v15237_v41  ;;  %v20767_v8 = vld [vmem:[#allocation180_spill] sm:$0xff] }
 0x38d   : > { %5427 = vmatmul.mubr.bf16.vlgmr.msra.gmra.mrb[160].mxu0 %v16884_v36  ;;  %6293 = vmatmul.mubr.bf16.gmra.mrb[160].mxu1 %v20755_v26  ;;  %v16916_v26 = vmax.bf16 %v20028_v60, %v2652_v6  ;;  %v20763_v6 = vpack.c.bf16 %v15201_v37, %v15184_v58 }
 0x38e   : > { %5436 = vmatprep.mubr.bf16.mxu0 %v16893_v30  ;;  %6302 = vmatprep.mubr.bf16.mxu1 %v20756_v56  ;;  %v2669_v56 = vadd.bf16 %v16815_v48, %v20764_v43 }
 0x38f   : > { %v2660_v20 = vadd.bf16 %v16854_v47, %v20763_v6  ;;  %v20768_v6 = vld [vmem:[#allocation178_spill] sm:$0xff] }
 0x390   : > { %v16909_v42 = vpop.f32.mrb[56].mxu1  ;;  %v16953_v37 = vmax.bf16 %v20028_v60, %v2669_v56  ;;  %v20770_v56 = vpack.c.bf16 %v15302_v38, %v15286_v53  ;;  %v20774_v53 = vld [vmem:[#allocation186_spill] sm:$0xff] }
 0x391   : > { %20759 = vst [vmem:[#allocation179_spill] sm:$0xff] %v16909_v42  ;;  %v16911_v62 = vpop.f32.mrb[57].mxu1 }
 0x392   : > { %v16913_v57 = vpop.f32.mrb[58].mxu1 }
 0x393   : > { %20760 = vst [vmem:[#allocation176_spill] sm:$0xff] %v16913_v57  ;;  %v16920_v18 = vpop.f32.mrb[59].mxu1 }
 0x395   : > { %5437 = vmatmul.mubr.bf16.gmra.mrb[164].mxu0 %v16916_v26  ;;  %6303 = vmatmul.mubr.bf16.gmra.mrb[164].mxu1 %v20761_v12  ;;  %v16946_v12 = vmax.bf16 %v20028_v60, %v2660_v20  ;;  %v20769_v20 = vpack.c.bf16 %v15244_v16, %v15233_v15 }
 0x396   : > { %5446 = vmatprep.mubr.bf16.mxu0 %v16923_v4  ;;  %6312 = vmatprep.mubr.bf16.mxu1 %v20762_v39  ;;  %v2677_v39 = vadd.bf16 %v16815_v48, %v20770_v56 }
 0x397   : > { %v2668_v43 = vadd.bf16 %v16854_v47, %v20769_v20  ;;  %v20775_v20 = vld [vmem:[#allocation184_spill] sm:$0xff] }
 0x398   : > { %v16939_v42 = vpop.f32.mrb[60].mxu1  ;;  %v16983_v16 = vmax.bf16 %v20028_v60, %v2677_v39  ;;  %v20778_v39 = vpack.c.bf16 %v15345_v7, %v15329_v46  ;;  %v20782_v7 = vld [vmem:[#allocation192_spill] sm:$0xff] }
 0x399   : > { %20765 = vst [vmem:[#allocation154_spill] sm:$0xff] %v16939_v42  ;;  %v16941_v35 = vpop.f32.mrb[61].mxu1 }
 0x39a   : > { %v16943_v57 = vpop.f32.mrb[62].mxu1 }
 0x39b   : > { %20766 = vst [vmem:[#allocation162_spill] sm:$0xff] %v16943_v57  ;;  %v16950_v58 = vpop.f32.mrb[63].mxu1 }
 0x39d   : > { %5447 = vmatmul.mubr.bf16.gmra.mrb[168].mxu0 %v16946_v12  ;;  %6313 = vmatmul.mubr.bf16.gmra.mrb[168].mxu1 %v20767_v8  ;;  %v16976_v8 = vmax.bf16 %v20028_v60, %v2668_v43  ;;  %v20776_v43 = vld [vmem:[#allocation206_spill] sm:$0xff] }
 0x39e   : > { %5456 = vmatprep.mubr.bf16.mxu0 %v16953_v37  ;;  %6322 = vmatprep.mubr.bf16.mxu1 %v20768_v6  ;;  %v20777_v56 = vpack.c.bf16 %v15293_v61, %v20776_v43 }
 0x3a0   : > { %v16969_v42 = vpop.f32.mrb[64].mxu1  ;;  %v2676_v6 = vadd.bf16 %v16854_v47, %v20777_v56  ;;  %v20783_v56 = vld [vmem:[#allocation190_spill] sm:$0xff] }
 0x3a1   : > { %20771 = vst [vmem:[#allocation181_spill] sm:$0xff] %v16969_v42  ;;  %v16971_v41 = vpop.f32.mrb[65].mxu1  ;;  %v2685_v42 = vadd.bf16 %v16815_v48, %v20778_v39 }
 0x3a2   : > { %20772 = vst [vmem:[#allocation160_spill] sm:$0xff] %v16971_v41  ;;  %v16973_v57 = vpop.f32.mrb[66].mxu1 }
 0x3a3   : > { %20773 = vst [vmem:[#allocation168_spill] sm:$0xff] %v16973_v57  ;;  %v16980_v15 = vpop.f32.mrb[67].mxu1  ;;  %v17013_v43 = vmax.bf16 %v20028_v60, %v2685_v42  ;;  %v20785_v42 = vpack.c.bf16 %v15394_v28, %v15378_v0  ;;  %v20790_v0 = vld [vmem:[#allocation198_spill] sm:$0xff] }
 0x3a5   : > { %5457 = vmatmul.mubr.bf16.gmra.mrb[172].mxu0 %v16976_v8  ;;  %6323 = vmatmul.mubr.bf16.gmra.mrb[172].mxu1 %v20774_v53  ;;  %v17006_v53 = vmax.bf16 %v20028_v60, %v2676_v6  ;;  %v20784_v6 = vpack.c.bf16 %v15336_v24, %v15325_v17 }
 0x3a6   : > { %5466 = vmatprep.mubr.bf16.mxu0 %v16983_v16  ;;  %6332 = vmatprep.mubr.bf16.mxu1 %v20775_v20  ;;  %v2693_v20 = vadd.bf16 %v16815_v48, %v20785_v42 }
 0x3a7   : > { %v2684_v39 = vadd.bf16 %v16854_v47, %v20784_v6  ;;  %v20791_v6 = vld [vmem:[#allocation196_spill] sm:$0xff] }
 0x3a8   : > { %v16999_v57 = vpop.f32.mrb[68].mxu1  ;;  %v17043_v24 = vmax.bf16 %v20028_v60, %v2693_v20  ;;  %v20793_v20 = vpack.c.bf16 %v15437_v40, %v15421_v9  ;;  %v20798_v40 = vld [vmem:[#allocation204_spill] sm:$0xff] }
 0x3a9   : > { %20779 = vst [vmem:[#allocation166_spill] sm:$0xff] %v16999_v57  ;;  %v17001_v38 = vpop.f32.mrb[69].mxu1 }
 0x3aa   : > { %20780 = vst [vmem:[#allocation174_spill] sm:$0xff] %v17001_v38  ;;  %v17003_v41 = vpop.f32.mrb[70].mxu1 }
 0x3ab   : > { %20781 = vst [vmem:[#allocation172_spill] sm:$0xff] %v17003_v41  ;;  %v17010_v61 = vpop.f32.mrb[71].mxu1 }
 0x3ad   : > { %5467 = vmatmul.mubr.bf16.gmra.mrb[176].mxu0 %v17006_v53  ;;  %6333 = vmatmul.mubr.bf16.gmra.mrb[176].mxu1 %v20782_v7  ;;  %v17036_v7 = vmax.bf16 %v20028_v60, %v2684_v39  ;;  %v20792_v39 = vpack.c.bf16 %v15385_v23, %v15368_v10 }
 0x3ae   : > { %5476 = vmatprep.mubr.bf16.mxu0 %v17013_v43  ;;  %6342 = vmatprep.mubr.bf16.mxu1 %v20783_v56  ;;  %v2701_v56 = vadd.bf16 %v16815_v48, %v20793_v20 }
 0x3af   : > { %v2692_v42 = vadd.bf16 %v16854_v47, %v20792_v39  ;;  %v20799_v39 = vld [vmem:[#allocation202_spill] sm:$0xff] }
 0x3b0   : > { %v17029_v57 = vpop.f32.mrb[72].mxu1  ;;  %v17073_v23 = vmax.bf16 %v20028_v60, %v2701_v56 }
 0x3b1   : > { %20786 = vst [vmem:[#allocation180_spill] sm:$0xff] %v17029_v57  ;;  %v17031_v46 = vpop.f32.mrb[73].mxu1 }
 0x3b2   : > { %20787 = vst [vmem:[#allocation178_spill] sm:$0xff] %v17031_v46  ;;  %v17033_v41 = vpop.f32.mrb[74].mxu1 }
 0x3b3   : > { %20788 = vst [vmem:[#allocation186_spill] sm:$0xff] %v17033_v41  ;;  %v17040_v17 = vpop.f32.mrb[75].mxu1 }
 0x3b4   : > { %20789 = vst [vmem:[#allocation184_spill] sm:$0xff] %v17040_v17 }
 0x3b5   : > { %5477 = vmatmul.mubr.bf16.gmra.mrb[180].mxu0 %v17036_v7  ;;  %6343 = vmatmul.mubr.bf16.gmra.mrb[180].mxu1 %v20790_v0  ;;  %v17066_v0 = vmax.bf16 %v20028_v60, %v2692_v42  ;;  %v20800_v42 = vpack.c.bf16 %v15428_v52, %v15417_v55 }
 0x3b6   : > { %5486 = vmatprep.mubr.bf16.mxu0 %v17043_v24  ;;  %6352 = vmatprep.mubr.bf16.mxu1 %v20791_v6  ;;  %v20801_v6 = vld [vmem:[#allocation187_spill] sm:$0xff] }
 0x3b7   : > { %v2700_v20 = vadd.bf16 %v16854_v47, %v20800_v42  ;;  %v20809_v42 = vld [vmem:[#allocation209_spill] sm:$0xff] }
 0x3b8   : > { %v17059_v57 = vpop.f32.mrb[76].mxu1 }
 0x3b9   : > { %20794 = vst [vmem:[#allocation206_spill] sm:$0xff] %v17059_v57  ;;  %v17061_v28 = vpop.f32.mrb[77].mxu1  ;;  %v20802_v57 = vld [vmem:[#allocation183_spill] sm:$0xff] }
 0x3ba   : > { %20795 = vst [vmem:[#allocation192_spill] sm:$0xff] %v17061_v28  ;;  %v17063_v41 = vpop.f32.mrb[78].mxu1  ;;  %v20803_v56 = vpack.c.bf16 %v20801_v6, %v20802_v57  ;;  %v20808_v6 = vld [vmem:[#allocation211_spill] sm:$0xff] }
 0x3bb   : > { %20796 = vst [vmem:[#allocation190_spill] sm:$0xff] %v17063_v41  ;;  %v17070_v10 = vpop.f32.mrb[79].mxu1 }
 0x3bc   : > { %20797 = vst [vmem:[#allocation198_spill] sm:$0xff] %v17070_v10  ;;  %v2709_v41 = vadd.bf16 %v16815_v48, %v20803_v56  ;;  %v20811_v56 = vld [vmem:[#allocation182_spill] sm:$0xff] }
 0x3bd   : > { %5487 = vmatmul.mubr.bf16.gmra.mrb[184].mxu0 %v17066_v0  ;;  %6353 = vmatmul.mubr.bf16.gmra.mrb[184].mxu1 %v20798_v40  ;;  %v17096_v40 = vmax.bf16 %v20028_v60, %v2700_v20  ;;  %v20810_v20 = vld [vmem:[#allocation185_spill] sm:$0xff] }
 0x3be   : > { %5496 = vmatprep.mubr.bf16.mxu0 %v17073_v23  ;;  %6362 = vmatprep.mubr.bf16.mxu1 %v20799_v39  ;;  %v17103_v52 = vmax.bf16 %v20028_v60, %v2709_v41  ;;  %v20812_v10 = vpack.c.bf16 %v20810_v20, %v20811_v56  ;;  %v20822_v56 = vld [vmem:[#allocation215_spill] sm:$0xff] }
 0x3c0   : > { %v17089_v46 = vpop.f32.mrb[80].mxu1  ;;  %v2708_v39 = vadd.bf16 %v16854_v47, %v20812_v10 }
 0x3c1   : > { %20804 = vst [vmem:[#allocation196_spill] sm:$0xff] %v17089_v46  ;;  %v17091_v9 = vpop.f32.mrb[81].mxu1  ;;  %v20813_v46 = vld [vmem:[#allocation193_spill] sm:$0xff] }
 0x3c2   : > { %20805 = vst [vmem:[#allocation204_spill] sm:$0xff] %v17091_v9  ;;  %v17093_v28 = vpop.f32.mrb[82].mxu1 }
 0x3c3   : > { %20806 = vst [vmem:[#allocation202_spill] sm:$0xff] %v17093_v28  ;;  %v17100_v55 = vpop.f32.mrb[83].mxu1  ;;  %v20814_v28 = vld [vmem:[#allocation189_spill] sm:$0xff] }
 0x3c4   : > { %20807 = vst [vmem:[#allocation187_spill] sm:$0xff] %v17100_v55  ;;  %v20815_v41 = vpack.c.bf16 %v20813_v46, %v20814_v28  ;;  %v12278_v46 = vld [vmem:[%s19432_s3 + $0x604] ss:$16 sps:$4 sm:$0xff]  }
 0x3c5   : > { %5497 = vmatmul.mubr.bf16.gmra.mrb[188].mxu0 %v17096_v40  ;;  %6363 = vmatmul.mubr.bf16.gmra.mrb[188].mxu1 %v20808_v6  ;;  %v17126_v6 = vmax.bf16 %v20028_v60, %v2708_v39  ;;  %v12276_v39 = vld [vmem:[%s19432_s3 + $0x600] ss:$16 sps:$4 sm:$0xff]   ;;  %v12281_v28 = vld [vmem:[%s19432_s3 + $0x624] ss:$16 sps:$4 sm:$0xff]  }
 0x3c6   : > { %5506 = vmatprep.mubr.bf16.mxu0 %v17103_v52  ;;  %6372 = vmatprep.mubr.bf16.mxu1 %v20809_v42  ;;  %v2717_v17 = vadd.bf16 %v16815_v48, %v20815_v41  ;;  %v20823_v41 = vld [vmem:[#allocation214_spill] sm:$0xff]  ;;  %v20825_v42 = vld [vmem:[#allocation188_spill] sm:$0xff] }
 0x3c7   : > { %20819 = vst [vmem:[#allocation185_spill] sm:$0xff] %v17126_v6  ;;  %5747 = vmatprep.subr.bf16.mxu0 %v12278_v46 }
 0x3c8   : > { %v17119_v38 = vpop.f32.mrb[84].mxu1  ;;  %v17133_v10 = vmax.bf16 %v20028_v60, %v2717_v17  ;;  %v20824_v17 = vld [vmem:[#allocation191_spill] sm:$0xff]  ;;  %5748 = vmatpush1.bf16.msra.mxu0 %v12276_v39  ;;  %v12287_v39 = vld [vmem:[%s19432_s3 + $0x664] ss:$16 sps:$4 sm:$0xff]  }
 0x3c9   : > { %20816 = vst [vmem:[#allocation183_spill] sm:$0xff] %v17119_v38  ;;  %v17121_v57 = vpop.f32.mrb[85].mxu1  ;;  %v20826_v38 = vpack.c.bf16 %v20824_v17, %v20825_v42  ;;  %5749 = vmatprep.subr.bf16.mxu0 %v12281_v28  ;;  %v12284_v28 = vld [vmem:[%s19432_s3 + $0x644] ss:$16 sps:$4 sm:$0xff]   ;;  %v20835_v17 = vld [vmem:[#allocation221_spill] sm:$0xff] }
 0x3ca   : > { %20817 = vst [vmem:[#allocation211_spill] sm:$0xff] %v17121_v57  ;;  %v17123_v9 = vpop.f32.mrb[86].mxu1  ;;  %20821 = vst [vmem:[#allocation193_spill] sm:$0xff] %v17133_v10  ;;  %v20827_v57 = vld [vmem:[#allocation199_spill] sm:$0xff] }
 0x3cb   : > { %20818 = vst [vmem:[#allocation209_spill] sm:$0xff] %v17123_v9  ;;  %v17130_v20 = vpop.f32.mrb[87].mxu1  ;;  %v2716_v9 = vadd.bf16 %v16854_v47, %v20826_v38 }
 0x3cc   : > { %20820 = vst [vmem:[#allocation182_spill] sm:$0xff] %v17130_v20  ;;  %v20828_v20 = vld [vmem:[#allocation195_spill] sm:$0xff] }
 0x3cd   : > { %5507 = vmatmul.mubr.bf16.gmra.mrb[192].mxu0 %v17126_v6  ;;  %6373 = vmatmul.mubr.bf16.gmra.mrb[192].mxu1 %v20822_v56  ;;  %v20829_v55 = vpack.c.bf16 %v20827_v57, %v20828_v20  ;;  %v12279_v56 = vld [vmem:[%s19432_s3 + $0x620] ss:$16 sps:$4 sm:$0xff]   ;;  %v17168_v46 = vmax.bf16 %v20028_v60, %v2716_v9 }
 0x3ce   : > { %5516 = vmatprep.mubr.bf16.mxu0 %v17133_v10  ;;  %6382 = vmatprep.mubr.bf16.mxu1 %v20823_v41  ;;  %v12282_v9 = vld [vmem:[%s19432_s3 + $0x640] ss:$16 sps:$4 sm:$0xff]  }
 0x3cf   : > { %v2725_v6 = vadd.bf16 %v16815_v48, %v20829_v55  ;;  %20833 = vst [vmem:[#allocation191_spill] sm:$0xff] %v17168_v46  ;;  %5750 = vmatpush1.bf16.msra.mxu0 %v12279_v56  ;;  %v20837_v56 = vld [vmem:[#allocation197_spill] sm:$0xff]  ;;  %v20838_v57 = vld [vmem:[#allocation194_spill] sm:$0xff] }
 0x3d0   : > { %v17161_v41 = vpop.f32.mrb[88].mxu1  ;;  %5751 = vmatprep.subr.bf16.mxu0 %v12284_v28 }
 0x3d1   : > { %20830 = vst [vmem:[#allocation189_spill] sm:$0xff] %v17161_v41  ;;  %v17163_v42 = vpop.f32.mrb[89].mxu1  ;;  %v17175_v55 = vmax.bf16 %v20028_v60, %v2725_v6  ;;  %v20836_v6 = vld [vmem:[#allocation220_spill] sm:$0xff]  ;;  %v20839_v41 = vpack.c.bf16 %v20837_v56, %v20838_v57 }
 0x3d2   : > { %20831 = vst [vmem:[#allocation215_spill] sm:$0xff] %v17163_v42  ;;  %v17165_v38 = vpop.f32.mrb[90].mxu1  ;;  %v20840_v42 = vld [vmem:[#allocation205_spill] sm:$0xff]  ;;  %v20848_v56 = vld [vmem:[#allocation200_spill] sm:$0xff] }
 0x3d3   : > { %20832 = vst [vmem:[#allocation214_spill] sm:$0xff] %v17165_v38  ;;  %v17172_v20 = vpop.f32.mrb[91].mxu1  ;;  %v2724_v38 = vadd.bf16 %v16854_v47, %v20839_v41  ;;  %5752 = vmatpush1.bf16.msra.mxu0 %v12282_v9  ;;  %v12293_v9 = vld [vmem:[%s19432_s3 + $0x6a4] ss:$16 sps:$4 sm:$0xff]  }
 0x3d4   : > { %20834 = vst [vmem:[#allocation188_spill] sm:$0xff] %v17172_v20  ;;  %v20841_v20 = vld [vmem:[#allocation201_spill] sm:$0xff]  ;;  %5753 = vmatprep.subr.bf16.mxu0 %v12287_v39  ;;  %v12290_v39 = vld [vmem:[%s19432_s3 + $0x684] ss:$16 sps:$4 sm:$0xff]  }
 0x3d5   : > { %5517 = vmatmul.mubr.bf16.gmra.mrb[196].mxu0 %v17168_v46  ;;  %6383 = vmatmul.mubr.bf16.gmra.mrb[196].mxu1 %v20835_v17  ;;  %v20842_v46 = vpack.c.bf16 %v20840_v42, %v20841_v20  ;;  %v12285_v17 = vld [vmem:[%s19432_s3 + $0x660] ss:$16 sps:$4 sm:$0xff]   ;;  %v17210_v28 = vmax.bf16 %v20028_v60, %v2724_v38 }
 0x3d6   : > { %5526 = vmatprep.mubr.bf16.mxu0 %v17175_v55  ;;  %6392 = vmatprep.mubr.bf16.mxu1 %v20836_v6  ;;  %v12288_v38 = vld [vmem:[%s19432_s3 + $0x680] ss:$16 sps:$4 sm:$0xff]  }
 0x3d7   : > { %v2733_v10 = vadd.bf16 %v16815_v48, %v20842_v46  ;;  %5754 = vmatpush1.bf16.msra.mxu0 %v12285_v17 }
 0x3d8   : > { %v17203_v6 = vpop.f32.mrb[92].mxu1  ;;  %5755 = vmatprep.subr.bf16.mxu0 %v12290_v39 }
 0x3d9   : > { %20843 = vst [vmem:[#allocation199_spill] sm:$0xff] %v17203_v6  ;;  %v17205_v57 = vpop.f32.mrb[93].mxu1  ;;  %v17217_v46 = vmax.bf16 %v20028_v60, %v2733_v10  ;;  %v20847_v10 = vld [vmem:[#allocation203_spill] sm:$0xff]  ;;  %v20850_v6 = vld [vmem:[#allocation212_spill] sm:$0xff] }
 0x3da   : > { %20844 = vst [vmem:[#allocation195_spill] sm:$0xff] %v17205_v57  ;;  %v17207_v41 = vpop.f32.mrb[94].mxu1  ;;  %v20849_v17 = vpack.c.bf16 %v20847_v10, %v20848_v56  ;;  %v12296_v10 = vld [vmem:[%s19432_s3 + $0x6c4] ss:$16 sps:$4 sm:$0xff]   ;;  %v20857_v56 = vld [vmem:[#allocation213_spill] sm:$0xff] }
 0x3db   : > { %20845 = vst [vmem:[#allocation221_spill] sm:$0xff] %v17207_v41  ;;  %v17214_v20 = vpop.f32.mrb[95].mxu1  ;;  %v20851_v41 = vld [vmem:[#allocation208_spill] sm:$0xff]  ;;  %5756 = vmatpush1.bf16.msra.mxu0 %v12288_v38  ;;  %v20856_v38 = vld [vmem:[#allocation217_spill] sm:$0xff] }
 0x3dc   : > { %20846 = vst [vmem:[#allocation220_spill] sm:$0xff] %v17214_v20  ;;  %v2732_v42 = vadd.bf16 %v16854_v47, %v20849_v17  ;;  %v20852_v57 = vpack.c.bf16 %v20850_v6, %v20851_v41  ;;  %5757 = vmatprep.subr.bf16.mxu0 %v12293_v9  ;;  %v12294_v6 = vld [vmem:[%s19432_s3 + $0x6c0] ss:$16 sps:$4 sm:$0xff]   ;;  %v12299_v9 = vld [vmem:[%s19432_s3 + $0x6e4] ss:$16 sps:$4 sm:$0xff]   ;;  %v20858_v17 = vpack.c.bf16 %v20856_v38, %v20857_v56 }
 0x3dd   : > { %5527 = vmatmul.mubr.bf16.gmra.mrb[200].mxu0 %v17210_v28  ;;  %6393 = vmatmul.mubr.bf16.gmra.mrb[200].mxu1 %v15431_v11  ;;  %v20854_v41 = vld [vmem:[#allocation207_spill] sm:$0xff]  ;;  %v12305_v38 = vld [vmem:[%s19432_s3 + $0x724] ss:$16 sps:$4 sm:$0xff]  }
 0x3de   : > { %5536 = vmatprep.mubr.bf16.mxu0 %v17217_v46  ;;  %6402 = vmatprep.mubr.bf16.mxu1 %v15426_v31  ;;  %v2741_v20 = vadd.bf16 %v16815_v48, %v20852_v57  ;;  %v12291_v31 = vld [vmem:[%s19432_s3 + $0x6a0] ss:$16 sps:$4 sm:$0xff]   ;;  %v17246_v11 = vmax.bf16 %v20028_v60, %v2732_v42 }
 0x3df   : > { %5758 = vmatpush1.bf16.msra.mxu0 %v12291_v31  ;;  %v20853_v57 = vld [vmem:[#allocation210_spill] sm:$0xff]  ;;  %v2749_v31 = vadd.bf16 %v16815_v48, %v20858_v17  ;;  %v20862_v56 = vld [vmem:[#allocation223_spill] sm:$0xff] }
 0x3e0   : > { %v17249_v39 = vmax.bf16 %v20028_v60, %v2741_v20  ;;  %v20855_v42 = vpack.c.bf16 %v20853_v57, %v20854_v41  ;;  %5759 = vmatprep.subr.bf16.mxu0 %v12296_v10  ;;  %v12302_v57 = vld [vmem:[%s19432_s3 + $0x704] ss:$16 sps:$4 sm:$0xff]   ;;  %v20863_v17 = vld [vmem:[#allocation219_spill] sm:$0xff] }
 0x3e1   : > { %v17279_v10 = vmax.bf16 %v20028_v60, %v2749_v31  ;;  %v20859_v41 = vld [vmem:[#allocation216_spill] sm:$0xff]  ;;  %v20864_v31 = vpack.c.bf16 %v20862_v56, %v20863_v17  ;;  %v20868_v17 = vld [vmem:[#allocation225_spill] sm:$0xff] }
 0x3e2   : > { %v2740_v20 = vadd.bf16 %v16854_v47, %v20855_v42  ;;  %v20860_v42 = vld [vmem:[#allocation135_spill] sm:$0xff]  ;;  %v12311_v56 = vld [vmem:[%s19432_s3 + $0x764] ss:$16 sps:$4 sm:$0xff]  }
 0x3e3   : > { %5760 = vmatpush1.bf16.msra.mxu0 %v12294_v6  ;;  %v12300_v6 = vld [vmem:[%s19432_s3 + $0x700] ss:$16 sps:$4 sm:$0xff]  }
 0x3e4   : > { %5761 = vmatprep.subr.bf16.mxu0 %v12299_v9 }
 0x3e5   : > { %5537 = vmatmul.mubr.bf16.gmra.mrb[204].mxu0 %v17246_v11  ;;  %6403 = vmatmul.mubr.bf16.gmra.mrb[204].mxu1 %v15474_v32  ;;  %v17276_v32 = vmax.bf16 %v20028_v60, %v2740_v20  ;;  %v20861_v20 = vpack.c.bf16 %v20859_v41, %v20860_v42  ;;  %v12308_v41 = vld [vmem:[%s19432_s3 + $0x744] ss:$16 sps:$4 sm:$0xff]  }
 0x3e6   : > { %5546 = vmatprep.mubr.bf16.mxu0 %v17249_v39  ;;  %6412 = vmatprep.mubr.bf16.mxu1 %v15471_v34  ;;  %v12297_v34 = vld [vmem:[%s19432_s3 + $0x6e0] ss:$16 sps:$4 sm:$0xff]  }
 0x3e7   : > { %5762 = vmatpush1.bf16.msra.mxu0 %v12297_v34  ;;  %v2748_v9 = vadd.bf16 %v16854_v47, %v20861_v20  ;;  %v2757_v34 = vadd.bf16 %v16815_v48, %v20864_v31  ;;  %v20865_v42 = vld [vmem:[#allocation222_spill] sm:$0xff]  ;;  %v20869_v31 = vpack.c.bf16 %v15439_v49, %v20868_v17 }
 0x3e8   : > { %5763 = vmatprep.subr.bf16.mxu0 %v12302_v57  ;;  %v20866_v20 = vld [vmem:[#allocation218_spill] sm:$0xff] }
 0x3e9   : > { %v17309_v57 = vmax.bf16 %v20028_v60, %v2757_v34  ;;  %v2765_v34 = vadd.bf16 %v16815_v48, %v20869_v31  ;;  %v12312_v49 = vld [vmem:[%s19432_s3 + $0x780] ss:$16 sps:$4 sm:$0xff]  }
 0x3eb   : > { %5764 = vmatpush1.bf16.msra.mxu0 %v12300_v6  ;;  %v12306_v6 = vld [vmem:[%s19432_s3 + $0x740] ss:$16 sps:$4 sm:$0xff]  }
 0x3ec   : > { %5765 = vmatprep.subr.bf16.mxu0 %v12305_v38 }
 0x3ed   : > { %5547 = vmatmul.mubr.bf16.gmra.mrb[208].mxu0 %v17276_v32  ;;  %6413 = vmatmul.mubr.bf16.gmra.mrb[208].mxu1 %v15517_v3  ;;  %v17306_v3 = vmax.bf16 %v20028_v60, %v2748_v9  ;;  %v20867_v9 = vpack.c.bf16 %v20865_v42, %v20866_v20  ;;  %v20871_v42 = vld [vmem:[#allocation224_spill] sm:$0xff] }
 0x3ee   : > { %5556 = vmatprep.mubr.bf16.mxu0 %v17279_v10  ;;  %6422 = vmatprep.mubr.bf16.mxu1 %v15514_v22  ;;  %v12303_v22 = vld [vmem:[%s19432_s3 + $0x720] ss:$16 sps:$4 sm:$0xff]  }
 0x3ef   : > { %5766 = vmatpush1.bf16.msra.mxu0 %v12303_v22  ;;  %v2756_v38 = vadd.bf16 %v16854_v47, %v20867_v9  ;;  %v17339_v22 = vmax.bf16 %v20028_v60, %v2765_v34 }
 0x3f0   : > { %5767 = vmatprep.subr.bf16.mxu0 %v12308_v41  ;;  %v12314_v41 = vld [vmem:[%s19432_s3 + $0x784] ss:$16 sps:$4 sm:$0xff]  }
 0x3f3   : > { %5768 = vmatpush1.bf16.msra.mxu0 %v12306_v6  ;;  %v20870_v6 = vld [vmem:[#allocation226_spill] sm:$0xff] }
 0x3f4   : > { %5769 = vmatprep.subr.bf16.mxu0 %v12311_v56  ;;  %v20872_v20 = vpack.c.bf16 %v20870_v6, %v20871_v42  ;;  %v20873_v56 = vld [vmem:[#allocation228_spill] sm:$0xff]  ;;  %v20878_v6 = vld [vmem:[#allocation229_spill] sm:$0xff]  ;;  %v20879_v42 = vld [vmem:[#allocation227_spill] sm:$0xff] }
 0x3f5   : > { %5557 = vmatmul.mubr.bf16.gmra.mrb[212].mxu0 %v17306_v3  ;;  %6423 = vmatmul.mubr.bf16.gmra.mrb[212].mxu1 %v15560_v27  ;;  %v17336_v27 = vmax.bf16 %v20028_v60, %v2756_v38  ;;  %v12317_v38 = vld [vmem:[%s19432_s3 + $0x7a4] ss:$16 sps:$4 sm:$0xff]   ;;  %v20874_v17 = vpack.c.bf16 %v15478_v54, %v20873_v56  ;;  %v12318_v54 = vld [vmem:[%s19432_s3 + $0x7c0] ss:$16 sps:$4 sm:$0xff]  }
 0x3f6   : > { %5566 = vmatprep.mubr.bf16.mxu0 %v17309_v57  ;;  %6432 = vmatprep.mubr.bf16.mxu1 %v15557_v59  ;;  %v12309_v59 = vld [vmem:[%s19432_s3 + $0x760] ss:$16 sps:$4 sm:$0xff]   ;;  %v2764_v9 = vadd.bf16 %v16854_v47, %v20872_v20  ;;  %v20880_v20 = vpack.c.bf16 %v20878_v6, %v20879_v42  ;;  %v12324_v6 = vld [vmem:[%s19432_s3 + $0x408] ss:$16 sps:$4 sm:$0xff]  }
 0x3f7   : > { %5770 = vmatpush1.bf16.msra.mxu0 %v12309_v59  ;;  %v2773_v31 = vadd.bf16 %v16815_v48, %v20874_v17  ;;  %v12320_v59 = vld [vmem:[%s19432_s3 + $0x7c4] ss:$16 sps:$4 sm:$0xff]   ;;  %v20881_v56 = vld [vmem:[#allocation233_spill] sm:$0xff]  ;;  %v20882_v17 = vld [vmem:[#allocation231_spill] sm:$0xff] }
 0x3f8   : > { %5771 = vmatprep.subr.bf16.mxu0 %v12314_v41  ;;  %v20876_v41 = vld [vmem:[#allocation239_spill] sm:$0xff] }
 0x3f9   : > { %v17369_v34 = vmax.bf16 %v20028_v60, %v2773_v31  ;;  %v20883_v31 = vpack.c.bf16 %v20881_v56, %v20882_v17  ;;  %v20889_v56 = vld [vmem:[#allocation230_spill] sm:$0xff] }
 0x3fb   : > { %5772 = vmatpush1.bf16.msra.mxu0 %v12312_v49  ;;  %20875 = vst [vmem:[#allocation197_spill] sm:$0xff] %v17369_v34  ;;  %v20877_v49 = vld [vmem:[#allocation242_spill] sm:$0xff] }
 0x3fc   : > { %5773 = vmatprep.subr.bf16.mxu0 %v12317_v38  ;;  %v12323_v38 = vld [vmem:[%s19432_s3 + $0x7e4] ss:$16 sps:$4 sm:$0xff]  }
 0x3fd   : > { %5567 = vmatmul.mubr.bf16.gmra.mrb[216].mxu0 %v17336_v27  ;;  %6433 = vmatmul.mubr.bf16.gmra.mrb[216].mxu1 %v15607_v25  ;;  %v17366_v25 = vmax.bf16 %v20028_v60, %v2764_v9  ;;  %v2772_v9 = vadd.bf16 %v16854_v47, %v20880_v20  ;;  %v20887_v20 = vld [vmem:[#allocation244_spill] sm:$0xff] }
 0x3fe   : > { %5576 = vmatprep.mubr.bf16.mxu0 %v17339_v22  ;;  %6442 = vmatprep.mubr.bf16.mxu1 %v15602_v19  ;;  %v12315_v19 = vld [vmem:[%s19432_s3 + $0x7a0] ss:$16 sps:$4 sm:$0xff]  }
 0x3ff   : > { %5774 = vmatpush1.bf16.msra.mxu0 %v12315_v19  ;;  %v2781_v19 = vadd.bf16 %v16815_v48, %v20883_v31  ;;  %v20891_v31 = vld [vmem:[#allocation67_spill] sm:$0xff] }
 0x400   : > { %5775 = vmatprep.subr.bf16.mxu0 %v12320_v59  ;;  %v17399_v59 = vmax.bf16 %v20028_v60, %v2772_v9 }
 0x401   : > { %v17405_v42 = vmax.bf16 %v20028_v60, %v2781_v19 }
 0x402   : > { %20884 = vst [vmem:[#allocation194_spill] sm:$0xff] %v17399_v59 }
 0x403   : > { %5776 = vmatpush1.bf16.msra.mxu0 %v12318_v54  ;;  %20885 = vst [vmem:[#allocation205_spill] sm:$0xff] %v17405_v42  ;;  %v20886_v54 = vld [vmem:[#allocation18_spill] sm:$0xff] }
 0x404   : > { %5777 = vmatprep.subr.bf16.mxu0 %v12323_v38  ;;  %v20888_v38 = vld [vmem:[#allocation232_spill] sm:$0xff] }
 0x405   : > { %5577 = vmatmul.mubr.bf16.gmra.mrb[220].mxu0 %v17366_v25  ;;  %6443 = vmatmul.mubr.bf16.gmra.mrb[220].mxu1 %v20876_v41  ;;  %v12321_v41 = vld [vmem:[%s19432_s3 + $0x7e0] ss:$16 sps:$4 sm:$0xff]   ;;  %v20890_v9 = vpack.c.bf16 %v20888_v38, %v20889_v56 }
 0x406   : > { %5586 = vmatprep.mubr.bf16.mxu0 %v17369_v34  ;;  %6485 = vmatprep.mubr.bf16.mxu1 %v20877_v49  ;;  %v12326_v49 = vld [vmem:[%s19432_s3 + $0x40c] ss:$16 sps:$4 sm:$0xff]   ;;  %v20897_v38 = vld [vmem:[#allocation246_spill] sm:$0xff] }
 0x407   : > { %6806 = vmatprep.subr.bf16.mxu1 %v12326_v49  ;;  %5778 = vmatpush1.bf16.msra.mxu0 %v12321_v41  ;;  %v2780_v17 = vadd.bf16 %v16854_v47, %v20890_v9  ;;  %v20892_v49 = vld [vmem:[#allocation235_spill] sm:$0xff]  ;;  %v20899_v56 = vld [vmem:[#allocation234_spill] sm:$0xff] }
 0x408   : > { %v20893_v34 = vpack.c.bf16 %v20891_v31, %v20892_v49  ;;  %v20901_v49 = vld [vmem:[#allocation68_spill] sm:$0xff] }
 0x409   : > { %v17420_v41 = vmax.bf16 %v20028_v60, %v2780_v17  ;;  %v12329_v17 = vld [vmem:[%s19432_s3 + $0x42c] ss:$16 sps:$4 sm:$0xff]  }
 0x40a   : > { %v2789_v19 = vadd.bf16 %v16815_v48, %v20893_v34  ;;  %v12327_v34 = vld [vmem:[%s19432_s3 + $0x428] ss:$16 sps:$4 sm:$0xff]  }
 0x40b   : > { %20894 = vst [vmem:[#allocation201_spill] sm:$0xff] %v17420_v41 }
 0x40d   : > { %5587 = vmatmul.mubr.bf16.gmra.mrb[224].mxu0 %v17399_v59  ;;  %6486 = vmatmul.mubr.bf16.vlgmr.msra.gmra.mrb[96].mxu1 %v20886_v54  ;;  %v17423_v54 = vmax.bf16 %v20028_v60, %v2789_v19  ;;  %v20902_v19 = vld [vmem:[#allocation238_spill] sm:$0xff] }
 0x40e   : > { %5596 = vmatprep.mubr.bf16.mxu0 %v17405_v42  ;;  %6495 = vmatprep.mubr.bf16.mxu1 %v20887_v20  ;;  %v20896_v20 = vld [vmem:[#allocation20_spill] sm:$0xff] }
 0x40f   : > { %6807 = vmatpush1.bf16.msra.mxu1 %v12324_v6  ;;  %20895 = vst [vmem:[#allocation203_spill] sm:$0xff] %v17423_v54  ;;  %v20898_v6 = vld [vmem:[#allocation236_spill] sm:$0xff] }
 0x410   : > { %v20900_v9 = vpack.c.bf16 %v20898_v6, %v20899_v56  ;;  %6808 = vmatprep.subr.bf16.mxu1 %v12329_v17  ;;  %v20906_v56 = vld [vmem:[#allocation24_spill] sm:$0xff] }
 0x412   : > { %v2788_v31 = vadd.bf16 %v16854_v47, %v20900_v9  ;;  %v20907_v9 = vld [vmem:[#allocation248_spill] sm:$0xff] }
 0x413   : > { %6809 = vmatpush1.bf16.msra.mxu1 %v12327_v34  ;;  %v20911_v34 = vld [vmem:[#allocation241_spill] sm:$0xff] }
 0x415   : > { %5597 = vmatmul.mubr.bf16.gmra.mrb[228].mxu0 %v17420_v41  ;;  %6496 = vmatmul.mubr.bf16.gmra.mrb[100].mxu1 %v20896_v20  ;;  %v20903_v20 = vpack.c.bf16 %v20901_v49, %v20902_v19  ;;  %v20908_v41 = vld [vmem:[#allocation73_spill] sm:$0xff] }
 0x416   : > { %5606 = vmatprep.mubr.bf16.mxu0 %v17423_v54  ;;  %6505 = vmatprep.mubr.bf16.mxu1 %v20897_v38  ;;  %v17444_v38 = vmax.bf16 %v20028_v60, %v2788_v31  ;;  %v20909_v49 = vld [vmem:[#allocation237_spill] sm:$0xff] }
 0x417   : > { %v2797_v54 = vadd.bf16 %v16815_v48, %v20903_v20  ;;  %v20910_v19 = vpack.c.bf16 %v20908_v41, %v20909_v49  ;;  %v20912_v20 = vld [vmem:[#allocation12_spill] sm:$0xff]  ;;  %v20917_v41 = vld [vmem:[#allocation250_spill] sm:$0xff] }
 0x418   : > { %20904 = vst [vmem:[#allocation200_spill] sm:$0xff] %v17444_v38  ;;  %v20913_v31 = vpack.c.bf16 %v20911_v34, %v20912_v20  ;;  %v20919_v49 = vld [vmem:[#allocation14_spill] sm:$0xff]  ;;  %v20921_v20 = vld [vmem:[#allocation243_spill] sm:$0xff] }
 0x419   : > { %v17447_v6 = vmax.bf16 %v20028_v60, %v2797_v54  ;;  %v2796_v17 = vadd.bf16 %v16854_v47, %v20910_v19 }
 0x41a   : > { %v2805_v42 = vadd.bf16 %v16815_v48, %v20913_v31  ;;  %v20922_v31 = vld [vmem:[#allocation11_spill] sm:$0xff] }
 0x41b   : > { %20905 = vst [vmem:[#allocation212_spill] sm:$0xff] %v17447_v6  ;;  %v17462_v54 = vmax.bf16 %v20028_v60, %v2796_v17  ;;  %v12330_v17 = vld [vmem:[%s19432_s3 + $0x448] ss:$16 sps:$4 sm:$0xff]  }
 0x41d   : > { %5607 = vmatmul.mubr.bf16.gmra.mrb[232].mxu0 %v17444_v38  ;;  %6506 = vmatmul.mubr.bf16.gmra.mrb[104].mxu1 %v20906_v56  ;;  %20914 = vst [vmem:[#allocation208_spill] sm:$0xff] %v17462_v54  ;;  %v17465_v38 = vmax.bf16 %v20028_v60, %v2805_v42  ;;  %v20916_v56 = vld [vmem:[#allocation28_spill] sm:$0xff]  ;;  %v12332_v42 = vld [vmem:[%s19432_s3 + $0x44c] ss:$16 sps:$4 sm:$0xff]  }
 0x41e   : > { %5616 = vmatprep.mubr.bf16.mxu0 %v17447_v6  ;;  %6515 = vmatprep.mubr.bf16.mxu1 %v20907_v9  ;;  %v20918_v9 = vld [vmem:[#allocation240_spill] sm:$0xff] }
 0x41f   : > { %20915 = vst [vmem:[#allocation210_spill] sm:$0xff] %v17465_v38  ;;  %v20920_v19 = vpack.c.bf16 %v20918_v9, %v20919_v49  ;;  %6810 = vmatprep.subr.bf16.mxu1 %v12332_v42  ;;  %v20926_v49 = vld [vmem:[#allocation32_spill] sm:$0xff] }
 0x420   : > { %6811 = vmatpush1.bf16.msra.mxu1 %v12330_v17  ;;  %v20931_v17 = vld [vmem:[#allocation245_spill] sm:$0xff] }
 0x421   : > { %v2804_v34 = vadd.bf16 %v16854_v47, %v20920_v19  ;;  %v20927_v19 = vld [vmem:[#allocation252_spill] sm:$0xff] }
 0x425   : > { %5617 = vmatmul.mubr.bf16.gmra.mrb[236].mxu0 %v17462_v54  ;;  %6516 = vmatmul.mubr.bf16.gmra.mrb[108].mxu1 %v20916_v56  ;;  %v20923_v56 = vpack.c.bf16 %v20921_v20, %v20922_v31  ;;  %v20928_v54 = vld [vmem:[#allocation16_spill] sm:$0xff]  ;;  %v20929_v20 = vld [vmem:[#allocation13_spill] sm:$0xff] }
 0x426   : > { %5626 = vmatprep.mubr.bf16.mxu0 %v17465_v38  ;;  %6525 = vmatprep.mubr.bf16.mxu1 %v20917_v41  ;;  %v17486_v41 = vmax.bf16 %v20028_v60, %v2804_v34  ;;  %v20930_v31 = vpack.c.bf16 %v20928_v54, %v20929_v20  ;;  %v20937_v54 = vld [vmem:[#allocation254_spill] sm:$0xff]  ;;  %v20939_v20 = vld [vmem:[#allocation17_spill] sm:$0xff] }
 0x427   : > { %v2813_v38 = vadd.bf16 %v16815_v48, %v20923_v56  ;;  %v20932_v56 = vld [vmem:[#allocation15_spill] sm:$0xff] }
 0x428   : > { %20924 = vst [vmem:[#allocation207_spill] sm:$0xff] %v17486_v41  ;;  %v2812_v42 = vadd.bf16 %v16854_v47, %v20930_v31  ;;  %v20933_v34 = vpack.c.bf16 %v20931_v17, %v20932_v56  ;;  %v20941_v56 = vld [vmem:[#allocation247_spill] sm:$0xff] }
 0x429   : > { %v17489_v9 = vmax.bf16 %v20028_v60, %v2813_v38 }
 0x42a   : > { %v2821_v6 = vadd.bf16 %v16815_v48, %v20933_v34  ;;  %v17504_v38 = vmax.bf16 %v20028_v60, %v2812_v42  ;;  %v12333_v42 = vld [vmem:[%s19432_s3 + $0x468] ss:$16 sps:$4 sm:$0xff]  }
 0x42b   : > { %20925 = vst [vmem:[#allocation217_spill] sm:$0xff] %v17489_v9  ;;  %v20942_v34 = vld [vmem:[#allocation19_spill] sm:$0xff] }
 0x42c   : > { %20934 = vst [vmem:[#allocation213_spill] sm:$0xff] %v17504_v38 }
 0x42d   : > { %5627 = vmatmul.mubr.bf16.gmra.mrb[240].mxu0 %v17486_v41  ;;  %6526 = vmatmul.mubr.bf16.gmra.mrb[112].mxu1 %v20926_v49  ;;  %v17507_v41 = vmax.bf16 %v20028_v60, %v2821_v6  ;;  %v20936_v49 = vld [vmem:[#allocation36_spill] sm:$0xff]  ;;  %v12335_v6 = vld [vmem:[%s19432_s3 + $0x46c] ss:$16 sps:$4 sm:$0xff]  }
 0x42e   : > { %5636 = vmatprep.mubr.bf16.mxu0 %v17489_v9  ;;  %6535 = vmatprep.mubr.bf16.mxu1 %v20927_v19  ;;  %v20938_v19 = vld [vmem:[#allocation22_spill] sm:$0xff] }
 0x42f   : > { %20935 = vst [vmem:[#allocation216_spill] sm:$0xff] %v17507_v41  ;;  %v20940_v31 = vpack.c.bf16 %v20938_v19, %v20939_v20  ;;  %6812 = vmatprep.subr.bf16.mxu1 %v12335_v6  ;;  %v20946_v20 = vld [vmem:[#allocation41_spill] sm:$0xff] }
 0x430   : > { %6813 = vmatpush1.bf16.msra.mxu1 %v12333_v42  ;;  %v20951_v42 = vld [vmem:[#allocation249_spill] sm:$0xff] }
 0x431   : > { %v2820_v17 = vadd.bf16 %v16854_v47, %v20940_v31  ;;  %v20947_v31 = vld [vmem:[#allocation256_spill] sm:$0xff] }
 0x435   : > { %5637 = vmatmul.mubr.bf16.gmra.mrb[244].mxu0 %v17504_v38  ;;  %6536 = vmatmul.mubr.bf16.gmra.mrb[116].mxu1 %v20936_v49  ;;  %v20943_v49 = vpack.c.bf16 %v20941_v56, %v20942_v34  ;;  %v20948_v38 = vld [vmem:[#allocation26_spill] sm:$0xff]  ;;  %v20949_v56 = vld [vmem:[#allocation21_spill] sm:$0xff] }
 0x436   : > { %5646 = vmatprep.mubr.bf16.mxu0 %v17507_v41  ;;  %6545 = vmatprep.mubr.bf16.mxu1 %v20937_v54  ;;  %v17528_v54 = vmax.bf16 %v20028_v60, %v2820_v17  ;;  %v20950_v34 = vpack.c.bf16 %v20948_v38, %v20949_v56  ;;  %v20957_v38 = vld [vmem:[#allocation30_spill] sm:$0xff] }
 0x437   : > { %v2829_v41 = vadd.bf16 %v16815_v48, %v20943_v49  ;;  %v20952_v49 = vld [vmem:[#allocation23_spill] sm:$0xff] }
 0x438   : > { %20944 = vst [vmem:[#allocation135_spill] sm:$0xff] %v17528_v54  ;;  %v2828_v6 = vadd.bf16 %v16854_v47, %v20950_v34  ;;  %v20953_v17 = vpack.c.bf16 %v20951_v42, %v20952_v49  ;;  %v20960_v42 = vld [vmem:[#allocation258_spill] sm:$0xff]  ;;  %v20961_v49 = vld [vmem:[#allocation251_spill] sm:$0xff] }
 0x439   : > { %v17531_v19 = vmax.bf16 %v20028_v60, %v2829_v41 }
 0x43a   : > { %v2837_v9 = vadd.bf16 %v16815_v48, %v20953_v17  ;;  %v17546_v41 = vmax.bf16 %v20028_v60, %v2828_v6  ;;  %v12336_v6 = vld [vmem:[%s19432_s3 + $0x488] ss:$16 sps:$4 sm:$0xff]  }
 0x43b   : > { %20945 = vst [vmem:[#allocation223_spill] sm:$0xff] %v17531_v19  ;;  %v20962_v17 = vld [vmem:[#allocation27_spill] sm:$0xff] }
 0x43c   : > { %20954 = vst [vmem:[#allocation219_spill] sm:$0xff] %v17546_v41 }
 0x43d   : > { %5647 = vmatmul.mubr.bf16.gmra.mrb[248].mxu0 %v17528_v54  ;;  %6546 = vmatmul.mubr.bf16.gmra.mrb[120].mxu1 %v20946_v20  ;;  %v17549_v54 = vmax.bf16 %v20028_v60, %v2837_v9  ;;  %v20956_v20 = vld [vmem:[#allocation46_spill] sm:$0xff]  ;;  %v12338_v9 = vld [vmem:[%s19432_s3 + $0x48c] ss:$16 sps:$4 sm:$0xff]  }
 0x43e   : > { %5656 = vmatprep.mubr.bf16.mxu0 %v17531_v19  ;;  %6555 = vmatprep.mubr.bf16.mxu1 %v20947_v31  ;;  %v20958_v31 = vld [vmem:[#allocation25_spill] sm:$0xff] }
 0x43f   : > { %20955 = vst [vmem:[#allocation222_spill] sm:$0xff] %v17549_v54  ;;  %v20959_v56 = vpack.c.bf16 %v20957_v38, %v20958_v31  ;;  %6814 = vmatprep.subr.bf16.mxu1 %v12338_v9  ;;  %v20972_v9 = vld [vmem:[#allocation31_spill] sm:$0xff] }
 0x440   : > { %6815 = vmatpush1.bf16.msra.mxu1 %v12336_v6  ;;  %v20971_v6 = vld [vmem:[#allocation253_spill] sm:$0xff] }
 0x441   : > { %v2836_v34 = vadd.bf16 %v16854_v47, %v20959_v56  ;;  %v20966_v56 = vld [vmem:[#allocation55_spill] sm:$0xff] }
 0x443   : > { %v17570_v38 = vmax.bf16 %v20028_v60, %v2836_v34  ;;  %v20973_v34 = vpack.c.bf16 %v20971_v6, %v20972_v9  ;;  %v20980_v6 = vld [vmem:[#allocation262_spill] sm:$0xff]  ;;  %v12341_v9 = vld [vmem:[%s19432_s3 + $0x4ac] ss:$16 sps:$4 sm:$0xff]  }
 0x444   : > { %6816 = vmatprep.subr.bf16.mxu1 %v12341_v9  ;;  %v20992_v9 = vld [vmem:[#allocation40_spill] sm:$0xff] }
 0x445   : > { %5657 = vmatmul.mubr.bf16.gmra.mrb[252].mxu0 %v17546_v41  ;;  %6556 = vmatmul.mubr.bf16.gmra.mrb[124].mxu1 %v20956_v20  ;;  %v20963_v20 = vpack.c.bf16 %v20961_v49, %v20962_v17  ;;  %20964 = vst [vmem:[#allocation218_spill] sm:$0xff] %v17570_v38  ;;  %v20968_v41 = vld [vmem:[#allocation29_spill] sm:$0xff]  ;;  %v20970_v17 = vld [vmem:[#allocation260_spill] sm:$0xff] }
 0x446   : > { %5666 = vmatprep.mubr.bf16.mxu0 %v17549_v54  ;;  %6565 = vmatprep.mubr.bf16.mxu1 %v20960_v42  ;;  %v20967_v42 = vld [vmem:[#allocation34_spill] sm:$0xff] }
 0x447   : > { %v2845_v54 = vadd.bf16 %v16815_v48, %v20963_v20  ;;  %v20969_v19 = vpack.c.bf16 %v20967_v42, %v20968_v41  ;;  %v2853_v20 = vadd.bf16 %v16815_v48, %v20973_v34  ;;  %v20978_v41 = vld [vmem:[#allocation33_spill] sm:$0xff]  ;;  %v20981_v34 = vld [vmem:[#allocation255_spill] sm:$0xff] }
 0x449   : > { %v17573_v31 = vmax.bf16 %v20028_v60, %v2845_v54  ;;  %v2844_v49 = vadd.bf16 %v16854_v47, %v20969_v19  ;;  %v20977_v19 = vld [vmem:[#allocation38_spill] sm:$0xff] }
 0x44a   : > { %v20979_v42 = vpack.c.bf16 %v20977_v19, %v20978_v41 }
 0x44b   : > { %20965 = vst [vmem:[#allocation225_spill] sm:$0xff] %v17573_v31  ;;  %v17588_v54 = vmax.bf16 %v20028_v60, %v2844_v49  ;;  %v12339_v49 = vld [vmem:[%s19432_s3 + $0x4a8] ss:$16 sps:$4 sm:$0xff]  }
 0x44c   : > { %6817 = vmatpush1.bf16.msra.mxu1 %v12339_v49  ;;  %v20991_v49 = vld [vmem:[#allocation257_spill] sm:$0xff] }
 0x44d   : > { %5667 = vmatmul.mubr.bf16.gmra.mrb[0].mxu0 %v17570_v38  ;;  %6566 = vmatmul.mubr.bf16.gmra.mrb[128].mxu1 %v20966_v56  ;;  %20974 = vst [vmem:[#allocation226_spill] sm:$0xff] %v17588_v54  ;;  %v17591_v38 = vmax.bf16 %v20028_v60, %v2853_v20  ;;  %v20976_v56 = vld [vmem:[#allocation63_spill] sm:$0xff] }
 0x44e   : > { %5676 = vmatprep.mubr.bf16.mxu0 %v17573_v31  ;;  %6575 = vmatprep.mubr.bf16.mxu1 %v20970_v17  ;;  %v2852_v17 = vadd.bf16 %v16854_v47, %v20979_v42  ;;  %v20982_v20 = vld [vmem:[#allocation35_spill] sm:$0xff]  ;;  %v20986_v42 = vld [vmem:[#allocation70_spill] sm:$0xff] }
 0x44f   : > { %20975 = vst [vmem:[#allocation224_spill] sm:$0xff] %v17591_v38 }
 0x450   : > { %v17612_v19 = vmax.bf16 %v20028_v60, %v2852_v17  ;;  %v20993_v17 = vpack.c.bf16 %v20991_v49, %v20992_v9  ;;  %v21000_v9 = vld [vmem:[#allocation266_spill] sm:$0xff] }
 0x452   : > { %20984 = vst [vmem:[#allocation228_spill] sm:$0xff] %v17612_v19 }
 0x455   : > { %5677 = vmatmul.mubr.bf16.gmra.mrb[4].mxu0 %v17588_v54  ;;  %6576 = vmatmul.mubr.bf16.gmra.mrb[132].mxu1 %v20976_v56  ;;  %v20983_v56 = vpack.c.bf16 %v20981_v34, %v20982_v20  ;;  %v20988_v54 = vld [vmem:[#allocation37_spill] sm:$0xff]  ;;  %v20990_v20 = vld [vmem:[#allocation264_spill] sm:$0xff] }
 0x456   : > { %5686 = vmatprep.mubr.bf16.mxu0 %v17591_v38  ;;  %6585 = vmatprep.mubr.bf16.mxu1 %v20980_v6  ;;  %v20987_v6 = vld [vmem:[#allocation43_spill] sm:$0xff] }
 0x457   : > { %v2861_v38 = vadd.bf16 %v16815_v48, %v20983_v56  ;;  %v20989_v31 = vpack.c.bf16 %v20987_v6, %v20988_v54  ;;  %v2869_v56 = vadd.bf16 %v16815_v48, %v20993_v17  ;;  %v20996_v54 = vld [vmem:[#allocation76_spill] sm:$0xff]  ;;  %v20997_v6 = vld [vmem:[#allocation49_spill] sm:$0xff] }
 0x458   : > { %v12347_v17 = vld [vmem:[%s19432_s3 + $0x4ec] ss:$16 sps:$4 sm:$0xff]  }
 0x459   : > { %v17615_v41 = vmax.bf16 %v20028_v60, %v2861_v38  ;;  %v2860_v34 = vadd.bf16 %v16854_v47, %v20989_v31  ;;  %v12342_v31 = vld [vmem:[%s19432_s3 + $0x4c8] ss:$16 sps:$4 sm:$0xff]  }
 0x45b   : > { %20985 = vst [vmem:[#allocation239_spill] sm:$0xff] %v17615_v41  ;;  %v17630_v38 = vmax.bf16 %v20028_v60, %v2860_v34  ;;  %v20998_v34 = vld [vmem:[#allocation42_spill] sm:$0xff] }
 0x45d   : > { %5687 = vmatmul.mubr.bf16.gmra.mrb[8].mxu0 %v17612_v19  ;;  %6586 = vmatmul.mubr.bf16.gmra.mrb[136].mxu1 %v20986_v42  ;;  %20994 = vst [vmem:[#allocation242_spill] sm:$0xff] %v17630_v38  ;;  %v17633_v19 = vmax.bf16 %v20028_v60, %v2869_v56  ;;  %v12344_v42 = vld [vmem:[%s19432_s3 + $0x4cc] ss:$16 sps:$4 sm:$0xff]  }
 0x45e   : > { %5696 = vmatprep.mubr.bf16.mxu0 %v17615_v41  ;;  %6595 = vmatprep.mubr.bf16.mxu1 %v20990_v20  ;;  %v20999_v20 = vpack.c.bf16 %v20997_v6, %v20998_v34  ;;  %v21001_v56 = vld [vmem:[#allocation259_spill] sm:$0xff] }
 0x45f   : > { %20995 = vst [vmem:[#allocation229_spill] sm:$0xff] %v17633_v19  ;;  %6818 = vmatprep.subr.bf16.mxu1 %v12344_v42  ;;  %v12350_v34 = vld [vmem:[%s19432_s3 + $0x50c] ss:$16 sps:$4 sm:$0xff]  }
 0x460   : > { %v2868_v49 = vadd.bf16 %v16854_v47, %v20999_v20  ;;  %6819 = vmatpush1.bf16.msra.mxu1 %v12342_v31  ;;  %v21007_v31 = vld [vmem:[#allocation59_spill] sm:$0xff]  ;;  %v21008_v20 = vld [vmem:[#allocation48_spill] sm:$0xff] }
 0x461   : > { %6820 = vmatprep.subr.bf16.mxu1 %v12347_v17  ;;  %v12353_v17 = vld [vmem:[%s19432_s3 + $0x52c] ss:$16 sps:$4 sm:$0xff]  }
 0x462   : > { %v17660_v6 = vmax.bf16 %v20028_v60, %v2868_v49  ;;  %v21009_v49 = vpack.c.bf16 %v21007_v31, %v21008_v20 }
 0x464   : > { %21004 = vst [vmem:[#allocation227_spill] sm:$0xff] %v17660_v6 }
 0x465   : > { %5697 = vmatmul.mubr.bf16.gmra.mrb[12].mxu0 %v17630_v38  ;;  %6596 = vmatmul.mubr.bf16.gmra.mrb[140].mxu1 %v20996_v54  ;;  %v21002_v38 = vld [vmem:[#allocation45_spill] sm:$0xff] }
 0x466   : > { %5706 = vmatprep.mubr.bf16.mxu0 %v17633_v19  ;;  %6605 = vmatprep.mubr.bf16.mxu1 %v21000_v9  ;;  %v21003_v41 = vpack.c.bf16 %v21001_v56, %v21002_v38  ;;  %v12345_v54 = vld [vmem:[%s19432_s3 + $0x4e8] ss:$16 sps:$4 sm:$0xff]  }
 0x467   : > { %6821 = vmatpush1.bf16.msra.mxu1 %v12345_v54  ;;  %v21006_v38 = vld [vmem:[#allocation82_spill] sm:$0xff]  ;;  %v21010_v9 = vld [vmem:[#allocation268_spill] sm:$0xff]  ;;  %v21011_v56 = vld [vmem:[#allocation261_spill] sm:$0xff] }
 0x468   : > { %v2877_v59 = vadd.bf16 %v16815_v48, %v21003_v41  ;;  %v12348_v41 = vld [vmem:[%s19432_s3 + $0x508] ss:$16 sps:$4 sm:$0xff]   ;;  %6822 = vmatprep.subr.bf16.mxu1 %v12350_v34  ;;  %v2583_v34 = vcombine.high %v16763_v51, %v16763_v51 }
 0x469   : > { %v21012_v54 = vld [vmem:[#allocation53_spill] sm:$0xff] }
 0x46a   : > { %v17663_v42 = vmax.bf16 %v20028_v60, %v2877_v59  ;;  %v2876_v59 = vadd.bf16 %v16854_v47, %v21009_v49  ;;  %v21015_v49 = vld [vmem:[#allocation88_spill] sm:$0xff]  ;;  %v21017_v51 = vld [vmem:[#allocation57_spill] sm:$0xff] }
 0x46b   : > { %6823 = vmatpush1.bf16.msra.mxu1 %v12348_v41  ;;  %v12354_v41 = vld [vmem:[%s19432_s3 + $0x548] ss:$16 sps:$4 sm:$0xff]  }
 0x46c   : > { %21005 = vst [vmem:[#allocation233_spill] sm:$0xff] %v17663_v42  ;;  %6824 = vmatprep.subr.bf16.mxu1 %v12353_v17  ;;  %v17690_v31 = vmax.bf16 %v20028_v60, %v2876_v59  ;;  %v21016_v59 = vld [vmem:[#allocation66_spill] sm:$0xff] }
 0x46d   : > { %5707 = vmatmul.mubr.bf16.gmra.mrb[16].mxu0 %v17660_v6  ;;  %6606 = vmatmul.mubr.bf16.gmra.mrb[144].mxu1 %v21006_v38  ;;  %v21013_v6 = vpack.c.bf16 %v21011_v56, %v21012_v54  ;;  %v12351_v38 = vld [vmem:[%s19432_s3 + $0x528] ss:$16 sps:$4 sm:$0xff]   ;;  %v12359_v56 = vld [vmem:[%s19432_s3 + $0x56c] ss:$16 sps:$4 sm:$0xff]   ;;  %v2634_v54 = vpack.i.b16 %v2583_v34, %v2583_v34 }
 0x46e   : > { %5716 = vmatprep.mubr.bf16.mxu0 %v17663_v42  ;;  %6615 = vmatprep.mubr.bf16.mxu1 %v21010_v9  ;;  %21014 = vst [vmem:[#allocation231_spill] sm:$0xff] %v17690_v31  ;;  %v21018_v9 = vpack.c.bf16 %v21016_v59, %v21017_v51  ;;  %v21019_v17 = vld [vmem:[#allocation270_spill] sm:$0xff] }
 0x46f   : > { %v2885_v19 = vadd.bf16 %v16815_v48, %v21013_v6  ;;  %6825 = vmatpush1.bf16.msra.mxu1 %v12351_v38  ;;  %v12356_v6 = vld [vmem:[%s19432_s3 + $0x54c] ss:$16 sps:$4 sm:$0xff]   ;;  %v12357_v59 = vld [vmem:[%s19432_s3 + $0x568] ss:$16 sps:$4 sm:$0xff]  }
 0x470   : > { %6826 = vmatprep.subr.bf16.mxu1 %v12356_v6  ;;  %v21020_v38 = vld [vmem:[#allocation263_spill] sm:$0xff]  ;;  %v2581_v6 = vcombine.high %v16804_v45, %v16804_v45  ;;  %v21026_v45 = vld [vmem:[#allocation72_spill] sm:$0xff] }
 0x471   : > { %v17695_v20 = vmax.bf16 %v20028_v60, %v2885_v19  ;;  %v2884_v19 = vadd.bf16 %v16854_v47, %v21018_v9  ;;  %v17727_v9 = vrot.slane %v2634_v54, %v20331_v44  ;;  %v21029_v54 = vld [vmem:[#allocation272_spill] sm:$0xff] }
 0x473   : > { %6827 = vmatpush1.bf16.msra.mxu1 %v12354_v41  ;;  %v17722_v51 = vmax.bf16 %v20028_v60, %v2884_v19  ;;  %v21027_v41 = vld [vmem:[#allocation65_spill] sm:$0xff] }
 0x474   : > { %6828 = vmatprep.subr.bf16.mxu1 %v12359_v56  ;;  %v21028_v19 = vpack.c.bf16 %v21026_v45, %v21027_v41  ;;  %v2627_v56 = vpack.i.b16 %v2581_v6, %v2581_v6  ;;  %v12363_v45 = vld [vmem:[%s19432_s3 + $0x5a8] ss:$16 sps:$4 sm:$0xff]  }
 0x475   : > { %5717 = vmatmul.mubr.bf16.gmra.mrb[20].mxu0 %v17690_v31  ;;  %6616 = vmatmul.mubr.bf16.gmra.mrb[148].mxu1 %v21015_v49  ;;  %v21021_v31 = vld [vmem:[#allocation61_spill] sm:$0xff]  ;;  %21023 = vst [vmem:[#allocation18_spill] sm:$0xff] %v17722_v51  ;;  %v21035_v41 = vld [vmem:[#allocation100_spill] sm:$0xff] }
 0x476   : > { %5726 = vmatprep.mubr.bf16.mxu0 %v17695_v20  ;;  %6625 = vmatprep.mubr.bf16.mxu1 %v21019_v17  ;;  %v21022_v42 = vpack.c.bf16 %v21020_v38, %v21021_v31  ;;  %v21025_v31 = vld [vmem:[#allocation94_spill] sm:$0xff]  ;;  %v2892_v17 = vadd.bf16 %v16854_v47, %v21028_v19  ;;  %v12365_v38 = vld [vmem:[%s19432_s3 + $0x5ac] ss:$16 sps:$4 sm:$0xff]   ;;  %v17760_v6 = vrot.slane %v2627_v56, %v20331_v44  ;;  %v21036_v19 = vld [vmem:[#allocation80_spill] sm:$0xff] }
 0x477   : > { %6829 = vmatpush1.bf16.msra.mxu1 %v12357_v59  ;;  %v21031_v59 = vld [vmem:[#allocation69_spill] sm:$0xff] }
 0x478   : > { %v2893_v49 = vadd.bf16 %v16815_v48, %v21022_v42  ;;  %v12362_v48 = vld [vmem:[%s19432_s3 + $0x58c] ss:$16 sps:$4 sm:$0xff]   ;;  %v12360_v42 = vld [vmem:[%s19432_s3 + $0x588] ss:$16 sps:$4 sm:$0xff]   ;;  %v17757_v47 = vmax.bf16 %v20028_v60, %v2892_v17 }
 0x479   : > { %6830 = vmatprep.subr.bf16.mxu1 %v12362_v48  ;;  %v21037_v17 = vld [vmem:[#allocation71_spill] sm:$0xff] }
 0x47a   : > { %v17730_v34 = vmax.bf16 %v20028_v60, %v2893_v49  ;;  %v21030_v49 = vld [vmem:[#allocation265_spill] sm:$0xff]  ;;  %21033 = vst [vmem:[#allocation232_spill] sm:$0xff] %v17757_v47  ;;  %v21038_v56 = vpack.c.bf16 %v21036_v19, %v21037_v17  ;;  %v21045_v17 = vld [vmem:[#allocation110_spill] sm:$0xff] }
 0x47b   : > { %6831 = vmatpush1.bf16.msra.mxu1 %v12360_v42  ;;  %v12366_v42 = vld [vmem:[%s19432_s3 + $0x5c8] ss:$16 sps:$4 sm:$0xff]  }
 0x47c   : > { %21024 = vst [vmem:[#allocation244_spill] sm:$0xff] %v17730_v34  ;;  %6832 = vmatprep.subr.bf16.mxu1 %v12365_v38  ;;  %v21039_v38 = vld [vmem:[#allocation274_spill] sm:$0xff] }
 0x47d   : > { %5727 = vmatmul.mubr.bf16.gmra.mrb[24].mxu0 %v17722_v51  ;;  %6626 = vmatmul.mubr.bf16.gmra.mrb[152].mxu1 %v21025_v31  ;;  %v21032_v51 = vpack.c.bf16 %v21030_v49, %v21031_v59  ;;  %v12371_v49 = vld [vmem:[%s19432_s3 + $0x5ec] ss:$16 sps:$4 sm:$0xff]  }
 0x47e   : > { %5736 = vmatprep.mubr.bf16.mxu0 %v17730_v34  ;;  %6635 = vmatprep.mubr.bf16.mxu1 %v21029_v54  ;;  %v2646_v54 = vadd.bf16 %v17760_v6, %v21038_v56  ;;  %v21040_v59 = vld [vmem:[#allocation267_spill] sm:$0xff]  ;;  %v21046_v56 = vld [vmem:[#allocation86_spill] sm:$0xff] }
 0x47f   : > { %v2647_v31 = vadd.bf16 %v17727_v9, %v21032_v51  ;;  %6833 = vmatpush1.bf16.msra.mxu1 %v12363_v45  ;;  %v12368_v51 = vld [vmem:[%s19432_s3 + $0x5cc] ss:$16 sps:$4 sm:$0xff]  }
 0x480   : > { %6834 = vmatprep.subr.bf16.mxu1 %v12368_v51  ;;  %v17790_v19 = vmax.bf16 %v20028_v60, %v2646_v54  ;;  %v21051_v54 = vld [vmem:[#allocation81_spill] sm:$0xff] }
 0x481   : > { %v17763_v48 = vmax.bf16 %v20028_v60, %v2647_v31  ;;  %v21041_v31 = vld [vmem:[#allocation75_spill] sm:$0xff] }
 0x482   : > { %v21042_v45 = vpack.c.bf16 %v21040_v59, %v21041_v31  ;;  %21043 = vst [vmem:[#allocation67_spill] sm:$0xff] %v17790_v19  ;;  %v21049_v31 = vld [vmem:[#allocation275_spill] sm:$0xff] }
 0x483   : > { %21034 = vst [vmem:[#allocation230_spill] sm:$0xff] %v17763_v48  ;;  %6835 = vmatpush1.bf16.msra.mxu1 %v12366_v42  ;;  %v21047_v42 = vld [vmem:[#allocation78_spill] sm:$0xff] }
 0x484   : > { %6836 = vmatprep.subr.bf16.mxu1 %v12371_v49  ;;  %v21050_v49 = vld [vmem:[#allocation269_spill] sm:$0xff] }
 0x485   : > { %5737 = vmatmul.mubr.bf16.gmra.mrb[28].mxu0 %v17757_v47  ;;  %6636 = vmatmul.mubr.bf16.gmra.mrb[156].mxu1 %v21035_v41  ;;  %v2655_v47 = vadd.bf16 %v17727_v9, %v21042_v45  ;;  %v12369_v41 = vld [vmem:[%s19432_s3 + $0x5e8] ss:$16 sps:$4 sm:$0xff]   ;;  %v21052_v45 = vpack.c.bf16 %v21050_v49, %v21051_v54 }
 0x486   : > { %5779 = vmatprep.mubr.bf16.mxu0 %v17763_v48  ;;  %6645 = vmatprep.mubr.bf16.mxu1 %v21039_v38  ;;  %v21048_v38 = vpack.c.bf16 %v21046_v56, %v21047_v42  ;;  %v21056_v56 = vld [vmem:[#allocation92_spill] sm:$0xff]  ;;  %v21060_v54 = vld [vmem:[#allocation271_spill] sm:$0xff] }
 0x487   : > { %v17793_v51 = vmax.bf16 %v20028_v60, %v2655_v47  ;;  %6837 = vmatpush1.bf16.msra.mxu1 %v12369_v41  ;;  %v2663_v47 = vadd.bf16 %v17727_v9, %v21052_v45  ;;  %v21057_v42 = vld [vmem:[#allocation84_spill] sm:$0xff]  ;;  %v21061_v45 = vld [vmem:[#allocation87_spill] sm:$0xff] }
 0x488   : > { %v2654_v59 = vadd.bf16 %v17760_v6, %v21048_v38  ;;  %v21058_v38 = vpack.c.bf16 %v21056_v56, %v21057_v42  ;;  %v21059_v49 = vld [vmem:[#allocation112_spill] sm:$0xff]  ;;  %v21066_v56 = vld [vmem:[#allocation98_spill] sm:$0xff] }
 0x489   : > { %21044 = vst [vmem:[#allocation235_spill] sm:$0xff] %v17793_v51  ;;  %v21067_v42 = vld [vmem:[#allocation90_spill] sm:$0xff] }
 0x48a   : > { %v17808_v41 = vmax.bf16 %v20028_v60, %v2654_v59  ;;  %v21062_v59 = vpack.c.bf16 %v21060_v54, %v21061_v45  ;;  %v21069_v54 = vld [vmem:[#allocation118_spill] sm:$0xff]  ;;  %v21070_v45 = vld [vmem:[#allocation273_spill] sm:$0xff] }
 0x48c   : > { %21053 = vst [vmem:[#allocation20_spill] sm:$0xff] %v17808_v41 }
 0x48d   : > { %5780 = vmatmul.mubr.bf16.vlgmr.msra.gmra.mrb[160].mxu0 %v17790_v19  ;;  %6646 = vmatmul.mubr.bf16.gmra.mrb[160].mxu1 %v21045_v17  ;;  %v17811_v19 = vmax.bf16 %v20028_v60, %v2663_v47  ;;  %v21055_v17 = vld [vmem:[#allocation83_spill] sm:$0xff] }
 0x48e   : > { %5789 = vmatprep.mubr.bf16.mxu0 %v17793_v51  ;;  %6655 = vmatprep.mubr.bf16.mxu1 %v21049_v31  ;;  %v2662_v31 = vadd.bf16 %v17760_v6, %v21058_v38  ;;  %v2671_v51 = vadd.bf16 %v17727_v9, %v21062_v59  ;;  %v21068_v38 = vpack.c.bf16 %v21066_v56, %v21067_v42  ;;  %v21071_v59 = vld [vmem:[#allocation93_spill] sm:$0xff]  ;;  %v21076_v56 = vld [vmem:[#allocation104_spill] sm:$0xff] }
 0x48f   : > { %21054 = vst [vmem:[#allocation246_spill] sm:$0xff] %v17811_v19  ;;  %v21077_v42 = vld [vmem:[#allocation96_spill] sm:$0xff] }
 0x490   : > { %v17826_v47 = vmax.bf16 %v20028_v60, %v2662_v31  ;;  %v21072_v31 = vpack.c.bf16 %v21070_v45, %v21071_v59  ;;  %v21079_v45 = vld [vmem:[#allocation123_spill] sm:$0xff]  ;;  %v21080_v59 = vld [vmem:[#allocation106_spill] sm:$0xff] }
 0x492   : > { %21063 = vst [vmem:[#allocation236_spill] sm:$0xff] %v17826_v47 }
 0x495   : > { %5790 = vmatmul.mubr.bf16.gmra.mrb[164].mxu0 %v17808_v41  ;;  %6656 = vmatmul.mubr.bf16.gmra.mrb[164].mxu1 %v21055_v17  ;;  %v17829_v41 = vmax.bf16 %v20028_v60, %v2671_v51  ;;  %v21065_v17 = vld [vmem:[#allocation89_spill] sm:$0xff] }
 0x496   : > { %5799 = vmatprep.mubr.bf16.mxu0 %v17811_v19  ;;  %6665 = vmatprep.mubr.bf16.mxu1 %v21059_v49  ;;  %v2670_v49 = vadd.bf16 %v17760_v6, %v21068_v38  ;;  %v2679_v19 = vadd.bf16 %v17727_v9, %v21072_v31  ;;  %v21078_v38 = vpack.c.bf16 %v21076_v56, %v21077_v42  ;;  %v21081_v31 = vld [vmem:[#allocation99_spill] sm:$0xff]  ;;  %v21087_v42 = vld [vmem:[#allocation102_spill] sm:$0xff] }
 0x497   : > { %21064 = vst [vmem:[#allocation234_spill] sm:$0xff] %v17829_v41  ;;  %v21086_v56 = vld [vmem:[#allocation79_spill] sm:$0xff] }
 0x498   : > { %v17844_v51 = vmax.bf16 %v20028_v60, %v2670_v49  ;;  %v21082_v49 = vpack.c.bf16 %v21080_v59, %v21081_v31  ;;  %v21089_v59 = vld [vmem:[#allocation58_spill] sm:$0xff]  ;;  %v21090_v31 = vld [vmem:[#allocation116_spill] sm:$0xff] }
 0x49a   : > { %21073 = vst [vmem:[#allocation68_spill] sm:$0xff] %v17844_v51 }
 0x49d   : > { %5800 = vmatmul.mubr.bf16.gmra.mrb[168].mxu0 %v17826_v47  ;;  %6666 = vmatmul.mubr.bf16.gmra.mrb[168].mxu1 %v21065_v17  ;;  %v17847_v47 = vmax.bf16 %v20028_v60, %v2679_v19  ;;  %v21075_v17 = vld [vmem:[#allocation95_spill] sm:$0xff] }
 0x49e   : > { %5809 = vmatprep.mubr.bf16.mxu0 %v17829_v41  ;;  %6675 = vmatprep.mubr.bf16.mxu1 %v21069_v54  ;;  %v2678_v54 = vadd.bf16 %v17760_v6, %v21078_v38  ;;  %v2687_v41 = vadd.bf16 %v17727_v9, %v21082_v49  ;;  %v21088_v38 = vpack.c.bf16 %v21086_v56, %v21087_v42  ;;  %v21091_v49 = vld [vmem:[#allocation108_spill] sm:$0xff]  ;;  %v21096_v56 = vld [vmem:[#allocation105_spill] sm:$0xff] }
 0x49f   : > { %21074 = vst [vmem:[#allocation238_spill] sm:$0xff] %v17847_v47  ;;  %v21097_v42 = vld [vmem:[#allocation85_spill] sm:$0xff] }
 0x4a0   : > { %v17862_v19 = vmax.bf16 %v20028_v60, %v2678_v54  ;;  %v21092_v54 = vpack.c.bf16 %v21090_v31, %v21091_v49  ;;  %v21099_v31 = vld [vmem:[#allocation62_spill] sm:$0xff] }
 0x4a1   : > { %v21100_v49 = vld [vmem:[#allocation122_spill] sm:$0xff] }
 0x4a2   : > { %21083 = vst [vmem:[#allocation24_spill] sm:$0xff] %v17862_v19 }
 0x4a5   : > { %5810 = vmatmul.mubr.bf16.gmra.mrb[172].mxu0 %v17844_v51  ;;  %6676 = vmatmul.mubr.bf16.gmra.mrb[172].mxu1 %v21075_v17  ;;  %v17865_v51 = vmax.bf16 %v20028_v60, %v2687_v41  ;;  %v21085_v17 = vld [vmem:[#allocation101_spill] sm:$0xff] }
 0x4a6   : > { %5819 = vmatprep.mubr.bf16.mxu0 %v17847_v47  ;;  %6685 = vmatprep.mubr.bf16.mxu1 %v21079_v45  ;;  %v2686_v45 = vadd.bf16 %v17760_v6, %v21088_v38  ;;  %v2695_v47 = vadd.bf16 %v17727_v9, %v21092_v54  ;;  %v21098_v38 = vpack.c.bf16 %v21096_v56, %v21097_v42  ;;  %v21101_v54 = vld [vmem:[#allocation114_spill] sm:$0xff]  ;;  %v21106_v56 = vld [vmem:[#allocation111_spill] sm:$0xff] }
 0x4a7   : > { %21084 = vst [vmem:[#allocation248_spill] sm:$0xff] %v17865_v51  ;;  %v21107_v42 = vld [vmem:[#allocation91_spill] sm:$0xff] }
 0x4a8   : > { %v17880_v41 = vmax.bf16 %v20028_v60, %v2686_v45  ;;  %v21102_v45 = vpack.c.bf16 %v21100_v49, %v21101_v54  ;;  %v21109_v49 = vld [vmem:[#allocation60_spill] sm:$0xff]  ;;  %v21110_v54 = vld [vmem:[#allocation127_spill] sm:$0xff] }
 0x4aa   : > { %21093 = vst [vmem:[#allocation73_spill] sm:$0xff] %v17880_v41 }
 0x4ad   : > { %5820 = vmatmul.mubr.bf16.gmra.mrb[176].mxu0 %v17862_v19  ;;  %6686 = vmatmul.mubr.bf16.gmra.mrb[176].mxu1 %v21085_v17  ;;  %v17883_v19 = vmax.bf16 %v20028_v60, %v2695_v47  ;;  %v21095_v17 = vld [vmem:[#allocation107_spill] sm:$0xff] }
 0x4ae   : > { %5829 = vmatprep.mubr.bf16.mxu0 %v17865_v51  ;;  %6695 = vmatprep.mubr.bf16.mxu1 %v21089_v59  ;;  %v2694_v59 = vadd.bf16 %v17760_v6, %v21098_v38  ;;  %v2703_v51 = vadd.bf16 %v17727_v9, %v21102_v45  ;;  %v21108_v38 = vpack.c.bf16 %v21106_v56, %v21107_v42  ;;  %v21111_v45 = vld [vmem:[#allocation120_spill] sm:$0xff]  ;;  %v21116_v56 = vld [vmem:[#allocation117_spill] sm:$0xff] }
 0x4af   : > { %21094 = vst [vmem:[#allocation237_spill] sm:$0xff] %v17883_v19  ;;  %v21117_v42 = vld [vmem:[#allocation97_spill] sm:$0xff] }
 0x4b0   : > { %v17898_v47 = vmax.bf16 %v20028_v60, %v2694_v59  ;;  %v21112_v59 = vpack.c.bf16 %v21110_v54, %v21111_v45  ;;  %v21119_v54 = vld [vmem:[#allocation137_spill] sm:$0xff]  ;;  %v21120_v45 = vld [vmem:[#allocation128_spill] sm:$0xff] }
 0x4b2   : > { %21103 = vst [vmem:[#allocation241_spill] sm:$0xff] %v17898_v47 }
 0x4b5   : > { %5830 = vmatmul.mubr.bf16.gmra.mrb[180].mxu0 %v17880_v41  ;;  %6696 = vmatmul.mubr.bf16.gmra.mrb[180].mxu1 %v21095_v17  ;;  %v17901_v41 = vmax.bf16 %v20028_v60, %v2703_v51  ;;  %v21105_v17 = vld [vmem:[#allocation113_spill] sm:$0xff] }
 0x4b6   : > { %5839 = vmatprep.mubr.bf16.mxu0 %v17883_v19  ;;  %6705 = vmatprep.mubr.bf16.mxu1 %v21099_v31  ;;  %v2702_v31 = vadd.bf16 %v17760_v6, %v21108_v38  ;;  %v2711_v19 = vadd.bf16 %v17727_v9, %v21112_v59  ;;  %v21118_v38 = vpack.c.bf16 %v21116_v56, %v21117_v42  ;;  %v21121_v59 = vld [vmem:[#allocation125_spill] sm:$0xff]  ;;  %v21125_v56 = vld [vmem:[#allocation136_spill] sm:$0xff]  ;;  %v21126_v42 = vld [vmem:[#allocation39_spill] sm:$0xff] }
 0x4b7   : > { %21104 = vst [vmem:[#allocation12_spill] sm:$0xff] %v17901_v41 }
 0x4b8   : > { %v17916_v51 = vmax.bf16 %v20028_v60, %v2702_v31  ;;  %v21122_v31 = vpack.c.bf16 %v21120_v45, %v21121_v59  ;;  %v21129_v59 = vld [vmem:[#allocation74_spill] sm:$0xff] }
 0x4ba   : > { %21113 = vst [vmem:[#allocation28_spill] sm:$0xff] %v17916_v51 }
 0x4bd   : > { %5840 = vmatmul.mubr.bf16.gmra.mrb[184].mxu0 %v17898_v47  ;;  %6706 = vmatmul.mubr.bf16.gmra.mrb[184].mxu1 %v21105_v17  ;;  %v17919_v47 = vmax.bf16 %v20028_v60, %v2711_v19  ;;  %v21115_v17 = vld [vmem:[#allocation119_spill] sm:$0xff] }
 0x4be   : > { %5849 = vmatprep.mubr.bf16.mxu0 %v17901_v41  ;;  %6715 = vmatprep.mubr.bf16.mxu1 %v21109_v49  ;;  %v2710_v49 = vadd.bf16 %v17760_v6, %v21118_v38  ;;  %v2719_v41 = vadd.bf16 %v17727_v9, %v21122_v31  ;;  %v21127_v38 = vld [vmem:[#allocation103_spill] sm:$0xff]  ;;  %v21130_v31 = vld [vmem:[#allocation130_spill] sm:$0xff] }
 0x4bf   : > { %21114 = vst [vmem:[#allocation250_spill] sm:$0xff] %v17919_v47 }
 0x4c0   : > { %v17934_v19 = vmax.bf16 %v20028_v60, %v2710_v49  ;;  %v12377_v49 = vld [vmem:[#allocation3 + $0x14] ss:$8 sps:$4 sm:$0xff]  }
 0x4c2   : > { %21123 = vst [vmem:[#allocation240_spill] sm:$0xff] %v17934_v19 }
 0x4c5   : > { %5850 = vmatmul.mubr.bf16.gmra.mrb[188].mxu0 %v17916_v51  ;;  %6716 = vmatmul.mubr.bf16.gmra.mrb[188].mxu1 %v21115_v17  ;;  %v17937_v51 = vmax.bf16 %v20028_v60, %v2719_v41  ;;  %v12374_v17 = vld [vmem:[#allocation3 + $0x4] ss:$8 sps:$4 sm:$0xff]   ;;  %v21131_v41 = vld [vmem:[#allocation47_spill] sm:$0xff] }
 0x4c6   : > { %5859 = vmatprep.mubr.bf16.mxu0 %v17919_v47  ;;  %6725 = vmatprep.mubr.bf16.mxu1 %v21119_v54  ;;  %v12372_v47 = vld [vmem:[#allocation3] ss:$8 sps:$4 sm:$0xff]   ;;  %v21128_v54 = vpack.c.bf16 %v21126_v42, %v21127_v38  ;;  %v21132_v48 = vpack.c.bf16 %v21130_v31, %v21131_v41  ;;  %v12380_v42 = vld [vmem:[#allocation3 + $0x24] ss:$8 sps:$4 sm:$0xff]   ;;  %v21141_v31 = vld [vmem:[#allocation51_spill] sm:$0xff] }
 0x4c7   : > { %21124 = vst [vmem:[#allocation14_spill] sm:$0xff] %v17937_v51  ;;  %8346 = vmatprep.subr.bf16.mxu0 %v12374_v17  ;;  %v12378_v17 = vld [vmem:[#allocation3 + $0x20] ss:$8 sps:$4 sm:$0xff]  }
 0x4c8   : > { %v2718_v45 = vadd.bf16 %v17760_v6, %v21128_v54  ;;  %v2727_v34 = vadd.bf16 %v17727_v9, %v21132_v48  ;;  %8347 = vmatpush1.bf16.msra.mxu0 %v12372_v47  ;;  %v21135_v38 = vld [vmem:[#allocation77_spill] sm:$0xff] }
 0x4c9   : > { %8348 = vmatprep.subr.bf16.mxu0 %v12377_v49  ;;  %v21136_v54 = vld [vmem:[#allocation9_spill] sm:$0xff]  ;;  %v21139_v49 = vld [vmem:[#allocation147_spill] sm:$0xff] }
 0x4ca   : > { %v21137_v48 = vld [vmem:[#allocation109_spill] sm:$0xff] }
 0x4cb   : > { %v21138_v47 = vpack.c.bf16 %v21136_v54, %v21137_v48  ;;  %v12386_v54 = vld [vmem:[#allocation3 + $0x44] ss:$8 sps:$4 sm:$0xff]   ;;  %v21145_v48 = vld [vmem:[#allocation146_spill] sm:$0xff] }
 0x4cd   : > { %5860 = vmatmul.mubr.bf16.gmra.mrb[192].mxu0 %v17934_v19  ;;  %6726 = vmatmul.mubr.bf16.gmra.mrb[192].mxu1 %v21125_v56  ;;  %v12375_v19 = vld [vmem:[#allocation3 + $0x10] ss:$8 sps:$4 sm:$0xff]   ;;  %v17952_v56 = vmax.bf16 %v20028_v60, %v2718_v45  ;;  %v12383_v45 = vld [vmem:[#allocation3 + $0x34] ss:$8 sps:$4 sm:$0xff]  }
 0x4ce   : > { %5869 = vmatprep.mubr.bf16.mxu0 %v17937_v51  ;;  %6735 = vmatprep.mubr.bf16.mxu1 %v21129_v59  ;;  %v17955_v51 = vmax.bf16 %v20028_v60, %v2727_v34  ;;  %v2726_v59 = vadd.bf16 %v17760_v6, %v21138_v47  ;;  %v21140_v34 = vld [vmem:[#allocation134_spill] sm:$0xff] }
 0x4cf   : > { %21133 = vst [vmem:[#allocation243_spill] sm:$0xff] %v17952_v56  ;;  %8349 = vmatpush1.bf16.msra.mxu0 %v12375_v19  ;;  %v21142_v19 = vpack.c.bf16 %v21140_v34, %v21141_v31  ;;  %v21146_v47 = vld [vmem:[#allocation10_spill] sm:$0xff]  ;;  %v21149_v34 = vld [vmem:[#allocation153_spill] sm:$0xff]  ;;  %v21151_v31 = vld [vmem:[#allocation132_spill] sm:$0xff] }
 0x4d0   : > { %21134 = vst [vmem:[#allocation11_spill] sm:$0xff] %v17955_v51  ;;  %8350 = vmatprep.subr.bf16.mxu0 %v12380_v42  ;;  %v12384_v42 = vld [vmem:[#allocation3 + $0x40] ss:$8 sps:$4 sm:$0xff]  }
 0x4d1   : > { %v2735_v41 = vadd.bf16 %v17727_v9, %v21142_v19 }
 0x4d3   : > { %8351 = vmatpush1.bf16.msra.mxu0 %v12378_v17 }
 0x4d4   : > { %8352 = vmatprep.subr.bf16.mxu0 %v12383_v45 }
 0x4d5   : > { %5870 = vmatmul.mubr.bf16.gmra.mrb[196].mxu0 %v17952_v56  ;;  %6736 = vmatmul.mubr.bf16.gmra.mrb[196].mxu1 %v21135_v38  ;;  %v12381_v56 = vld [vmem:[#allocation3 + $0x30] ss:$8 sps:$4 sm:$0xff]   ;;  %v17970_v38 = vmax.bf16 %v20028_v60, %v2726_v59  ;;  %v21150_v59 = vld [vmem:[#allocation141_spill] sm:$0xff] }
 0x4d6   : > { %5879 = vmatprep.mubr.bf16.mxu0 %v17955_v51  ;;  %6745 = vmatprep.mubr.bf16.mxu1 %v21139_v49  ;;  %v17973_v51 = vmax.bf16 %v20028_v60, %v2735_v41  ;;  %v21147_v49 = vld [vmem:[#allocation115_spill] sm:$0xff]  ;;  %v21152_v19 = vpack.c.bf16 %v21150_v59, %v21151_v31 }
 0x4d7   : > { %21143 = vst [vmem:[#allocation32_spill] sm:$0xff] %v17970_v38  ;;  %8353 = vmatpush1.bf16.msra.mxu0 %v12381_v56  ;;  %v21148_v17 = vpack.c.bf16 %v21146_v47, %v21147_v49  ;;  %v12389_v41 = vld [vmem:[#allocation3 + $0x54] ss:$8 sps:$4 sm:$0xff]   ;;  %v12392_v47 = vld [vmem:[#allocation3 + $0x64] ss:$8 sps:$4 sm:$0xff]  }
 0x4d8   : > { %21144 = vst [vmem:[#allocation252_spill] sm:$0xff] %v17973_v51  ;;  %8354 = vmatprep.subr.bf16.mxu0 %v12386_v54  ;;  %v2743_v56 = vadd.bf16 %v17727_v9, %v21152_v19  ;;  %v12390_v54 = vld [vmem:[#allocation3 + $0x60] ss:$8 sps:$4 sm:$0xff]   ;;  %v21159_v31 = vld [vmem:[#allocation159_spill] sm:$0xff] }
 0x4d9   : > { %v2734_v45 = vadd.bf16 %v17760_v6, %v21148_v17  ;;  %v21155_v49 = vld [vmem:[#allocation152_spill] sm:$0xff]  ;;  %v21161_v19 = vld [vmem:[#allocation139_spill] sm:$0xff] }
 0x4da   : > { %v21156_v17 = vld [vmem:[#allocation64_spill] sm:$0xff] }
 0x4db   : > { %8355 = vmatpush1.bf16.msra.mxu0 %v12384_v42  ;;  %v21157_v42 = vld [vmem:[#allocation121_spill] sm:$0xff] }
 0x4dc   : > { %8356 = vmatprep.subr.bf16.mxu0 %v12389_v41  ;;  %v12395_v41 = vld [vmem:[#allocation3 + $0x74] ss:$8 sps:$4 sm:$0xff]  }
 0x4dd   : > { %5880 = vmatmul.mubr.bf16.gmra.mrb[200].mxu0 %v17970_v38  ;;  %6746 = vmatmul.mubr.bf16.gmra.mrb[200].mxu1 %v21145_v48  ;;  %v12387_v38 = vld [vmem:[#allocation3 + $0x50] ss:$8 sps:$4 sm:$0xff]   ;;  %v17988_v48 = vmax.bf16 %v20028_v60, %v2734_v45  ;;  %v21160_v45 = vld [vmem:[#allocation145_spill] sm:$0xff] }
 0x4de   : > { %5889 = vmatprep.mubr.bf16.mxu0 %v17973_v51  ;;  %6755 = vmatprep.mubr.bf16.mxu1 %v21149_v34  ;;  %v17991_v51 = vmax.bf16 %v20028_v60, %v2743_v56  ;;  %v21158_v34 = vpack.c.bf16 %v21156_v17, %v21157_v42  ;;  %v21162_v56 = vpack.c.bf16 %v21160_v45, %v21161_v19  ;;  %v12398_v17 = vld [vmem:[#allocation3 + $0x84] ss:$8 sps:$4 sm:$0xff]   ;;  %v21165_v42 = vld [vmem:[#allocation158_spill] sm:$0xff] }
 0x4df   : > { %21153 = vst [vmem:[#allocation16_spill] sm:$0xff] %v17988_v48  ;;  %8357 = vmatpush1.bf16.msra.mxu0 %v12387_v38  ;;  %v21169_v19 = vld [vmem:[#allocation165_spill] sm:$0xff] }
 0x4e0   : > { %21154 = vst [vmem:[#allocation13_spill] sm:$0xff] %v17991_v51  ;;  %v2742_v59 = vadd.bf16 %v17760_v6, %v21158_v34  ;;  %8358 = vmatprep.subr.bf16.mxu0 %v12392_v47  ;;  %v2751_v38 = vadd.bf16 %v17727_v9, %v21162_v56  ;;  %v12396_v47 = vld [vmem:[#allocation3 + $0x80] ss:$8 sps:$4 sm:$0xff]   ;;  %v21171_v56 = vld [vmem:[#allocation143_spill] sm:$0xff] }
 0x4e1   : > { %v21166_v34 = vld [vmem:[#allocation124_spill] sm:$0xff] }
 0x4e3   : > { %8359 = vmatpush1.bf16.msra.mxu0 %v12390_v54  ;;  %v21167_v54 = vld [vmem:[#allocation126_spill] sm:$0xff] }
 0x4e4   : > { %8360 = vmatprep.subr.bf16.mxu0 %v12395_v41  ;;  %v12401_v41 = vld [vmem:[#allocation3 + $0x94] ss:$8 sps:$4 sm:$0xff]  }
 0x4e5   : > { %5890 = vmatmul.mubr.bf16.gmra.mrb[204].mxu0 %v17988_v48  ;;  %6756 = vmatmul.mubr.bf16.gmra.mrb[204].mxu1 %v21155_v49  ;;  %v12393_v48 = vld [vmem:[#allocation3 + $0x70] ss:$8 sps:$4 sm:$0xff]   ;;  %v18006_v49 = vmax.bf16 %v20028_v60, %v2742_v59 }
 0x4e6   : > { %5899 = vmatprep.mubr.bf16.mxu0 %v17991_v51  ;;  %6765 = vmatprep.mubr.bf16.mxu1 %v21159_v31  ;;  %v18009_v51 = vmax.bf16 %v20028_v60, %v2751_v38  ;;  %v21168_v31 = vpack.c.bf16 %v21166_v34, %v21167_v54  ;;  %v21170_v59 = vld [vmem:[#allocation151_spill] sm:$0xff]  ;;  %v12404_v34 = vld [vmem:[#allocation3 + $0xa4] ss:$8 sps:$4 sm:$0xff]   ;;  %v21173_v54 = vld [vmem:[#allocation54_spill] sm:$0xff] }
 0x4e7   : > { %21163 = vst [vmem:[#allocation245_spill] sm:$0xff] %v18006_v49  ;;  %8361 = vmatpush1.bf16.msra.mxu0 %v12393_v48  ;;  %v21172_v38 = vpack.c.bf16 %v21170_v59, %v21171_v56  ;;  %v21177_v59 = vld [vmem:[#allocation149_spill] sm:$0xff] }
 0x4e8   : > { %21164 = vst [vmem:[#allocation15_spill] sm:$0xff] %v18009_v51  ;;  %v2750_v45 = vadd.bf16 %v17760_v6, %v21168_v31  ;;  %8362 = vmatprep.subr.bf16.mxu0 %v12398_v17  ;;  %v12402_v17 = vld [vmem:[#allocation3 + $0xa0] ss:$8 sps:$4 sm:$0xff]  }
 0x4e9   : > { %v2759_v48 = vadd.bf16 %v17727_v9, %v21172_v38  ;;  %v12407_v38 = vld [vmem:[#allocation3 + $0xb4] ss:$8 sps:$4 sm:$0xff]  }
 0x4eb   : > { %8363 = vmatpush1.bf16.msra.mxu0 %v12396_v47  ;;  %v21174_v47 = vld [vmem:[#allocation44_spill] sm:$0xff] }
 0x4ec   : > { %8364 = vmatprep.subr.bf16.mxu0 %v12401_v41  ;;  %v21175_v31 = vpack.c.bf16 %v21173_v54, %v21174_v47  ;;  %v12410_v54 = vld [vmem:[#allocation3 + $0xc4] ss:$8 sps:$4 sm:$0xff]  }
 0x4ed   : > { %5900 = vmatmul.mubr.bf16.gmra.mrb[208].mxu0 %v18006_v49  ;;  %6766 = vmatmul.mubr.bf16.gmra.mrb[208].mxu1 %v21165_v42  ;;  %v12399_v49 = vld [vmem:[#allocation3 + $0x90] ss:$8 sps:$4 sm:$0xff]   ;;  %v18024_v42 = vmax.bf16 %v20028_v60, %v2750_v45  ;;  %v21176_v45 = vld [vmem:[#allocation157_spill] sm:$0xff] }
 0x4ee   : > { %5909 = vmatprep.mubr.bf16.mxu0 %v18009_v51  ;;  %6775 = vmatprep.mubr.bf16.mxu1 %v21169_v19  ;;  %v18027_v51 = vmax.bf16 %v20028_v60, %v2759_v48  ;;  %v2758_v19 = vadd.bf16 %v17760_v6, %v21175_v31  ;;  %v21178_v56 = vpack.c.bf16 %v21176_v45, %v21177_v59  ;;  %v12405_v48 = vld [vmem:[#allocation3 + $0xb0] ss:$8 sps:$4 sm:$0xff]  }
 0x4ef   : > { %8365 = vmatpush1.bf16.msra.mxu0 %v12399_v49  ;;  %v21183_v45 = vld [vmem:[#allocation155_spill] sm:$0xff] }
 0x4f0   : > { %8366 = vmatprep.subr.bf16.mxu0 %v12404_v34  ;;  %v2767_v49 = vadd.bf16 %v17727_v9, %v21178_v56  ;;  %v21179_v34 = vld [vmem:[#allocation56_spill] sm:$0xff] }
 0x4f2   : > { %v18045_v41 = vmax.bf16 %v20028_v60, %v2767_v49  ;;  %v12413_v49 = vld [vmem:[#allocation3 + $0xd4] ss:$8 sps:$4 sm:$0xff]  }
 0x4f3   : > { %8367 = vmatpush1.bf16.msra.mxu0 %v12402_v17  ;;  %v21180_v17 = vld [vmem:[#allocation129_spill] sm:$0xff] }
 0x4f4   : > { %8368 = vmatprep.subr.bf16.mxu0 %v12407_v38  ;;  %v21181_v47 = vpack.c.bf16 %v21179_v34, %v21180_v17  ;;  %v12411_v38 = vld [vmem:[#allocation3 + $0xd0] ss:$8 sps:$4 sm:$0xff]   ;;  %v12416_v34 = vld [vmem:[#allocation3 + $0xe4] ss:$8 sps:$4 sm:$0xff]  }
 0x4f5   : > { %5910 = vmatmul.mubr.bf16.gmra.mrb[212].mxu0 %v18024_v42  ;;  %6776 = vmatmul.mubr.bf16.gmra.mrb[212].mxu1 %v16742_v63  ;;  %v18042_v63 = vmax.bf16 %v20028_v60, %v2758_v19  ;;  %v21182_v19 = vld [vmem:[#allocation163_spill] sm:$0xff] }
 0x4f6   : > { %5919 = vmatprep.mubr.bf16.mxu0 %v18027_v51  ;;  %6785 = vmatprep.mubr.bf16.mxu1 %v16751_v21  ;;  %v12408_v21 = vld [vmem:[#allocation3 + $0xc0] ss:$8 sps:$4 sm:$0xff]   ;;  %v2766_v31 = vadd.bf16 %v17760_v6, %v21181_v47  ;;  %v21184_v59 = vpack.c.bf16 %v21182_v19, %v21183_v45 }
 0x4f7   : > { %8369 = vmatpush1.bf16.msra.mxu0 %v12405_v48  ;;  %v21189_v19 = vld [vmem:[#allocation161_spill] sm:$0xff] }
 0x4f8   : > { %8370 = vmatprep.subr.bf16.mxu0 %v12410_v54  ;;  %v2775_v56 = vadd.bf16 %v17727_v9, %v21184_v59  ;;  %v21185_v54 = vld [vmem:[#allocation131_spill] sm:$0xff] }
 0x4fa   : > { %v18063_v48 = vmax.bf16 %v20028_v60, %v2775_v56  ;;  %v12419_v56 = vld [vmem:[#allocation3 + $0xf4] ss:$8 sps:$4 sm:$0xff]  }
 0x4fb   : > { %8371 = vmatpush1.bf16.msra.mxu0 %v12408_v21  ;;  %v21186_v21 = vld [vmem:[#allocation133_spill] sm:$0xff] }
 0x4fc   : > { %8372 = vmatprep.subr.bf16.mxu0 %v12413_v49  ;;  %v21187_v17 = vpack.c.bf16 %v21185_v54, %v21186_v21  ;;  %v12417_v49 = vld [vmem:[#allocation3 + $0xf0] ss:$8 sps:$4 sm:$0xff]  }
 0x4fd   : > { %5920 = vmatmul.mubr.bf16.gmra.mrb[216].mxu0 %v18042_v63  ;;  %6786 = vmatmul.mubr.bf16.gmra.mrb[216].mxu1 %v16789_v14  ;;  %v18060_v14 = vmax.bf16 %v20028_v60, %v2766_v31  ;;  %v21188_v31 = vld [vmem:[#allocation169_spill] sm:$0xff] }
 0x4fe   : > { %5929 = vmatprep.mubr.bf16.mxu0 %v18045_v41  ;;  %6795 = vmatprep.mubr.bf16.mxu1 %v16798_v5  ;;  %v12414_v5 = vld [vmem:[#allocation3 + $0xe0] ss:$8 sps:$4 sm:$0xff]   ;;  %v2774_v47 = vadd.bf16 %v17760_v6, %v21187_v17  ;;  %v21190_v45 = vpack.c.bf16 %v21188_v31, %v21189_v19  ;;  %v21195_v31 = vld [vmem:[#allocation167_spill] sm:$0xff] }
 0x4ff   : > { %8373 = vmatpush1.bf16.msra.mxu0 %v12411_v38  ;;  %v12420_v21 = vld [vmem:[%s19432_s3 + $0x608] ss:$16 sps:$4 sm:$0xff]   ;;  %v12422_v17 = vld [vmem:[%s19432_s3 + $0x60c] ss:$16 sps:$4 sm:$0xff]  }
 0x500   : > { %8374 = vmatprep.subr.bf16.mxu0 %v12416_v34  ;;  %v2783_v59 = vadd.bf16 %v17727_v9, %v21190_v45  ;;  %v21192_v34 = vld [vmem:[#allocation140_spill] sm:$0xff]  ;;  %7159 = vmatprep.subr.bf16.mxu1 %v12422_v17 }
 0x502   : > { %v18081_v38 = vmax.bf16 %v20028_v60, %v2783_v59  ;;  %v21197_v59 = vld [vmem:[#allocation164_spill] sm:$0xff] }
 0x503   : > { %8375 = vmatpush1.bf16.msra.mxu0 %v12414_v5 }
 0x504   : > { %8376 = vmatprep.subr.bf16.mxu0 %v12419_v56  ;;  %v21198_v56 = vld [vmem:[#allocation144_spill] sm:$0xff] }
 0x505   : > { %5930 = vmatmul.mubr.bf16.gmra.mrb[220].mxu0 %v18060_v14  ;;  %6796 = vmatmul.mubr.bf16.gmra.mrb[220].mxu1 %v16839_v29  ;;  %v18078_v29 = vmax.bf16 %v20028_v60, %v2774_v47  ;;  %v21194_v47 = vld [vmem:[#allocation142_spill] sm:$0xff] }
 0x506   : > { %5939 = vmatprep.mubr.bf16.mxu0 %v18063_v48  ;;  %6838 = vmatprep.mubr.bf16.mxu1 %v16848_v1  ;;  %v21191_v1 = vld [vmem:[#allocation138_spill] sm:$0xff] }
 0x507   : > { %8377 = vmatpush1.bf16.msra.mxu0 %v12417_v49  ;;  %v21193_v54 = vpack.c.bf16 %v21191_v1, %v21192_v34  ;;  %v21199_v49 = vpack.c.bf16 %v21197_v59, %v21198_v56  ;;  %v21200_v34 = vld [vmem:[#allocation171_spill] sm:$0xff] }
 0x509   : > { %v2782_v5 = vadd.bf16 %v17760_v6, %v21193_v54  ;;  %v2790_v1 = vadd.bf16 %v17760_v6, %v21199_v49  ;;  %v21201_v54 = vpack.c.bf16 %v16795_v50, %v21200_v34  ;;  %v12423_v50 = vld [vmem:[%s19432_s3 + $0x628] ss:$16 sps:$4 sm:$0xff]  }
 0x50a   : > { %v21207_v49 = vld [vmem:[#allocation148_spill] sm:$0xff] }
 0x50b   : > { %v18102_v45 = vmax.bf16 %v20028_v60, %v2782_v5  ;;  %v2799_v5 = vadd.bf16 %v17727_v9, %v21201_v54  ;;  %v21210_v54 = vpack.c.bf16 %v16890_v33, %v16881_v2  ;;  %v12426_v2 = vld [vmem:[%s19432_s3 + $0x648] ss:$16 sps:$4 sm:$0xff]   ;;  %v12428_v33 = vld [vmem:[%s19432_s3 + $0x64c] ss:$16 sps:$4 sm:$0xff]  }
 0x50d   : > { %5940 = vmatmul.mubr.bf16.gmra.mrb[224].mxu0 %v18078_v29  ;;  %6839 = vmatmul.mubr.bf16.vlgmr.msra.gmra.mrb[96].mxu1 %v16884_v36  ;;  %v21196_v36 = vpack.c.bf16 %v21194_v47, %v21195_v31  ;;  %v18123_v17 = vmax.bf16 %v20028_v60, %v2799_v5  ;;  %v21203_v47 = vld [vmem:[#allocation175_spill] sm:$0xff]  ;;  %v2815_v5 = vadd.bf16 %v17727_v9, %v21210_v54 }
 0x50e   : > { %5949 = vmatprep.mubr.bf16.mxu0 %v18081_v38  ;;  %6848 = vmatprep.mubr.bf16.mxu1 %v16893_v30 }
 0x50f   : > { %v2791_v19 = vadd.bf16 %v17727_v9, %v21196_v36  ;;  %7160 = vmatpush1.bf16.msra.mxu1 %v12420_v21  ;;  %v18120_v21 = vmax.bf16 %v20028_v60, %v2790_v1  ;;  %v12425_v36 = vld [vmem:[%s19432_s3 + $0x62c] ss:$16 sps:$4 sm:$0xff]  }
 0x510   : > { %7161 = vmatprep.subr.bf16.mxu1 %v12425_v36  ;;  %v21208_v1 = vld [vmem:[#allocation173_spill] sm:$0xff] }
 0x511   : > { %v18105_v30 = vmax.bf16 %v20028_v60, %v2791_v19  ;;  %v21205_v19 = vld [vmem:[#allocation170_spill] sm:$0xff]  ;;  %v21209_v34 = vpack.c.bf16 %v21207_v49, %v21208_v1 }
 0x513   : > { %7162 = vmatpush1.bf16.msra.mxu1 %v12423_v50 }
 0x514   : > { %7163 = vmatprep.subr.bf16.mxu1 %v12428_v33  ;;  %v21227_v33 = vld [vmem:[#allocation174_spill] sm:$0xff] }
 0x515   : > { %5950 = vmatmul.mubr.bf16.gmra.mrb[228].mxu0 %v18102_v45  ;;  %6849 = vmatmul.mubr.bf16.gmra.mrb[100].mxu1 %v16916_v26  ;;  %v21202_v26 = vld [vmem:[#allocation150_spill] sm:$0xff] }
 0x516   : > { %5959 = vmatprep.mubr.bf16.mxu0 %v18105_v30  ;;  %6858 = vmatprep.mubr.bf16.mxu1 %v16923_v4  ;;  %v21204_v4 = vpack.c.bf16 %v21202_v26, %v21203_v47  ;;  %v18165_v47 = vmax.bf16 %v20028_v60, %v2815_v5  ;;  %v21222_v5 = vld [vmem:[#allocation160_spill] sm:$0xff] }
 0x517   : > { %7164 = vmatpush1.bf16.msra.mxu1 %v12426_v2 }
 0x518   : > { %v2798_v31 = vadd.bf16 %v17760_v6, %v21204_v4  ;;  %v21212_v4 = vld [vmem:[#allocation177_spill] sm:$0xff] }
 0x51a   : > { %v18144_v56 = vmax.bf16 %v20028_v60, %v2798_v31 }
 0x51d   : > { %5960 = vmatmul.mubr.bf16.gmra.mrb[232].mxu0 %v18120_v21  ;;  %6859 = vmatmul.mubr.bf16.gmra.mrb[104].mxu1 %v16946_v12  ;;  %v21206_v12 = vpack.c.bf16 %v16845_v13, %v21205_v19  ;;  %v2806_v13 = vadd.bf16 %v17760_v6, %v21209_v34  ;;  %v21215_v19 = vld [vmem:[#allocation176_spill] sm:$0xff] }
 0x51e   : > { %5969 = vmatprep.mubr.bf16.mxu0 %v18123_v17  ;;  %6868 = vmatprep.mubr.bf16.mxu1 %v16953_v37 }
 0x51f   : > { %v2807_v59 = vadd.bf16 %v17727_v9, %v21206_v12  ;;  %v18162_v26 = vmax.bf16 %v20028_v60, %v2806_v13  ;;  %v21216_v12 = vld [vmem:[#allocation179_spill] sm:$0xff]  ;;  %v21220_v13 = vld [vmem:[#allocation154_spill] sm:$0xff] }
 0x521   : > { %v18147_v37 = vmax.bf16 %v20028_v60, %v2807_v59  ;;  %v21217_v59 = vpack.c.bf16 %v21215_v19, %v21216_v12 }
 0x525   : > { %5970 = vmatmul.mubr.bf16.gmra.mrb[236].mxu0 %v18144_v56  ;;  %6869 = vmatmul.mubr.bf16.gmra.mrb[108].mxu1 %v16976_v8  ;;  %v21211_v8 = vld [vmem:[#allocation156_spill] sm:$0xff] }
 0x526   : > { %5979 = vmatprep.mubr.bf16.mxu0 %v18147_v37  ;;  %6878 = vmatprep.mubr.bf16.mxu1 %v16983_v16  ;;  %v21213_v16 = vpack.c.bf16 %v21211_v8, %v21212_v4 }
 0x528   : > { %v2814_v31 = vadd.bf16 %v17760_v6, %v21213_v16  ;;  %v21224_v16 = vld [vmem:[#allocation168_spill] sm:$0xff] }
 0x52a   : > { %v18186_v36 = vmax.bf16 %v20028_v60, %v2814_v31  ;;  %v21225_v31 = vld [vmem:[#allocation181_spill] sm:$0xff] }
 0x52b   : > { %v21226_v2 = vpack.c.bf16 %v21224_v16, %v21225_v31  ;;  %v21239_v16 = vld [vmem:[#allocation180_spill] sm:$0xff] }
 0x52d   : > { %5980 = vmatmul.mubr.bf16.gmra.mrb[240].mxu0 %v18162_v26  ;;  %6879 = vmatmul.mubr.bf16.gmra.mrb[112].mxu1 %v17006_v53  ;;  %v21214_v53 = vpack.c.bf16 %v16920_v18, %v16911_v62  ;;  %v2822_v62 = vadd.bf16 %v17760_v6, %v21217_v59  ;;  %v21218_v18 = vpack.c.bf16 %v16950_v58, %v16941_v35  ;;  %v12429_v35 = vld [vmem:[%s19432_s3 + $0x668] ss:$16 sps:$4 sm:$0xff]   ;;  %v12431_v58 = vld [vmem:[%s19432_s3 + $0x66c] ss:$16 sps:$4 sm:$0xff]  }
 0x52e   : > { %5989 = vmatprep.mubr.bf16.mxu0 %v18165_v47  ;;  %6888 = vmatprep.mubr.bf16.mxu1 %v17013_v43  ;;  %v21230_v59 = vld [vmem:[#allocation172_spill] sm:$0xff] }
 0x52f   : > { %v2823_v50 = vadd.bf16 %v17727_v9, %v21214_v53  ;;  %v2831_v49 = vadd.bf16 %v17727_v9, %v21218_v18  ;;  %v18204_v1 = vmax.bf16 %v20028_v60, %v2822_v62  ;;  %7165 = vmatprep.subr.bf16.mxu1 %v12431_v58  ;;  %v21228_v53 = vpack.c.bf16 %v17010_v61, %v21227_v33  ;;  %v21231_v62 = vld [vmem:[#allocation166_spill] sm:$0xff]  ;;  %v21233_v61 = vld [vmem:[#allocation193_spill] sm:$0xff]  ;;  %v21242_v33 = vld [vmem:[#allocation192_spill] sm:$0xff] }
 0x530   : > { %7166 = vmatpush1.bf16.msra.mxu1 %v12429_v35 }
 0x531   : > { %v18189_v43 = vmax.bf16 %v20028_v60, %v2823_v50  ;;  %v18207_v34 = vmax.bf16 %v20028_v60, %v2831_v49  ;;  %v2847_v50 = vadd.bf16 %v17727_v9, %v21228_v53  ;;  %v12432_v49 = vld [vmem:[%s19432_s3 + $0x688] ss:$16 sps:$4 sm:$0xff]  }
 0x533   : > { %v18249_v12 = vmax.bf16 %v20028_v60, %v2847_v50 }
 0x535   : > { %5990 = vmatmul.mubr.bf16.gmra.mrb[244].mxu0 %v18186_v36  ;;  %6889 = vmatmul.mubr.bf16.gmra.mrb[116].mxu1 %v17036_v7  ;;  %v21219_v7 = vld [vmem:[#allocation162_spill] sm:$0xff] }
 0x536   : > { %5999 = vmatprep.mubr.bf16.mxu0 %v18189_v43  ;;  %6898 = vmatprep.mubr.bf16.mxu1 %v17043_v24  ;;  %v21221_v24 = vpack.c.bf16 %v21219_v7, %v21220_v13  ;;  %v12434_v7 = vld [vmem:[%s19432_s3 + $0x68c] ss:$16 sps:$4 sm:$0xff]   ;;  %v21234_v13 = vld [vmem:[#allocation184_spill] sm:$0xff] }
 0x537   : > { %7167 = vmatprep.subr.bf16.mxu1 %v12434_v7  ;;  %v21249_v7 = vld [vmem:[#allocation187_spill] sm:$0xff] }
 0x538   : > { %v2830_v54 = vadd.bf16 %v17760_v6, %v21221_v24  ;;  %v21235_v24 = vld [vmem:[#allocation178_spill] sm:$0xff]  ;;  %7168 = vmatpush1.bf16.msra.mxu1 %v12432_v49  ;;  %v12437_v49 = vld [vmem:[%s19432_s3 + $0x6ac] ss:$16 sps:$4 sm:$0xff]  }
 0x539   : > { %7169 = vmatprep.subr.bf16.mxu1 %v12437_v49 }
 0x53a   : > { %v18228_v4 = vmax.bf16 %v20028_v60, %v2830_v54  ;;  %v21236_v54 = vpack.c.bf16 %v21234_v13, %v21235_v24  ;;  %v21250_v13 = vld [vmem:[#allocation204_spill] sm:$0xff] }
 0x53c   : > { %v2855_v35 = vadd.bf16 %v17727_v9, %v21236_v54 }
 0x53d   : > { %6000 = vmatmul.mubr.bf16.gmra.mrb[248].mxu0 %v18204_v1  ;;  %6899 = vmatmul.mubr.bf16.gmra.mrb[120].mxu1 %v17066_v0  ;;  %v21223_v0 = vpack.c.bf16 %v16980_v15, %v21222_v5  ;;  %v2838_v15 = vadd.bf16 %v17760_v6, %v21226_v2 }
 0x53e   : > { %6009 = vmatprep.mubr.bf16.mxu0 %v18207_v34  ;;  %6908 = vmatprep.mubr.bf16.mxu1 %v17073_v23  ;;  %v18273_v5 = vmax.bf16 %v20028_v60, %v2855_v35 }
 0x53f   : > { %v2839_v8 = vadd.bf16 %v17727_v9, %v21223_v0  ;;  %v18246_v19 = vmax.bf16 %v20028_v60, %v2838_v15  ;;  %v21237_v0 = vld [vmem:[#allocation191_spill] sm:$0xff]  ;;  %v21241_v15 = vld [vmem:[#allocation198_spill] sm:$0xff] }
 0x540   : > { %v21243_v53 = vpack.c.bf16 %v21241_v15, %v21242_v33  ;;  %v12440_v15 = vld [vmem:[%s19432_s3 + $0x6cc] ss:$16 sps:$4 sm:$0xff]   ;;  %v12438_v33 = vld [vmem:[%s19432_s3 + $0x6c8] ss:$16 sps:$4 sm:$0xff]  }
 0x541   : > { %v18231_v23 = vmax.bf16 %v20028_v60, %v2839_v8  ;;  %v21238_v8 = vld [vmem:[#allocation186_spill] sm:$0xff] }
 0x542   : > { %v21240_v31 = vpack.c.bf16 %v21238_v8, %v21239_v16  ;;  %v2863_v50 = vadd.bf16 %v17727_v9, %v21243_v53  ;;  %v21254_v53 = vld [vmem:[#allocation202_spill] sm:$0xff] }
 0x544   : > { %v2854_v2 = vadd.bf16 %v17760_v6, %v21240_v31 }
 0x545   : > { %6010 = vmatmul.mubr.bf16.gmra.mrb[252].mxu0 %v18228_v4  ;;  %6909 = vmatmul.mubr.bf16.gmra.mrb[124].mxu1 %v17096_v40  ;;  %v21229_v40 = vld [vmem:[#allocation185_spill] sm:$0xff] }
 0x546   : > { %6019 = vmatprep.mubr.bf16.mxu0 %v18231_v23  ;;  %6918 = vmatprep.mubr.bf16.mxu1 %v17103_v52  ;;  %v21232_v52 = vpack.c.bf16 %v21230_v59, %v21231_v62  ;;  %v18291_v59 = vmax.bf16 %v20028_v60, %v2863_v50  ;;  %v21246_v62 = vld [vmem:[#allocation190_spill] sm:$0xff]  ;;  %v21255_v50 = vld [vmem:[#allocation196_spill] sm:$0xff] }
 0x548   : > { %v2846_v18 = vadd.bf16 %v17760_v6, %v21232_v52  ;;  %21245 = vst [vmem:[#allocation254_spill] sm:$0xff] %v18291_v59  ;;  %v21247_v52 = vld [vmem:[#allocation206_spill] sm:$0xff] }
 0x54a   : > { %v18270_v58 = vmax.bf16 %v20028_v60, %v2846_v18 }
 0x54d   : > { %6020 = vmatmul.mubr.bf16.gmra.mrb[0].mxu0 %v18246_v19  ;;  %6919 = vmatmul.mubr.bf16.gmra.mrb[128].mxu1 %v21229_v40  ;;  %v18288_v40 = vmax.bf16 %v20028_v60, %v2854_v2 }
 0x54e   : > { %6029 = vmatprep.mubr.bf16.mxu0 %v18249_v12  ;;  %6928 = vmatprep.mubr.bf16.mxu1 %v21233_v61  ;;  %v12435_v61 = vld [vmem:[%s19432_s3 + $0x6a8] ss:$16 sps:$4 sm:$0xff]  }
 0x54f   : > { %21244 = vst [vmem:[#allocation36_spill] sm:$0xff] %v18288_v40  ;;  %7170 = vmatpush1.bf16.msra.mxu1 %v12435_v61 }
 0x550   : > { %7171 = vmatprep.subr.bf16.mxu1 %v12440_v15  ;;  %v21266_v15 = vld [vmem:[#allocation215_spill] sm:$0xff] }
 0x553   : > { %7172 = vmatpush1.bf16.msra.mxu1 %v12438_v33 }
 0x555   : > { %6030 = vmatmul.mubr.bf16.gmra.mrb[4].mxu0 %v18270_v58  ;;  %6929 = vmatmul.mubr.bf16.gmra.mrb[132].mxu1 %v21237_v0 }
 0x556   : > { %6039 = vmatprep.mubr.bf16.mxu0 %v18273_v5  ;;  %6938 = vmatprep.mubr.bf16.mxu1 %v17175_v55  ;;  %v21248_v55 = vpack.c.bf16 %v21246_v62, %v21247_v52  ;;  %v21256_v62 = vpack.c.bf16 %v21254_v53, %v21255_v50 }
 0x558   : > { %v2862_v18 = vadd.bf16 %v17760_v6, %v21248_v55  ;;  %v2870_v52 = vadd.bf16 %v17760_v6, %v21256_v62  ;;  %v21257_v55 = vld [vmem:[#allocation182_spill] sm:$0xff]  ;;  %v12446_v62 = vld [vmem:[%s19432_s3 + $0x70c] ss:$16 sps:$4 sm:$0xff]  }
 0x55d   : > { %6040 = vmatmul.mubr.bf16.gmra.mrb[8].mxu0 %v18288_v40  ;;  %6939 = vmatmul.mubr.bf16.gmra.mrb[136].mxu1 %v17210_v28  ;;  %v21251_v28 = vpack.c.bf16 %v21249_v7, %v21250_v13 }
 0x55e   : > { %6049 = vmatprep.mubr.bf16.mxu0 %v18291_v59  ;;  %6948 = vmatprep.mubr.bf16.mxu1 %v17217_v46  ;;  %v18318_v46 = vmax.bf16 %v20028_v60, %v2862_v18  ;;  %v21258_v18 = vld [vmem:[#allocation211_spill] sm:$0xff] }
 0x55f   : > { %v2871_v24 = vadd.bf16 %v17727_v9, %v21251_v28  ;;  %v21259_v61 = vpack.c.bf16 %v21257_v55, %v21258_v18  ;;  %v12441_v28 = vld [vmem:[%s19432_s3 + $0x6e8] ss:$16 sps:$4 sm:$0xff]  }
 0x560   : > { %v18311_v54 = vpop.f32.mrb[160].mxu0  ;;  %21252 = vst [vmem:[#allocation22_spill] sm:$0xff] %v18318_v46  ;;  %v12444_v55 = vld [vmem:[%s19432_s3 + $0x708] ss:$16 sps:$4 sm:$0xff]  }
 0x561   : > { %v18313_v35 = vpop.f32.mrb[161].mxu0  ;;  %v18327_v2 = vmax.bf16 %v20028_v60, %v2871_v24  ;;  %v2879_v49 = vadd.bf16 %v17727_v9, %v21259_v61  ;;  %v18360_v24 = vmax.bf16 %v20028_v60, %v2870_v52  ;;  %v10585_v52 = vld.sshfl [vmem:[%s19433_s4] sm:$0x33 pattern:$0x75316420]  ;;  %v21262_v18 = vld [vmem:[#allocation209_spill] sm:$0xff] }
 0x562   : > { %v18315_v0 = vpop.f32.mrb[162].mxu0  ;;  %v21263_v61 = vld [vmem:[#allocation183_spill] sm:$0xff]  ;;  %v7649_v31 = vcombine.high %v10585_v52, %v10585_v52 }
 0x563   : > { %v18322_v16 = vpop.f32.mrb[163].mxu0  ;;  %21253 = vst [vmem:[#allocation17_spill] sm:$0xff] %v18327_v2  ;;  %21260 = vst [vmem:[#allocation247_spill] sm:$0xff] %v18360_v24  ;;  %v18369_v50 = vmax.bf16 %v20028_v60, %v2879_v49  ;;  %v21264_v49 = vpack.c.bf16 %v21262_v18, %v21263_v61  ;;  %v21269_v18 = vld [vmem:[#allocation52_spill] sm:$0xff] }
 0x564   : > { %v18412_v61 = vrot.slane %v7649_v31, %v21269_v18  ;;  %v21270_v31 = vld [vmem:[#allocation214_spill] sm:$0xff] }
 0x565   : > { %6050 = vmatmul.mubr.bf16.gmra.mrb[12].mxu0 %v18318_v46  ;;  %6949 = vmatmul.mubr.bf16.gmra.mrb[140].mxu1 %v17246_v11  ;;  %v12443_v11 = vld [vmem:[%s19432_s3 + $0x6ec] ss:$16 sps:$4 sm:$0xff]   ;;  %21261 = vst [vmem:[#allocation19_spill] sm:$0xff] %v18369_v50 }
 0x566   : > { %6059 = vmatprep.mubr.bf16.mxu0 %v18327_v2  ;;  %6958 = vmatprep.mubr.bf16.mxu1 %v17249_v39  ;;  %v21274_v2 = vld [vmem:[#allocation195_spill] sm:$0xff]  ;;  %v7674_v59 = vpack.i.b16 %v18412_v61, %v18412_v61 }
 0x567   : > { %7173 = vmatprep.subr.bf16.mxu1 %v12443_v11  ;;  %v2878_v11 = vadd.bf16 %v17760_v6, %v21264_v49 }
 0x568   : > { %v18347_v7 = vpop.f32.mrb[164].mxu0  ;;  %7174 = vmatpush1.bf16.msra.mxu1 %v12441_v28  ;;  %v21265_v28 = vld [vmem:[#allocation188_spill] sm:$0xff] }
 0x569   : > { %v18352_v13 = vpop.f32.mrb[165].mxu0  ;;  %7175 = vmatprep.subr.bf16.mxu1 %v12446_v62  ;;  %v21267_v53 = vpack.c.bf16 %v21265_v28, %v21266_v15  ;;  %v18405_v15 = vmax.bf16 %v20028_v60, %v2878_v11  ;;  %v12452_v11 = vld [vmem:[%s19432_s3 + $0x74c] ss:$16 sps:$4 sm:$0xff]  }
 0x56a   : > { %v18357_v39 = vpop.f32.mrb[166].mxu0 }
 0x56b   : > { %v18364_v33 = vpop.f32.mrb[167].mxu0  ;;  %v2887_v8 = vadd.bf16 %v17727_v9, %v21267_v53  ;;  %21268 = vst [vmem:[#allocation41_spill] sm:$0xff] %v18405_v15  ;;  %v21271_v53 = vld [vmem:[#allocation189_spill] sm:$0xff] }
 0x56c   : > { %7176 = vmatpush1.bf16.msra.mxu1 %v12444_v55  ;;  %v21272_v49 = vpack.c.bf16 %v21270_v31, %v21271_v53  ;;  %v21281_v31 = vpack.c.bf16 %v18322_v16, %v18313_v35 }
 0x56d   : > { %6060 = vmatmul.mubr.bf16.gmra.mrb[16].mxu0 %v18360_v24  ;;  %6959 = vmatmul.mubr.bf16.gmra.mrb[144].mxu1 %v17276_v32  ;;  %v12449_v32 = vld [vmem:[%s19432_s3 + $0x72c] ss:$16 sps:$4 sm:$0xff]   ;;  %v18417_v28 = vmax.bf16 %v20028_v60, %v2887_v8 }
 0x56e   : > { %6069 = vmatprep.mubr.bf16.mxu0 %v18369_v50  ;;  %6968 = vmatprep.mubr.bf16.mxu1 %v17279_v10  ;;  %v12447_v10 = vld [vmem:[%s19432_s3 + $0x728] ss:$16 sps:$4 sm:$0xff]   ;;  %v2886_v8 = vadd.bf16 %v17760_v6, %v21272_v49 }
 0x56f   : > { %7177 = vmatprep.subr.bf16.mxu1 %v12449_v32  ;;  %v12450_v32 = vld [vmem:[%s19432_s3 + $0x748] ss:$16 sps:$4 sm:$0xff]  }
 0x570   : > { %v18392_v24 = vpop.f32.mrb[168].mxu0  ;;  %7178 = vmatpush1.bf16.msra.mxu1 %v12447_v10  ;;  %v21273_v10 = vld [vmem:[#allocation220_spill] sm:$0xff] }
 0x571   : > { %v18397_v50 = vpop.f32.mrb[169].mxu0  ;;  %7179 = vmatprep.subr.bf16.mxu1 %v12452_v11  ;;  %v21275_v46 = vpack.c.bf16 %v21273_v10, %v21274_v2 }
 0x572   : > { %v18402_v62 = vpop.f32.mrb[170].mxu0 }
 0x573   : > { %v18409_v55 = vpop.f32.mrb[171].mxu0 }
 0x574   : > { %7180 = vmatpush1.bf16.msra.mxu1 %v12450_v32  ;;  %v18462_v32 = vrot.slane %v7674_v59, %v20331_v44  ;;  %v21278_v59 = vld [vmem:[#allocation221_spill] sm:$0xff] }
 0x575   : > { %6070 = vmatmul.mubr.bf16.gmra.mrb[20].mxu0 %v18405_v15  ;;  %6969 = vmatmul.mubr.bf16.gmra.mrb[148].mxu1 %v17306_v3  ;;  %v2895_v15 = vadd.bf16 %v17727_v9, %v21275_v46  ;;  %v12455_v3 = vld [vmem:[%s19432_s3 + $0x76c] ss:$16 sps:$4 sm:$0xff]   ;;  %v18452_v9 = vmax.bf16 %v20028_v60, %v2886_v8  ;;  %v18455_v46 = vrot.slane %v10585_v52, %v21269_v18  ;;  %v12456_v8 = vld [vmem:[%s19432_s3 + $0x788] ss:$16 sps:$4 sm:$0xff]  }
 0x576   : > { %6079 = vmatprep.mubr.bf16.mxu0 %v18417_v28  ;;  %6978 = vmatprep.mubr.bf16.mxu1 %v17309_v57  ;;  %v12453_v57 = vld [vmem:[%s19432_s3 + $0x768] ss:$16 sps:$4 sm:$0xff]   ;;  %v12458_v52 = vld [vmem:[%s19432_s3 + $0x78c] ss:$16 sps:$4 sm:$0xff]   ;;  %v7695_v18 = vadd.bf16 %v18462_v32, %v21281_v31 }
 0x577   : > { %7181 = vmatprep.subr.bf16.mxu1 %v12455_v3  ;;  %21276 = vst [vmem:[#allocation256_spill] sm:$0xff] %v18452_v9  ;;  %v18467_v10 = vmax.bf16 %v20028_v60, %v2895_v15  ;;  %v21279_v3 = vld [vmem:[#allocation199_spill] sm:$0xff] }
 0x578   : > { %v18439_v40 = vpop.f32.mrb[172].mxu0  ;;  %7182 = vmatpush1.bf16.msra.mxu1 %v12453_v57  ;;  %v21280_v2 = vpack.c.bf16 %v21278_v59, %v21279_v3  ;;  %v7667_v57 = vpack.i.b16 %v18455_v46, %v18455_v46  ;;  %v12464_v3 = vld [vmem:[%s19432_s3 + $0x7cc] ss:$16 sps:$4 sm:$0xff]  }
 0x579   : > { %v18444_v53 = vpop.f32.mrb[173].mxu0  ;;  %21277 = vst [vmem:[#allocation26_spill] sm:$0xff] %v18467_v10  ;;  %7183 = vmatprep.subr.bf16.mxu1 %v12458_v52 }
 0x57a   : > { %v18449_v49 = vpop.f32.mrb[174].mxu0  ;;  %v2894_v15 = vadd.bf16 %v17760_v6, %v21280_v2  ;;  %v12459_v6 = vld [vmem:[%s19432_s3 + $0x7a8] ss:$16 sps:$4 sm:$0xff]   ;;  %v18505_v16 = vrot.slane %v7667_v57, %v20331_v44  ;;  %v21283_v57 = vpack.c.bf16 %v18315_v0, %v18311_v54 }
 0x57b   : > { %v18459_v11 = vpop.f32.mrb[175].mxu0  ;;  %v12465_v54 = vld [vmem:[%s19432_s3 + $0x7e8] ss:$16 sps:$4 sm:$0xff]  }
 0x57c   : > { %7184 = vmatpush1.bf16.msra.mxu1 %v12456_v8  ;;  %v18502_v35 = vmax.bf16 %v20028_v60, %v2894_v15  ;;  %v7823_v8 = vmax.bf16 %v20028_v60, %v7695_v18  ;;  %v12462_v15 = vld [vmem:[%s19432_s3 + $0x7c8] ss:$16 sps:$4 sm:$0xff]  }
 0x57d   : > { %6080 = vmatmul.mubr.bf16.gmra.mrb[24].mxu0 %v18452_v9  ;;  %6979 = vmatmul.mubr.bf16.gmra.mrb[152].mxu1 %v17336_v27  ;;  %v12461_v27 = vld [vmem:[%s19432_s3 + $0x7ac] ss:$16 sps:$4 sm:$0xff]  }
 0x57e   : > { %6089 = vmatprep.mubr.bf16.mxu0 %v18467_v10  ;;  %6988 = vmatprep.mubr.bf16.mxu1 %v17339_v22  ;;  %21282 = vst [vmem:[#allocation21_spill] sm:$0xff] %v18502_v35  ;;  %v21284_v18 = vld [vmem:[#allocation197_spill] sm:$0xff] }
 0x57f   : > { %7185 = vmatprep.subr.bf16.mxu1 %v12461_v27  ;;  %v7694_v27 = vadd.bf16 %v18505_v16, %v21283_v57 }
 0x580   : > { %v18489_v9 = vpop.f32.mrb[176].mxu0  ;;  %7186 = vmatpush1.bf16.msra.mxu1 %v12459_v6 }
 0x581   : > { %v18494_v59 = vpop.f32.mrb[177].mxu0  ;;  %7187 = vmatprep.subr.bf16.mxu1 %v12464_v3  ;;  %v7822_v3 = vmax.bf16 %v20028_v60, %v7694_v27  ;;  %v21289_v27 = vpack.c.bf16 %v18409_v55, %v18397_v50  ;;  %v21291_v50 = vpack.c.bf16 %v18402_v62, %v18392_v24 }
 0x582   : > { %v18499_v22 = vpop.f32.mrb[178].mxu0 }
 0x583   : > { %v5827_v31 = vpop.f32.mrb[179].mxu0  ;;  %v7702_v55 = vadd.bf16 %v18505_v16, %v21291_v50  ;;  %v21296_v50 = vld [vmem:[#allocation212_spill] sm:$0xff] }
 0x584   : > { %v7529_v52 = vpack.c.bf16 %v5827_v31, %v18494_v59  ;;  %v21285_v59 = vpack.c.bf16 %v18364_v33, %v18352_v13  ;;  %7188 = vmatpush1.bf16.msra.mxu1 %v12462_v15  ;;  %v7703_v13 = vadd.bf16 %v18462_v32, %v21289_v27 }
 0x585   : > { %6090 = vmatmul.mubr.bf16.gmra.mrb[28].mxu0 %v18502_v35  ;;  %6989 = vmatmul.mubr.bf16.gmra.mrb[156].mxu1 %v17366_v25  ;;  %v12467_v25 = vld [vmem:[%s19432_s3 + $0x7ec] ss:$16 sps:$4 sm:$0xff]  }
 0x586   : > { %8378 = vmatprep.mubr.bf16.mxu0 %v7823_v8  ;;  %6998 = vmatprep.mubr.bf16.mxu1 %v21284_v18  ;;  %v7699_v6 = vadd.bf16 %v18462_v32, %v21285_v59  ;;  %v21286_v18 = vld [vmem:[#allocation194_spill] sm:$0xff]  ;;  %v21287_v59 = vpack.c.bf16 %v18357_v39, %v18347_v7 }
 0x587   : > { %7189 = vmatprep.subr.bf16.mxu1 %v12467_v25  ;;  %v21288_v25 = vld [vmem:[#allocation205_spill] sm:$0xff] }
 0x588   : > { %v18528_v31 = vpop.f32.mrb[180].mxu0  ;;  %v7827_v15 = vmax.bf16 %v20028_v60, %v7699_v6  ;;  %7190 = vmatpush1.bf16.msra.mxu1 %v12465_v54  ;;  %v7698_v2 = vadd.bf16 %v18505_v16, %v21287_v59  ;;  %v21292_v59 = vld [vmem:[#allocation203_spill] sm:$0xff] }
 0x589   : > { %v5833_v8 = vpop.f32.mrb[181].mxu0 }
 0x58a   : > { %v18536_v0 = vpop.f32.mrb[182].mxu0 }
 0x58b   : > { %v5837_v33 = vpop.f32.mrb[183].mxu0 }
 0x58c   : > { %v7533_v57 = vpack.c.bf16 %v5837_v33, %v5833_v8 }
 0x58d   : > { %8379 = vmatmul.mubr.bf16.vlgmr.msra.gmra.mrb[32].mxu0 %v7822_v3  ;;  %6999 = vmatmul.mubr.bf16.gmra.mrb[160].mxu1 %v21286_v18  ;;  %v7826_v3 = vmax.bf16 %v20028_v60, %v7698_v2  ;;  %v21290_v18 = vld [vmem:[#allocation201_spill] sm:$0xff]  ;;  %v21293_v2 = vpack.c.bf16 %v18459_v11, %v18444_v53  ;;  %v21295_v53 = vpack.c.bf16 %v18449_v49, %v18439_v40  ;;  %v21297_v49 = vld [vmem:[#allocation208_spill] sm:$0xff] }
 0x58e   : > { %8388 = vmatprep.mubr.bf16.mxu0 %v7827_v15  ;;  %7008 = vmatprep.mubr.bf16.mxu1 %v21288_v25  ;;  %v7831_v15 = vmax.bf16 %v20028_v60, %v7703_v13 }
 0x58f   : > { %v7707_v25 = vadd.bf16 %v18462_v32, %v21293_v2  ;;  %v7706_v11 = vadd.bf16 %v18505_v16, %v21295_v53  ;;  %v7715_v53 = vadd.bf16 %v18462_v32, %v7533_v57  ;;  %v21301_v57 = vpack.c.bf16 %v18536_v0, %v18528_v31  ;;  %v21303_v0 = vld [vmem:[#allocation213_spill] sm:$0xff] }
 0x590   : > { %v18552_v8 = vpop.f32.mrb[184].mxu0 }
 0x591   : > { %v5843_v6 = vpop.f32.mrb[185].mxu0 }
 0x592   : > { %v18554_v54 = vpop.f32.mrb[186].mxu0 }
 0x593   : > { %v7536_v33 = vpack.c.bf16 %v18554_v54, %v18552_v8  ;;  %v5847_v7 = vpop.f32.mrb[187].mxu0  ;;  %v21305_v54 = vld [vmem:[#allocation135_spill] sm:$0xff] }
 0x594   : > { %v7537_v39 = vpack.c.bf16 %v5847_v7, %v5843_v6 }
 0x595   : > { %8389 = vmatmul.mubr.bf16.gmra.mrb[36].mxu0 %v7826_v3  ;;  %7009 = vmatmul.mubr.bf16.gmra.mrb[164].mxu1 %v21290_v18  ;;  %v7830_v3 = vmax.bf16 %v20028_v60, %v7702_v55  ;;  %v21294_v18 = vld [vmem:[#allocation200_spill] sm:$0xff]  ;;  %v7711_v55 = vadd.bf16 %v18462_v32, %v7529_v52  ;;  %v21298_v52 = vpack.c.bf16 %v18499_v22, %v18489_v9  ;;  %v21300_v22 = vld [vmem:[#allocation207_spill] sm:$0xff] }
 0x596   : > { %8398 = vmatprep.mubr.bf16.mxu0 %v7831_v15  ;;  %7018 = vmatprep.mubr.bf16.mxu1 %v21292_v59  ;;  %v7835_v15 = vmax.bf16 %v20028_v60, %v7707_v25  ;;  %v7834_v25 = vmax.bf16 %v20028_v60, %v7706_v11  ;;  %v7843_v9 = vmax.bf16 %v20028_v60, %v7715_v53 }
 0x597   : > { %v7839_v40 = vmax.bf16 %v20028_v60, %v7711_v55 }
 0x598   : > { %v18570_v27 = vpop.f32.mrb[188].mxu0 }
 0x599   : > { %v5853_v6 = vpop.f32.mrb[189].mxu0 }
 0x59a   : > { %v18572_v13 = vpop.f32.mrb[190].mxu0 }
 0x59b   : > { %v5857_v24 = vpop.f32.mrb[191].mxu0 }
 0x59c   : > { %v7541_v62 = vpack.c.bf16 %v5857_v24, %v5853_v6 }
 0x59d   : > { %8399 = vmatmul.mubr.bf16.gmra.mrb[40].mxu0 %v7830_v3  ;;  %7019 = vmatmul.mubr.bf16.gmra.mrb[168].mxu1 %v21294_v18  ;;  %v21299_v18 = vld [vmem:[#allocation210_spill] sm:$0xff] }
 0x59e   : > { %8408 = vmatprep.mubr.bf16.mxu0 %v7835_v15  ;;  %7028 = vmatprep.mubr.bf16.mxu1 %v21296_v50  ;;  %v7710_v15 = vadd.bf16 %v18505_v16, %v21298_v52  ;;  %v7719_v52 = vadd.bf16 %v18462_v32, %v7537_v39  ;;  %v7718_v39 = vadd.bf16 %v18505_v16, %v7536_v33 }
 0x59f   : > { %v21306_v33 = vpack.c.bf16 %v18572_v13, %v18570_v27  ;;  %v21308_v13 = vld [vmem:[#allocation219_spill] sm:$0xff] }
 0x5a0   : > { %v18585_v59 = vpop.f32.mrb[192].mxu0  ;;  %v7838_v55 = vmax.bf16 %v20028_v60, %v7710_v15  ;;  %v7847_v31 = vmax.bf16 %v20028_v60, %v7719_v52  ;;  %v7846_v52 = vmax.bf16 %v20028_v60, %v7718_v39 }
 0x5a1   : > { %v5863_v2 = vpop.f32.mrb[193].mxu0 }
 0x5a2   : > { %v18587_v7 = vpop.f32.mrb[194].mxu0 }
 0x5a3   : > { %v5867_v3 = vpop.f32.mrb[195].mxu0 }
 0x5a4   : > { %v7545_v24 = vpack.c.bf16 %v5867_v3, %v5863_v2 }
 0x5a5   : > { %8409 = vmatmul.mubr.bf16.gmra.mrb[44].mxu0 %v7834_v25  ;;  %7029 = vmatmul.mubr.bf16.gmra.mrb[172].mxu1 %v21297_v49  ;;  %v21302_v49 = vld [vmem:[#allocation217_spill] sm:$0xff] }
 0x5a6   : > { %8418 = vmatprep.mubr.bf16.mxu0 %v7839_v40  ;;  %7038 = vmatprep.mubr.bf16.mxu1 %v21299_v18  ;;  %v7714_v40 = vadd.bf16 %v18505_v16, %v21301_v57 }
 0x5a8   : > { %v18600_v11 = vpop.f32.mrb[196].mxu0  ;;  %v7842_v53 = vmax.bf16 %v20028_v60, %v7714_v40 }
 0x5a9   : > { %v5873_v50 = vpop.f32.mrb[197].mxu0 }
 0x5aa   : > { %v18602_v6 = vpop.f32.mrb[198].mxu0 }
 0x5ab   : > { %v5877_v25 = vpop.f32.mrb[199].mxu0 }
 0x5ac   : > { %v7549_v3 = vpack.c.bf16 %v5877_v25, %v5873_v50 }
 0x5ad   : > { %8419 = vmatmul.mubr.bf16.gmra.mrb[48].mxu0 %v7838_v55  ;;  %7039 = vmatmul.mubr.bf16.gmra.mrb[176].mxu1 %v21300_v22  ;;  %v7723_v22 = vadd.bf16 %v18462_v32, %v7541_v62  ;;  %v7722_v62 = vadd.bf16 %v18505_v16, %v21306_v33 }
 0x5ae   : > { %8428 = vmatprep.mubr.bf16.mxu0 %v7843_v9  ;;  %7048 = vmatprep.mubr.bf16.mxu1 %v21302_v49  ;;  %v21304_v9 = vld [vmem:[#allocation216_spill] sm:$0xff]  ;;  %v7731_v33 = vadd.bf16 %v18462_v32, %v7549_v3  ;;  %v21312_v3 = vpack.c.bf16 %v18602_v6, %v18600_v11  ;;  %v21314_v11 = vld [vmem:[#allocation226_spill] sm:$0xff] }
 0x5af   : > { %v7851_v8 = vmax.bf16 %v20028_v60, %v7723_v22  ;;  %v7850_v22 = vmax.bf16 %v20028_v60, %v7722_v62 }
 0x5b0   : > { %v18615_v15 = vpop.f32.mrb[200].mxu0 }
 0x5b1   : > { %v5883_v18 = vpop.f32.mrb[201].mxu0 }
 0x5b2   : > { %v18617_v2 = vpop.f32.mrb[202].mxu0 }
 0x5b3   : > { %v7552_v50 = vpack.c.bf16 %v18617_v2, %v18615_v15  ;;  %v5887_v55 = vpop.f32.mrb[203].mxu0  ;;  %v21316_v15 = vld [vmem:[#allocation228_spill] sm:$0xff] }
 0x5b4   : > { %v7553_v25 = vpack.c.bf16 %v5887_v55, %v5883_v18 }
 0x5b5   : > { %8429 = vmatmul.mubr.bf16.gmra.mrb[52].mxu0 %v7842_v53  ;;  %7049 = vmatmul.mubr.bf16.gmra.mrb[180].mxu1 %v21303_v0  ;;  %v7727_v0 = vadd.bf16 %v18462_v32, %v7545_v24  ;;  %v21309_v24 = vpack.c.bf16 %v18587_v7, %v18585_v59  ;;  %v7859_v7 = vmax.bf16 %v20028_v60, %v7731_v33  ;;  %v21311_v59 = vld [vmem:[#allocation218_spill] sm:$0xff] }
 0x5b6   : > { %8438 = vmatprep.mubr.bf16.mxu0 %v7847_v31  ;;  %7058 = vmatprep.mubr.bf16.mxu1 %v21304_v9  ;;  %v21307_v31 = vld [vmem:[#allocation223_spill] sm:$0xff] }
 0x5b7   : > { %v7855_v27 = vmax.bf16 %v20028_v60, %v7727_v0 }
 0x5b8   : > { %v18630_v57 = vpop.f32.mrb[204].mxu0 }
 0x5b9   : > { %v5893_v40 = vpop.f32.mrb[205].mxu0 }
 0x5ba   : > { %v18632_v49 = vpop.f32.mrb[206].mxu0 }
 0x5bb   : > { %v5897_v53 = vpop.f32.mrb[207].mxu0 }
 0x5bc   : > { %v7557_v55 = vpack.c.bf16 %v5897_v53, %v5893_v40 }
 0x5bd   : > { %8439 = vmatmul.mubr.bf16.gmra.mrb[56].mxu0 %v7846_v52  ;;  %7059 = vmatmul.mubr.bf16.gmra.mrb[184].mxu1 %v21305_v54  ;;  %v21310_v54 = vld [vmem:[#allocation222_spill] sm:$0xff] }
 0x5be   : > { %8448 = vmatprep.mubr.bf16.mxu0 %v7851_v8  ;;  %7068 = vmatprep.mubr.bf16.mxu1 %v21307_v31  ;;  %v7726_v8 = vadd.bf16 %v18505_v16, %v21309_v24  ;;  %v7735_v24 = vadd.bf16 %v18462_v32, %v7553_v25  ;;  %v7734_v25 = vadd.bf16 %v18505_v16, %v7552_v50 }
 0x5bf   : > { %v21317_v50 = vpack.c.bf16 %v18632_v49, %v18630_v57 }
 0x5c0   : > { %v18645_v39 = vpop.f32.mrb[208].mxu0  ;;  %v7854_v0 = vmax.bf16 %v20028_v60, %v7726_v8  ;;  %v7863_v6 = vmax.bf16 %v20028_v60, %v7735_v24  ;;  %v7862_v24 = vmax.bf16 %v20028_v60, %v7734_v25 }
 0x5c1   : > { %v5903_v9 = vpop.f32.mrb[209].mxu0 }
 0x5c2   : > { %v18647_v18 = vpop.f32.mrb[210].mxu0 }
 0x5c3   : > { %v5907_v52 = vpop.f32.mrb[211].mxu0 }
 0x5c4   : > { %v7561_v53 = vpack.c.bf16 %v5907_v52, %v5903_v9 }
 0x5c5   : > { %8449 = vmatmul.mubr.bf16.gmra.mrb[60].mxu0 %v7850_v22  ;;  %7069 = vmatmul.mubr.bf16.gmra.mrb[188].mxu1 %v21308_v13  ;;  %v21313_v13 = vld [vmem:[#allocation225_spill] sm:$0xff] }
 0x5c6   : > { %8458 = vmatprep.mubr.bf16.mxu0 %v7855_v27  ;;  %7078 = vmatprep.mubr.bf16.mxu1 %v21310_v54  ;;  %v7730_v27 = vadd.bf16 %v18505_v16, %v21312_v3 }
 0x5c8   : > { %v18660_v62 = vpop.f32.mrb[212].mxu0  ;;  %v7858_v33 = vmax.bf16 %v20028_v60, %v7730_v27 }
 0x5c9   : > { %v5913_v31 = vpop.f32.mrb[213].mxu0 }
 0x5ca   : > { %v18662_v40 = vpop.f32.mrb[214].mxu0 }
 0x5cb   : > { %v5917_v22 = vpop.f32.mrb[215].mxu0 }
 0x5cc   : > { %v7565_v52 = vpack.c.bf16 %v5917_v22, %v5913_v31 }
 0x5cd   : > { %8459 = vmatmul.mubr.bf16.gmra.mrb[64].mxu0 %v7854_v0  ;;  %7079 = vmatmul.mubr.bf16.gmra.mrb[192].mxu1 %v21311_v59  ;;  %v7739_v59 = vadd.bf16 %v18462_v32, %v7557_v55  ;;  %v7738_v55 = vadd.bf16 %v18505_v16, %v21317_v50  ;;  %v21321_v50 = vld [vmem:[#allocation229_spill] sm:$0xff] }
 0x5ce   : > { %8468 = vmatprep.mubr.bf16.mxu0 %v7859_v7  ;;  %7088 = vmatprep.mubr.bf16.mxu1 %v21313_v13  ;;  %v21315_v7 = vld [vmem:[#allocation224_spill] sm:$0xff] }
 0x5cf   : > { %v7867_v2 = vmax.bf16 %v20028_v60, %v7739_v59  ;;  %v7866_v59 = vmax.bf16 %v20028_v60, %v7738_v55  ;;  %v12468_v55 = vld [vmem:[#allocation3 + $0x100] ss:$8 sps:$4 sm:$0xff]  }
 0x5d0   : > { %v18675_v8 = vpop.f32.mrb[216].mxu0 }
 0x5d1   : > { %v5923_v54 = vpop.f32.mrb[217].mxu0 }
 0x5d2   : > { %v18677_v9 = vpop.f32.mrb[218].mxu0 }
 0x5d3   : > { %v7568_v31 = vpack.c.bf16 %v18677_v9, %v18675_v8  ;;  %v5927_v0 = vpop.f32.mrb[219].mxu0 }
 0x5d4   : > { %v7569_v22 = vpack.c.bf16 %v5927_v0, %v5923_v54 }
 0x5d5   : > { %8469 = vmatmul.mubr.bf16.gmra.mrb[68].mxu0 %v7858_v33  ;;  %7089 = vmatmul.mubr.bf16.gmra.mrb[196].mxu1 %v21314_v11  ;;  %v7743_v11 = vadd.bf16 %v18462_v32, %v7561_v53  ;;  %v21320_v53 = vpack.c.bf16 %v18647_v18, %v18645_v39 }
 0x5d6   : > { %8478 = vmatprep.mubr.bf16.mxu0 %v7863_v6  ;;  %7098 = vmatprep.mubr.bf16.mxu1 %v21315_v7  ;;  %v21318_v6 = vld [vmem:[#allocation239_spill] sm:$0xff] }
 0x5d7   : > { %v7871_v49 = vmax.bf16 %v20028_v60, %v7743_v11 }
 0x5d8   : > { %v18690_v3 = vpop.f32.mrb[220].mxu0 }
 0x5d9   : > { %v5933_v27 = vpop.f32.mrb[221].mxu0 }
 0x5da   : > { %v18692_v13 = vpop.f32.mrb[222].mxu0 }
 0x5db   : > { %v5937_v33 = vpop.f32.mrb[223].mxu0 }
 0x5dc   : > { %v7573_v0 = vpack.c.bf16 %v5937_v33, %v5933_v27 }
 0x5dd   : > { %8479 = vmatmul.mubr.bf16.gmra.mrb[72].mxu0 %v7862_v24  ;;  %7099 = vmatmul.mubr.bf16.gmra.mrb[200].mxu1 %v21316_v15  ;;  %v7742_v15 = vadd.bf16 %v18505_v16, %v21320_v53  ;;  %v7747_v24 = vadd.bf16 %v18462_v32, %v7565_v52  ;;  %v21322_v52 = vld [vmem:[#allocation227_spill] sm:$0xff] }
 0x5de   : > { %8488 = vmatprep.mubr.bf16.mxu0 %v7867_v2  ;;  %7108 = vmatprep.mubr.bf16.mxu1 %v21318_v6  ;;  %v21319_v2 = vld [vmem:[#allocation242_spill] sm:$0xff]  ;;  %v12470_v6 = vld [vmem:[#allocation3 + $0x104] ss:$8 sps:$4 sm:$0xff]  }
 0x5df   : > { %8699 = vmatprep.subr.bf16.mxu0 %v12470_v6 }
 0x5e0   : > { %v18705_v25 = vpop.f32.mrb[224].mxu0  ;;  %8700 = vmatpush1.bf16.msra.mxu0 %v12468_v55 }
 0x5e1   : > { %v18707_v7 = vpop.f32.mrb[225].mxu0 }
 0x5e2   : > { %v18709_v27 = vpop.f32.mrb[226].mxu0 }
 0x5e3   : > { %v5947_v33 = vpop.f32.mrb[227].mxu0 }
 0x5e4   : > { %v7577_v57 = vpack.c.bf16 %v5947_v33, %v18707_v7 }
 0x5e5   : > { %8489 = vmatmul.mubr.bf16.gmra.mrb[76].mxu0 %v7866_v59  ;;  %7109 = vmatmul.mubr.bf16.gmra.mrb[204].mxu1 %v21319_v2  ;;  %v7870_v59 = vmax.bf16 %v20028_v60, %v7742_v15  ;;  %v21323_v2 = vpack.c.bf16 %v18662_v40, %v18660_v62  ;;  %v7751_v15 = vadd.bf16 %v18462_v32, %v7569_v22 }
 0x5e6   : > { %8498 = vmatprep.mubr.bf16.mxu0 %v7871_v49  ;;  %7118 = vmatprep.mubr.bf16.mxu1 %v21321_v50  ;;  %v7875_v49 = vmax.bf16 %v20028_v60, %v7747_v24  ;;  %v21324_v50 = vld [vmem:[#allocation233_spill] sm:$0xff]  ;;  %v7750_v22 = vadd.bf16 %v18505_v16, %v7568_v31 }
 0x5e7   : > { %v7746_v53 = vadd.bf16 %v18505_v16, %v21323_v2  ;;  %v7879_v62 = vmax.bf16 %v20028_v60, %v7751_v15  ;;  %v12473_v2 = vld [vmem:[#allocation3 + $0x114] ss:$8 sps:$4 sm:$0xff]  }
 0x5e8   : > { %v18723_v54 = vpop.f32.mrb[228].mxu0  ;;  %8701 = vmatprep.subr.bf16.mxu0 %v12473_v2 }
 0x5e9   : > { %v18725_v7 = vpop.f32.mrb[229].mxu0  ;;  %v7874_v24 = vmax.bf16 %v20028_v60, %v7746_v53  ;;  %v7755_v53 = vadd.bf16 %v18462_v32, %v7573_v0  ;;  %v21326_v0 = vld [vmem:[#allocation18_spill] sm:$0xff] }
 0x5ea   : > { %v18727_v11 = vpop.f32.mrb[230].mxu0 }
 0x5eb   : > { %v7580_v18 = vpack.c.bf16 %v18727_v11, %v18723_v54  ;;  %v5957_v39 = vpop.f32.mrb[231].mxu0  ;;  %v7883_v31 = vmax.bf16 %v20028_v60, %v7755_v53 }
 0x5ec   : > { %v7581_v33 = vpack.c.bf16 %v5957_v39, %v18725_v7 }
 0x5ed   : > { %8499 = vmatmul.mubr.bf16.gmra.mrb[80].mxu0 %v7870_v59  ;;  %7119 = vmatmul.mubr.bf16.gmra.mrb[208].mxu1 %v21322_v52  ;;  %v12471_v52 = vld [vmem:[#allocation3 + $0x110] ss:$8 sps:$4 sm:$0xff]  }
 0x5ee   : > { %8508 = vmatprep.mubr.bf16.mxu0 %v7875_v49  ;;  %7128 = vmatprep.mubr.bf16.mxu1 %v21324_v50  ;;  %v21325_v49 = vld [vmem:[#allocation231_spill] sm:$0xff] }
 0x5ef   : > { %8702 = vmatpush1.bf16.msra.mxu0 %v12471_v52 }
 0x5f0   : > { %v18741_v55 = vpop.f32.mrb[232].mxu0 }
 0x5f1   : > { %v18743_v6 = vpop.f32.mrb[233].mxu0 }
 0x5f2   : > { %v18745_v7 = vpop.f32.mrb[234].mxu0 }
 0x5f3   : > { %v7584_v59 = vpack.c.bf16 %v18745_v7, %v18741_v55  ;;  %v5967_v39 = vpop.f32.mrb[235].mxu0 }
 0x5f4   : > { %v7585_v40 = vpack.c.bf16 %v5967_v39, %v18743_v6  ;;  %v21327_v39 = vpack.c.bf16 %v18692_v13, %v18690_v3 }
 0x5f5   : > { %8509 = vmatmul.mubr.bf16.gmra.mrb[84].mxu0 %v7874_v24  ;;  %7129 = vmatmul.mubr.bf16.gmra.mrb[212].mxu1 %v21325_v49  ;;  %v7878_v24 = vmax.bf16 %v20028_v60, %v7750_v22  ;;  %v21328_v49 = vld [vmem:[#allocation244_spill] sm:$0xff]  ;;  %v7759_v22 = vadd.bf16 %v18462_v32, %v7577_v57  ;;  %v21330_v57 = vpack.c.bf16 %v18709_v27, %v18705_v25 }
 0x5f6   : > { %8518 = vmatprep.mubr.bf16.mxu0 %v7879_v62  ;;  %7138 = vmatprep.mubr.bf16.mxu1 %v17695_v20  ;;  %v7754_v62 = vadd.bf16 %v18505_v16, %v21327_v39  ;;  %v21331_v39 = vld [vmem:[#allocation230_spill] sm:$0xff] }
 0x5f7   : > { %v7887_v13 = vmax.bf16 %v20028_v60, %v7759_v22 }
 0x5f8   : > { %v18759_v50 = vpop.f32.mrb[236].mxu0  ;;  %v7882_v53 = vmax.bf16 %v20028_v60, %v7754_v62  ;;  %v12474_v62 = vld [vmem:[#allocation3 + $0x120] ss:$8 sps:$4 sm:$0xff]  }
 0x5f9   : > { %v18761_v6 = vpop.f32.mrb[237].mxu0 }
 0x5fa   : > { %v18763_v15 = vpop.f32.mrb[238].mxu0 }
 0x5fb   : > { %v5977_v8 = vpop.f32.mrb[239].mxu0 }
 0x5fc   : > { %v7589_v20 = vpack.c.bf16 %v5977_v8, %v18761_v6 }
 0x5fd   : > { %8519 = vmatmul.mubr.bf16.gmra.mrb[88].mxu0 %v7878_v24  ;;  %7139 = vmatmul.mubr.bf16.gmra.mrb[216].mxu1 %v21326_v0  ;;  %v7758_v0 = vadd.bf16 %v18505_v16, %v21330_v57  ;;  %v7763_v24 = vadd.bf16 %v18462_v32, %v7581_v33  ;;  %v21332_v33 = vld [vmem:[#allocation67_spill] sm:$0xff] }
 0x5fe   : > { %8528 = vmatprep.mubr.bf16.mxu0 %v7883_v31  ;;  %7148 = vmatprep.mubr.bf16.mxu1 %v21328_v49  ;;  %v21329_v31 = vld [vmem:[#allocation232_spill] sm:$0xff]  ;;  %v21333_v57 = vld [vmem:[#allocation235_spill] sm:$0xff] }
 0x5ff   : > { %v12476_v49 = vld [vmem:[#allocation3 + $0x124] ss:$8 sps:$4 sm:$0xff]  }
 0x600   : > { %v18777_v52 = vpop.f32.mrb[240].mxu0  ;;  %8703 = vmatprep.subr.bf16.mxu0 %v12476_v49 }
 0x601   : > { %v18779_v2 = vpop.f32.mrb[241].mxu0  ;;  %8704 = vmatpush1.bf16.msra.mxu0 %v12474_v62 }
 0x602   : > { %v18781_v6 = vpop.f32.mrb[242].mxu0 }
 0x603   : > { %v5987_v8 = vpop.f32.mrb[243].mxu0 }
 0x604   : > { %v7593_v3 = vpack.c.bf16 %v5987_v8, %v18779_v2 }
 0x605   : > { %8529 = vmatmul.mubr.bf16.gmra.mrb[92].mxu0 %v7882_v53  ;;  %7149 = vmatmul.mubr.bf16.gmra.mrb[220].mxu1 %v21329_v31  ;;  %v7886_v53 = vmax.bf16 %v20028_v60, %v7758_v0  ;;  %v7762_v31 = vadd.bf16 %v18505_v16, %v7580_v18  ;;  %v7767_v0 = vadd.bf16 %v18462_v32, %v7585_v40  ;;  %v21334_v18 = vld [vmem:[#allocation20_spill] sm:$0xff] }
 0x606   : > { %8538 = vmatprep.mubr.bf16.mxu0 %v7887_v13  ;;  %7191 = vmatprep.mubr.bf16.mxu1 %v21331_v39  ;;  %v7891_v13 = vmax.bf16 %v20028_v60, %v7763_v24  ;;  %v7766_v40 = vadd.bf16 %v18505_v16, %v7584_v59 }
 0x607   : > { %v7890_v24 = vmax.bf16 %v20028_v60, %v7762_v31  ;;  %v7895_v11 = vmax.bf16 %v20028_v60, %v7767_v0  ;;  %v7771_v31 = vadd.bf16 %v18462_v32, %v7589_v20  ;;  %v21336_v20 = vld [vmem:[#allocation236_spill] sm:$0xff] }
 0x608   : > { %v18795_v9 = vpop.f32.mrb[244].mxu0 }
 0x609   : > { %v18797_v2 = vpop.f32.mrb[245].mxu0 }
 0x60a   : > { %v18799_v22 = vpop.f32.mrb[246].mxu0 }
 0x60b   : > { %v7596_v25 = vpack.c.bf16 %v18799_v22, %v18795_v9  ;;  %v5997_v27 = vpop.f32.mrb[247].mxu0 }
 0x60c   : > { %v7597_v8 = vpack.c.bf16 %v5997_v27, %v18797_v2  ;;  %v21335_v27 = vld [vmem:[#allocation246_spill] sm:$0xff] }
 0x60d   : > { %8539 = vmatmul.mubr.bf16.gmra.mrb[96].mxu0 %v7886_v53  ;;  %7192 = vmatmul.mubr.bf16.vlgmr.msra.gmra.mrb[96].mxu1 %v21332_v33  ;;  %v12479_v33 = vld [vmem:[#allocation3 + $0x134] ss:$8 sps:$4 sm:$0xff]  }
 0x60e   : > { %8548 = vmatprep.mubr.bf16.mxu0 %v7891_v13  ;;  %7201 = vmatprep.mubr.bf16.mxu1 %v21333_v57  ;;  %v12477_v13 = vld [vmem:[#allocation3 + $0x130] ss:$8 sps:$4 sm:$0xff]  }
 0x60f   : > { %8705 = vmatprep.subr.bf16.mxu0 %v12479_v33 }
 0x610   : > { %v18813_v39 = vpop.f32.mrb[248].mxu0  ;;  %8706 = vmatpush1.bf16.msra.mxu0 %v12477_v13 }
 0x611   : > { %v18815_v62 = vpop.f32.mrb[249].mxu0 }
 0x612   : > { %v18817_v49 = vpop.f32.mrb[250].mxu0 }
 0x613   : > { %v7600_v2 = vpack.c.bf16 %v18817_v49, %v18813_v39  ;;  %v6007_v53 = vpop.f32.mrb[251].mxu0 }
 0x614   : > { %v7601_v54 = vpack.c.bf16 %v6007_v53, %v18815_v62  ;;  %v7899_v53 = vmax.bf16 %v20028_v60, %v7771_v31 }
 0x615   : > { %8549 = vmatmul.mubr.bf16.gmra.mrb[100].mxu0 %v7890_v24  ;;  %7202 = vmatmul.mubr.bf16.gmra.mrb[100].mxu1 %v21334_v18  ;;  %v7894_v24 = vmax.bf16 %v20028_v60, %v7766_v40  ;;  %v7775_v40 = vadd.bf16 %v18462_v32, %v7593_v3  ;;  %v21340_v3 = vpack.c.bf16 %v18781_v6, %v18777_v52 }
 0x616   : > { %8558 = vmatprep.mubr.bf16.mxu0 %v7895_v11  ;;  %7211 = vmatprep.mubr.bf16.mxu1 %v21335_v27  ;;  %v21337_v11 = vpack.c.bf16 %v18763_v15, %v18759_v50  ;;  %v21338_v27 = vld [vmem:[#allocation234_spill] sm:$0xff] }
 0x617   : > { %v7903_v15 = vmax.bf16 %v20028_v60, %v7775_v40 }
 0x618   : > { %v18831_v57 = vpop.f32.mrb[252].mxu0  ;;  %v7770_v18 = vadd.bf16 %v18505_v16, %v21337_v11  ;;  %v21341_v11 = vld [vmem:[#allocation238_spill] sm:$0xff] }
 0x619   : > { %v18833_v62 = vpop.f32.mrb[253].mxu0 }
 0x61a   : > { %v18835_v0 = vpop.f32.mrb[254].mxu0  ;;  %v7898_v31 = vmax.bf16 %v20028_v60, %v7770_v18  ;;  %v12480_v18 = vld [vmem:[#allocation3 + $0x140] ss:$8 sps:$4 sm:$0xff]  }
 0x61b   : > { %v6017_v7 = vpop.f32.mrb[255].mxu0 }
 0x61c   : > { %v7605_v59 = vpack.c.bf16 %v6017_v7, %v18833_v62 }
 0x61d   : > { %8559 = vmatmul.mubr.bf16.gmra.mrb[104].mxu0 %v7894_v24  ;;  %7212 = vmatmul.mubr.bf16.gmra.mrb[104].mxu1 %v21336_v20  ;;  %v7774_v20 = vadd.bf16 %v18505_v16, %v21340_v3  ;;  %v7779_v24 = vadd.bf16 %v18462_v32, %v7597_v8  ;;  %v21342_v8 = vld [vmem:[#allocation24_spill] sm:$0xff] }
 0x61e   : > { %8568 = vmatprep.mubr.bf16.mxu0 %v7899_v53  ;;  %7221 = vmatprep.mubr.bf16.mxu1 %v21338_v27  ;;  %v21339_v53 = vld [vmem:[#allocation68_spill] sm:$0xff] }
 0x61f   : > { %v12482_v27 = vld [vmem:[#allocation3 + $0x144] ss:$8 sps:$4 sm:$0xff]  }
 0x620   : > { %v18849_v13 = vpop.f32.mrb[0].mxu0  ;;  %8707 = vmatprep.subr.bf16.mxu0 %v12482_v27  ;;  %v21343_v3 = vld [vmem:[#allocation248_spill] sm:$0xff] }
 0x621   : > { %v18851_v33 = vpop.f32.mrb[1].mxu0  ;;  %8708 = vmatpush1.bf16.msra.mxu0 %v12480_v18 }
 0x622   : > { %v18853_v62 = vpop.f32.mrb[2].mxu0 }
 0x623   : > { %v6027_v7 = vpop.f32.mrb[3].mxu0 }
 0x624   : > { %v7609_v50 = vpack.c.bf16 %v6027_v7, %v18851_v33 }
 0x625   : > { %8569 = vmatmul.mubr.bf16.gmra.mrb[108].mxu0 %v7898_v31  ;;  %7222 = vmatmul.mubr.bf16.gmra.mrb[108].mxu1 %v21339_v53  ;;  %v7902_v31 = vmax.bf16 %v20028_v60, %v7774_v20  ;;  %v7778_v53 = vadd.bf16 %v18505_v16, %v7596_v25  ;;  %v7783_v20 = vadd.bf16 %v18462_v32, %v7601_v54  ;;  %v21344_v25 = vld [vmem:[#allocation73_spill] sm:$0xff] }
 0x626   : > { %8578 = vmatprep.mubr.bf16.mxu0 %v7903_v15  ;;  %7231 = vmatprep.mubr.bf16.mxu1 %v21341_v11  ;;  %v7907_v15 = vmax.bf16 %v20028_v60, %v7779_v24  ;;  %v7782_v54 = vadd.bf16 %v18505_v16, %v7600_v2  ;;  %v7791_v39 = vadd.bf16 %v18462_v32, %v7609_v50 }
 0x627   : > { %v7906_v24 = vmax.bf16 %v20028_v60, %v7778_v53  ;;  %v7911_v22 = vmax.bf16 %v20028_v60, %v7783_v20  ;;  %v7787_v53 = vadd.bf16 %v18462_v32, %v7605_v59 }
 0x628   : > { %v18867_v55 = vpop.f32.mrb[4].mxu0  ;;  %v7919_v50 = vmax.bf16 %v20028_v60, %v7791_v39 }
 0x629   : > { %v18869_v33 = vpop.f32.mrb[5].mxu0  ;;  %v7915_v59 = vmax.bf16 %v20028_v60, %v7787_v53 }
 0x62a   : > { %v18871_v40 = vpop.f32.mrb[6].mxu0 }
 0x62b   : > { %v6037_v6 = vpop.f32.mrb[7].mxu0 }
 0x62c   : > { %v7613_v7 = vpack.c.bf16 %v6037_v6, %v18869_v33  ;;  %v21345_v6 = vld [vmem:[#allocation237_spill] sm:$0xff] }
 0x62d   : > { %8579 = vmatmul.mubr.bf16.gmra.mrb[112].mxu0 %v7902_v31  ;;  %7232 = vmatmul.mubr.bf16.gmra.mrb[112].mxu1 %v21342_v8  ;;  %v12485_v8 = vld [vmem:[#allocation3 + $0x154] ss:$8 sps:$4 sm:$0xff]  }
 0x62e   : > { %8588 = vmatprep.mubr.bf16.mxu0 %v7907_v15  ;;  %7241 = vmatprep.mubr.bf16.mxu1 %v21343_v3  ;;  %v12483_v15 = vld [vmem:[#allocation3 + $0x150] ss:$8 sps:$4 sm:$0xff]   ;;  %v7795_v52 = vadd.bf16 %v18462_v32, %v7613_v7 }
 0x62f   : > { %8709 = vmatprep.subr.bf16.mxu0 %v12485_v8  ;;  %v12488_v8 = vld [vmem:[#allocation3 + $0x164] ss:$8 sps:$4 sm:$0xff]  }
 0x630   : > { %v18885_v11 = vpop.f32.mrb[8].mxu0  ;;  %8710 = vmatpush1.bf16.msra.mxu0 %v12483_v15  ;;  %v12486_v15 = vld [vmem:[#allocation3 + $0x160] ss:$8 sps:$4 sm:$0xff]  }
 0x631   : > { %v18887_v18 = vpop.f32.mrb[9].mxu0  ;;  %8711 = vmatprep.subr.bf16.mxu0 %v12488_v8  ;;  %v12489_v8 = vld [vmem:[#allocation3 + $0x170] ss:$8 sps:$4 sm:$0xff]  }
 0x632   : > { %v18889_v27 = vpop.f32.mrb[10].mxu0 }
 0x633   : > { %v18894_v31 = vpop.f32.mrb[11].mxu0 }
 0x634   : > { %8712 = vmatpush1.bf16.msra.mxu0 %v12486_v15  ;;  %v21351_v15 = vld [vmem:[#allocation250_spill] sm:$0xff] }
 0x635   : > { %8589 = vmatmul.mubr.bf16.gmra.mrb[116].mxu0 %v7906_v24  ;;  %7242 = vmatmul.mubr.bf16.gmra.mrb[116].mxu1 %v21344_v25  ;;  %v7910_v24 = vmax.bf16 %v20028_v60, %v7782_v54  ;;  %v21347_v25 = vpack.c.bf16 %v18835_v0, %v18831_v57  ;;  %v21348_v54 = vld [vmem:[#allocation12_spill] sm:$0xff] }
 0x636   : > { %8598 = vmatprep.mubr.bf16.mxu0 %v7911_v22  ;;  %7251 = vmatprep.mubr.bf16.mxu1 %v21345_v6  ;;  %v21346_v22 = vld [vmem:[#allocation241_spill] sm:$0xff] }
 0x637   : > { %v7786_v6 = vadd.bf16 %v18505_v16, %v21347_v25  ;;  %v12491_v25 = vld [vmem:[#allocation3 + $0x174] ss:$8 sps:$4 sm:$0xff]   ;;  %v12494_v57 = vld [vmem:[#allocation3 + $0x184] ss:$8 sps:$4 sm:$0xff]  }
 0x638   : > { %v18906_v3 = vpop.f32.mrb[12].mxu0  ;;  %8713 = vmatprep.subr.bf16.mxu0 %v12491_v25  ;;  %v21352_v25 = vld [vmem:[#allocation240_spill] sm:$0xff] }
 0x639   : > { %v18908_v33 = vpop.f32.mrb[13].mxu0  ;;  %8714 = vmatpush1.bf16.msra.mxu0 %v12489_v8  ;;  %v21354_v8 = vld [vmem:[#allocation14_spill] sm:$0xff] }
 0x63a   : > { %v18910_v20 = vpop.f32.mrb[14].mxu0  ;;  %8715 = vmatprep.subr.bf16.mxu0 %v12494_v57  ;;  %v21353_v57 = vpack.c.bf16 %v18871_v40, %v18867_v55  ;;  %v21358_v40 = vld [vmem:[#allocation11_spill] sm:$0xff] }
 0x63b   : > { %v18915_v49 = vpop.f32.mrb[15].mxu0 }
 0x63d   : > { %8599 = vmatmul.mubr.bf16.gmra.mrb[120].mxu0 %v7910_v24  ;;  %7252 = vmatmul.mubr.bf16.gmra.mrb[120].mxu1 %v21346_v22  ;;  %v7914_v24 = vmax.bf16 %v20028_v60, %v7786_v6  ;;  %v21349_v22 = vld [vmem:[#allocation28_spill] sm:$0xff] }
 0x63e   : > { %8608 = vmatprep.mubr.bf16.mxu0 %v7915_v59  ;;  %7261 = vmatprep.mubr.bf16.mxu1 %v21348_v54  ;;  %v21350_v54 = vpack.c.bf16 %v18853_v62, %v18849_v13  ;;  %v12495_v13 = vld [vmem:[#allocation3 + $0x190] ss:$8 sps:$4 sm:$0xff]   ;;  %v21355_v59 = vpack.c.bf16 %v18894_v31, %v18887_v18 }
 0x640   : > { %v18927_v9 = vpop.f32.mrb[16].mxu0  ;;  %v7790_v6 = vadd.bf16 %v18505_v16, %v21350_v54  ;;  %v7923_v54 = vmax.bf16 %v20028_v60, %v7795_v52  ;;  %v7799_v7 = vadd.bf16 %v18462_v32, %v21355_v59  ;;  %v21356_v59 = vld [vmem:[#allocation243_spill] sm:$0xff] }
 0x641   : > { %v18929_v2 = vpop.f32.mrb[17].mxu0 }
 0x642   : > { %v18931_v53 = vpop.f32.mrb[18].mxu0  ;;  %v7927_v31 = vmax.bf16 %v20028_v60, %v7799_v7 }
 0x643   : > { %v18936_v0 = vpop.f32.mrb[19].mxu0 }
 0x645   : > { %8609 = vmatmul.mubr.bf16.gmra.mrb[124].mxu0 %v7914_v24  ;;  %7262 = vmatmul.mubr.bf16.gmra.mrb[124].mxu1 %v21349_v22  ;;  %v12492_v22 = vld [vmem:[#allocation3 + $0x180] ss:$8 sps:$4 sm:$0xff]  }
 0x646   : > { %8618 = vmatprep.mubr.bf16.mxu0 %v7919_v50  ;;  %7271 = vmatprep.mubr.bf16.mxu1 %v21351_v15  ;;  %v7918_v50 = vmax.bf16 %v20028_v60, %v7790_v6  ;;  %v12497_v15 = vld [vmem:[#allocation3 + $0x194] ss:$8 sps:$4 sm:$0xff]   ;;  %v7794_v6 = vadd.bf16 %v18505_v16, %v21353_v57  ;;  %v12498_v57 = vld [vmem:[#allocation3 + $0x1a0] ss:$8 sps:$4 sm:$0xff]  }
 0x647   : > { %8716 = vmatpush1.bf16.msra.mxu0 %v12492_v22 }
 0x648   : > { %v18948_v35 = vpop.f32.mrb[20].mxu0  ;;  %8717 = vmatprep.subr.bf16.mxu0 %v12497_v15  ;;  %v7922_v55 = vmax.bf16 %v20028_v60, %v7794_v6  ;;  %v12503_v15 = vld [vmem:[#allocation3 + $0x1b4] ss:$8 sps:$4 sm:$0xff]   ;;  %v21357_v6 = vpack.c.bf16 %v18889_v27, %v18885_v11  ;;  %v12504_v27 = vld [vmem:[#allocation3 + $0x1c0] ss:$8 sps:$4 sm:$0xff]  }
 0x649   : > { %v18950_v39 = vpop.f32.mrb[21].mxu0 }
 0x64a   : > { %v18952_v24 = vpop.f32.mrb[22].mxu0 }
 0x64b   : > { %v18957_v62 = vpop.f32.mrb[23].mxu0  ;;  %8718 = vmatpush1.bf16.msra.mxu0 %v12495_v13  ;;  %v12501_v13 = vld [vmem:[#allocation3 + $0x1b0] ss:$8 sps:$4 sm:$0xff]  }
 0x64d   : > { %8619 = vmatmul.mubr.bf16.gmra.mrb[128].mxu0 %v7918_v50  ;;  %7272 = vmatmul.mubr.bf16.gmra.mrb[128].mxu1 %v21352_v25  ;;  %v12500_v50 = vld [vmem:[#allocation3 + $0x1a4] ss:$8 sps:$4 sm:$0xff]  }
 0x64e   : > { %8628 = vmatprep.mubr.bf16.mxu0 %v7923_v54  ;;  %7281 = vmatprep.mubr.bf16.mxu1 %v21354_v8  ;;  %v7798_v8 = vadd.bf16 %v18505_v16, %v21357_v6 }
 0x64f   : > { %8719 = vmatprep.subr.bf16.mxu0 %v12500_v50 }
 0x650   : > { %v18972_v52 = vpop.f32.mrb[24].mxu0  ;;  %8720 = vmatpush1.bf16.msra.mxu0 %v12498_v57  ;;  %v21360_v57 = vld [vmem:[#allocation32_spill] sm:$0xff] }
 0x651   : > { %v18974_v54 = vpop.f32.mrb[25].mxu0  ;;  %8721 = vmatprep.subr.bf16.mxu0 %v12503_v15 }
 0x652   : > { %v18976_v25 = vpop.f32.mrb[26].mxu0 }
 0x653   : > { %v18981_v22 = vpop.f32.mrb[27].mxu0 }
 0x654   : > { %v7633_v18 = vpack.c.bf16 %v18981_v22, %v18974_v54  ;;  %v21359_v54 = vpack.c.bf16 %v18915_v49, %v18908_v33  ;;  %8722 = vmatpush1.bf16.msra.mxu0 %v12501_v13  ;;  %v12509_v33 = vld [vmem:[#allocation3 + $0x1d4] ss:$8 sps:$4 sm:$0xff]   ;;  %v21361_v49 = vpack.c.bf16 %v18910_v20, %v18906_v3  ;;  %v21363_v13 = vpack.c.bf16 %v18936_v0, %v18929_v2  ;;  %v21364_v3 = vld [vmem:[#allocation16_spill] sm:$0xff]  ;;  %v21366_v0 = vld [vmem:[#allocation13_spill] sm:$0xff] }
 0x655   : > { %8629 = vmatmul.mubr.bf16.gmra.mrb[132].mxu0 %v7922_v55  ;;  %7282 = vmatmul.mubr.bf16.gmra.mrb[132].mxu1 %v21356_v59  ;;  %v12506_v55 = vld [vmem:[#allocation3 + $0x1c4] ss:$8 sps:$4 sm:$0xff]   ;;  %v7926_v59 = vmax.bf16 %v20028_v60, %v7798_v8  ;;  %v12507_v8 = vld [vmem:[#allocation3 + $0x1d0] ss:$8 sps:$4 sm:$0xff]   ;;  %v12515_v20 = vld [vmem:[#allocation3 + $0x1f4] ss:$8 sps:$4 sm:$0xff]  }
 0x656   : > { %8638 = vmatprep.mubr.bf16.mxu0 %v7927_v31  ;;  %7291 = vmatprep.mubr.bf16.mxu1 %v21358_v40  ;;  %v7803_v7 = vadd.bf16 %v18462_v32, %v21359_v54  ;;  %v7802_v15 = vadd.bf16 %v18505_v16, %v21361_v49  ;;  %v21362_v54 = vld [vmem:[#allocation252_spill] sm:$0xff]  ;;  %v21368_v49 = vld [vmem:[#allocation245_spill] sm:$0xff] }
 0x657   : > { %8723 = vmatprep.subr.bf16.mxu0 %v12506_v55 }
 0x658   : > { %v6091_v50 = vpop.f32.mrb[28].mxu0  ;;  %v7931_v40 = vmax.bf16 %v20028_v60, %v7803_v7  ;;  %8724 = vmatpush1.bf16.msra.mxu0 %v12504_v27  ;;  %v7807_v7 = vadd.bf16 %v18462_v32, %v21363_v13  ;;  %v7930_v55 = vmax.bf16 %v20028_v60, %v7802_v15  ;;  %v21367_v27 = vpack.c.bf16 %v18957_v62, %v18950_v39  ;;  %v21370_v15 = vld [vmem:[#allocation15_spill] sm:$0xff] }
 0x659   : > { %v6093_v22 = vpop.f32.mrb[29].mxu0  ;;  %8725 = vmatprep.subr.bf16.mxu0 %v12509_v33  ;;  %v7815_v39 = vadd.bf16 %v18462_v32, %v7633_v18 }
 0x65a   : > { %v6095_v31 = vpop.f32.mrb[30].mxu0 }
 0x65b   : > { %v7636_v10 = vpack.c.bf16 %v6095_v31, %v6091_v50  ;;  %v6097_v11 = vpop.f32.mrb[31].mxu0  ;;  %v12512_v50 = vld [vmem:[#allocation3 + $0x1e4] ss:$8 sps:$4 sm:$0xff]   ;;  %v7935_v31 = vmax.bf16 %v20028_v60, %v7807_v7 }
 0x65c   : > { %v7637_v6 = vpack.c.bf16 %v6097_v11, %v6093_v22  ;;  %8726 = vmatpush1.bf16.msra.mxu0 %v12507_v8  ;;  %v12510_v22 = vld [vmem:[#allocation3 + $0x1e0] ss:$8 sps:$4 sm:$0xff]   ;;  %v12513_v11 = vld [vmem:[#allocation3 + $0x1f0] ss:$8 sps:$4 sm:$0xff]   ;;  %v21371_v8 = vpack.c.bf16 %v18976_v25, %v18972_v52 }
 0x65d   : > { %8639 = vmatmul.mubr.bf16.gmra.mrb[136].mxu0 %v7926_v59  ;;  %7292 = vmatmul.mubr.bf16.gmra.mrb[136].mxu1 %v21360_v57  ;;  %v21365_v59 = vpack.c.bf16 %v18931_v53, %v18927_v9  ;;  %v21369_v9 = vpack.c.bf16 %v18952_v24, %v18948_v35 }
 0x65e   : > { %8648 = vmatprep.mubr.bf16.mxu0 %v7931_v40  ;;  %7301 = vmatprep.mubr.bf16.mxu1 %v21362_v54  ;;  %v7811_v40 = vadd.bf16 %v18462_v32, %v21367_v27  ;;  %v7943_v54 = vmax.bf16 %v20028_v60, %v7815_v39  ;;  %v7814_v13 = vadd.bf16 %v18505_v16, %v21371_v8 }
 0x65f   : > { %8727 = vmatprep.subr.bf16.mxu0 %v12512_v50  ;;  %v7806_v2 = vadd.bf16 %v18505_v16, %v21365_v59  ;;  %v7810_v53 = vadd.bf16 %v18505_v16, %v21369_v9  ;;  %v7819_v35 = vadd.bf16 %v18462_v32, %v7637_v6  ;;  %v21376_v32 = vld [vmem:[#allocation247_spill] sm:$0xff]  ;;  %v21378_v59 = vld [vmem:[#allocation41_spill] sm:$0xff] }
 0x660   : > { %8728 = vmatpush1.bf16.msra.mxu0 %v12510_v22  ;;  %v7939_v33 = vmax.bf16 %v20028_v60, %v7811_v40  ;;  %v7942_v24 = vmax.bf16 %v20028_v60, %v7814_v13 }
 0x661   : > { %8729 = vmatprep.subr.bf16.mxu0 %v12515_v20  ;;  %v7934_v57 = vmax.bf16 %v20028_v60, %v7806_v2  ;;  %v7938_v62 = vmax.bf16 %v20028_v60, %v7810_v53  ;;  %v7947_v18 = vmax.bf16 %v20028_v60, %v7819_v35 }
 0x664   : > { %8730 = vmatpush1.bf16.msra.mxu0 %v12513_v11 }
 0x665   : > { %8649 = vmatmul.mubr.bf16.gmra.mrb[140].mxu0 %v7930_v55  ;;  %7302 = vmatmul.mubr.bf16.gmra.mrb[140].mxu1 %v21364_v3 }
 0x666   : > { %8658 = vmatprep.mubr.bf16.mxu0 %v7935_v31  ;;  %7311 = vmatprep.mubr.bf16.mxu1 %v21366_v0 }
 0x66d   : > { %8659 = vmatmul.mubr.bf16.gmra.mrb[144].mxu0 %v7934_v57  ;;  %7312 = vmatmul.mubr.bf16.gmra.mrb[144].mxu1 %v21368_v49 }
 0x66e   : > { %8668 = vmatprep.mubr.bf16.mxu0 %v7939_v33  ;;  %7321 = vmatprep.mubr.bf16.mxu1 %v21370_v15  ;;  %v21379_v15 = vld [vmem:[#allocation256_spill] sm:$0xff] }
 0x675   : > { %8669 = vmatmul.mubr.bf16.gmra.mrb[148].mxu0 %v7938_v62  ;;  %7322 = vmatmul.mubr.bf16.gmra.mrb[148].mxu1 %v18024_v42  ;;  %v7818_v42 = vadd.bf16 %v18505_v16, %v7636_v10  ;;  %v21377_v16 = vld [vmem:[#allocation19_spill] sm:$0xff]  ;;  %v21380_v62 = vld [vmem:[#allocation26_spill] sm:$0xff] }
 0x676   : > { %8678 = vmatprep.mubr.bf16.mxu0 %v7943_v54  ;;  %7331 = vmatprep.mubr.bf16.mxu1 %v18027_v51  ;;  %v7664_v51 = vcombine.high %v18455_v46, %v18455_v46 }
 0x677   : > { %v7946_v52 = vmax.bf16 %v20028_v60, %v7818_v42 }
 0x67d   : > { %8679 = vmatmul.mubr.bf16.gmra.mrb[152].mxu0 %v7942_v24  ;;  %7332 = vmatmul.mubr.bf16.gmra.mrb[152].mxu1 %v18042_v63  ;;  %v7665_v63 = vcombine.high %v18412_v61, %v18412_v61 }
 0x67e   : > { %8688 = vmatprep.mubr.bf16.mxu0 %v7947_v18  ;;  %7341 = vmatprep.mubr.bf16.mxu1 %v18045_v41  ;;  %v7681_v41 = vpack.i.b16 %v7664_v51, %v7664_v51  ;;  %v21381_v51 = vld [vmem:[#allocation21_spill] sm:$0xff] }
 0x685   : > { %8689 = vmatmul.mubr.bf16.gmra.mrb[156].mxu0 %v7946_v52  ;;  %7342 = vmatmul.mubr.bf16.gmra.mrb[156].mxu1 %v18060_v14  ;;  %v21372_v14 = vld [vmem:[#allocation36_spill] sm:$0xff] }
 0x686   : > { %7351 = vmatprep.mubr.bf16.mxu1 %v18063_v48  ;;  %v21373_v48 = vld [vmem:[#allocation254_spill] sm:$0xff] }
 0x68d   : > { %7352 = vmatmul.mubr.bf16.gmra.mrb[160].mxu1 %v18078_v29  ;;  %v7688_v29 = vpack.i.b16 %v7665_v63, %v7665_v63 }
 0x68e   : > { %7361 = vmatprep.mubr.bf16.mxu1 %v18081_v38 }
 0x695   : > { %7362 = vmatmul.mubr.bf16.gmra.mrb[164].mxu1 %v18102_v45 }
 0x696   : > { %7371 = vmatprep.mubr.bf16.mxu1 %v18105_v30  ;;  %v19073_v30 = vrot.slane %v7681_v41, %v20331_v44 }
 0x69d   : > { %7372 = vmatmul.mubr.bf16.gmra.mrb[168].mxu1 %v18120_v21 }
 0x69e   : > { %7381 = vmatprep.mubr.bf16.mxu1 %v18123_v17  ;;  %v19076_v17 = vrot.slane %v7688_v29, %v20331_v44 }
 0x6a5   : > { %7382 = vmatmul.mubr.bf16.gmra.mrb[172].mxu1 %v18144_v56 }
 0x6a6   : > { %7391 = vmatprep.mubr.bf16.mxu1 %v18147_v37 }
 0x6ad   : > { %7392 = vmatmul.mubr.bf16.gmra.mrb[176].mxu1 %v18162_v26 }
 0x6ae   : > { %7401 = vmatprep.mubr.bf16.mxu1 %v18165_v47 }
 0x6b5   : > { %7402 = vmatmul.mubr.bf16.gmra.mrb[180].mxu1 %v18186_v36  ;;  %v21374_v36 = vld [vmem:[#allocation22_spill] sm:$0xff] }
 0x6b6   : > { %7411 = vmatprep.mubr.bf16.mxu1 %v18189_v43 }
 0x6bd   : > { %7412 = vmatmul.mubr.bf16.gmra.mrb[184].mxu1 %v18204_v1  ;;  %v21375_v1 = vld [vmem:[#allocation17_spill] sm:$0xff] }
 0x6be   : > { %7421 = vmatprep.mubr.bf16.mxu1 %v18207_v34 }
 0x6c5   : > { %7422 = vmatmul.mubr.bf16.gmra.mrb[188].mxu1 %v18228_v4 }
 0x6c6   : > { %7431 = vmatprep.mubr.bf16.mxu1 %v18231_v23 }
 0x6cd   : > { %7432 = vmatmul.mubr.bf16.gmra.mrb[192].mxu1 %v18246_v19 }
 0x6ce   : > { %7441 = vmatprep.mubr.bf16.mxu1 %v18249_v12 }
 0x6d5   : > { %7442 = vmatmul.mubr.bf16.gmra.mrb[196].mxu1 %v18270_v58 }
 0x6d6   : > { %7451 = vmatprep.mubr.bf16.mxu1 %v18273_v5 }
 0x6dd   : > { %7452 = vmatmul.mubr.bf16.gmra.mrb[200].mxu1 %v21372_v14 }
 0x6de   : > { %7461 = vmatprep.mubr.bf16.mxu1 %v21373_v48 }
 0x6e0   : > { %v7193_v38 = vpop.f32.mrb[96].mxu1 }
 0x6e1   : > { %v7195_v45 = vpop.f32.mrb[97].mxu1 }
 0x6e2   : > { %v7197_v21 = vpop.f32.mrb[98].mxu1 }
 0x6e3   : > { %v7514_v56 = vpack.c.bf16 %v7197_v21, %v7193_v38  ;;  %v7199_v37 = vpop.f32.mrb[99].mxu1 }
 0x6e4   : > { %v7515_v26 = vpack.c.bf16 %v7199_v37, %v7195_v45 }
 0x6e5   : > { %v7696_v47 = vadd.bf16 %v19073_v30, %v7514_v56  ;;  %7462 = vmatmul.mubr.bf16.gmra.mrb[204].mxu1 %v21374_v36 }
 0x6e6   : > { %v7697_v43 = vadd.bf16 %v19076_v17, %v7515_v26  ;;  %7471 = vmatprep.mubr.bf16.mxu1 %v21375_v1 }
 0x6e7   : > { %v7824_v23 = vmax.bf16 %v20028_v60, %v7696_v47 }
 0x6e8   : > { %v7203_v34 = vpop.f32.mrb[100].mxu1  ;;  %v7825_v4 = vmax.bf16 %v20028_v60, %v7697_v43 }
 0x6e9   : > { %v7205_v19 = vpop.f32.mrb[101].mxu1 }
 0x6ea   : > { %v7207_v12 = vpop.f32.mrb[102].mxu1  ;;  %8731 = vmatprep.mubr.bf16.mxu0 %v7825_v4 }
 0x6eb   : > { %v7518_v58 = vpack.c.bf16 %v7207_v12, %v7203_v34  ;;  %v7209_v5 = vpop.f32.mrb[103].mxu1  ;;  %8732 = vmatmul.mubr.bf16.vlgmr.msra.gmra.mrb[32].mxu0 %v7824_v23 }
 0x6ec   : > { %v7519_v61 = vpack.c.bf16 %v7209_v5, %v7205_v19 }
 0x6ed   : > { %v7700_v46 = vadd.bf16 %v19073_v30, %v7518_v58  ;;  %7472 = vmatmul.mubr.bf16.gmra.mrb[208].mxu1 %v21376_v32 }
 0x6ee   : > { %v7701_v10 = vadd.bf16 %v19076_v17, %v7519_v61  ;;  %7481 = vmatprep.mubr.bf16.mxu1 %v21377_v16 }
 0x6ef   : > { %v7828_v7 = vmax.bf16 %v20028_v60, %v7700_v46 }
 0x6f0   : > { %v7213_v25 = vpop.f32.mrb[104].mxu1  ;;  %v7829_v6 = vmax.bf16 %v20028_v60, %v7701_v10 }
 0x6f1   : > { %v7215_v50 = vpop.f32.mrb[105].mxu1 }
 0x6f2   : > { %v7217_v55 = vpop.f32.mrb[106].mxu1  ;;  %8741 = vmatprep.mubr.bf16.mxu0 %v7829_v6 }
 0x6f3   : > { %v7522_v22 = vpack.c.bf16 %v7217_v55, %v7213_v25  ;;  %v7219_v31 = vpop.f32.mrb[107].mxu1  ;;  %8742 = vmatmul.mubr.bf16.gmra.mrb[36].mxu0 %v7828_v7 }
 0x6f4   : > { %v7523_v3 = vpack.c.bf16 %v7219_v31, %v7215_v50 }
 0x6f5   : > { %v7704_v20 = vadd.bf16 %v19073_v30, %v7522_v22  ;;  %7482 = vmatmul.mubr.bf16.gmra.mrb[212].mxu1 %v21378_v59 }
 0x6f6   : > { %v7705_v2 = vadd.bf16 %v19076_v17, %v7523_v3  ;;  %7491 = vmatprep.mubr.bf16.mxu1 %v18417_v28 }
 0x6f7   : > { %v7832_v27 = vmax.bf16 %v20028_v60, %v7704_v20 }
 0x6f8   : > { %v7223_v0 = vpop.f32.mrb[108].mxu1  ;;  %v7833_v11 = vmax.bf16 %v20028_v60, %v7705_v2 }
 0x6f9   : > { %v7225_v40 = vpop.f32.mrb[109].mxu1 }
 0x6fa   : > { %v7227_v57 = vpop.f32.mrb[110].mxu1  ;;  %8751 = vmatprep.mubr.bf16.mxu0 %v7833_v11 }
 0x6fb   : > { %v7526_v33 = vpack.c.bf16 %v7227_v57, %v7223_v0  ;;  %v7229_v49 = vpop.f32.mrb[111].mxu1  ;;  %8752 = vmatmul.mubr.bf16.gmra.mrb[40].mxu0 %v7832_v27 }
 0x6fc   : > { %v7527_v9 = vpack.c.bf16 %v7229_v49, %v7225_v40 }
 0x6fd   : > { %v7708_v53 = vadd.bf16 %v19073_v30, %v7526_v33  ;;  %7492 = vmatmul.mubr.bf16.gmra.mrb[216].mxu1 %v21379_v15 }
 0x6fe   : > { %v7709_v39 = vadd.bf16 %v19076_v17, %v7527_v9  ;;  %7501 = vmatprep.mubr.bf16.mxu1 %v21380_v62 }
 0x6ff   : > { %v7836_v8 = vmax.bf16 %v20028_v60, %v7708_v53 }
 0x700   : > { %v7233_v28 = vpop.f32.mrb[112].mxu1  ;;  %v7837_v54 = vmax.bf16 %v20028_v60, %v7709_v39 }
 0x701   : > { %v7235_v13 = vpop.f32.mrb[113].mxu1 }
 0x702   : > { %v7237_v35 = vpop.f32.mrb[114].mxu1  ;;  %8761 = vmatprep.mubr.bf16.mxu0 %v7837_v54 }
 0x703   : > { %v7530_v24 = vpack.c.bf16 %v7237_v35, %v7233_v28  ;;  %v7239_v18 = vpop.f32.mrb[115].mxu1  ;;  %8762 = vmatmul.mubr.bf16.gmra.mrb[44].mxu0 %v7836_v8 }
 0x704   : > { %v7531_v42 = vpack.c.bf16 %v7239_v18, %v7235_v13 }
 0x705   : > { %v7712_v52 = vadd.bf16 %v19073_v30, %v7530_v24  ;;  %7502 = vmatmul.mubr.bf16.gmra.mrb[220].mxu1 %v21381_v51 }
 0x706   : > { %v7713_v63 = vadd.bf16 %v19076_v17, %v7531_v42 }
 0x707   : > { %v7840_v48 = vmax.bf16 %v20028_v60, %v7712_v52 }
 0x708   : > { %v7243_v41 = vpop.f32.mrb[116].mxu1  ;;  %v7841_v14 = vmax.bf16 %v20028_v60, %v7713_v63 }
 0x709   : > { %v7245_v29 = vpop.f32.mrb[117].mxu1 }
 0x70a   : > { %v7247_v38 = vpop.f32.mrb[118].mxu1  ;;  %8771 = vmatprep.mubr.bf16.mxu0 %v7841_v14 }
 0x70b   : > { %v7534_v45 = vpack.c.bf16 %v7247_v38, %v7243_v41  ;;  %v7249_v21 = vpop.f32.mrb[119].mxu1  ;;  %8772 = vmatmul.mubr.bf16.gmra.mrb[48].mxu0 %v7840_v48 }
 0x70c   : > { %v7535_v56 = vpack.c.bf16 %v7249_v21, %v7245_v29 }
 0x70d   : > { %v7716_v37 = vadd.bf16 %v19073_v30, %v7534_v45 }
 0x70e   : > { %v7717_v26 = vadd.bf16 %v19076_v17, %v7535_v56 }
 0x70f   : > { %v7844_v43 = vmax.bf16 %v20028_v60, %v7716_v37 }
 0x710   : > { %v7253_v47 = vpop.f32.mrb[120].mxu1  ;;  %v7845_v36 = vmax.bf16 %v20028_v60, %v7717_v26 }
 0x711   : > { %v7255_v1 = vpop.f32.mrb[121].mxu1 }
 0x712   : > { %v7257_v34 = vpop.f32.mrb[122].mxu1  ;;  %8781 = vmatprep.mubr.bf16.mxu0 %v7845_v36 }
 0x713   : > { %v7538_v4 = vpack.c.bf16 %v7257_v34, %v7253_v47  ;;  %v7259_v23 = vpop.f32.mrb[123].mxu1  ;;  %8782 = vmatmul.mubr.bf16.gmra.mrb[52].mxu0 %v7844_v43 }
 0x714   : > { %v7539_v19 = vpack.c.bf16 %v7259_v23, %v7255_v1 }
 0x715   : > { %v7720_v12 = vadd.bf16 %v19073_v30, %v7538_v4 }
 0x716   : > { %v7721_v58 = vadd.bf16 %v19076_v17, %v7539_v19 }
 0x717   : > { %v7848_v46 = vmax.bf16 %v20028_v60, %v7720_v12 }
 0x718   : > { %v7263_v5 = vpop.f32.mrb[124].mxu1  ;;  %v7849_v61 = vmax.bf16 %v20028_v60, %v7721_v58 }
 0x719   : > { %v7265_v32 = vpop.f32.mrb[125].mxu1 }
 0x71a   : > { %v7267_v10 = vpop.f32.mrb[126].mxu1  ;;  %8791 = vmatprep.mubr.bf16.mxu0 %v7849_v61 }
 0x71b   : > { %v7542_v16 = vpack.c.bf16 %v7267_v10, %v7263_v5  ;;  %v7269_v25 = vpop.f32.mrb[127].mxu1  ;;  %8792 = vmatmul.mubr.bf16.gmra.mrb[56].mxu0 %v7848_v46 }
 0x71c   : > { %v7543_v6 = vpack.c.bf16 %v7269_v25, %v7265_v32 }
 0x71d   : > { %v7724_v7 = vadd.bf16 %v19073_v30, %v7542_v16 }
 0x71e   : > { %v7725_v50 = vadd.bf16 %v19076_v17, %v7543_v6 }
 0x71f   : > { %v7852_v31 = vmax.bf16 %v20028_v60, %v7724_v7 }
 0x720   : > { %v7273_v55 = vpop.f32.mrb[128].mxu1  ;;  %v7853_v22 = vmax.bf16 %v20028_v60, %v7725_v50 }
 0x721   : > { %v7275_v3 = vpop.f32.mrb[129].mxu1 }
 0x722   : > { %v7277_v20 = vpop.f32.mrb[130].mxu1  ;;  %8801 = vmatprep.mubr.bf16.mxu0 %v7853_v22 }
 0x723   : > { %v7546_v59 = vpack.c.bf16 %v7277_v20, %v7273_v55  ;;  %v7279_v2 = vpop.f32.mrb[131].mxu1  ;;  %8802 = vmatmul.mubr.bf16.gmra.mrb[60].mxu0 %v7852_v31 }
 0x724   : > { %v7547_v0 = vpack.c.bf16 %v7279_v2, %v7275_v3 }
 0x725   : > { %v7728_v11 = vadd.bf16 %v19073_v30, %v7546_v59 }
 0x726   : > { %v7729_v27 = vadd.bf16 %v19076_v17, %v7547_v0 }
 0x727   : > { %v7856_v33 = vmax.bf16 %v20028_v60, %v7728_v11 }
 0x728   : > { %v7283_v40 = vpop.f32.mrb[132].mxu1  ;;  %v7857_v57 = vmax.bf16 %v20028_v60, %v7729_v27 }
 0x729   : > { %v7285_v49 = vpop.f32.mrb[133].mxu1 }
 0x72a   : > { %v7287_v9 = vpop.f32.mrb[134].mxu1  ;;  %8811 = vmatprep.mubr.bf16.mxu0 %v7857_v57 }
 0x72b   : > { %v7550_v53 = vpack.c.bf16 %v7287_v9, %v7283_v40  ;;  %v7289_v15 = vpop.f32.mrb[135].mxu1  ;;  %8812 = vmatmul.mubr.bf16.gmra.mrb[64].mxu0 %v7856_v33 }
 0x72c   : > { %v7551_v39 = vpack.c.bf16 %v7289_v15, %v7285_v49 }
 0x72d   : > { %v7732_v62 = vadd.bf16 %v19073_v30, %v7550_v53 }
 0x72e   : > { %v7733_v28 = vadd.bf16 %v19076_v17, %v7551_v39 }
 0x72f   : > { %v7860_v13 = vmax.bf16 %v20028_v60, %v7732_v62 }
 0x730   : > { %v7293_v54 = vpop.f32.mrb[136].mxu1  ;;  %v7861_v8 = vmax.bf16 %v20028_v60, %v7733_v28 }
 0x731   : > { %v7295_v35 = vpop.f32.mrb[137].mxu1 }
 0x732   : > { %v7297_v24 = vpop.f32.mrb[138].mxu1  ;;  %8821 = vmatprep.mubr.bf16.mxu0 %v7861_v8 }
 0x733   : > { %v7554_v18 = vpack.c.bf16 %v7297_v24, %v7293_v54  ;;  %v7299_v42 = vpop.f32.mrb[139].mxu1  ;;  %8822 = vmatmul.mubr.bf16.gmra.mrb[68].mxu0 %v7860_v13 }
 0x734   : > { %v7555_v52 = vpack.c.bf16 %v7299_v42, %v7295_v35 }
 0x735   : > { %v7736_v51 = vadd.bf16 %v19073_v30, %v7554_v18 }
 0x736   : > { %v7737_v63 = vadd.bf16 %v19076_v17, %v7555_v52 }
 0x737   : > { %v7864_v48 = vmax.bf16 %v20028_v60, %v7736_v51 }
 0x738   : > { %v7303_v41 = vpop.f32.mrb[140].mxu1  ;;  %v7865_v14 = vmax.bf16 %v20028_v60, %v7737_v63 }
 0x739   : > { %v7305_v29 = vpop.f32.mrb[141].mxu1 }
 0x73a   : > { %v7307_v38 = vpop.f32.mrb[142].mxu1  ;;  %8831 = vmatprep.mubr.bf16.mxu0 %v7865_v14 }
 0x73b   : > { %v7558_v45 = vpack.c.bf16 %v7307_v38, %v7303_v41  ;;  %v7309_v21 = vpop.f32.mrb[143].mxu1  ;;  %8832 = vmatmul.mubr.bf16.gmra.mrb[72].mxu0 %v7864_v48 }
 0x73c   : > { %v7559_v56 = vpack.c.bf16 %v7309_v21, %v7305_v29 }
 0x73d   : > { %v7740_v37 = vadd.bf16 %v19073_v30, %v7558_v45 }
 0x73e   : > { %v7741_v26 = vadd.bf16 %v19076_v17, %v7559_v56 }
 0x73f   : > { %v7868_v43 = vmax.bf16 %v20028_v60, %v7740_v37 }
 0x740   : > { %v7313_v47 = vpop.f32.mrb[144].mxu1  ;;  %v7869_v36 = vmax.bf16 %v20028_v60, %v7741_v26 }
 0x741   : > { %v7315_v1 = vpop.f32.mrb[145].mxu1 }
 0x742   : > { %v7317_v34 = vpop.f32.mrb[146].mxu1  ;;  %8841 = vmatprep.mubr.bf16.mxu0 %v7869_v36 }
 0x743   : > { %v7562_v4 = vpack.c.bf16 %v7317_v34, %v7313_v47  ;;  %v7319_v23 = vpop.f32.mrb[147].mxu1  ;;  %8842 = vmatmul.mubr.bf16.gmra.mrb[76].mxu0 %v7868_v43 }
 0x744   : > { %v7563_v19 = vpack.c.bf16 %v7319_v23, %v7315_v1 }
 0x745   : > { %v7744_v12 = vadd.bf16 %v19073_v30, %v7562_v4 }
 0x746   : > { %v7745_v58 = vadd.bf16 %v19076_v17, %v7563_v19 }
 0x747   : > { %v7872_v46 = vmax.bf16 %v20028_v60, %v7744_v12 }
 0x748   : > { %v7323_v5 = vpop.f32.mrb[148].mxu1  ;;  %v7873_v61 = vmax.bf16 %v20028_v60, %v7745_v58 }
 0x749   : > { %v7325_v32 = vpop.f32.mrb[149].mxu1 }
 0x74a   : > { %v7327_v10 = vpop.f32.mrb[150].mxu1  ;;  %8851 = vmatprep.mubr.bf16.mxu0 %v7873_v61 }
 0x74b   : > { %v7566_v16 = vpack.c.bf16 %v7327_v10, %v7323_v5  ;;  %v7329_v25 = vpop.f32.mrb[151].mxu1  ;;  %8852 = vmatmul.mubr.bf16.gmra.mrb[80].mxu0 %v7872_v46 }
 0x74c   : > { %v7567_v6 = vpack.c.bf16 %v7329_v25, %v7325_v32 }
 0x74d   : > { %v7748_v7 = vadd.bf16 %v19073_v30, %v7566_v16 }
 0x74e   : > { %v7749_v50 = vadd.bf16 %v19076_v17, %v7567_v6 }
 0x74f   : > { %v7876_v31 = vmax.bf16 %v20028_v60, %v7748_v7 }
 0x750   : > { %v7333_v55 = vpop.f32.mrb[152].mxu1  ;;  %v7877_v22 = vmax.bf16 %v20028_v60, %v7749_v50 }
 0x751   : > { %v7335_v3 = vpop.f32.mrb[153].mxu1 }
 0x752   : > { %v7337_v20 = vpop.f32.mrb[154].mxu1  ;;  %8861 = vmatprep.mubr.bf16.mxu0 %v7877_v22 }
 0x753   : > { %v7570_v59 = vpack.c.bf16 %v7337_v20, %v7333_v55  ;;  %v7339_v2 = vpop.f32.mrb[155].mxu1  ;;  %8862 = vmatmul.mubr.bf16.gmra.mrb[84].mxu0 %v7876_v31 }
 0x754   : > { %v7571_v0 = vpack.c.bf16 %v7339_v2, %v7335_v3 }
 0x755   : > { %v7752_v11 = vadd.bf16 %v19073_v30, %v7570_v59 }
 0x756   : > { %v7753_v27 = vadd.bf16 %v19076_v17, %v7571_v0 }
 0x757   : > { %v7880_v33 = vmax.bf16 %v20028_v60, %v7752_v11 }
 0x758   : > { %v7343_v40 = vpop.f32.mrb[156].mxu1  ;;  %v7881_v57 = vmax.bf16 %v20028_v60, %v7753_v27 }
 0x759   : > { %v7345_v49 = vpop.f32.mrb[157].mxu1 }
 0x75a   : > { %v7347_v9 = vpop.f32.mrb[158].mxu1  ;;  %8871 = vmatprep.mubr.bf16.mxu0 %v7881_v57 }
 0x75b   : > { %v7574_v53 = vpack.c.bf16 %v7347_v9, %v7343_v40  ;;  %v7349_v15 = vpop.f32.mrb[159].mxu1  ;;  %8872 = vmatmul.mubr.bf16.gmra.mrb[88].mxu0 %v7880_v33 }
 0x75c   : > { %v7575_v39 = vpack.c.bf16 %v7349_v15, %v7345_v49 }
 0x75d   : > { %v7756_v62 = vadd.bf16 %v19073_v30, %v7574_v53 }
 0x75e   : > { %v7757_v28 = vadd.bf16 %v19076_v17, %v7575_v39 }
 0x75f   : > { %v7884_v13 = vmax.bf16 %v20028_v60, %v7756_v62 }
 0x760   : > { %v7353_v54 = vpop.f32.mrb[160].mxu1  ;;  %v7885_v8 = vmax.bf16 %v20028_v60, %v7757_v28 }
 0x761   : > { %v7355_v35 = vpop.f32.mrb[161].mxu1 }
 0x762   : > { %v7357_v24 = vpop.f32.mrb[162].mxu1  ;;  %8881 = vmatprep.mubr.bf16.mxu0 %v7885_v8 }
 0x763   : > { %v7578_v18 = vpack.c.bf16 %v7357_v24, %v7353_v54  ;;  %v7359_v42 = vpop.f32.mrb[163].mxu1  ;;  %8882 = vmatmul.mubr.bf16.gmra.mrb[92].mxu0 %v7884_v13 }
 0x764   : > { %v7579_v52 = vpack.c.bf16 %v7359_v42, %v7355_v35 }
 0x765   : > { %v7760_v51 = vadd.bf16 %v19073_v30, %v7578_v18 }
 0x766   : > { %v7761_v63 = vadd.bf16 %v19076_v17, %v7579_v52 }
 0x767   : > { %v7888_v48 = vmax.bf16 %v20028_v60, %v7760_v51 }
 0x768   : > { %v7363_v41 = vpop.f32.mrb[164].mxu1  ;;  %v7889_v14 = vmax.bf16 %v20028_v60, %v7761_v63 }
 0x769   : > { %v7365_v29 = vpop.f32.mrb[165].mxu1 }
 0x76a   : > { %v7367_v38 = vpop.f32.mrb[166].mxu1  ;;  %8891 = vmatprep.mubr.bf16.mxu0 %v7889_v14 }
 0x76b   : > { %v7582_v45 = vpack.c.bf16 %v7367_v38, %v7363_v41  ;;  %v7369_v21 = vpop.f32.mrb[167].mxu1  ;;  %8892 = vmatmul.mubr.bf16.gmra.mrb[96].mxu0 %v7888_v48 }
 0x76c   : > { %v7583_v56 = vpack.c.bf16 %v7369_v21, %v7365_v29 }
 0x76d   : > { %v7764_v37 = vadd.bf16 %v19073_v30, %v7582_v45 }
 0x76e   : > { %v7765_v26 = vadd.bf16 %v19076_v17, %v7583_v56 }
 0x76f   : > { %v7892_v43 = vmax.bf16 %v20028_v60, %v7764_v37 }
 0x770   : > { %v7373_v47 = vpop.f32.mrb[168].mxu1  ;;  %v7893_v36 = vmax.bf16 %v20028_v60, %v7765_v26 }
 0x771   : > { %v7375_v1 = vpop.f32.mrb[169].mxu1 }
 0x772   : > { %v7377_v34 = vpop.f32.mrb[170].mxu1  ;;  %8901 = vmatprep.mubr.bf16.mxu0 %v7893_v36 }
 0x773   : > { %v7586_v4 = vpack.c.bf16 %v7377_v34, %v7373_v47  ;;  %v7379_v23 = vpop.f32.mrb[171].mxu1  ;;  %8902 = vmatmul.mubr.bf16.gmra.mrb[100].mxu0 %v7892_v43 }
 0x774   : > { %v7587_v19 = vpack.c.bf16 %v7379_v23, %v7375_v1 }
 0x775   : > { %v7768_v12 = vadd.bf16 %v19073_v30, %v7586_v4 }
 0x776   : > { %v7769_v58 = vadd.bf16 %v19076_v17, %v7587_v19 }
 0x777   : > { %v7896_v46 = vmax.bf16 %v20028_v60, %v7768_v12 }
 0x778   : > { %v7383_v5 = vpop.f32.mrb[172].mxu1  ;;  %v7897_v61 = vmax.bf16 %v20028_v60, %v7769_v58 }
 0x779   : > { %v7385_v32 = vpop.f32.mrb[173].mxu1 }
 0x77a   : > { %v7387_v10 = vpop.f32.mrb[174].mxu1  ;;  %8911 = vmatprep.mubr.bf16.mxu0 %v7897_v61 }
 0x77b   : > { %v7590_v16 = vpack.c.bf16 %v7387_v10, %v7383_v5  ;;  %v7389_v25 = vpop.f32.mrb[175].mxu1  ;;  %8912 = vmatmul.mubr.bf16.gmra.mrb[104].mxu0 %v7896_v46 }
 0x77c   : > { %v7591_v6 = vpack.c.bf16 %v7389_v25, %v7385_v32 }
 0x77d   : > { %v7772_v7 = vadd.bf16 %v19073_v30, %v7590_v16 }
 0x77e   : > { %v7773_v50 = vadd.bf16 %v19076_v17, %v7591_v6 }
 0x77f   : > { %v7900_v31 = vmax.bf16 %v20028_v60, %v7772_v7 }
 0x780   : > { %v7393_v55 = vpop.f32.mrb[176].mxu1  ;;  %v7901_v22 = vmax.bf16 %v20028_v60, %v7773_v50 }
 0x781   : > { %v7395_v3 = vpop.f32.mrb[177].mxu1 }
 0x782   : > { %v7397_v20 = vpop.f32.mrb[178].mxu1  ;;  %8921 = vmatprep.mubr.bf16.mxu0 %v7901_v22 }
 0x783   : > { %v7594_v59 = vpack.c.bf16 %v7397_v20, %v7393_v55  ;;  %v7399_v2 = vpop.f32.mrb[179].mxu1  ;;  %8922 = vmatmul.mubr.bf16.gmra.mrb[108].mxu0 %v7900_v31 }
 0x784   : > { %v7595_v0 = vpack.c.bf16 %v7399_v2, %v7395_v3 }
 0x785   : > { %v7776_v11 = vadd.bf16 %v19073_v30, %v7594_v59 }
 0x786   : > { %v7777_v27 = vadd.bf16 %v19076_v17, %v7595_v0 }
 0x787   : > { %v7904_v33 = vmax.bf16 %v20028_v60, %v7776_v11 }
 0x788   : > { %v7403_v40 = vpop.f32.mrb[180].mxu1  ;;  %v7905_v57 = vmax.bf16 %v20028_v60, %v7777_v27 }
 0x789   : > { %v7405_v49 = vpop.f32.mrb[181].mxu1 }
 0x78a   : > { %v7407_v9 = vpop.f32.mrb[182].mxu1  ;;  %8931 = vmatprep.mubr.bf16.mxu0 %v7905_v57  ;;  %v21382_v57 = vld [vmem:[#allocation50_spill] sm:$0xff] }
 0x78b   : > { %v7598_v53 = vpack.c.bf16 %v7407_v9, %v7403_v40  ;;  %v7409_v15 = vpop.f32.mrb[183].mxu1  ;;  %8932 = vmatmul.mubr.bf16.gmra.mrb[112].mxu0 %v7904_v33  ;;  %v8014_v40 = vld [vmem:[%s19435_s6] sm:$0x3]  ;;  %v8022_v33 = vsub.s32 1, %v21382_v57 }
 0x78c   : > { %v7599_v39 = vpack.c.bf16 %v7409_v15, %v7405_v49 }
 0x78d   : > { %v7780_v62 = vadd.bf16 %v19073_v30, %v7598_v53 }
 0x78e   : > { %v7781_v28 = vadd.bf16 %v19076_v17, %v7599_v39 }
 0x78f   : > { %v7908_v13 = vmax.bf16 %v20028_v60, %v7780_v62  ;;  %v19200_v62 = vrot.slane %v8014_v40, %v20331_v44 }
 0x790   : > { %v7413_v54 = vpop.f32.mrb[184].mxu1  ;;  %v7909_v8 = vmax.bf16 %v20028_v60, %v7781_v28 }
 0x791   : > { %v7415_v35 = vpop.f32.mrb[185].mxu1 }
 0x792   : > { %v7417_v24 = vpop.f32.mrb[186].mxu1  ;;  %8941 = vmatprep.mubr.bf16.mxu0 %v7909_v8  ;;  %v19204_v8 = vrot.slane %v8014_v40, %v8022_v33 }
 0x793   : > { %v7602_v18 = vpack.c.bf16 %v7417_v24, %v7413_v54  ;;  %v7419_v42 = vpop.f32.mrb[187].mxu1  ;;  %8942 = vmatmul.mubr.bf16.gmra.mrb[116].mxu0 %v7908_v13 }
 0x794   : > { %v7603_v52 = vpack.c.bf16 %v7419_v42, %v7415_v35 }
 0x795   : > { %v7784_v51 = vadd.bf16 %v19073_v30, %v7602_v18 }
 0x796   : > { %v7785_v63 = vadd.bf16 %v19076_v17, %v7603_v52 }
 0x797   : > { %v7912_v48 = vmax.bf16 %v20028_v60, %v7784_v51 }
 0x798   : > { %v7423_v41 = vpop.f32.mrb[188].mxu1  ;;  %v7913_v14 = vmax.bf16 %v20028_v60, %v7785_v63 }
 0x799   : > { %v7425_v29 = vpop.f32.mrb[189].mxu1 }
 0x79a   : > { %v7427_v38 = vpop.f32.mrb[190].mxu1  ;;  %8951 = vmatprep.mubr.bf16.mxu0 %v7913_v14 }
 0x79b   : > { %v7606_v45 = vpack.c.bf16 %v7427_v38, %v7423_v41  ;;  %v7429_v21 = vpop.f32.mrb[191].mxu1  ;;  %8952 = vmatmul.mubr.bf16.gmra.mrb[120].mxu0 %v7912_v48 }
 0x79c   : > { %v7607_v56 = vpack.c.bf16 %v7429_v21, %v7425_v29 }
 0x79d   : > { %v7788_v37 = vadd.bf16 %v19073_v30, %v7606_v45 }
 0x79e   : > { %v7789_v26 = vadd.bf16 %v19076_v17, %v7607_v56 }
 0x79f   : > { %v7916_v43 = vmax.bf16 %v20028_v60, %v7788_v37 }
 0x7a0   : > { %v7433_v47 = vpop.f32.mrb[192].mxu1  ;;  %v7917_v36 = vmax.bf16 %v20028_v60, %v7789_v26 }
 0x7a1   : > { %v7435_v1 = vpop.f32.mrb[193].mxu1 }
 0x7a2   : > { %v7437_v34 = vpop.f32.mrb[194].mxu1  ;;  %8961 = vmatprep.mubr.bf16.mxu0 %v7917_v36 }
 0x7a3   : > { %v7610_v4 = vpack.c.bf16 %v7437_v34, %v7433_v47  ;;  %v7439_v23 = vpop.f32.mrb[195].mxu1  ;;  %8962 = vmatmul.mubr.bf16.gmra.mrb[124].mxu0 %v7916_v43 }
 0x7a4   : > { %v7611_v19 = vpack.c.bf16 %v7439_v23, %v7435_v1 }
 0x7a5   : > { %v7792_v12 = vadd.bf16 %v19073_v30, %v7610_v4 }
 0x7a6   : > { %v7793_v58 = vadd.bf16 %v19076_v17, %v7611_v19 }
 0x7a7   : > { %v7920_v46 = vmax.bf16 %v20028_v60, %v7792_v12 }
 0x7a8   : > { %v7443_v5 = vpop.f32.mrb[196].mxu1  ;;  %v7921_v61 = vmax.bf16 %v20028_v60, %v7793_v58 }
 0x7a9   : > { %v7445_v32 = vpop.f32.mrb[197].mxu1 }
 0x7aa   : > { %v7447_v10 = vpop.f32.mrb[198].mxu1  ;;  %8971 = vmatprep.mubr.bf16.mxu0 %v7921_v61 }
 0x7ab   : > { %v7614_v16 = vpack.c.bf16 %v7447_v10, %v7443_v5  ;;  %v7449_v25 = vpop.f32.mrb[199].mxu1  ;;  %8972 = vmatmul.mubr.bf16.gmra.mrb[128].mxu0 %v7920_v46 }
 0x7ac   : > { %v7615_v6 = vpack.c.bf16 %v7449_v25, %v7445_v32 }
 0x7ad   : > { %v7796_v7 = vadd.bf16 %v19073_v30, %v7614_v16 }
 0x7ae   : > { %v7797_v50 = vadd.bf16 %v19076_v17, %v7615_v6 }
 0x7af   : > { %v7924_v31 = vmax.bf16 %v20028_v60, %v7796_v7 }
 0x7b0   : > { %v7453_v55 = vpop.f32.mrb[200].mxu1  ;;  %v7925_v22 = vmax.bf16 %v20028_v60, %v7797_v50 }
 0x7b1   : > { %v7455_v3 = vpop.f32.mrb[201].mxu1 }
 0x7b2   : > { %v7457_v20 = vpop.f32.mrb[202].mxu1  ;;  %8981 = vmatprep.mubr.bf16.mxu0 %v7925_v22 }
 0x7b3   : > { %v7618_v59 = vpack.c.bf16 %v7457_v20, %v7453_v55  ;;  %v7459_v2 = vpop.f32.mrb[203].mxu1  ;;  %8982 = vmatmul.mubr.bf16.gmra.mrb[132].mxu0 %v7924_v31 }
 0x7b4   : > { %v7619_v0 = vpack.c.bf16 %v7459_v2, %v7455_v3 }
 0x7b5   : > { %v7800_v11 = vadd.bf16 %v19073_v30, %v7618_v59 }
 0x7b6   : > { %v7801_v27 = vadd.bf16 %v19076_v17, %v7619_v0 }
 0x7b7   : > { %v7928_v53 = vmax.bf16 %v20028_v60, %v7800_v11 }
 0x7b8   : > { %v7463_v49 = vpop.f32.mrb[204].mxu1  ;;  %v7929_v9 = vmax.bf16 %v20028_v60, %v7801_v27 }
 0x7b9   : > { %v7465_v15 = vpop.f32.mrb[205].mxu1 }
 0x7ba   : > { %v7467_v39 = vpop.f32.mrb[206].mxu1  ;;  %8991 = vmatprep.mubr.bf16.mxu0 %v7929_v9 }
 0x7bb   : > { %v7622_v28 = vpack.c.bf16 %v7467_v39, %v7463_v49  ;;  %v7469_v54 = vpop.f32.mrb[207].mxu1  ;;  %8992 = vmatmul.mubr.bf16.gmra.mrb[136].mxu0 %v7928_v53 }
 0x7bc   : > { %v7623_v13 = vpack.c.bf16 %v7469_v54, %v7465_v15 }
 0x7bd   : > { %v7804_v35 = vadd.bf16 %v19073_v30, %v7622_v28 }
 0x7be   : > { %v7805_v24 = vadd.bf16 %v19076_v17, %v7623_v13  ;;  %v8733_v18 = vpop.f32.mrb[32].mxu0 }
 0x7bf   : > { %v10924_v42 = vadd.f32 %v8733_v18, %v19200_v62  ;;  %v8735_v52 = vpop.f32.mrb[33].mxu0  ;;  %v7932_v48 = vmax.bf16 %v20028_v60, %v7804_v35 }
 0x7c0   : > { %v10925_v51 = vadd.f32 %v8735_v52, %v19204_v8  ;;  %v7473_v63 = vpop.f32.mrb[208].mxu1  ;;  %v8737_v41 = vpop.f32.mrb[34].mxu0  ;;  %v7933_v14 = vmax.bf16 %v20028_v60, %v7805_v24 }
 0x7c1   : > { %v10650_v29 = vmul.f32 -1.442695, %v10924_v42  ;;  %v10926_v38 = vadd.f32 %v8737_v41, %v19200_v62  ;;  %v7475_v45 = vpop.f32.mrb[209].mxu1  ;;  %v8739_v21 = vpop.f32.mrb[35].mxu0 }
 0x7c2   : > { %v10651_v56 = vmul.f32 -1.442695, %v10925_v51  ;;  %v10927_v37 = vadd.f32 %v8739_v21, %v19204_v8  ;;  %v7477_v26 = vpop.f32.mrb[210].mxu1  ;;  %9001 = vmatprep.mubr.bf16.mxu0 %v7933_v14 }
 0x7c3   : > { %12516 = vpow2.f32 %v10650_v29  ;;  %v10652_v47 = vmul.f32 -1.442695, %v10926_v38  ;;  %v7626_v36 = vpack.c.bf16 %v7477_v26, %v7473_v63  ;;  %v7479_v43 = vpop.f32.mrb[211].mxu1  ;;  %9002 = vmatmul.mubr.bf16.gmra.mrb[140].mxu0 %v7932_v48 }
 0x7c4   : > { %12518 = vpow2.f32 %v10651_v56  ;;  %v10653_v1 = vmul.f32 -1.442695, %v10927_v37  ;;  %v7627_v34 = vpack.c.bf16 %v7479_v43, %v7475_v45 }
 0x7c5   : > { %12520 = vpow2.f32 %v10652_v47  ;;  %v7808_v4 = vadd.bf16 %v19073_v30, %v7626_v36 }
 0x7c6   : > { %12522 = vpow2.f32 %v10653_v1  ;;  %v7809_v23 = vadd.bf16 %v19076_v17, %v7627_v34  ;;  %v8743_v19 = vpop.f32.mrb[36].mxu0 }
 0x7c7   : > { %v10928_v12 = vadd.f32 %v8743_v19, %v19200_v62  ;;  %v8745_v58 = vpop.f32.mrb[37].mxu0  ;;  %v7936_v10 = vmax.bf16 %v20028_v60, %v7808_v4 }
 0x7c8   : > { %v10929_v5 = vadd.f32 %v8745_v58, %v19204_v8  ;;  %v7483_v61 = vpop.f32.mrb[212].mxu1  ;;  %v8747_v46 = vpop.f32.mrb[38].mxu0  ;;  %v7937_v32 = vmax.bf16 %v20028_v60, %v7809_v23 }
 0x7c9   : > { %v10654_v16 = vmul.f32 -1.442695, %v10928_v12  ;;  %v10930_v25 = vadd.f32 %v8747_v46, %v19200_v62  ;;  %v7485_v6 = vpop.f32.mrb[213].mxu1  ;;  %v8749_v7 = vpop.f32.mrb[39].mxu0 }
 0x7ca   : > { %v10655_v50 = vmul.f32 -1.442695, %v10929_v5  ;;  %v10931_v55 = vadd.f32 %v8749_v7, %v19204_v8  ;;  %v7487_v22 = vpop.f32.mrb[214].mxu1  ;;  %9011 = vmatprep.mubr.bf16.mxu0 %v7937_v32 }
 0x7cb   : > { %12524 = vpow2.f32 %v10654_v16  ;;  %v10656_v31 = vmul.f32 -1.442695, %v10930_v25  ;;  %v7630_v3 = vpack.c.bf16 %v7487_v22, %v7483_v61  ;;  %v7489_v20 = vpop.f32.mrb[215].mxu1  ;;  %9012 = vmatmul.mubr.bf16.gmra.mrb[144].mxu0 %v7936_v10 }
 0x7cc   : > { %12526 = vpow2.f32 %v10655_v50  ;;  %v10657_v59 = vmul.f32 -1.442695, %v10931_v55  ;;  %v7631_v2 = vpack.c.bf16 %v7489_v20, %v7485_v6 }
 0x7cd   : > { %v12517_v0 = vpop.eup %12516  ;;  %12528 = vpow2.f32 %v10656_v31  ;;  %v7812_v11 = vadd.bf16 %v19073_v30, %v7630_v3 }
 0x7ce   : > { %v12519_v27 = vpop.eup %12518  ;;  %v9436_v40 = vadd.f32 1.0, %v12517_v0  ;;  %12530 = vpow2.f32 %v10657_v59  ;;  %v7813_v49 = vadd.bf16 %v19076_v17, %v7631_v2  ;;  %v8753_v9 = vpop.f32.mrb[40].mxu0 }
 0x7cf   : > { %v12521_v53 = vpop.eup %12520  ;;  %v9437_v15 = vadd.f32 1.0, %v12519_v27  ;;  %v7940_v39 = vmax.bf16 %v20028_v60, %v7812_v11  ;;  %v10932_v28 = vadd.f32 %v8753_v9, %v19200_v62  ;;  %v8755_v54 = vpop.f32.mrb[41].mxu0 }
 0x7d0   : > { %v12523_v13 = vpop.eup %12522  ;;  %12532 = vrcp.f32 %v9436_v40  ;;  %v9438_v35 = vadd.f32 1.0, %v12521_v53  ;;  %v10933_v24 = vadd.f32 %v8755_v54, %v19204_v8  ;;  %v7493_v18 = vpop.f32.mrb[216].mxu1  ;;  %v7941_v52 = vmax.bf16 %v20028_v60, %v7813_v49 }
 0x7d1   : > { %v8757_v42 = vpop.f32.mrb[42].mxu0  ;;  %12534 = vrcp.f32 %v9437_v15  ;;  %v9439_v51 = vadd.f32 1.0, %v12523_v13  ;;  %v10658_v63 = vmul.f32 -1.442695, %v10932_v28  ;;  %v7495_v14 = vpop.f32.mrb[217].mxu1 }
 0x7d2   : > { %v10934_v41 = vadd.f32 %v8757_v42, %v19200_v62  ;;  %v8759_v48 = vpop.f32.mrb[43].mxu0  ;;  %12536 = vrcp.f32 %v9438_v35  ;;  %v10659_v29 = vmul.f32 -1.442695, %v10933_v24  ;;  %v7497_v45 = vpop.f32.mrb[218].mxu1  ;;  %9021 = vmatprep.mubr.bf16.mxu0 %v7941_v52 }
 0x7d3   : > { %v10935_v38 = vadd.f32 %v8759_v48, %v19204_v8  ;;  %12538 = vrcp.f32 %v9439_v51  ;;  %v7634_v56 = vpack.c.bf16 %v7497_v45, %v7493_v18  ;;  %v7499_v37 = vpop.f32.mrb[219].mxu1  ;;  %9022 = vmatmul.mubr.bf16.gmra.mrb[148].mxu0 %v7940_v39 }
 0x7d4   : > { %v10660_v21 = vmul.f32 -1.442695, %v10934_v41  ;;  %12540 = vpow2.f32 %v10658_v63  ;;  %v7635_v47 = vpack.c.bf16 %v7499_v37, %v7495_v14 }
 0x7d5   : > { %v10661_v26 = vmul.f32 -1.442695, %v10935_v38  ;;  %v12525_v36 = vpop.eup %12524  ;;  %12542 = vpow2.f32 %v10659_v29  ;;  %v7816_v43 = vadd.bf16 %v19073_v30, %v7634_v56 }
 0x7d6   : > { %v12527_v1 = vpop.eup %12526  ;;  %v9440_v34 = vadd.f32 1.0, %v12525_v36  ;;  %12544 = vpow2.f32 %v10660_v21  ;;  %v7817_v4 = vadd.bf16 %v19076_v17, %v7635_v47  ;;  %v8763_v23 = vpop.f32.mrb[44].mxu0 }
 0x7d7   : > { %v12529_v19 = vpop.eup %12528  ;;  %v9441_v12 = vadd.f32 1.0, %v12527_v1  ;;  %12546 = vpow2.f32 %v10661_v26  ;;  %v7944_v58 = vmax.bf16 %v20028_v60, %v7816_v43  ;;  %v10936_v5 = vadd.f32 %v8763_v23, %v19200_v62  ;;  %v8765_v61 = vpop.f32.mrb[45].mxu0 }
 0x7d8   : > { %v12531_v46 = vpop.eup %12530  ;;  %12548 = vrcp.f32 %v9440_v34  ;;  %v9442_v32 = vadd.f32 1.0, %v12529_v19  ;;  %v10937_v10 = vadd.f32 %v8765_v61, %v19204_v8  ;;  %v7503_v16 = vpop.f32.mrb[220].mxu1  ;;  %v7945_v6 = vmax.bf16 %v20028_v60, %v7817_v4 }
 0x7d9   : > { %v8767_v25 = vpop.f32.mrb[46].mxu0  ;;  %12550 = vrcp.f32 %v9441_v12  ;;  %v9443_v7 = vadd.f32 1.0, %v12531_v46  ;;  %v10662_v50 = vmul.f32 -1.442695, %v10936_v5  ;;  %v7505_v22 = vpop.f32.mrb[221].mxu1 }
 0x7da   : > { %v10938_v55 = vadd.f32 %v8767_v25, %v19200_v62  ;;  %v8769_v31 = vpop.f32.mrb[47].mxu0  ;;  %v12533_v3 = vpop.eup %12532  ;;  %12552 = vrcp.f32 %v9442_v32  ;;  %v10663_v20 = vmul.f32 -1.442695, %v10937_v10  ;;  %9031 = vmatprep.mubr.bf16.mxu0 %v7945_v6 }
 0x7db   : > { %v10939_v59 = vadd.f32 %v8769_v31, %v19204_v8  ;;  %v7507_v2 = vpop.f32.mrb[222].mxu1  ;;  %v12535_v0 = vpop.eup %12534  ;;  %12554 = vrcp.f32 %v9443_v7  ;;  %9032 = vmatmul.mubr.bf16.gmra.mrb[152].mxu0 %v7944_v58 }
 0x7dc   : > { %v10664_v11 = vmul.f32 -1.442695, %v10938_v55  ;;  %v7638_v27 = vpack.c.bf16 %v7507_v2, %v7503_v16  ;;  %v7509_v40 = vpop.f32.mrb[223].mxu1  ;;  %v12537_v49 = vpop.eup %12536  ;;  %12556 = vpow2.f32 %v10662_v50 }
 0x7dd   : > { %v10665_v9 = vmul.f32 -1.442695, %v10939_v59  ;;  %v7639_v53 = vpack.c.bf16 %v7509_v40, %v7505_v22  ;;  %v12539_v15 = vpop.eup %12538  ;;  %12558 = vpow2.f32 %v10663_v20  ;;  %v10790_v28 = vpack.c.bf16 %v12537_v49, %v12533_v3 }
 0x7de   : > { %v7820_v39 = vadd.bf16 %v19073_v30, %v7638_v27  ;;  %v12541_v54 = vpop.eup %12540  ;;  %12560 = vpow2.f32 %v10664_v11  ;;  %v8773_v35 = vpop.f32.mrb[48].mxu0  ;;  %v10788_v24 = vpack.c.bf16 %v12539_v15, %v12535_v0 }
 0x7df   : > { %v7821_v13 = vadd.bf16 %v19076_v17, %v7639_v53  ;;  %v12543_v18 = vpop.eup %12542  ;;  %v9444_v42 = vadd.f32 1.0, %v12541_v54  ;;  %12562 = vpow2.f32 %v10665_v9  ;;  %v10940_v52 = vadd.f32 %v8773_v35, %v19200_v62  ;;  %v8775_v51 = vpop.f32.mrb[49].mxu0 }
 0x7e0   : > { %v12545_v63 = vpop.eup %12544  ;;  %v9445_v41 = vadd.f32 1.0, %v12543_v18  ;;  %v7948_v14 = vmax.bf16 %v20028_v60, %v7820_v39  ;;  %v10941_v48 = vadd.f32 %v8775_v51, %v19204_v8  ;;  %v8777_v30 = vpop.f32.mrb[50].mxu0  ;;  %10789 = vmatprep.subr.bf16.mxu1 %v10788_v24 }
 0x7e1   : > { %v7949_v29 = vmax.bf16 %v20028_v60, %v7821_v13  ;;  %v12547_v38 = vpop.eup %12546  ;;  %12564 = vrcp.f32 %v9444_v42  ;;  %v9446_v17 = vadd.f32 1.0, %v12545_v63  ;;  %v10666_v45 = vmul.f32 -1.442695, %v10940_v52  ;;  %v8779_v56 = vpop.f32.mrb[51].mxu0  ;;  %10791 = vmatpush1.bf16.xpose.msra.mxu1 %v10790_v28  ;;  %v9820_v60 = vld [vmem:[%s19436_s7] sm:$0x3] }
 0x7e2   : > { %v10942_v21 = vadd.f32 %v8777_v30, %v19200_v62  ;;  %v12549_v37 = vpop.eup %12548  ;;  %12566 = vrcp.f32 %v9445_v41  ;;  %v9447_v26 = vadd.f32 1.0, %v12547_v38  ;;  %v10667_v47 = vmul.f32 -1.442695, %v10941_v48 }
 0x7e3   : > { %v10943_v36 = vadd.f32 %v8779_v56, %v19204_v8  ;;  %9041 = vmatprep.mubr.bf16.mxu0 %v7949_v29  ;;  %v12551_v43 = vpop.eup %12550  ;;  %12568 = vrcp.f32 %v9446_v17  ;;  %v19251_v23 = vrot.slane %v9820_v60, %v8022_v33 }
 0x7e4   : > { %v10668_v1 = vmul.f32 -1.442695, %v10942_v21  ;;  %9042 = vmatmul.mubr.bf16.gmra.mrb[156].mxu0 %v7948_v14  ;;  %v12553_v34 = vpop.eup %12552  ;;  %12570 = vrcp.f32 %v9447_v26 }
 0x7e5   : > { %v10669_v4 = vmul.f32 -1.442695, %v10943_v36  ;;  %v12555_v19 = vpop.eup %12554  ;;  %12572 = vpow2.f32 %v10666_v45  ;;  %v10794_v12 = vpack.c.bf16 %v12553_v34, %v12549_v37  ;;  %9906 = vmatprep.mubr.f32.mxu1 %v19251_v23 }
 0x7e6   : > { %v12557_v58 = vpop.eup %12556  ;;  %12574 = vpow2.f32 %v10667_v47  ;;  %v8783_v5 = vpop.f32.mrb[52].mxu0  ;;  %v10792_v61 = vpack.c.bf16 %v12555_v19, %v12551_v43 }
 0x7e7   : > { %v12559_v46 = vpop.eup %12558  ;;  %v9448_v32 = vadd.f32 1.0, %v12557_v58  ;;  %12576 = vpow2.f32 %v10668_v1  ;;  %v10944_v10 = vadd.f32 %v8783_v5, %v19200_v62  ;;  %v8785_v16 = vpop.f32.mrb[53].mxu0 }
 0x7e8   : > { %v12561_v25 = vpop.eup %12560  ;;  %v9449_v6 = vadd.f32 1.0, %v12559_v46  ;;  %12578 = vpow2.f32 %v10669_v4  ;;  %v10945_v57 = vadd.f32 %v8785_v16, %v19204_v8  ;;  %v8787_v33 = vpop.f32.mrb[54].mxu0  ;;  %10793 = vmatprep.subr.bf16.mxu1 %v10792_v61 }
 0x7e9   : > { %v12563_v7 = vpop.eup %12562  ;;  %12580 = vrcp.f32 %v9448_v32  ;;  %v9450_v50 = vadd.f32 1.0, %v12561_v25  ;;  %v10670_v55 = vmul.f32 -1.442695, %v10944_v10  ;;  %v10946_v22 = vadd.f32 %v8787_v33, %v19200_v62  ;;  %v8789_v31 = vpop.f32.mrb[55].mxu0  ;;  %10795 = vmatpush1.bf16.xpose.msra.mxu1 %v10794_v12 }
 0x7ea   : > { %12582 = vrcp.f32 %v9449_v6  ;;  %v9451_v3 = vadd.f32 1.0, %v12563_v7  ;;  %v10671_v20 = vmul.f32 -1.442695, %v10945_v57  ;;  %v10947_v59 = vadd.f32 %v8789_v31, %v19204_v8 }
 0x7eb   : > { %v12565_v2 = vpop.eup %12564  ;;  %12584 = vrcp.f32 %v9450_v50  ;;  %v10672_v0 = vmul.f32 -1.442695, %v10946_v22 }
 0x7ec   : > { %v12567_v11 = vpop.eup %12566  ;;  %12586 = vrcp.f32 %v9451_v3  ;;  %v10673_v27 = vmul.f32 -1.442695, %v10947_v59 }
 0x7ed   : > { %v12569_v40 = vpop.eup %12568  ;;  %12588 = vpow2.f32 %v10670_v55 }
 0x7ee   : > { %v12571_v49 = vpop.eup %12570  ;;  %12590 = vpow2.f32 %v10671_v20  ;;  %v8793_v9 = vpop.f32.mrb[56].mxu0  ;;  %v10798_v53 = vpack.c.bf16 %v12569_v40, %v12565_v2 }
 0x7ef   : > { %v12573_v15 = vpop.eup %12572  ;;  %12592 = vpow2.f32 %v10672_v0  ;;  %v10948_v39 = vadd.f32 %v8793_v9, %v19200_v62  ;;  %v8795_v28 = vpop.f32.mrb[57].mxu0  ;;  %v10796_v54 = vpack.c.bf16 %v12571_v49, %v12567_v11 }
 0x7f0   : > { %v12575_v13 = vpop.eup %12574  ;;  %v9452_v35 = vadd.f32 1.0, %v12573_v15  ;;  %12594 = vpow2.f32 %v10673_v27  ;;  %v10949_v24 = vadd.f32 %v8795_v28, %v19204_v8  ;;  %v8797_v18 = vpop.f32.mrb[58].mxu0 }
 0x7f1   : > { %v12577_v42 = vpop.eup %12576  ;;  %v9453_v52 = vadd.f32 1.0, %v12575_v13  ;;  %v10950_v51 = vadd.f32 %v8797_v18, %v19200_v62  ;;  %10797 = vmatprep.subr.bf16.mxu1 %v10796_v54  ;;  %v8799_v63 = vpop.f32.mrb[59].mxu0  ;;  %v10674_v48 = vmul.f32 -1.442695, %v10948_v39 }
 0x7f2   : > { %v12579_v41 = vpop.eup %12578  ;;  %12596 = vrcp.f32 %v9452_v35  ;;  %v9454_v14 = vadd.f32 1.0, %v12577_v42  ;;  %v10951_v30 = vadd.f32 %v8799_v63, %v19204_v8  ;;  %10799 = vmatpush1.bf16.xpose.msra.mxu1 %v10798_v53  ;;  %v10675_v17 = vmul.f32 -1.442695, %v10949_v24 }
 0x7f3   : > { %v12581_v29 = vpop.eup %12580  ;;  %12598 = vrcp.f32 %v9453_v52  ;;  %v9455_v38 = vadd.f32 1.0, %v12579_v41  ;;  %v10676_v21 = vmul.f32 -1.442695, %v10950_v51 }
 0x7f4   : > { %v12583_v45 = vpop.eup %12582  ;;  %12600 = vrcp.f32 %v9454_v14  ;;  %v10677_v37 = vmul.f32 -1.442695, %v10951_v30 }
 0x7f5   : > { %v12585_v56 = vpop.eup %12584  ;;  %12602 = vrcp.f32 %v9455_v38 }
 0x7f6   : > { %v12587_v26 = vpop.eup %12586  ;;  %12604 = vpow2.f32 %v10674_v48  ;;  %v8803_v47 = vpop.f32.mrb[60].mxu0  ;;  %v10802_v36 = vpack.c.bf16 %v12585_v56, %v12581_v29 }
 0x7f7   : > { %v12589_v43 = vpop.eup %12588  ;;  %12606 = vpow2.f32 %v10675_v17  ;;  %v10952_v1 = vadd.f32 %v8803_v47, %v19200_v62  ;;  %v8805_v60 = vpop.f32.mrb[61].mxu0  ;;  %v10800_v34 = vpack.c.bf16 %v12587_v26, %v12583_v45 }
 0x7f8   : > { %v12591_v4 = vpop.eup %12590  ;;  %v9456_v19 = vadd.f32 1.0, %v12589_v43  ;;  %12608 = vpow2.f32 %v10676_v21  ;;  %v10953_v12 = vadd.f32 %v8805_v60, %v19204_v8  ;;  %v8807_v58 = vpop.f32.mrb[62].mxu0 }
 0x7f9   : > { %v12593_v5 = vpop.eup %12592  ;;  %v9457_v61 = vadd.f32 1.0, %v12591_v4  ;;  %12610 = vpow2.f32 %v10677_v37  ;;  %v10954_v46 = vadd.f32 %v8807_v58, %v19200_v62  ;;  %10801 = vmatprep.subr.bf16.mxu1 %v10800_v34  ;;  %v8809_v32 = vpop.f32.mrb[63].mxu0  ;;  %v10678_v25 = vmul.f32 -1.442695, %v10952_v1 }
 0x7fa   : > { %v12595_v10 = vpop.eup %12594  ;;  %12612 = vrcp.f32 %v9456_v19  ;;  %v9458_v16 = vadd.f32 1.0, %v12593_v5  ;;  %v10955_v6 = vadd.f32 %v8809_v32, %v19204_v8  ;;  %10803 = vmatpush1.bf16.xpose.msra.mxu1 %v10802_v36  ;;  %v10679_v33 = vmul.f32 -1.442695, %v10953_v12 }
 0x7fb   : > { %12614 = vrcp.f32 %v9457_v61  ;;  %v9459_v57 = vadd.f32 1.0, %v12595_v10  ;;  %v10680_v50 = vmul.f32 -1.442695, %v10954_v46 }
 0x7fc   : > { %v12597_v7 = vpop.eup %12596  ;;  %12616 = vrcp.f32 %v9458_v16  ;;  %v10681_v22 = vmul.f32 -1.442695, %v10955_v6 }
 0x7fd   : > { %v12599_v55 = vpop.eup %12598  ;;  %12618 = vrcp.f32 %v9459_v57 }
 0x7fe   : > { %v12601_v31 = vpop.eup %12600  ;;  %12620 = vpow2.f32 %v10678_v25  ;;  %v8813_v3 = vpop.f32.mrb[64].mxu0 }
 0x7ff   : > { %v12603_v20 = vpop.eup %12602  ;;  %12622 = vpow2.f32 %v10679_v33  ;;  %v10956_v59 = vadd.f32 %v8813_v3, %v19200_v62  ;;  %v8815_v2 = vpop.f32.mrb[65].mxu0  ;;  %v10806_v0 = vpack.c.bf16 %v12601_v31, %v12597_v7 }
 0x800   : > { %v12605_v11 = vpop.eup %12604  ;;  %12624 = vpow2.f32 %v10680_v50  ;;  %v10957_v27 = vadd.f32 %v8815_v2, %v19204_v8  ;;  %v8817_v40 = vpop.f32.mrb[66].mxu0  ;;  %v10804_v49 = vpack.c.bf16 %v12603_v20, %v12599_v55 }
 0x801   : > { %v12607_v9 = vpop.eup %12606  ;;  %v9460_v53 = vadd.f32 1.0, %v12605_v11  ;;  %12626 = vpow2.f32 %v10681_v22  ;;  %v10958_v15 = vadd.f32 %v8817_v40, %v19200_v62  ;;  %v8819_v39 = vpop.f32.mrb[67].mxu0  ;;  %v10682_v18 = vmul.f32 -1.442695, %v10956_v59 }
 0x802   : > { %v12609_v28 = vpop.eup %12608  ;;  %v9461_v54 = vadd.f32 1.0, %v12607_v9  ;;  %10805 = vmatprep.subr.bf16.mxu1 %v10804_v49  ;;  %v10959_v13 = vadd.f32 %v8819_v39, %v19204_v8  ;;  %v10683_v51 = vmul.f32 -1.442695, %v10957_v27 }
 0x803   : > { %v12611_v35 = vpop.eup %12610  ;;  %12628 = vrcp.f32 %v9460_v53  ;;  %v9462_v24 = vadd.f32 1.0, %v12609_v28  ;;  %10807 = vmatpush1.bf16.xpose.msra.mxu1 %v10806_v0  ;;  %v10684_v41 = vmul.f32 -1.442695, %v10958_v15 }
 0x804   : > { %v12613_v42 = vpop.eup %12612  ;;  %12630 = vrcp.f32 %v9461_v54  ;;  %v9463_v52 = vadd.f32 1.0, %v12611_v35  ;;  %v10685_v48 = vmul.f32 -1.442695, %v10959_v13 }
 0x805   : > { %v12615_v63 = vpop.eup %12614  ;;  %12632 = vrcp.f32 %v9462_v24 }
 0x806   : > { %v12617_v14 = vpop.eup %12616  ;;  %12634 = vrcp.f32 %v9463_v52  ;;  %v8823_v30 = vpop.f32.mrb[68].mxu0 }
 0x807   : > { %v12619_v29 = vpop.eup %12618  ;;  %12636 = vpow2.f32 %v10682_v18  ;;  %v10960_v38 = vadd.f32 %v8823_v30, %v19200_v62  ;;  %v8825_v17 = vpop.f32.mrb[69].mxu0  ;;  %v10810_v45 = vpack.c.bf16 %v12617_v14, %v12613_v42 }
 0x808   : > { %v12621_v21 = vpop.eup %12620  ;;  %12638 = vpow2.f32 %v10683_v51  ;;  %v10961_v56 = vadd.f32 %v8825_v17, %v19204_v8  ;;  %v8827_v37 = vpop.f32.mrb[70].mxu0  ;;  %v10808_v26 = vpack.c.bf16 %v12619_v29, %v12615_v63 }
 0x809   : > { %v12623_v47 = vpop.eup %12622  ;;  %v9464_v36 = vadd.f32 1.0, %v12621_v21  ;;  %12640 = vpow2.f32 %v10684_v41  ;;  %v10962_v43 = vadd.f32 %v8827_v37, %v19200_v62  ;;  %v8829_v1 = vpop.f32.mrb[71].mxu0  ;;  %v10686_v58 = vmul.f32 -1.442695, %v10960_v38 }
 0x80a   : > { %v12625_v60 = vpop.eup %12624  ;;  %v9465_v34 = vadd.f32 1.0, %v12623_v47  ;;  %12642 = vpow2.f32 %v10685_v48  ;;  %10809 = vmatprep.subr.bf16.mxu1 %v10808_v26  ;;  %v10963_v4 = vadd.f32 %v8829_v1, %v19204_v8  ;;  %v10687_v61 = vmul.f32 -1.442695, %v10961_v56 }
 0x80b   : > { %v12627_v19 = vpop.eup %12626  ;;  %12644 = vrcp.f32 %v9464_v36  ;;  %v9466_v12 = vadd.f32 1.0, %v12625_v60  ;;  %10811 = vmatpush1.bf16.xpose.msra.mxu1 %v10810_v45  ;;  %v10688_v32 = vmul.f32 -1.442695, %v10962_v43 }
 0x80c   : > { %12646 = vrcp.f32 %v9465_v34  ;;  %v9467_v5 = vadd.f32 1.0, %v12627_v19  ;;  %v10689_v16 = vmul.f32 -1.442695, %v10963_v4 }
 0x80d   : > { %v12629_v46 = vpop.eup %12628  ;;  %12648 = vrcp.f32 %v9466_v12 }
 0x80e   : > { %v12631_v10 = vpop.eup %12630  ;;  %12650 = vrcp.f32 %v9467_v5  ;;  %v8833_v25 = vpop.f32.mrb[72].mxu0 }
 0x80f   : > { %v12633_v6 = vpop.eup %12632  ;;  %12652 = vpow2.f32 %v10686_v58  ;;  %v10964_v57 = vadd.f32 %v8833_v25, %v19200_v62  ;;  %v8835_v33 = vpop.f32.mrb[73].mxu0 }
 0x810   : > { %v12635_v7 = vpop.eup %12634  ;;  %12654 = vpow2.f32 %v10687_v61  ;;  %v10965_v50 = vadd.f32 %v8835_v33, %v19204_v8  ;;  %v8837_v55 = vpop.f32.mrb[74].mxu0  ;;  %v10814_v22 = vpack.c.bf16 %v12633_v6, %v12629_v46 }
 0x811   : > { %v12637_v31 = vpop.eup %12636  ;;  %12656 = vpow2.f32 %v10688_v32  ;;  %v10690_v3 = vmul.f32 -1.442695, %v10964_v57  ;;  %v10966_v20 = vadd.f32 %v8837_v55, %v19200_v62  ;;  %v10812_v59 = vpack.c.bf16 %v12635_v7, %v12631_v10  ;;  %v8839_v2 = vpop.f32.mrb[75].mxu0 }
 0x812   : > { %v12639_v0 = vpop.eup %12638  ;;  %v9468_v11 = vadd.f32 1.0, %v12637_v31  ;;  %12658 = vpow2.f32 %v10689_v16  ;;  %v10967_v27 = vadd.f32 %v8839_v2, %v19204_v8  ;;  %v10691_v15 = vmul.f32 -1.442695, %v10965_v50 }
 0x813   : > { %v12641_v40 = vpop.eup %12640  ;;  %v9469_v49 = vadd.f32 1.0, %v12639_v0  ;;  %12660 = vpow2.f32 %v10690_v3  ;;  %10813 = vmatprep.subr.bf16.mxu1 %v10812_v59  ;;  %v10692_v54 = vmul.f32 -1.442695, %v10966_v20 }
 0x814   : > { %v12643_v9 = vpop.eup %12642  ;;  %12662 = vrcp.f32 %v9468_v11  ;;  %v9470_v53 = vadd.f32 1.0, %v12641_v40  ;;  %10815 = vmatpush1.bf16.xpose.msra.mxu1 %v10814_v22  ;;  %v10693_v35 = vmul.f32 -1.442695, %v10967_v27 }
 0x815   : > { %v12645_v39 = vpop.eup %12644  ;;  %12664 = vrcp.f32 %v9469_v49  ;;  %v9471_v28 = vadd.f32 1.0, %v12643_v9 }
 0x816   : > { %v12647_v13 = vpop.eup %12646  ;;  %12666 = vrcp.f32 %v9470_v53  ;;  %v8843_v24 = vpop.f32.mrb[76].mxu0 }
 0x817   : > { %v12649_v18 = vpop.eup %12648  ;;  %12668 = vrcp.f32 %v9471_v28  ;;  %v10968_v42 = vadd.f32 %v8843_v24, %v19200_v62  ;;  %v8845_v52 = vpop.f32.mrb[77].mxu0 }
 0x818   : > { %v12651_v51 = vpop.eup %12650  ;;  %12670 = vpow2.f32 %v10691_v15  ;;  %v8847_v63 = vpop.f32.mrb[78].mxu0  ;;  %v10818_v41 = vpack.c.bf16 %v12649_v18, %v12645_v39  ;;  %v10969_v30 = vadd.f32 %v8845_v52, %v19204_v8 }
 0x819   : > { %v12653_v14 = vpop.eup %12652  ;;  %12672 = vpow2.f32 %v10692_v54  ;;  %v10694_v48 = vmul.f32 -1.442695, %v10968_v42  ;;  %v10816_v29 = vpack.c.bf16 %v12651_v51, %v12647_v13  ;;  %v8849_v38 = vpop.f32.mrb[79].mxu0  ;;  %v10970_v21 = vadd.f32 %v8847_v63, %v19200_v62 }
 0x81a   : > { %v12655_v17 = vpop.eup %12654  ;;  %v9472_v45 = vadd.f32 1.0, %v12653_v14  ;;  %12674 = vpow2.f32 %v10693_v35  ;;  %v10971_v26 = vadd.f32 %v8849_v38, %v19204_v8  ;;  %v10695_v60 = vmul.f32 -1.442695, %v10969_v30 }
 0x81b   : > { %v12657_v56 = vpop.eup %12656  ;;  %v9473_v37 = vadd.f32 1.0, %v12655_v17  ;;  %12676 = vpow2.f32 %v10694_v48  ;;  %10817 = vmatprep.subr.bf16.mxu1 %v10816_v29  ;;  %v10696_v19 = vmul.f32 -1.442695, %v10970_v21 }
 0x81c   : > { %v12659_v47 = vpop.eup %12658  ;;  %12678 = vrcp.f32 %v9472_v45  ;;  %v9474_v36 = vadd.f32 1.0, %v12657_v56  ;;  %10819 = vmatpush1.bf16.xpose.msra.mxu1 %v10818_v41  ;;  %v10697_v5 = vmul.f32 -1.442695, %v10971_v26 }
 0x81d   : > { %v12661_v43 = vpop.eup %12660  ;;  %12680 = vrcp.f32 %v9473_v37  ;;  %v9475_v1 = vadd.f32 1.0, %v12659_v47 }
 0x81e   : > { %v12663_v34 = vpop.eup %12662  ;;  %12682 = vrcp.f32 %v9474_v36  ;;  %v9476_v4 = vadd.f32 1.0, %v12661_v43  ;;  %v8853_v12 = vpop.f32.mrb[80].mxu0 }
 0x81f   : > { %v12665_v58 = vpop.eup %12664  ;;  %12684 = vrcp.f32 %v9475_v1  ;;  %v10972_v61 = vadd.f32 %v8853_v12, %v19200_v62  ;;  %v8855_v46 = vpop.f32.mrb[81].mxu0 }
 0x820   : > { %v12667_v32 = vpop.eup %12666  ;;  %12686 = vrcp.f32 %v9476_v4  ;;  %v8857_v10 = vpop.f32.mrb[82].mxu0  ;;  %v10973_v6 = vadd.f32 %v8855_v46, %v19204_v8 }
 0x821   : > { %v12669_v16 = vpop.eup %12668  ;;  %12688 = vpow2.f32 %v10695_v60  ;;  %v10698_v25 = vmul.f32 -1.442695, %v10972_v61  ;;  %v8859_v57 = vpop.f32.mrb[83].mxu0  ;;  %v10822_v33 = vpack.c.bf16 %v12667_v32, %v12663_v34  ;;  %v10974_v50 = vadd.f32 %v8857_v10, %v19200_v62 }
 0x822   : > { %v12671_v7 = vpop.eup %12670  ;;  %12690 = vpow2.f32 %v10696_v19  ;;  %v10820_v55 = vpack.c.bf16 %v12669_v16, %v12665_v58  ;;  %v10975_v3 = vadd.f32 %v8859_v57, %v19204_v8  ;;  %v10699_v11 = vmul.f32 -1.442695, %v10973_v6 }
 0x823   : > { %v12673_v22 = vpop.eup %12672  ;;  %v9477_v31 = vadd.f32 1.0, %v12671_v7  ;;  %12692 = vpow2.f32 %v10697_v5  ;;  %v10700_v49 = vmul.f32 -1.442695, %v10974_v50 }
 0x824   : > { %v12675_v20 = vpop.eup %12674  ;;  %v9478_v59 = vadd.f32 1.0, %v12673_v22  ;;  %12694 = vpow2.f32 %v10698_v25  ;;  %10821 = vmatprep.subr.bf16.mxu1 %v10820_v55  ;;  %v10701_v15 = vmul.f32 -1.442695, %v10975_v3 }
 0x825   : > { %v12677_v2 = vpop.eup %12676  ;;  %12696 = vrcp.f32 %v9477_v31  ;;  %v9479_v0 = vadd.f32 1.0, %v12675_v20  ;;  %10823 = vmatpush1.bf16.xpose.msra.mxu1 %v10822_v33 }
 0x826   : > { %v12679_v27 = vpop.eup %12678  ;;  %12698 = vrcp.f32 %v9478_v59  ;;  %v9480_v40 = vadd.f32 1.0, %v12677_v2  ;;  %v8863_v9 = vpop.f32.mrb[84].mxu0 }
 0x827   : > { %v12681_v53 = vpop.eup %12680  ;;  %12700 = vrcp.f32 %v9479_v0  ;;  %v10976_v39 = vadd.f32 %v8863_v9, %v19200_v62  ;;  %v8865_v28 = vpop.f32.mrb[85].mxu0 }
 0x828   : > { %v12683_v54 = vpop.eup %12682  ;;  %12702 = vrcp.f32 %v9480_v40  ;;  %v10977_v13 = vadd.f32 %v8865_v28, %v19204_v8  ;;  %v8867_v35 = vpop.f32.mrb[86].mxu0  ;;  %v9821_v28 = vld [vmem:[#allocation2] sm:$0x1] }
 0x829   : > { %v12685_v24 = vpop.eup %12684  ;;  %12704 = vpow2.f32 %v10699_v11  ;;  %v10702_v18 = vmul.f32 -1.442695, %v10976_v39  ;;  %v8869_v42 = vpop.f32.mrb[87].mxu0  ;;  %v10826_v52 = vpack.c.bf16 %v12683_v54, %v12679_v27  ;;  %v10978_v41 = vadd.f32 %v8867_v35, %v19200_v62  ;;  %9824 = vperm.xlu0 %12002, %v9821_v28  }
 0x82a   : > { %v12687_v51 = vpop.eup %12686  ;;  %12706 = vpow2.f32 %v10700_v49  ;;  %v10703_v63 = vmul.f32 -1.442695, %v10977_v13  ;;  %v10824_v14 = vpack.c.bf16 %v12685_v24, %v12681_v53  ;;  %v10979_v30 = vadd.f32 %v8869_v42, %v19204_v8 }
 0x82b   : > { %v12689_v48 = vpop.eup %12688  ;;  %12708 = vpow2.f32 %v10701_v15  ;;  %v10704_v37 = vmul.f32 -1.442695, %v10978_v41 }
 0x82c   : > { %v12691_v29 = vpop.eup %12690  ;;  %v9481_v38 = vadd.f32 1.0, %v12689_v48  ;;  %12710 = vpow2.f32 %v10702_v18  ;;  %10825 = vmatprep.subr.bf16.mxu1 %v10824_v14  ;;  %v10705_v43 = vmul.f32 -1.442695, %v10979_v30 }
 0x82d   : > { %v12693_v17 = vpop.eup %12692  ;;  %v9482_v45 = vadd.f32 1.0, %v12691_v29  ;;  %12712 = vpow2.f32 %v10703_v63  ;;  %10827 = vmatpush1.bf16.xpose.msra.mxu1 %v10826_v52 }
 0x82e   : > { %v12695_v21 = vpop.eup %12694  ;;  %12714 = vrcp.f32 %v9481_v38  ;;  %v9483_v56 = vadd.f32 1.0, %v12693_v17  ;;  %v8873_v26 = vpop.f32.mrb[88].mxu0 }
 0x82f   : > { %v12697_v47 = vpop.eup %12696  ;;  %12716 = vrcp.f32 %v9482_v45  ;;  %v9484_v36 = vadd.f32 1.0, %v12695_v21  ;;  %v10980_v1 = vadd.f32 %v8873_v26, %v19200_v62  ;;  %v8875_v60 = vpop.f32.mrb[89].mxu0 }
 0x830   : > { %v12699_v34 = vpop.eup %12698  ;;  %12718 = vrcp.f32 %v9483_v56  ;;  %v10981_v4 = vadd.f32 %v8875_v60, %v19204_v8  ;;  %v8877_v19 = vpop.f32.mrb[90].mxu0 }
 0x831   : > { %v12701_v12 = vpop.eup %12700  ;;  %12720 = vrcp.f32 %v9484_v36  ;;  %v10706_v58 = vmul.f32 -1.442695, %v10980_v1  ;;  %v8879_v5 = vpop.f32.mrb[91].mxu0  ;;  %v10830_v61 = vpack.c.bf16 %v12699_v34, %v12687_v51  ;;  %v10982_v25 = vadd.f32 %v8877_v19, %v19200_v62 }
 0x832   : > { %v12703_v46 = vpop.eup %12702  ;;  %12722 = vpow2.f32 %v10704_v37  ;;  %v10707_v32 = vmul.f32 -1.442695, %v10981_v4  ;;  %v10828_v10 = vpack.c.bf16 %v12701_v12, %v12697_v47  ;;  %v10983_v33 = vadd.f32 %v8879_v5, %v19204_v8 }
 0x833   : > { %v12705_v16 = vpop.eup %12704  ;;  %12724 = vpow2.f32 %v10705_v43  ;;  %v10708_v59 = vmul.f32 -1.442695, %v10982_v25 }
 0x834   : > { %v12707_v6 = vpop.eup %12706  ;;  %v9485_v57 = vadd.f32 1.0, %v12705_v16  ;;  %12726 = vpow2.f32 %v10706_v58  ;;  %10829 = vmatprep.subr.bf16.mxu1 %v10828_v10  ;;  %v10709_v40 = vmul.f32 -1.442695, %v10983_v33 }
 0x835   : > { %v12709_v7 = vpop.eup %12708  ;;  %v9486_v50 = vadd.f32 1.0, %v12707_v6  ;;  %12728 = vpow2.f32 %v10707_v32  ;;  %10831 = vmatpush1.bf16.xpose.msra.mxu1 %v10830_v61 }
 0x836   : > { %v12711_v55 = vpop.eup %12710  ;;  %12730 = vrcp.f32 %v9485_v57  ;;  %v9487_v22 = vadd.f32 1.0, %v12709_v7  ;;  %v8883_v31 = vpop.f32.mrb[92].mxu0 }
 0x837   : > { %v12713_v3 = vpop.eup %12712  ;;  %12732 = vrcp.f32 %v9486_v50  ;;  %v9488_v20 = vadd.f32 1.0, %v12711_v55  ;;  %v10984_v2 = vadd.f32 %v8883_v31, %v19200_v62  ;;  %v8885_v0 = vpop.f32.mrb[93].mxu0 }
 0x838   : > { %v12715_v11 = vpop.eup %12714  ;;  %12734 = vrcp.f32 %v9487_v22  ;;  %v9489_v27 = vadd.f32 1.0, %v12713_v3  ;;  %v10985_v49 = vadd.f32 %v8885_v0, %v19204_v8  ;;  %v8887_v9 = vpop.f32.mrb[94].mxu0 }
 0x839   : > { %v12717_v53 = vpop.eup %12716  ;;  %12736 = vrcp.f32 %v9488_v20  ;;  %v10710_v15 = vmul.f32 -1.442695, %v10984_v2  ;;  %v8889_v39 = vpop.f32.mrb[95].mxu0  ;;  %v10986_v18 = vadd.f32 %v8887_v9, %v19200_v62 }
 0x83a   : > { %v12719_v54 = vpop.eup %12718  ;;  %12738 = vrcp.f32 %v9489_v27  ;;  %v10711_v13 = vmul.f32 -1.442695, %v10985_v49  ;;  %v10834_v35 = vpack.c.bf16 %v12717_v53, %v12703_v46  ;;  %v10987_v51 = vadd.f32 %v8889_v39, %v19204_v8 }
 0x83b   : > { %v12721_v24 = vpop.eup %12720  ;;  %12740 = vpow2.f32 %v10708_v59  ;;  %v10832_v42 = vpack.c.bf16 %v12719_v54, %v12715_v11  ;;  %v10712_v17 = vmul.f32 -1.442695, %v10986_v18 }
 0x83c   : > { %v12723_v52 = vpop.eup %12722  ;;  %12742 = vpow2.f32 %v10709_v40  ;;  %v10713_v26 = vmul.f32 -1.442695, %v10987_v51 }
 0x83d   : > { %v12725_v63 = vpop.eup %12724  ;;  %v9490_v41 = vadd.f32 1.0, %v12723_v52  ;;  %12744 = vpow2.f32 %v10710_v15  ;;  %10833 = vmatprep.subr.bf16.mxu1 %v10832_v42 }
 0x83e   : > { %v12727_v14 = vpop.eup %12726  ;;  %v9491_v48 = vadd.f32 1.0, %v12725_v63  ;;  %12746 = vpow2.f32 %v10711_v13  ;;  %10835 = vmatpush1.bf16.xpose.msra.mxu1 %v10834_v35  ;;  %v8893_v30 = vpop.f32.mrb[96].mxu0 }
 0x83f   : > { %v12729_v29 = vpop.eup %12728  ;;  %12748 = vrcp.f32 %v9490_v41  ;;  %v9492_v38 = vadd.f32 1.0, %v12727_v14  ;;  %v10988_v45 = vadd.f32 %v8893_v30, %v19200_v62  ;;  %v8895_v21 = vpop.f32.mrb[97].mxu0 }
 0x840   : > { %v12731_v56 = vpop.eup %12730  ;;  %12750 = vrcp.f32 %v9491_v48  ;;  %v9493_v37 = vadd.f32 1.0, %v12729_v29  ;;  %v10989_v47 = vadd.f32 %v8895_v21, %v19204_v8  ;;  %v8897_v36 = vpop.f32.mrb[98].mxu0 }
 0x841   : > { %v12733_v43 = vpop.eup %12732  ;;  %12752 = vrcp.f32 %v9492_v38  ;;  %v10714_v1 = vmul.f32 -1.442695, %v10988_v45  ;;  %v10990_v60 = vadd.f32 %v8897_v36, %v19200_v62  ;;  %v8899_v34 = vpop.f32.mrb[99].mxu0 }
 0x842   : > { %v12735_v4 = vpop.eup %12734  ;;  %12754 = vrcp.f32 %v9493_v37  ;;  %v10715_v19 = vmul.f32 -1.442695, %v10989_v47  ;;  %v10838_v12 = vpack.c.bf16 %v12733_v43, %v12721_v24  ;;  %v10991_v32 = vadd.f32 %v8899_v34, %v19204_v8 }
 0x843   : > { %v12737_v58 = vpop.eup %12736  ;;  %12756 = vpow2.f32 %v10712_v17  ;;  %v10716_v5 = vmul.f32 -1.442695, %v10990_v60  ;;  %v10836_v61 = vpack.c.bf16 %v12735_v4, %v12731_v56 }
 0x844   : > { %v12739_v46 = vpop.eup %12738  ;;  %12758 = vpow2.f32 %v10713_v26  ;;  %v10717_v31 = vmul.f32 -1.442695, %v10991_v32 }
 0x845   : > { %v12741_v10 = vpop.eup %12740  ;;  %12760 = vpow2.f32 %v10714_v1  ;;  %10837 = vmatprep.subr.bf16.mxu1 %v10836_v61 }
 0x846   : > { %v12743_v16 = vpop.eup %12742  ;;  %v9494_v25 = vadd.f32 1.0, %v12741_v10  ;;  %12762 = vpow2.f32 %v10715_v19  ;;  %10839 = vmatpush1.bf16.xpose.msra.mxu1 %v10838_v12  ;;  %v8903_v6 = vpop.f32.mrb[100].mxu0 }
 0x847   : > { %v12745_v57 = vpop.eup %12744  ;;  %v9495_v33 = vadd.f32 1.0, %v12743_v16  ;;  %12764 = vpow2.f32 %v10716_v5  ;;  %v10992_v7 = vadd.f32 %v8903_v6, %v19200_v62  ;;  %v8905_v50 = vpop.f32.mrb[101].mxu0 }
 0x848   : > { %v12747_v55 = vpop.eup %12746  ;;  %12766 = vrcp.f32 %v9494_v25  ;;  %v9496_v22 = vadd.f32 1.0, %v12745_v57  ;;  %v10993_v3 = vadd.f32 %v8905_v50, %v19204_v8  ;;  %v8907_v20 = vpop.f32.mrb[102].mxu0 }
 0x849   : > { %v12749_v59 = vpop.eup %12748  ;;  %12768 = vrcp.f32 %v9495_v33  ;;  %v9497_v2 = vadd.f32 1.0, %v12747_v55  ;;  %v10718_v0 = vmul.f32 -1.442695, %v10992_v7  ;;  %v10994_v11 = vadd.f32 %v8907_v20, %v19200_v62  ;;  %v8909_v27 = vpop.f32.mrb[103].mxu0 }
 0x84a   : > { %v12751_v40 = vpop.eup %12750  ;;  %12770 = vrcp.f32 %v9496_v22  ;;  %v10719_v49 = vmul.f32 -1.442695, %v10993_v3  ;;  %v10842_v9 = vpack.c.bf16 %v12749_v59, %v12737_v58  ;;  %v10995_v13 = vadd.f32 %v8909_v27, %v19204_v8 }
 0x84b   : > { %v12753_v53 = vpop.eup %12752  ;;  %12772 = vrcp.f32 %v9497_v2  ;;  %v10720_v15 = vmul.f32 -1.442695, %v10994_v11  ;;  %v10840_v39 = vpack.c.bf16 %v12751_v40, %v12739_v46 }
 0x84c   : > { %v12755_v28 = vpop.eup %12754  ;;  %12774 = vpow2.f32 %v10717_v31  ;;  %v10721_v17 = vmul.f32 -1.442695, %v10995_v13 }
 0x84d   : > { %v12757_v54 = vpop.eup %12756  ;;  %12776 = vpow2.f32 %v10718_v0  ;;  %10841 = vmatprep.subr.bf16.mxu1 %v10840_v39 }
 0x84e   : > { %v12759_v35 = vpop.eup %12758  ;;  %v9498_v24 = vadd.f32 1.0, %v12757_v54  ;;  %12778 = vpow2.f32 %v10719_v49  ;;  %10843 = vmatpush1.bf16.xpose.msra.mxu1 %v10842_v9  ;;  %v8913_v18 = vpop.f32.mrb[104].mxu0 }
 0x84f   : > { %v12761_v42 = vpop.eup %12760  ;;  %v9499_v52 = vadd.f32 1.0, %v12759_v35  ;;  %12780 = vpow2.f32 %v10720_v15  ;;  %v10996_v51 = vadd.f32 %v8913_v18, %v19200_v62  ;;  %v8915_v63 = vpop.f32.mrb[105].mxu0 }
 0x850   : > { %v12763_v41 = vpop.eup %12762  ;;  %12782 = vrcp.f32 %v9498_v24  ;;  %v9500_v14 = vadd.f32 1.0, %v12761_v42  ;;  %v10997_v48 = vadd.f32 %v8915_v63, %v19204_v8  ;;  %v8917_v30 = vpop.f32.mrb[106].mxu0 }
 0x851   : > { %v12765_v29 = vpop.eup %12764  ;;  %12784 = vrcp.f32 %v9499_v52  ;;  %v9501_v38 = vadd.f32 1.0, %v12763_v41  ;;  %v10998_v45 = vadd.f32 %v8917_v30, %v19200_v62  ;;  %v8919_v21 = vpop.f32.mrb[107].mxu0  ;;  %v10722_v26 = vmul.f32 -1.442695, %v10996_v51  ;;  %v13092_v41 = vld [vmem:[%s19436_s7] sm:$0x3] }
 0x852   : > { %v12767_v56 = vpop.eup %12766  ;;  %12786 = vrcp.f32 %v9500_v14  ;;  %v9502_v37 = vadd.f32 1.0, %v12765_v29  ;;  %v10723_v36 = vmul.f32 -1.442695, %v10997_v48  ;;  %v10999_v19 = vadd.f32 %v8919_v21, %v19204_v8 }
 0x853   : > { %v12769_v47 = vpop.eup %12768  ;;  %12788 = vrcp.f32 %v9501_v38  ;;  %v10846_v43 = vpack.c.bf16 %v12767_v56, %v12753_v53  ;;  %v10724_v60 = vmul.f32 -1.442695, %v10998_v45  ;;  %v19321_v14 = vrot.slane %v13092_v41, %v20331_v44 }
 0x854   : > { %v12771_v1 = vpop.eup %12770  ;;  %12790 = vrcp.f32 %v9502_v37  ;;  %v10844_v34 = vpack.c.bf16 %v12769_v47, %v12755_v28  ;;  %v10725_v7 = vmul.f32 -1.442695, %v10999_v19 }
 0x855   : > { %v12773_v4 = vpop.eup %12772  ;;  %12792 = vpow2.f32 %v10721_v17 }
 0x856   : > { %v12775_v12 = vpop.eup %12774  ;;  %12794 = vpow2.f32 %v10722_v26  ;;  %10845 = vmatprep.subr.bf16.mxu1 %v10844_v34  ;;  %v8923_v58 = vpop.f32.mrb[108].mxu0 }
 0x857   : > { %v12777_v5 = vpop.eup %12776  ;;  %v9503_v61 = vadd.f32 1.0, %v12775_v12  ;;  %12796 = vpow2.f32 %v10723_v36  ;;  %10847 = vmatpush1.bf16.xpose.msra.mxu1 %v10846_v43  ;;  %v11000_v46 = vadd.f32 %v8923_v58, %v19200_v62  ;;  %v8925_v32 = vpop.f32.mrb[109].mxu0 }
 0x858   : > { %v12779_v10 = vpop.eup %12778  ;;  %v9504_v16 = vadd.f32 1.0, %v12777_v5  ;;  %12798 = vpow2.f32 %v10724_v60  ;;  %v11001_v25 = vadd.f32 %v8925_v32, %v19204_v8  ;;  %v8927_v6 = vpop.f32.mrb[110].mxu0 }
 0x859   : > { %v12781_v57 = vpop.eup %12780  ;;  %12800 = vrcp.f32 %v9503_v61  ;;  %v9505_v33 = vadd.f32 1.0, %v12779_v10  ;;  %v11002_v50 = vadd.f32 %v8927_v6, %v19200_v62  ;;  %v8929_v55 = vpop.f32.mrb[111].mxu0  ;;  %v10726_v3 = vmul.f32 -1.442695, %v11000_v46 }
 0x85a   : > { %v12783_v22 = vpop.eup %12782  ;;  %12802 = vrcp.f32 %v9504_v16  ;;  %v9506_v31 = vadd.f32 1.0, %v12781_v57  ;;  %v11003_v20 = vadd.f32 %v8929_v55, %v19204_v8  ;;  %v10727_v2 = vmul.f32 -1.442695, %v11001_v25 }
 0x85b   : > { %v12785_v59 = vpop.eup %12784  ;;  %12804 = vrcp.f32 %v9505_v33  ;;  %v10850_v0 = vpack.c.bf16 %v12783_v22, %v12771_v1  ;;  %v10728_v27 = vmul.f32 -1.442695, %v11002_v50 }
 0x85c   : > { %v12787_v11 = vpop.eup %12786  ;;  %12806 = vrcp.f32 %v9506_v31  ;;  %v10848_v40 = vpack.c.bf16 %v12785_v59, %v12773_v4  ;;  %v10729_v9 = vmul.f32 -1.442695, %v11003_v20 }
 0x85d   : > { %v12789_v49 = vpop.eup %12788  ;;  %12808 = vpow2.f32 %v10725_v7 }
 0x85e   : > { %v12791_v53 = vpop.eup %12790  ;;  %12810 = vpow2.f32 %v10726_v3  ;;  %10849 = vmatprep.subr.bf16.mxu1 %v10848_v40  ;;  %v8933_v15 = vpop.f32.mrb[112].mxu0 }
 0x85f   : > { %v12793_v39 = vpop.eup %12792  ;;  %12812 = vpow2.f32 %v10727_v2  ;;  %10851 = vmatpush1.bf16.xpose.msra.mxu1 %v10850_v0  ;;  %v11004_v28 = vadd.f32 %v8933_v15, %v19200_v62  ;;  %v8935_v54 = vpop.f32.mrb[113].mxu0  ;;  %v10854_v13 = vpack.c.bf16 %v12791_v53, %v12787_v11 }
 0x860   : > { %v12795_v35 = vpop.eup %12794  ;;  %v9507_v24 = vadd.f32 1.0, %v12793_v39  ;;  %12814 = vpow2.f32 %v10728_v27  ;;  %v11005_v18 = vadd.f32 %v8935_v54, %v19204_v8  ;;  %v8937_v42 = vpop.f32.mrb[114].mxu0 }
 0x861   : > { %v12797_v52 = vpop.eup %12796  ;;  %v9508_v51 = vadd.f32 1.0, %v12795_v35  ;;  %12816 = vpow2.f32 %v10729_v9  ;;  %v11006_v63 = vadd.f32 %v8937_v42, %v19200_v62  ;;  %v8939_v48 = vpop.f32.mrb[115].mxu0  ;;  %v10730_v38 = vmul.f32 -1.442695, %v11004_v28 }
 0x862   : > { %v12799_v30 = vpop.eup %12798  ;;  %12818 = vrcp.f32 %v9507_v24  ;;  %v9509_v29 = vadd.f32 1.0, %v12797_v52  ;;  %v11007_v17 = vadd.f32 %v8939_v48, %v19204_v8  ;;  %v10731_v56 = vmul.f32 -1.442695, %v11005_v18 }
 0x863   : > { %v12801_v45 = vpop.eup %12800  ;;  %12820 = vrcp.f32 %v9508_v51  ;;  %v9510_v21 = vadd.f32 1.0, %v12799_v30  ;;  %v10732_v26 = vmul.f32 -1.442695, %v11006_v63 }
 0x864   : > { %v12803_v37 = vpop.eup %12802  ;;  %12822 = vrcp.f32 %v9509_v29  ;;  %v10852_v47 = vpack.c.bf16 %v12801_v45, %v12789_v49  ;;  %v10733_v43 = vmul.f32 -1.442695, %v11007_v17 }
 0x865   : > { %v12805_v36 = vpop.eup %12804  ;;  %12824 = vrcp.f32 %v9510_v21 }
 0x866   : > { %v12807_v1 = vpop.eup %12806  ;;  %12826 = vpow2.f32 %v10730_v38  ;;  %10853 = vmatprep.subr.bf16.mxu1 %v10852_v47  ;;  %9907 = vmatmul.mubr.f32.vlgmr.msra.gmra.mrb[224].mxu1 %v19321_v14  ;;  %v8943_v60 = vpop.f32.mrb[116].mxu0 }
 0x867   : > { %v12809_v34 = vpop.eup %12808  ;;  %12828 = vpow2.f32 %v10731_v56  ;;  %10855 = vmatpush1.bf16.xpose.msra.mxu1 %v10854_v13  ;;  %v11008_v4 = vadd.f32 %v8943_v60, %v19200_v62  ;;  %v8945_v19 = vpop.f32.mrb[117].mxu0  ;;  %v10858_v12 = vpack.c.bf16 %v12807_v1, %v12803_v37  ;;  %9977 = vmatprep.mubr.f32.mxu1 %v19251_v23 }
 0x868   : > { %v12811_v58 = vpop.eup %12810  ;;  %v9511_v5 = vadd.f32 1.0, %v12809_v34  ;;  %12830 = vpow2.f32 %v10732_v26  ;;  %v11009_v61 = vadd.f32 %v8945_v19, %v19204_v8  ;;  %v8947_v46 = vpop.f32.mrb[118].mxu0 }
 0x869   : > { %v12813_v32 = vpop.eup %12812  ;;  %v9512_v10 = vadd.f32 1.0, %v12811_v58  ;;  %12832 = vpow2.f32 %v10733_v43  ;;  %v11010_v16 = vadd.f32 %v8947_v46, %v19200_v62  ;;  %v8949_v25 = vpop.f32.mrb[119].mxu0  ;;  %v10734_v50 = vmul.f32 -1.442695, %v11008_v4 }
 0x86a   : > { %v12815_v6 = vpop.eup %12814  ;;  %12834 = vrcp.f32 %v9511_v5  ;;  %v9513_v57 = vadd.f32 1.0, %v12813_v32  ;;  %v11011_v33 = vadd.f32 %v8949_v25, %v19204_v8  ;;  %v10735_v31 = vmul.f32 -1.442695, %v11009_v61 }
 0x86b   : > { %v12817_v7 = vpop.eup %12816  ;;  %12836 = vrcp.f32 %v9512_v10  ;;  %v9514_v23 = vadd.f32 1.0, %v12815_v6  ;;  %v10736_v20 = vmul.f32 -1.442695, %v11010_v16 }
 0x86c   : > { %v12819_v55 = vpop.eup %12818  ;;  %12838 = vrcp.f32 %v9513_v57  ;;  %v9515_v22 = vadd.f32 1.0, %v12817_v7  ;;  %v10737_v0 = vmul.f32 -1.442695, %v11011_v33 }
 0x86d   : > { %v12821_v3 = vpop.eup %12820  ;;  %12840 = vrcp.f32 %v9514_v23  ;;  %v10856_v59 = vpack.c.bf16 %v12819_v55, %v12805_v36 }
 0x86e   : > { %v12823_v2 = vpop.eup %12822  ;;  %12842 = vrcp.f32 %v9515_v22  ;;  %v8953_v11 = vpop.f32.mrb[120].mxu0 }
 0x86f   : > { %v12825_v27 = vpop.eup %12824  ;;  %12844 = vpow2.f32 %v10734_v50  ;;  %10857 = vmatprep.subr.bf16.mxu1 %v10856_v59  ;;  %v11012_v40 = vadd.f32 %v8953_v11, %v19200_v62  ;;  %v8955_v49 = vpop.f32.mrb[121].mxu0 }
 0x870   : > { %v12827_v9 = vpop.eup %12826  ;;  %12846 = vpow2.f32 %v10735_v31  ;;  %10859 = vmatpush1.bf16.xpose.msra.mxu1 %v10858_v12  ;;  %v11013_v53 = vadd.f32 %v8955_v49, %v19204_v8  ;;  %v8957_v15 = vpop.f32.mrb[122].mxu0  ;;  %v10862_v39 = vpack.c.bf16 %v12825_v27, %v12821_v3 }
 0x871   : > { %v12829_v28 = vpop.eup %12828  ;;  %v9516_v54 = vadd.f32 1.0, %v12827_v9  ;;  %12848 = vpow2.f32 %v10736_v20  ;;  %v11014_v13 = vadd.f32 %v8957_v15, %v19200_v62  ;;  %v8959_v35 = vpop.f32.mrb[123].mxu0  ;;  %v10738_v63 = vmul.f32 -1.442695, %v11012_v40 }
 0x872   : > { %v12831_v24 = vpop.eup %12830  ;;  %v9517_v18 = vadd.f32 1.0, %v12829_v28  ;;  %12850 = vpow2.f32 %v10737_v0  ;;  %v11015_v42 = vadd.f32 %v8959_v35, %v19204_v8  ;;  %v10739_v30 = vmul.f32 -1.442695, %v11013_v53 }
 0x873   : > { %v12833_v52 = vpop.eup %12832  ;;  %12852 = vrcp.f32 %v9516_v54  ;;  %v9518_v51 = vadd.f32 1.0, %v12831_v24  ;;  %v10740_v38 = vmul.f32 -1.442695, %v11014_v13 }
 0x874   : > { %v12835_v41 = vpop.eup %12834  ;;  %12854 = vrcp.f32 %v9517_v18  ;;  %v9519_v48 = vadd.f32 1.0, %v12833_v52  ;;  %v10741_v21 = vmul.f32 -1.442695, %v11015_v42 }
 0x875   : > { %v12837_v29 = vpop.eup %12836  ;;  %12856 = vrcp.f32 %v9518_v51  ;;  %v10860_v17 = vpack.c.bf16 %v12835_v41, %v12823_v2 }
 0x876   : > { %v12839_v45 = vpop.eup %12838  ;;  %12858 = vrcp.f32 %v9519_v48  ;;  %v8963_v56 = vpop.f32.mrb[124].mxu0 }
 0x877   : > { %v12841_v37 = vpop.eup %12840  ;;  %12860 = vpow2.f32 %v10738_v63  ;;  %10861 = vmatprep.subr.bf16.mxu1 %v10860_v17  ;;  %v11016_v26 = vadd.f32 %v8963_v56, %v19200_v62  ;;  %v8965_v47 = vpop.f32.mrb[125].mxu0 }
 0x878   : > { %v12843_v36 = vpop.eup %12842  ;;  %12862 = vpow2.f32 %v10739_v30  ;;  %10863 = vmatpush1.bf16.xpose.msra.mxu1 %v10862_v39  ;;  %v11017_v43 = vadd.f32 %v8965_v47, %v19204_v8  ;;  %v8967_v1 = vpop.f32.mrb[126].mxu0  ;;  %v10866_v60 = vpack.c.bf16 %v12841_v37, %v12837_v29 }
 0x879   : > { %v12845_v34 = vpop.eup %12844  ;;  %12864 = vpow2.f32 %v10740_v38  ;;  %v10742_v4 = vmul.f32 -1.442695, %v11016_v26  ;;  %v11018_v19 = vadd.f32 %v8967_v1, %v19200_v62  ;;  %v10864_v12 = vpack.c.bf16 %v12843_v36, %v12839_v45  ;;  %v8969_v58 = vpop.f32.mrb[127].mxu0 }
 0x87a   : > { %v12847_v5 = vpop.eup %12846  ;;  %v9520_v61 = vadd.f32 1.0, %v12845_v34  ;;  %12866 = vpow2.f32 %v10741_v21  ;;  %v11019_v46 = vadd.f32 %v8969_v58, %v19204_v8  ;;  %v10743_v6 = vmul.f32 -1.442695, %v11017_v43 }
 0x87b   : > { %v12849_v32 = vpop.eup %12848  ;;  %v9521_v10 = vadd.f32 1.0, %v12847_v5  ;;  %12868 = vpow2.f32 %v10742_v4  ;;  %10865 = vmatprep.subr.bf16.mxu1 %v10864_v12  ;;  %v10744_v7 = vmul.f32 -1.442695, %v11018_v19 }
 0x87c   : > { %v12851_v16 = vpop.eup %12850  ;;  %12870 = vrcp.f32 %v9520_v61  ;;  %v9522_v25 = vadd.f32 1.0, %v12849_v32  ;;  %v10745_v50 = vmul.f32 -1.442695, %v11019_v46 }
 0x87d   : > { %v12853_v57 = vpop.eup %12852  ;;  %12872 = vrcp.f32 %v9521_v10  ;;  %v9523_v33 = vadd.f32 1.0, %v12851_v16 }
 0x87e   : > { %v12855_v23 = vpop.eup %12854  ;;  %12874 = vrcp.f32 %v9522_v25  ;;  %v8973_v55 = vpop.f32.mrb[128].mxu0 }
 0x87f   : > { %v12857_v22 = vpop.eup %12856  ;;  %12876 = vrcp.f32 %v9523_v33  ;;  %v11020_v31 = vadd.f32 %v8973_v55, %v19200_v62  ;;  %v8975_v3 = vpop.f32.mrb[129].mxu0 }
 0x880   : > { %v12859_v20 = vpop.eup %12858  ;;  %12878 = vpow2.f32 %v10743_v6  ;;  %10867 = vmatpush1.bf16.xpose.msra.mxu1 %v10866_v60  ;;  %v8977_v59 = vpop.f32.mrb[130].mxu0  ;;  %v10870_v2 = vpack.c.bf16 %v12857_v22, %v12853_v57  ;;  %v11021_v27 = vadd.f32 %v8975_v3, %v19204_v8 }
 0x881   : > { %v12861_v0 = vpop.eup %12860  ;;  %12880 = vpow2.f32 %v10744_v7  ;;  %v10746_v11 = vmul.f32 -1.442695, %v11020_v31  ;;  %v10868_v40 = vpack.c.bf16 %v12859_v20, %v12855_v23  ;;  %v8979_v49 = vpop.f32.mrb[131].mxu0  ;;  %v11022_v15 = vadd.f32 %v8977_v59, %v19200_v62 }
 0x882   : > { %v12863_v9 = vpop.eup %12862  ;;  %v9524_v53 = vadd.f32 1.0, %v12861_v0  ;;  %12882 = vpow2.f32 %v10745_v50  ;;  %v11023_v54 = vadd.f32 %v8979_v49, %v19204_v8  ;;  %v10747_v42 = vmul.f32 -1.442695, %v11021_v27 }
 0x883   : > { %v12865_v39 = vpop.eup %12864  ;;  %v9525_v28 = vadd.f32 1.0, %v12863_v9  ;;  %12884 = vpow2.f32 %v10746_v11  ;;  %10869 = vmatprep.subr.bf16.mxu1 %v10868_v40  ;;  %v10748_v63 = vmul.f32 -1.442695, %v11022_v15 }
 0x884   : > { %v12867_v13 = vpop.eup %12866  ;;  %12886 = vrcp.f32 %v9524_v53  ;;  %v9526_v35 = vadd.f32 1.0, %v12865_v39  ;;  %v10749_v30 = vmul.f32 -1.442695, %v11023_v54 }
 0x885   : > { %v12869_v24 = vpop.eup %12868  ;;  %12888 = vrcp.f32 %v9525_v28  ;;  %v9527_v18 = vadd.f32 1.0, %v12867_v13 }
 0x886   : > { %v12871_v52 = vpop.eup %12870  ;;  %12890 = vrcp.f32 %v9526_v35  ;;  %v9528_v51 = vadd.f32 1.0, %v12869_v24  ;;  %v8983_v41 = vpop.f32.mrb[132].mxu0 }
 0x887   : > { %v12873_v48 = vpop.eup %12872  ;;  %12892 = vrcp.f32 %v9527_v18  ;;  %v11024_v29 = vadd.f32 %v8983_v41, %v19200_v62  ;;  %v8985_v38 = vpop.f32.mrb[133].mxu0 }
 0x888   : > { %v12875_v17 = vpop.eup %12874  ;;  %12894 = vrcp.f32 %v9528_v51  ;;  %10871 = vmatpush1.bf16.xpose.msra.mxu1 %v10870_v2  ;;  %v8987_v45 = vpop.f32.mrb[134].mxu0  ;;  %v11025_v37 = vadd.f32 %v8985_v38, %v19204_v8 }
 0x889   : > { %v12877_v21 = vpop.eup %12876  ;;  %12896 = vpow2.f32 %v10747_v42  ;;  %v10750_v56 = vmul.f32 -1.442695, %v11024_v29  ;;  %v8989_v26 = vpop.f32.mrb[135].mxu0  ;;  %v10874_v47 = vpack.c.bf16 %v12875_v17, %v12871_v52  ;;  %v11026_v43 = vadd.f32 %v8987_v45, %v19200_v62 }
 0x88a   : > { %v12879_v36 = vpop.eup %12878  ;;  %12898 = vpow2.f32 %v10748_v63  ;;  %v10872_v1 = vpack.c.bf16 %v12877_v21, %v12873_v48  ;;  %v11027_v4 = vadd.f32 %v8989_v26, %v19204_v8  ;;  %v10751_v61 = vmul.f32 -1.442695, %v11025_v37 }
 0x88b   : > { %v12881_v60 = vpop.eup %12880  ;;  %v9529_v34 = vadd.f32 1.0, %v12879_v36  ;;  %12900 = vpow2.f32 %v10749_v30  ;;  %v10752_v10 = vmul.f32 -1.442695, %v11026_v43 }
 0x88c   : > { %v12883_v19 = vpop.eup %12882  ;;  %v9530_v12 = vadd.f32 1.0, %v12881_v60  ;;  %12902 = vpow2.f32 %v10750_v56  ;;  %10873 = vmatprep.subr.bf16.mxu1 %v10872_v1  ;;  %v10753_v6 = vmul.f32 -1.442695, %v11027_v4 }
 0x88d   : > { %v12885_v58 = vpop.eup %12884  ;;  %12904 = vrcp.f32 %v9529_v34  ;;  %v9531_v5 = vadd.f32 1.0, %v12883_v19 }
 0x88e   : > { %v12887_v46 = vpop.eup %12886  ;;  %12906 = vrcp.f32 %v9530_v12  ;;  %v9532_v32 = vadd.f32 1.0, %v12885_v58  ;;  %v8993_v16 = vpop.f32.mrb[136].mxu0 }
 0x88f   : > { %v12889_v25 = vpop.eup %12888  ;;  %12908 = vrcp.f32 %v9531_v5  ;;  %v11028_v57 = vadd.f32 %v8993_v16, %v19200_v62  ;;  %v8995_v33 = vpop.f32.mrb[137].mxu0 }
 0x890   : > { %v12891_v7 = vpop.eup %12890  ;;  %12910 = vrcp.f32 %v9532_v32  ;;  %10875 = vmatpush1.bf16.xpose.msra.mxu1 %v10874_v47  ;;  %v11029_v23 = vadd.f32 %v8995_v33, %v19204_v8  ;;  %v8997_v50 = vpop.f32.mrb[138].mxu0 }
 0x891   : > { %v12893_v55 = vpop.eup %12892  ;;  %12912 = vpow2.f32 %v10751_v61  ;;  %v10754_v22 = vmul.f32 -1.442695, %v11028_v57  ;;  %v8999_v31 = vpop.f32.mrb[139].mxu0  ;;  %v10878_v3 = vpack.c.bf16 %v12891_v7, %v12887_v46  ;;  %v11030_v2 = vadd.f32 %v8997_v50, %v19200_v62 }
 0x892   : > { %v19348_v20 = vpop.eup %12894  ;;  %12914 = vpow2.f32 %v10752_v10  ;;  %v10755_v59 = vmul.f32 -1.442695, %v11029_v23  ;;  %v10876_v0 = vpack.c.bf16 %v12893_v55, %v12889_v25  ;;  %v11031_v27 = vadd.f32 %v8999_v31, %v19204_v8 }
 0x893   : > { %v12897_v11 = vpop.eup %12896  ;;  %12916 = vpow2.f32 %v10753_v6  ;;  %v10756_v28 = vmul.f32 -1.442695, %v11030_v2 }
 0x894   : > { %v12899_v40 = vpop.eup %12898  ;;  %v9533_v49 = vadd.f32 1.0, %v12897_v11  ;;  %12918 = vpow2.f32 %v10754_v22  ;;  %10877 = vmatprep.subr.bf16.mxu1 %v10876_v0  ;;  %v10757_v24 = vmul.f32 -1.442695, %v11031_v27 }
 0x895   : > { %v12901_v9 = vpop.eup %12900  ;;  %v9534_v53 = vadd.f32 1.0, %v12899_v40  ;;  %12920 = vpow2.f32 %v10755_v59 }
 0x896   : > { %v12903_v15 = vpop.eup %12902  ;;  %12922 = vrcp.f32 %v9533_v49  ;;  %v9535_v39 = vadd.f32 1.0, %v12901_v9  ;;  %v9003_v54 = vpop.f32.mrb[140].mxu0 }
 0x897   : > { %v12905_v13 = vpop.eup %12904  ;;  %12924 = vrcp.f32 %v9534_v53  ;;  %v9536_v35 = vadd.f32 1.0, %v12903_v15  ;;  %v11032_v18 = vadd.f32 %v9003_v54, %v19200_v62  ;;  %v9005_v42 = vpop.f32.mrb[141].mxu0 }
 0x898   : > { %v12907_v52 = vpop.eup %12906  ;;  %12926 = vrcp.f32 %v9535_v39  ;;  %10879 = vmatpush1.bf16.xpose.msra.mxu1 %v10878_v3  ;;  %v11033_v51 = vadd.f32 %v9005_v42, %v19204_v8  ;;  %v9007_v63 = vpop.f32.mrb[142].mxu0 }
 0x899   : > { %v12909_v41 = vpop.eup %12908  ;;  %12928 = vrcp.f32 %v9536_v35  ;;  %v10758_v48 = vmul.f32 -1.442695, %v11032_v18  ;;  %v9009_v30 = vpop.f32.mrb[143].mxu0  ;;  %v10882_v29 = vpack.c.bf16 %v12907_v52, %v19348_v20  ;;  %v11034_v56 = vadd.f32 %v9007_v63, %v19200_v62 }
 0x89a   : > { %v19355_v38 = vpop.eup %12910  ;;  %12930 = vpow2.f32 %v10756_v28  ;;  %v10759_v17 = vmul.f32 -1.442695, %v11033_v51  ;;  %v10880_v45 = vpack.c.bf16 %v12909_v41, %v12905_v13  ;;  %v11035_v47 = vadd.f32 %v9009_v30, %v19204_v8 }
 0x89b   : > { %v12913_v21 = vpop.eup %12912  ;;  %12932 = vpow2.f32 %v10757_v24  ;;  %v10760_v12 = vmul.f32 -1.442695, %v11034_v56 }
 0x89c   : > { %v12915_v37 = vpop.eup %12914  ;;  %v9537_v26 = vadd.f32 1.0, %v12913_v21  ;;  %12934 = vpow2.f32 %v10758_v48  ;;  %10881 = vmatprep.subr.bf16.mxu1 %v10880_v45  ;;  %v10761_v32 = vmul.f32 -1.442695, %v11035_v47 }
 0x89d   : > { %v12917_v36 = vpop.eup %12916  ;;  %v9538_v43 = vadd.f32 1.0, %v12915_v37  ;;  %12936 = vpow2.f32 %v10759_v17 }
 0x89e   : > { %v12919_v1 = vpop.eup %12918  ;;  %12938 = vrcp.f32 %v9537_v26  ;;  %v9539_v60 = vadd.f32 1.0, %v12917_v36  ;;  %v9013_v34 = vpop.f32.mrb[144].mxu0 }
 0x89f   : > { %v12921_v4 = vpop.eup %12920  ;;  %12940 = vrcp.f32 %v9538_v43  ;;  %v9540_v19 = vadd.f32 1.0, %v12919_v1  ;;  %v11036_v58 = vadd.f32 %v9013_v34, %v19200_v62  ;;  %v9015_v5 = vpop.f32.mrb[145].mxu0 }
 0x8a0   : > { %v12923_v61 = vpop.eup %12922  ;;  %12942 = vrcp.f32 %v9539_v60  ;;  %v9541_v46 = vadd.f32 1.0, %v12921_v4  ;;  %10883 = vmatpush1.bf16.xpose.msra.mxu1 %v10882_v29  ;;  %v11037_v10 = vadd.f32 %v9015_v5, %v19204_v8  ;;  %v9017_v16 = vpop.f32.mrb[146].mxu0 }
 0x8a1   : > { %v12925_v25 = vpop.eup %12924  ;;  %12944 = vrcp.f32 %v9540_v19  ;;  %v10762_v6 = vmul.f32 -1.442695, %v11036_v58  ;;  %v9019_v57 = vpop.f32.mrb[147].mxu0  ;;  %v11038_v55 = vadd.f32 %v9017_v16, %v19200_v62 }
 0x8a2   : > { %v12927_v33 = vpop.eup %12926  ;;  %12946 = vrcp.f32 %v9541_v46  ;;  %v10763_v7 = vmul.f32 -1.442695, %v11037_v10  ;;  %v10886_v23 = vpack.c.bf16 %v12925_v25, %v19355_v38  ;;  %v11039_v3 = vadd.f32 %v9019_v57, %v19204_v8 }
 0x8a3   : > { %v12929_v50 = vpop.eup %12928  ;;  %12948 = vpow2.f32 %v10760_v12  ;;  %v10884_v22 = vpack.c.bf16 %v12927_v33, %v12923_v61  ;;  %v10764_v49 = vmul.f32 -1.442695, %v11038_v55 }
 0x8a4   : > { %v12931_v31 = vpop.eup %12930  ;;  %12950 = vpow2.f32 %v10761_v32  ;;  %v10765_v28 = vmul.f32 -1.442695, %v11039_v3 }
 0x8a5   : > { %v12933_v20 = vpop.eup %12932  ;;  %v9542_v59 = vadd.f32 1.0, %v12931_v31  ;;  %12952 = vpow2.f32 %v10762_v6  ;;  %10885 = vmatprep.subr.bf16.mxu1 %v10884_v22 }
 0x8a6   : > { %v12935_v2 = vpop.eup %12934  ;;  %v9543_v0 = vadd.f32 1.0, %v12933_v20  ;;  %12954 = vpow2.f32 %v10763_v7  ;;  %v9023_v11 = vpop.f32.mrb[148].mxu0 }
 0x8a7   : > { %v12937_v27 = vpop.eup %12936  ;;  %12956 = vrcp.f32 %v9542_v59  ;;  %v9544_v40 = vadd.f32 1.0, %v12935_v2  ;;  %v11040_v9 = vadd.f32 %v9023_v11, %v19200_v62  ;;  %v9025_v53 = vpop.f32.mrb[149].mxu0 }
 0x8a8   : > { %v12939_v15 = vpop.eup %12938  ;;  %12958 = vrcp.f32 %v9543_v0  ;;  %v9545_v39 = vadd.f32 1.0, %v12937_v27  ;;  %10887 = vmatpush1.bf16.xpose.msra.mxu1 %v10886_v23  ;;  %v11041_v54 = vadd.f32 %v9025_v53, %v19204_v8  ;;  %v9027_v13 = vpop.f32.mrb[150].mxu0 }
 0x8a9   : > { %v12941_v35 = vpop.eup %12940  ;;  %12960 = vrcp.f32 %v9544_v40  ;;  %v10766_v24 = vmul.f32 -1.442695, %v11040_v9  ;;  %v11042_v18 = vadd.f32 %v9027_v13, %v19200_v62  ;;  %v9029_v42 = vpop.f32.mrb[151].mxu0 }
 0x8aa   : > { %v12943_v52 = vpop.eup %12942  ;;  %12962 = vrcp.f32 %v9545_v39  ;;  %v10767_v51 = vmul.f32 -1.442695, %v11041_v54  ;;  %v10890_v63 = vpack.c.bf16 %v12941_v35, %v12929_v50  ;;  %v11043_v38 = vadd.f32 %v9029_v42, %v19204_v8 }
 0x8ab   : > { %v12945_v41 = vpop.eup %12944  ;;  %12964 = vpow2.f32 %v10764_v49  ;;  %v10768_v48 = vmul.f32 -1.442695, %v11042_v18  ;;  %v10888_v30 = vpack.c.bf16 %v12943_v52, %v12939_v15 }
 0x8ac   : > { %v12947_v29 = vpop.eup %12946  ;;  %12966 = vpow2.f32 %v10765_v28  ;;  %v10769_v60 = vmul.f32 -1.442695, %v11043_v38 }
 0x8ad   : > { %v12949_v17 = vpop.eup %12948  ;;  %12968 = vpow2.f32 %v10766_v24  ;;  %10889 = vmatprep.subr.bf16.mxu1 %v10888_v30 }
 0x8ae   : > { %v12951_v45 = vpop.eup %12950  ;;  %v9546_v21 = vadd.f32 1.0, %v12949_v17  ;;  %12970 = vpow2.f32 %v10767_v51  ;;  %v9033_v56 = vpop.f32.mrb[152].mxu0 }
 0x8af   : > { %v12953_v37 = vpop.eup %12952  ;;  %v9547_v26 = vadd.f32 1.0, %v12951_v45  ;;  %12972 = vpow2.f32 %v10768_v48  ;;  %v11044_v47 = vadd.f32 %v9033_v56, %v19200_v62  ;;  %v9035_v36 = vpop.f32.mrb[153].mxu0 }
 0x8b0   : > { %v12955_v43 = vpop.eup %12954  ;;  %12974 = vrcp.f32 %v9546_v21  ;;  %v9548_v1 = vadd.f32 1.0, %v12953_v37  ;;  %10891 = vmatpush1.bf16.xpose.msra.mxu1 %v10890_v63  ;;  %v11045_v34 = vadd.f32 %v9035_v36, %v19204_v8  ;;  %v9037_v4 = vpop.f32.mrb[154].mxu0 }
 0x8b1   : > { %v12957_v19 = vpop.eup %12956  ;;  %12976 = vrcp.f32 %v9547_v26  ;;  %v9549_v12 = vadd.f32 1.0, %v12955_v43  ;;  %v10770_v58 = vmul.f32 -1.442695, %v11044_v47  ;;  %v11046_v5 = vadd.f32 %v9037_v4, %v19200_v62  ;;  %v9039_v61 = vpop.f32.mrb[155].mxu0 }
 0x8b2   : > { %v12959_v46 = vpop.eup %12958  ;;  %12978 = vrcp.f32 %v9548_v1  ;;  %v10771_v32 = vmul.f32 -1.442695, %v11045_v34  ;;  %v10894_v10 = vpack.c.bf16 %v12957_v19, %v12945_v41  ;;  %v11047_v7 = vadd.f32 %v9039_v61, %v19204_v8 }
 0x8b3   : > { %v12961_v16 = vpop.eup %12960  ;;  %12980 = vrcp.f32 %v9549_v12  ;;  %v10772_v25 = vmul.f32 -1.442695, %v11046_v5  ;;  %v10892_v6 = vpack.c.bf16 %v12959_v46, %v12947_v29 }
 0x8b4   : > { %v12963_v57 = vpop.eup %12962  ;;  %12982 = vpow2.f32 %v10769_v60  ;;  %v10773_v49 = vmul.f32 -1.442695, %v11047_v7 }
 0x8b5   : > { %v12965_v33 = vpop.eup %12964  ;;  %12984 = vpow2.f32 %v10770_v58  ;;  %10893 = vmatprep.subr.bf16.mxu1 %v10892_v6 }
 0x8b6   : > { %v12967_v23 = vpop.eup %12966  ;;  %v9550_v50 = vadd.f32 1.0, %v12965_v33  ;;  %12986 = vpow2.f32 %v10771_v32 }
 0x8b7   : > { %v9043_v55 = vpop.f32.mrb[156].mxu0  ;;  %v12969_v22 = vpop.eup %12968  ;;  %v9551_v31 = vadd.f32 1.0, %v12967_v23  ;;  %12988 = vpow2.f32 %v10772_v25 }
 0x8b8   : > { %v11048_v3 = vadd.f32 %v9043_v55, %v19200_v62  ;;  %v9045_v20 = vpop.f32.mrb[157].mxu0  ;;  %v12971_v59 = vpop.eup %12970  ;;  %12990 = vrcp.f32 %v9550_v50  ;;  %v9552_v2 = vadd.f32 1.0, %v12969_v22  ;;  %10895 = vmatpush1.bf16.xpose.msra.mxu1 %v10894_v10 }
 0x8b9   : > { %v11049_v0 = vadd.f32 %v9045_v20, %v19204_v8  ;;  %v9047_v11 = vpop.f32.mrb[158].mxu0  ;;  %v12973_v27 = vpop.eup %12972  ;;  %12992 = vrcp.f32 %v9551_v31  ;;  %v9553_v40 = vadd.f32 1.0, %v12971_v59 }
 0x8ba   : > { %v11050_v9 = vadd.f32 %v9047_v11, %v19200_v62  ;;  %v9049_v53 = vpop.f32.mrb[159].mxu0  ;;  %v12975_v15 = vpop.eup %12974  ;;  %12994 = vrcp.f32 %v9552_v2  ;;  %v9554_v39 = vadd.f32 1.0, %v12973_v27  ;;  %v10774_v28 = vmul.f32 -1.442695, %v11048_v3 }
 0x8bb   : > { %v12977_v54 = vpop.eup %12976  ;;  %12996 = vrcp.f32 %v9553_v40  ;;  %v10775_v13 = vmul.f32 -1.442695, %v11049_v0  ;;  %v10898_v35 = vpack.c.bf16 %v12975_v15, %v12961_v16  ;;  %v11051_v51 = vadd.f32 %v9049_v53, %v19204_v8  ;;  %v9825_v20 = vpop.permute.xlu0 %9824 }
 0x8bc   : > { %v12979_v24 = vpop.eup %12978  ;;  %12998 = vrcp.f32 %v9554_v39  ;;  %v10776_v18 = vmul.f32 -1.442695, %v11050_v9  ;;  %v10896_v42 = vpack.c.bf16 %v12977_v54, %v12963_v57  ;;  %v9830_v59 = vrot.slane %v9825_v20, %v20331_v44 }
 0x8bd   : > { %v12981_v52 = vpop.eup %12980  ;;  %13000 = vpow2.f32 %v10773_v49  ;;  %v10777_v38 = vmul.f32 -1.442695, %v11051_v51 }
 0x8be   : > { %v12983_v63 = vpop.eup %12982  ;;  %13002 = vpow2.f32 %v10774_v28  ;;  %10897 = vmatprep.subr.bf16.mxu1 %v10896_v42 }
 0x8bf   : > { %v12985_v62 = vpop.eup %12984  ;;  %v9555_v41 = vadd.f32 1.0, %v12983_v63  ;;  %13004 = vpow2.f32 %v10775_v13 }
 0x8c0   : > { %v12987_v48 = vpop.eup %12986  ;;  %v9556_v30 = vadd.f32 1.0, %v12985_v62  ;;  %13006 = vpow2.f32 %v10776_v18  ;;  %10899 = vmatpush1.bf16.xpose.msra.mxu1 %v10898_v35 }
 0x8c1   : > { %v12989_v29 = vpop.eup %12988  ;;  %13008 = vrcp.f32 %v9555_v41  ;;  %v9557_v47 = vadd.f32 1.0, %v12987_v48 }
 0x8c2   : > { %v12991_v17 = vpop.eup %12990  ;;  %v9558_v45 = vadd.f32 1.0, %v12989_v29  ;;  %13010 = vrcp.f32 %v9556_v30  ;;  %v21383_v29 = vld [vmem:[#allocation52_spill] sm:$0xff] }
 0x8c3   : > { %v12993_v21 = vpop.eup %12992  ;;  %v10902_v56 = vpack.c.bf16 %v12991_v17, %v12979_v24 }
 0x8c4   : > { %v12995_v37 = vpop.eup %12994  ;;  %13012 = vrcp.f32 %v9558_v45  ;;  %v10900_v8 = vpack.c.bf16 %v12993_v21, %v12981_v52  ;;  %v21384_v21 = vlaneseq }
 0x8c5   : > { %v12997_v26 = vpop.eup %12996  ;;  %13014 = vpow2.f32 %v10777_v38 }
 0x8c6   : > { %v12999_v36 = vpop.eup %12998  ;;  %10901 = vmatprep.subr.bf16.mxu1 %v10900_v8  ;;  %13016 = vrcp.f32 %v9557_v47  ;;  %vm10039_vm1 = vcmp.lt.s32.totalorder %v21384_v21, 512 }
 0x8c7   : > { %v13001_v43 = vpop.eup %13000  ;;  %v10906_v1 = vpack.c.bf16 %v12999_v36, %v12995_v37 }
 0x8c8   : > { %v13003_v60 = vpop.eup %13002  ;;  %v9559_v34 = vadd.f32 1.0, %v13001_v43  ;;  %10903 = vmatpush1.bf16.xpose.msra.mxu1 %v10902_v56 }
 0x8c9   : > { %v13005_v4 = vpop.eup %13004  ;;  %v9560_v19 = vadd.f32 1.0, %v13003_v60 }
 0x8ca   : > { %v13007_v12 = vpop.eup %13006  ;;  %13018 = vrcp.f32 %v9559_v34  ;;  %v9561_v32 = vadd.f32 1.0, %v13005_v4 }
 0x8cb   : > { %v13009_v58 = vpop.eup %13008  ;;  %v9562_v5 = vadd.f32 1.0, %v13007_v12  ;;  %13020 = vrcp.f32 %v9560_v19 }
 0x8cc   : > { %v10904_v61 = vpack.c.bf16 %v13009_v58, %v12997_v26  ;;  %v13011_v46 = vpop.eup %13010 }
 0x8cd   : > { %13022 = vrcp.f32 %v9562_v5 }
 0x8ce   : > { %v13013_v10 = vpop.eup %13012  ;;  %10905 = vmatprep.subr.bf16.mxu1 %v10904_v61  ;;  %13024 = vrcp.f32 %v9561_v32 }
 0x8cf   : > { %v13015_v16 = vpop.eup %13014  ;;  %v10910_v25 = vpack.c.bf16 %v13013_v10, %v13011_v46 }
 0x8d0   : > { %v9563_v6 = vadd.f32 1.0, %v13015_v16  ;;  %10907 = vmatpush1.bf16.xpose.msra.mxu1 %v10906_v1  ;;  %v13017_v57 = vpop.eup %13016 }
 0x8d2   : > { %13026 = vrcp.f32 %v9563_v6 }
 0x8d4   : > { %v13019_v33 = vpop.eup %13018 }
 0x8d5   : > { %v10908_v7 = vpack.c.bf16 %v13019_v33, %v13017_v57  ;;  %v13021_v23 = vpop.eup %13020 }
 0x8d7   : > { %v13023_v50 = vpop.eup %13022  ;;  %10909 = vmatprep.subr.bf16.mxu1 %v10908_v7 }
 0x8d8   : > { %10911 = vmatpush1.bf16.xpose.msra.mxu1 %v10910_v25  ;;  %v10914_v55 = vpack.c.bf16 %v13023_v50, %v13021_v23  ;;  %v13025_v22 = vpop.eup %13024 }
 0x8dc   : > { %v13027_v31 = vpop.eup %13026 }
 0x8dd   : > { %v10912_v3 = vpack.c.bf16 %v13027_v31, %v13025_v22 }
 0x8df   : > { %10913 = vmatprep.subr.bf16.mxu1 %v10912_v3 }
 0x8e0   : > { %10915 = vmatpush1.bf16.xpose.msra.mxu1 %v10914_v55 }
 0x8e7   : > { %9978 = vmatmul.mubr.f32.vlgmr.msra.gmra.mrb[226].mxu1 %v19321_v14 }
 0x939   : > { %v9908_v2 = vpop.f32.mrb[224].mxu1 }
 0x93a   : > { %v9909_v0 = vadd.f32 %v9908_v2, %v9830_v59  ;;  %v9910_v11 = vpop.f32.mrb[225].mxu1 }
 0x93b   : > { %v9911_v27 = vadd.f32 %v9910_v11, %v9830_v59 }
 0x93c   : > { %v10778_v40 = vmul.f32 -1.442695, %v9909_v0 }
 0x93d   : > { %v10779_v49 = vmul.f32 -1.442695, %v9911_v27 }
 0x93e   : > { %13028 = vpow2.f32 %v10778_v40 }
 0x93f   : > { %13030 = vpow2.f32 %v10779_v49 }
 0x948   : > { %v13029_v9 = vpop.eup %13028 }
 0x949   : > { %v13031_v53 = vpop.eup %13030  ;;  %v9996_v15 = vadd.f32 1.0, %v13029_v9 }
 0x94a   : > { %v9997_v39 = vadd.f32 1.0, %v13031_v53 }
 0x94b   : > { %13032 = vrcp.f32 %v9996_v15 }
 0x94c   : > { %13034 = vrcp.f32 %v9997_v39 }
 0x955   : > { %v13033_v28 = vpop.eup %13032 }
 0x956   : > { %v13035_v54 = vpop.eup %13034 }
 0x957   : > { %v10012_v14 = vcombine.low %v13033_v28, %v13035_v54 }
 0x959   : > { %v10020_v38 = vrot.slane %v10012_v14, %v21383_v29 }
 0x9ba   : > { %v9979_v13 = vpop.f32.mrb[226].mxu1 }
 0x9bb   : > { %v9980_v44 = vadd.f32 %v9979_v13, %v9830_v59  ;;  %v9981_v35 = vpop.f32.mrb[227].mxu1 }
 0x9bc   : > { %v9982_v24 = vadd.f32 %v9981_v35, %v9830_v59 }
 0x9bd   : > { %v10780_v18 = vmul.f32 -1.442695, %v9980_v44 }
 0x9be   : > { %v10781_v42 = vmul.f32 -1.442695, %v9982_v24 }
 0x9bf   : > { %13036 = vpow2.f32 %v10780_v18 }
 0x9c0   : > { %13038 = vpow2.f32 %v10781_v42 }
 0x9c9   : > { %v13037_v52 = vpop.eup %13036 }
 0x9ca   : > { %v13039_v51 = vpop.eup %13038  ;;  %v9998_v63 = vadd.f32 1.0, %v13037_v52 }
 0x9cb   : > { %v9999_v62 = vadd.f32 1.0, %v13039_v51 }
 0x9cc   : > { %13040 = vrcp.f32 %v9998_v63 }
 0x9cd   : > { %13042 = vrcp.f32 %v9999_v62 }
 0x9d6   : > { %v13041_v41 = vpop.eup %13040 }
 0x9d7   : > { %v13043_v48 = vpop.eup %13042 }
 0x9d8   : > { %v10013_v30 = vcombine.low %v13041_v41, %v13043_v48 }
 0x9da   : > { %v10027_v17 = vrot.slane %v10013_v30, %v21383_v29 }
 0x9dc   : > { %v10028_v45 = vcombine.low %v10020_v38, %v10027_v17 }
 0x9de   : > { %v10035_v56 = vrot.slane %v10028_v45, %v21383_v29 }
 0x9e0   : > { %10041 = vst.msk [vmem:[%s343_s22] sm:$0xf] %vm10039_vm1, %v10035_v56 }
 0x9e1   : > { %13135 = shalt.err (!%p13132_p7)
}
 0x9e2   : > { %s13136_s28 = scalar_lea.hbm %s19387_s24, 64  ;;  %s13140_s18 = scalar_lea.hbm %s19438_s9, 128 }
 0x9e3   : > { %p13137_p8 = scmp.ne.s32.totalorder %s19387_s24, %s13136_s28  ;;  %p13141_p1 = scmp.lt.u32.totalorder %s19387_s24, %s19438_s9 }
 0x9e4   : > { %p13142_p0 = scmp.lt.u32.totalorder %s13140_s18, %s13136_s28  ;;  %p13144_p6 = scmp.lt.u32.totalorder %s13136_s28, %s19387_s24 }
 0x9e5   : > { %p13138_p11 = pnand %p13137_p8, %p21385_p9 }
 0x9e6   : > { %p13143_p5 = por %p13142_p0, %p13141_p1 }
 0x9e7   : > { %p13139_p13 = pneg %p13138_p11 }
 0x9e8   : > { %p13145_p10 = por %p13144_p6, %p13143_p5 }
 0x9ea   : > { %p13146_p12 = pnand %p13145_p10, %p13139_p13 }
 0x9ec   : > { %13149 = shalt.err (!%p13146_p12)
}
 0x9ed   : > { %11952 = dma.vmem_to_hbm [thread:$0]  (%p21385_p9), %s19389_s23, 64, %s19387_s24, %s10043_s27  }
 0x9ee PF: > { %p11964_p2 = scmp.ge.s32.totalorder %s13188_s14, 2  ;;  %s10069_s26 = sand.u32 1, %s13176_s11  }
 0x9ef   : > { %p21386_p3 = scmp.ne.s32.totalorder %s19996_s21, 0  ;;  %s10070_s25 = scalar_lea.sflag [#allocation5], %s10069_s26 }
 0x9f1   : > { %p11959_p4 = pnand %p11964_p2, %p21386_p3 }
 0x9f3   : > { %13171 = dma.done.wait (!%p11959_p4), %s10070_s25, 64  }
 0x9f4   : > { %13173 = vsyncadd (!%p11959_p4), %s10070_s25, 4294967232  ;;  %p22_p7 = scmp.ge.s32.totalorder %s13274_s16, 4   ;;  %s21387_s11 = smov %s13180_s12 }
 0x9f5   : > { %s21388_s12 = smov %s13184_s13  ;;  %s21389_s13 = smov %s13285_s19 }
 0x9f6   : > { %s21390_s14 = smov %s13274_s16  ;;  %24 = sbr.rel (!%p22_p7) target bundleno = 7 (0x7), region = 96 }
 0x9fd   :  { %10075 = vsyncpa [#allocation4], 1 }
 0x9fe   :  { %10077 = vsyncpa [#allocation4 + $0x1], 1 }
 0x9ff   :  { %10078 = vsyncpa [#allocation5], 1 }
 0xa00   :  { %10080 = vsyncpa [#allocation5 + $0x1], 1 }

</bundles_post_ra>
